<compile_context>
chip_gen: v6e
topology: v6e:2x2x1
jax: 0.10.0
libtpu: 0.0.40
codegen_flags: <defaults>
</compile_context>

<pallas_src>
import math

import jax
import jax.numpy as jnp
import numpy as np
from jax.experimental import pallas as pl
from jax.experimental.pallas import tpu as pltpu

# ---- small config consistent with Encoder.__init__ ----
NUM_LAYERS = 2
D = 32                 # d_model
H = 4                  # num_heads
HD = D // H            # head_dim
HIDDEN = 64            # hidden_mlp_dim
INP_FEATURES = 8
OUT_FEATURES = 4
B = 2
S = 64                 # sequence length (<= 168 pos-encoding rows, >= 48)
TAIL = 48              # output projection acts on x[:, -48:, :]
LN_EPS = 1e-9          # matches nn.LayerNorm(D, eps=1e-09) in the spec


def _vmem():
    return pl.BlockSpec(memory_space=pltpu.MemorySpace.VMEM)


def _layernorm(x, g, b, eps=LN_EPS):
    mu = jnp.mean(x, axis=-1, keepdims=True)
    d = x - mu
    var = jnp.mean(d * d, axis=-1, keepdims=True)
    return d * jax.lax.rsqrt(var + eps) * g + b


# ------------------------------ fused kernel ----------------------------------


def fused_encoder_kernel(x_ref, w_in_ref, bias_in_ref,
                         wqkv_ref, bqkv_ref, wo_ref, bo_ref,
                         g1_ref, be1_ref,
                         w1_ref, b1_ref, w2_ref, b2_ref, g2_ref, be2_ref,
                         wout_ref, bout_ref,
                         o_ref, *attn_refs):
    # x_ref: (B*S, F); all weights pre-transposed so matmuls are plain x @ W.
    # input projection (+ sqrt(D) folded into weights, + pos folded into bias)
    x2 = jnp.dot(x_ref[...], w_in_ref[...],
                 preferred_element_type=jnp.float32) + bias_in_ref[...]

    for l in range(NUM_LAYERS):                       # static unroll (2 layers)
        a_out = attn_refs[l]

        # One fused qkv projection for all heads: (B*S, D) @ (D, 3D) -> (B*S, 3D)
        # Lane layout: [ q(h0..h3) | k(h0..h3) | v(h0..h3) ], 1/sqrt(d_k) already
        # folded into the q block of wqkv/bqkv.
        qkv = jnp.dot(x2, wqkv_ref[l],
                      preferred_element_type=jnp.float32) + bqkv_ref[l]

        head_vals = []
        for h in range(H):                            # static unroll over heads
            q = qkv[:, h * HD:(h + 1) * HD]                       # (B*S, HD)
            k = qkv[:, D + h * HD:D + (h + 1) * HD]
            v = qkv[:, 2 * D + h * HD:2 * D + (h + 1) * HD]
            vals_b = []
            for b in range(B):                        # static unroll over batch
                qb = q[b * S:(b + 1) * S]             # (S, HD) sublane-aligned slice
                kb = k[b * S:(b + 1) * S]
                vb = v[b * S:(b + 1) * S]
                s = jax.lax.dot_general(qb, kb, (((1,), (1,)), ((), ())),
                                        preferred_element_type=jnp.float32)  # (S, S)
                m = jnp.max(s, axis=-1, keepdims=True)
                e = jnp.exp(s - m)
                denom = jnp.sum(e, axis=-1, keepdims=True)
                r = pl.reciprocal(denom, approx=True)           # EUP slot
                r = r * (2.0 - denom * r)                       # 1 Newton step (VPU)
                att = e * r
                a_out[b, h] = att                     # direct (B, H, S, S) layout
                vals_b.append(jnp.dot(att, vb,
                                      preferred_element_type=jnp.float32))  # (S, HD)
            head_vals.append(jnp.concatenate(vals_b, axis=0))   # (B*S, HD)

        # Fused output projection: one lane concat + one (B*S,32)@(32,32) matmul.
        val = jnp.concatenate(head_vals, axis=-1)               # (B*S, D)
        attn_out = jnp.dot(val, wo_ref[l],
                           preferred_element_type=jnp.float32) + bo_ref[l]
        # dropout1: identity (inference)
        out1 = _layernorm(x2 + attn_out, g1_ref[l], be1_ref[l])

        ff = jnp.dot(out1, w1_ref[l],
                     preferred_element_type=jnp.float32) + b1_ref[l]
        ff = jnp.maximum(ff, 0.0)                     # ReLU; FFN dropout: identity
        ff = jnp.dot(ff, w2_ref[l],
                     preferred_element_type=jnp.float32) + b2_ref[l]
        # dropout2: identity (inference)
        x2 = _layernorm(out1 + ff, g2_ref[l], be2_ref[l])

    # Output projection on ALL rows (tail slice is done lane-/sublane-free in the
    # wrapper; the 32 extra rows are noise on an N=4 matmul).
    o_ref[...] = jnp.dot(x2, wout_ref[...],
                         preferred_element_type=jnp.float32) + bout_ref[...]


# --------------------------- wrapper / param prep ------------------------------


def prepare_kernel_params(p):
    """PyTorch-layout params -> kernel layout (pre-transposed, de-interleaved,
    q/k/v fused per layer)."""
    sqrt_d = math.sqrt(float(D))
    inv_sqrt_hd = 1.0 / math.sqrt(float(HD))

    w_in = p["w_in"].T * sqrt_d                              # (F, D), sqrt(D) folded
    pos_tiled = jnp.tile(p["pos"][:S], (B, 1))               # (B*S, D)
    bias_in = p["b_in"] * sqrt_d + pos_tiled                 # (B*S, D)

    def per_layer(lp):
        wqkv, bqkv = lp["wqkv"], lp["bqkv"]                  # (3D, D), (1, 3D)
        wq_r, wk_r, wv_r = [], [], []
        bq_r, bk_r, bv_r = [], [], []
        for h in range(H):
            base = h * 3 * HD                                # q|k|v interleaved per head
            wq_r.append(wqkv[base:base + HD] * inv_sqrt_hd)          # (HD, D)
            bq_r.append(bqkv[:, base:base + HD] * inv_sqrt_hd)       # (1, HD)
            wk_r.append(wqkv[base + HD:base + 2 * HD])
            bk_r.append(bqkv[:, base + HD:base + 2 * HD])
            wv_r.append(wqkv[base + 2 * HD:base + 3 * HD])
            bv_r.append(bqkv[:, base + 2 * HD:base + 3 * HD])
        # Fused lane layout: [ q(all heads) | k(all heads) | v(all heads) ]
        w_fused = jnp.concatenate(wq_r + wk_r + wv_r, axis=0).T     # (D, 3D)
        b_fused = jnp.concatenate(bq_r + bk_r + bv_r, axis=-1)      # (1, 3D)
        return dict(wqkv=w_fused, bqkv=b_fused,
                    wo=lp["wo"].T, bo=lp["bo"],                     # (D, D), (1, D)
                    g1=lp["g1"], be1=lp["be1"],
                    w1=lp["w1"].T, b1=lp["b1"],
                    w2=lp["w2"].T, b2=lp["b2"],
                    g2=lp["g2"], be2=lp["be2"])

    per = [per_layer(lp) for lp in p["layers"]]

    def stack(name):
        return jnp.stack([layer[name] for layer in per])     # leading layer dim

    return dict(w_in=w_in, bias_in=bias_in,
                wqkv=stack("wqkv"), bqkv=stack("bqkv"),
                wo=stack("wo"), bo=stack("bo"),
                g1=stack("g1"), be1=stack("be1"),
                w1=stack("w1"), b1=stack("b1"),
                w2=stack("w2"), b2=stack("b2"),
                g2=stack("g2"), be2=stack("be2"),
                wout=p["w_out"].T, bout=p["b_out"])


def encoder_forward(kp, x):
    x2d = x.reshape(B * S, INP_FEATURES)
    args = (x2d, kp["w_in"], kp["bias_in"],
            kp["wqkv"], kp["bqkv"], kp["wo"], kp["bo"],
            kp["g1"], kp["be1"],
            kp["w1"], kp["b1"], kp["w2"], kp["b2"], kp["g2"], kp["be2"],
            kp["wout"], kp["bout"])
    out_shapes = ((jax.ShapeDtypeStruct((B * S, OUT_FEATURES), jnp.float32),)
                  + tuple(jax.ShapeDtypeStruct((B, H, S, S), jnp.float32)
                          for _ in range(NUM_LAYERS)))
    # Advisory cost hint so XLA schedules around this single fused custom call.
    cost = pl.CostEstimate(flops=6_500_000, transcendentals=66_000,
                           bytes_accessed=360_000)
    results = pl.pallas_call(
        fused_encoder_kernel,
        out_shape=out_shapes,
        in_specs=[_vmem() for _ in args],
        out_specs=tuple(_vmem() for _ in out_shapes),
        cost_estimate=cost,
    )(*args)
    out_full = results[0].reshape(B, S, OUT_FEATURES)
    out = out_full[:, -TAIL:, :]                      # tail slice done in wrapper
    attn = {f"encoder_layer{i + 1}": results[1 + i] for i in range(NUM_LAYERS)}
    return out, attn


# --------------------------- pure-JAX reference --------------------------------


def encoder_reference(params, x):
    y = jnp.einsum("bsf,df->bsd", x, params["w_in"]) + params["b_in"]
    y = y * math.sqrt(float(D))
    y = y + params["pos"][: x.shape[1]][None]
    attn_weights = {}
    for i, lp in enumerate(params["layers"]):
        bsz, seq, _ = y.shape
        qkv = jnp.einsum("bsd,ed->bse", y, lp["wqkv"]) + lp["bqkv"]
        qkv = qkv.reshape(bsz, seq, H, 3 * HD).transpose(0, 2, 1, 3)
        q, k, v = jnp.split(qkv, 3, axis=-1)
        s = jnp.einsum("bhqe,bhke->bhqk", q, k) / math.sqrt(float(HD))
        a = jax.nn.softmax(s, axis=-1)
        vals = jnp.einsum("bhqk,bhke->bhqe", a, v)
        vals = vals.transpose(0, 2, 1, 3).reshape(bsz, seq, D)
        attn_out = jnp.einsum("bsd,od->bso", vals, lp["wo"]) + lp["bo"]
        out1 = _layernorm(y + attn_out, lp["g1"], lp["be1"])
        ff = jax.nn.relu(jnp.einsum("bsd,md->bsm", out1, lp["w1"]) + lp["b1"])
        ff = jnp.einsum("bsm,dm->bsd", ff, lp["w2"]) + lp["b2"]
        y = _layernorm(out1 + ff, lp["g2"], lp["be2"])
        attn_weights[f"encoder_layer{i + 1}"] = a
    out = jnp.einsum("bsd,od->bso", y[:, -TAIL:, :], params["w_out"]) + params["b_out"]
    return out, attn_weights


# --------------------------- deterministic init --------------------------------


def init_params(key):
    ks = jax.random.split(key, 3 + NUM_LAYERS)

    def lin(k, out_f, in_f, scale=0.05):
        kw, kb = jax.random.split(k)
        return (jax.random.normal(kw, (out_f, in_f), jnp.float32) * scale,
                jax.random.normal(kb, (1, out_f), jnp.float32) * scale)

    w_in, b_in = lin(ks[0], D, INP_FEATURES)
    pos = jax.random.normal(ks[1], (168, D), jnp.float32)

    layers = []
    for i in range(NUM_LAYERS):
        lk = jax.random.split(ks[2 + i], 8)
        wqkv, bqkv = lin(lk[0], 3 * D, D)
        wo, bo = lin(lk[1], D, D)
        w1, b1 = lin(lk[2], HIDDEN, D)
        w2, b2 = lin(lk[3], D, HIDDEN)
        g1 = 1.0 + 0.1 * jax.random.normal(lk[4], (1, D), jnp.float32)
        be1 = 0.1 * jax.random.normal(lk[5], (1, D), jnp.float32)
        g2 = 1.0 + 0.1 * jax.random.normal(lk[6], (1, D), jnp.float32)
        be2 = 0.1 * jax.random.normal(lk[7], (1, D), jnp.float32)
        layers.append(dict(wqkv=wqkv, bqkv=bqkv, wo=wo, bo=bo,
                           w1=w1, b1=b1, w2=w2, b2=b2,
                           g1=g1, be1=be1, g2=g2, be2=be2))

    w_out, b_out = lin(ks[2 + NUM_LAYERS], OUT_FEATURES, D)
    return dict(w_in=w_in, b_in=b_in, pos=pos, layers=layers,
                w_out=w_out, b_out=b_out)


# ------------------------------------ main -------------------------------------

if __name__ == "__main__":
    key = jax.random.PRNGKey(0)
    pkey, xkey = jax.random.split(key)
    params = init_params(pkey)
    x = jax.random.normal(xkey, (B, S, INP_FEATURES), jnp.float32)

    kparams = prepare_kernel_params(params)
    out, attn = encoder_forward(kparams, x)
    out = jax.block_until_ready(out)

    ref_out, ref_attn = encoder_reference(params, x)
    np.testing.assert_allclose(np.asarray(out), np.asarray(ref_out),
                               rtol=2e-4, atol=2e-4)
    for name in attn:
        np.testing.assert_allclose(np.asarray(attn[name]),
                                   np.asarray(ref_attn[name]),
                                   rtol=2e-4, atol=2e-4)
    print("KERNEL_OK")
</pallas_src>

<mosaic_0001>
module attributes {stable_mosaic.version = 11 : i64} {
  func.func @fused_encoder_kernel(%arg0: memref<128x8xf32, #tpu.memory_space<vmem>>, %arg1: memref<8x32xf32, #tpu.memory_space<vmem>>, %arg2: memref<128x32xf32, #tpu.memory_space<vmem>>, %arg3: memref<2x32x96xf32, #tpu.memory_space<vmem>>, %arg4: memref<2x1x96xf32, #tpu.memory_space<vmem>>, %arg5: memref<2x32x32xf32, #tpu.memory_space<vmem>>, %arg6: memref<2x1x32xf32, #tpu.memory_space<vmem>>, %arg7: memref<2x1x32xf32, #tpu.memory_space<vmem>>, %arg8: memref<2x1x32xf32, #tpu.memory_space<vmem>>, %arg9: memref<2x32x64xf32, #tpu.memory_space<vmem>>, %arg10: memref<2x1x64xf32, #tpu.memory_space<vmem>>, %arg11: memref<2x64x32xf32, #tpu.memory_space<vmem>>, %arg12: memref<2x1x32xf32, #tpu.memory_space<vmem>>, %arg13: memref<2x1x32xf32, #tpu.memory_space<vmem>>, %arg14: memref<2x1x32xf32, #tpu.memory_space<vmem>>, %arg15: memref<32x4xf32, #tpu.memory_space<vmem>>, %arg16: memref<1x4xf32, #tpu.memory_space<vmem>>, %arg17: memref<128x4xf32, #tpu.memory_space<vmem>>, %arg18: memref<2x4x64x64xf32, #tpu.memory_space<vmem>>, %arg19: memref<2x4x64x64xf32, #tpu.memory_space<vmem>>) attributes {dimension_semantics = [], scalar_prefetch = 0 : i64, scratch_operands = 0 : i64, tpu.core_type = #tpu.core_type<tc>} {
    %c0 = arith.constant 0 : index
    %c0_0 = arith.constant 0 : index
    %0 = vector.load %arg0[%c0, %c0_0] : memref<128x8xf32, #tpu.memory_space<vmem>>, vector<128x8xf32>
    %c0_1 = arith.constant 0 : index
    %c0_2 = arith.constant 0 : index
    %1 = vector.load %arg1[%c0_1, %c0_2] : memref<8x32xf32, #tpu.memory_space<vmem>>, vector<8x32xf32>
    %cst = arith.constant dense<0.000000e+00> : vector<128x32xf32>
    %2 = tpu.matmul %0, %1, %cst {dimension_numbers = #tpu.dot_dimension_numbers<[1], [0], [0], [1], [0, 0, 1, 1], [], []>} : vector<128x8xf32>, vector<8x32xf32>, vector<128x32xf32> -> vector<128x32xf32>
    %c0_3 = arith.constant 0 : index
    %c0_4 = arith.constant 0 : index
    %3 = vector.load %arg2[%c0_3, %c0_4] : memref<128x32xf32, #tpu.memory_space<vmem>>, vector<128x32xf32>
    %4 = arith.addf %2, %3 : vector<128x32xf32>
    %c0_5 = arith.constant 0 : index
    %c0_6 = arith.constant 0 : index
    %c0_7 = arith.constant 0 : index
    %5 = vector.load %arg3[%c0_5, %c0_6, %c0_7] : memref<2x32x96xf32, #tpu.memory_space<vmem>>, vector<1x32x96xf32>
    %6 = vector.shape_cast %5 : vector<1x32x96xf32> to vector<32x96xf32>
    %cst_8 = arith.constant dense<0.000000e+00> : vector<128x96xf32>
    %7 = tpu.matmul %4, %6, %cst_8 {dimension_numbers = #tpu.dot_dimension_numbers<[1], [0], [0], [1], [0, 0, 1, 1], [], []>} : vector<128x32xf32>, vector<32x96xf32>, vector<128x96xf32> -> vector<128x96xf32>
    %c0_9 = arith.constant 0 : index
    %c0_10 = arith.constant 0 : index
    %c0_11 = arith.constant 0 : index
    %8 = vector.load %arg4[%c0_9, %c0_10, %c0_11] : memref<2x1x96xf32, #tpu.memory_space<vmem>>, vector<1x1x96xf32>
    %9 = vector.shape_cast %8 : vector<1x1x96xf32> to vector<1x96xf32>
    %10 = vector.broadcast %9 : vector<1x96xf32> to vector<128x96xf32>
    %11 = arith.addf %7, %10 : vector<128x96xf32>
    %12 = vector.extract_strided_slice %11 {offsets = [0, 0], sizes = [128, 8], strides = [1, 1]} : vector<128x96xf32> to vector<128x8xf32>
    %13 = vector.extract_strided_slice %11 {offsets = [0, 32], sizes = [128, 8], strides = [1, 1]} : vector<128x96xf32> to vector<128x8xf32>
    %14 = vector.extract_strided_slice %11 {offsets = [0, 64], sizes = [128, 8], strides = [1, 1]} : vector<128x96xf32> to vector<128x8xf32>
    %15 = vector.extract_strided_slice %12 {offsets = [0, 0], sizes = [64, 8], strides = [1, 1]} : vector<128x8xf32> to vector<64x8xf32>
    %16 = vector.extract_strided_slice %13 {offsets = [0, 0], sizes = [64, 8], strides = [1, 1]} : vector<128x8xf32> to vector<64x8xf32>
    %17 = vector.extract_strided_slice %14 {offsets = [0, 0], sizes = [64, 8], strides = [1, 1]} : vector<128x8xf32> to vector<64x8xf32>
    %cst_12 = arith.constant dense<0.000000e+00> : vector<64x64xf32>
    %18 = tpu.matmul %15, %16, %cst_12 {dimension_numbers = #tpu.dot_dimension_numbers<[1], [1], [0], [0], [0, 0, 1, 0], [], []>} : vector<64x8xf32>, vector<64x8xf32>, vector<64x64xf32> -> vector<64x64xf32>
    %cst_13 = arith.constant dense<0xFF800000> : vector<64xf32>
    %19 = vector.multi_reduction <maximumf>, %18, %cst_13 [1] : vector<64x64xf32> to vector<64xf32>
    %20 = vector.shape_cast %19 : vector<64xf32> to vector<64x1xf32>
    %21 = vector.broadcast %20 : vector<64x1xf32> to vector<64x64xf32>
    %22 = arith.subf %18, %21 : vector<64x64xf32>
    %23 = math.exp %22 : vector<64x64xf32>
    %cst_14 = arith.constant dense<0.000000e+00> : vector<64xf32>
    %24 = vector.multi_reduction <add>, %23, %cst_14 [1] : vector<64x64xf32> to vector<64xf32>
    %25 = vector.shape_cast %24 : vector<64xf32> to vector<64x1xf32>
    %26 = tpu.reciprocal %25 {approx = true} : vector<64x1xf32> -> vector<64x1xf32>
    %27 = arith.mulf %25, %26 : vector<64x1xf32>
    %cst_15 = arith.constant 2.000000e+00 : f32
    %28 = vector.broadcast %cst_15 : f32 to vector<64x1xf32>
    %29 = arith.subf %28, %27 : vector<64x1xf32>
    %30 = arith.mulf %26, %29 : vector<64x1xf32>
    %31 = vector.broadcast %30 : vector<64x1xf32> to vector<64x64xf32>
    %32 = arith.mulf %23, %31 : vector<64x64xf32>
    %c0_16 = arith.constant 0 : index
    %c0_17 = arith.constant 0 : index
    %c0_18 = arith.constant 0 : index
    %c0_19 = arith.constant 0 : index
    %33 = vector.load %arg18[%c0_16, %c0_17, %c0_18, %c0_19] : memref<2x4x64x64xf32, #tpu.memory_space<vmem>>, vector<1x1x64x64xf32>
    %34 = vector.shape_cast %33 : vector<1x1x64x64xf32> to vector<64x64xf32>
    %35 = vector.shape_cast %32 : vector<64x64xf32> to vector<1x1x64x64xf32>
    tpu.vector_store %arg18[%c0_16, %c0_17, %c0_18, %c0_19], %35 {strides = array<i32>} : memref<2x4x64x64xf32, #tpu.memory_space<vmem>>, vector<1x1x64x64xf32>,
    %cst_20 = arith.constant dense<0.000000e+00> : vector<64x8xf32>
    %36 = tpu.matmul %32, %17, %cst_20 {dimension_numbers = #tpu.dot_dimension_numbers<[1], [0], [0], [1], [0, 0, 1, 1], [], []>} : vector<64x64xf32>, vector<64x8xf32>, vector<64x8xf32> -> vector<64x8xf32>
    %37 = vector.extract_strided_slice %12 {offsets = [64, 0], sizes = [64, 8], strides = [1, 1]} : vector<128x8xf32> to vector<64x8xf32>
    %38 = vector.extract_strided_slice %13 {offsets = [64, 0], sizes = [64, 8], strides = [1, 1]} : vector<128x8xf32> to vector<64x8xf32>
    %39 = vector.extract_strided_slice %14 {offsets = [64, 0], sizes = [64, 8], strides = [1, 1]} : vector<128x8xf32> to vector<64x8xf32>
    %cst_21 = arith.constant dense<0.000000e+00> : vector<64x64xf32>
    %40 = tpu.matmul %37, %38, %cst_21 {dimension_numbers = #tpu.dot_dimension_numbers<[1], [1], [0], [0], [0, 0, 1, 0], [], []>} : vector<64x8xf32>, vector<64x8xf32>, vector<64x64xf32> -> vector<64x64xf32>
    %cst_22 = arith.constant dense<0xFF800000> : vector<64xf32>
    %41 = vector.multi_reduction <maximumf>, %40, %cst_22 [1] : vector<64x64xf32> to vector<64xf32>
    %42 = vector.shape_cast %41 : vector<64xf32> to vector<64x1xf32>
    %43 = vector.broadcast %42 : vector<64x1xf32> to vector<64x64xf32>
    %44 = arith.subf %40, %43 : vector<64x64xf32>
    %45 = math.exp %44 : vector<64x64xf32>
    %cst_23 = arith.constant dense<0.000000e+00> : vector<64xf32>
    %46 = vector.multi_reduction <add>, %45, %cst_23 [1] : vector<64x64xf32> to vector<64xf32>
    %47 = vector.shape_cast %46 : vector<64xf32> to vector<64x1xf32>
    %48 = tpu.reciprocal %47 {approx = true} : vector<64x1xf32> -> vector<64x1xf32>
    %49 = arith.mulf %47, %48 : vector<64x1xf32>
    %cst_24 = arith.constant 2.000000e+00 : f32
    %50 = vector.broadcast %cst_24 : f32 to vector<64x1xf32>
    %51 = arith.subf %50, %49 : vector<64x1xf32>
    %52 = arith.mulf %48, %51 : vector<64x1xf32>
    %53 = vector.broadcast %52 : vector<64x1xf32> to vector<64x64xf32>
    %54 = arith.mulf %45, %53 : vector<64x64xf32>
    %c1 = arith.constant 1 : index
    %c0_25 = arith.constant 0 : index
    %c0_26 = arith.constant 0 : index
    %c0_27 = arith.constant 0 : index
    %55 = vector.load %arg18[%c1, %c0_25, %c0_26, %c0_27] : memref<2x4x64x64xf32, #tpu.memory_space<vmem>>, vector<1x1x64x64xf32>
    %56 = vector.shape_cast %55 : vector<1x1x64x64xf32> to vector<64x64xf32>
    %57 = vector.shape_cast %54 : vector<64x64xf32> to vector<1x1x64x64xf32>
    tpu.vector_store %arg18[%c1, %c0_25, %c0_26, %c0_27], %57 {strides = array<i32>} : memref<2x4x64x64xf32, #tpu.memory_space<vmem>>, vector<1x1x64x64xf32>,
    %cst_28 = arith.constant dense<0.000000e+00> : vector<64x8xf32>
    %58 = tpu.matmul %54, %39, %cst_28 {dimension_numbers = #tpu.dot_dimension_numbers<[1], [0], [0], [1], [0, 0, 1, 1], [], []>} : vector<64x64xf32>, vector<64x8xf32>, vector<64x8xf32> -> vector<64x8xf32>
    %59 = tpu.concatenate %36, %58 in 0 : vector<64x8xf32>, vector<64x8xf32> -> vector<128x8xf32>
    %60 = vector.extract_strided_slice %11 {offsets = [0, 8], sizes = [128, 8], strides = [1, 1]} : vector<128x96xf32> to vector<128x8xf32>
    %61 = vector.extract_strided_slice %11 {offsets = [0, 40], sizes = [128, 8], strides = [1, 1]} : vector<128x96xf32> to vector<128x8xf32>
    %62 = vector.extract_strided_slice %11 {offsets = [0, 72], sizes = [128, 8], strides = [1, 1]} : vector<128x96xf32> to vector<128x8xf32>
    %63 = vector.extract_strided_slice %60 {offsets = [0, 0], sizes = [64, 8], strides = [1, 1]} : vector<128x8xf32> to vector<64x8xf32>
    %64 = vector.extract_strided_slice %61 {offsets = [0, 0], sizes = [64, 8], strides = [1, 1]} : vector<128x8xf32> to vector<64x8xf32>
    %65 = vector.extract_strided_slice %62 {offsets = [0, 0], sizes = [64, 8], strides = [1, 1]} : vector<128x8xf32> to vector<64x8xf32>
    %cst_29 = arith.constant dense<0.000000e+00> : vector<64x64xf32>
    %66 = tpu.matmul %63, %64, %cst_29 {dimension_numbers = #tpu.dot_dimension_numbers<[1], [1], [0], [0], [0, 0, 1, 0], [], []>} : vector<64x8xf32>, vector<64x8xf32>, vector<64x64xf32> -> vector<64x64xf32>
    %cst_30 = arith.constant dense<0xFF800000> : vector<64xf32>
    %67 = vector.multi_reduction <maximumf>, %66, %cst_30 [1] : vector<64x64xf32> to vector<64xf32>
    %68 = vector.shape_cast %67 : vector<64xf32> to vector<64x1xf32>
    %69 = vector.broadcast %68 : vector<64x1xf32> to vector<64x64xf32>
    %70 = arith.subf %66, %69 : vector<64x64xf32>
    %71 = math.exp %70 : vector<64x64xf32>
    %cst_31 = arith.constant dense<0.000000e+00> : vector<64xf32>
    %72 = vector.multi_reduction <add>, %71, %cst_31 [1] : vector<64x64xf32> to vector<64xf32>
    %73 = vector.shape_cast %72 : vector<64xf32> to vector<64x1xf32>
    %74 = tpu.reciprocal %73 {approx = true} : vector<64x1xf32> -> vector<64x1xf32>
    %75 = arith.mulf %73, %74 : vector<64x1xf32>
    %cst_32 = arith.constant 2.000000e+00 : f32
    %76 = vector.broadcast %cst_32 : f32 to vector<64x1xf32>
    %77 = arith.subf %76, %75 : vector<64x1xf32>
    %78 = arith.mulf %74, %77 : vector<64x1xf32>
    %79 = vector.broadcast %78 : vector<64x1xf32> to vector<64x64xf32>
    %80 = arith.mulf %71, %79 : vector<64x64xf32>
    %c0_33 = arith.constant 0 : index
    %c1_34 = arith.constant 1 : index
    %c0_35 = arith.constant 0 : index
    %c0_36 = arith.constant 0 : index
    %81 = vector.load %arg18[%c0_33, %c1_34, %c0_35, %c0_36] : memref<2x4x64x64xf32, #tpu.memory_space<vmem>>, vector<1x1x64x64xf32>
    %82 = vector.shape_cast %81 : vector<1x1x64x64xf32> to vector<64x64xf32>
    %83 = vector.shape_cast %80 : vector<64x64xf32> to vector<1x1x64x64xf32>
    tpu.vector_store %arg18[%c0_33, %c1_34, %c0_35, %c0_36], %83 {strides = array<i32>} : memref<2x4x64x64xf32, #tpu.memory_space<vmem>>, vector<1x1x64x64xf32>,
    %cst_37 = arith.constant dense<0.000000e+00> : vector<64x8xf32>
    %84 = tpu.matmul %80, %65, %cst_37 {dimension_numbers = #tpu.dot_dimension_numbers<[1], [0], [0], [1], [0, 0, 1, 1], [], []>} : vector<64x64xf32>, vector<64x8xf32>, vector<64x8xf32> -> vector<64x8xf32>
    %85 = vector.extract_strided_slice %60 {offsets = [64, 0], sizes = [64, 8], strides = [1, 1]} : vector<128x8xf32> to vector<64x8xf32>
    %86 = vector.extract_strided_slice %61 {offsets = [64, 0], sizes = [64, 8], strides = [1, 1]} : vector<128x8xf32> to vector<64x8xf32>
    %87 = vector.extract_strided_slice %62 {offsets = [64, 0], sizes = [64, 8], strides = [1, 1]} : vector<128x8xf32> to vector<64x8xf32>
    %cst_38 = arith.constant dense<0.000000e+00> : vector<64x64xf32>
    %88 = tpu.matmul %85, %86, %cst_38 {dimension_numbers = #tpu.dot_dimension_numbers<[1], [1], [0], [0], [0, 0, 1, 0], [], []>} : vector<64x8xf32>, vector<64x8xf32>, vector<64x64xf32> -> vector<64x64xf32>
    %cst_39 = arith.constant dense<0xFF800000> : vector<64xf32>
    %89 = vector.multi_reduction <maximumf>, %88, %cst_39 [1] : vector<64x64xf32> to vector<64xf32>
    %90 = vector.shape_cast %89 : vector<64xf32> to vector<64x1xf32>
    %91 = vector.broadcast %90 : vector<64x1xf32> to vector<64x64xf32>
    %92 = arith.subf %88, %91 : vector<64x64xf32>
    %93 = math.exp %92 : vector<64x64xf32>
    %cst_40 = arith.constant dense<0.000000e+00> : vector<64xf32>
    %94 = vector.multi_reduction <add>, %93, %cst_40 [1] : vector<64x64xf32> to vector<64xf32>
    %95 = vector.shape_cast %94 : vector<64xf32> to vector<64x1xf32>
    %96 = tpu.reciprocal %95 {approx = true} : vector<64x1xf32> -> vector<64x1xf32>
    %97 = arith.mulf %95, %96 : vector<64x1xf32>
    %cst_41 = arith.constant 2.000000e+00 : f32
    %98 = vector.broadcast %cst_41 : f32 to vector<64x1xf32>
    %99 = arith.subf %98, %97 : vector<64x1xf32>
    %100 = arith.mulf %96, %99 : vector<64x1xf32>
    %101 = vector.broadcast %100 : vector<64x1xf32> to vector<64x64xf32>
    %102 = arith.mulf %93, %101 : vector<64x64xf32>
    %c1_42 = arith.constant 1 : index
    %c1_43 = arith.constant 1 : index
    %c0_44 = arith.constant 0 : index
    %c0_45 = arith.constant 0 : index
    %103 = vector.load %arg18[%c1_42, %c1_43, %c0_44, %c0_45] : memref<2x4x64x64xf32, #tpu.memory_space<vmem>>, vector<1x1x64x64xf32>
    %104 = vector.shape_cast %103 : vector<1x1x64x64xf32> to vector<64x64xf32>
    %105 = vector.shape_cast %102 : vector<64x64xf32> to vector<1x1x64x64xf32>
    tpu.vector_store %arg18[%c1_42, %c1_43, %c0_44, %c0_45], %105 {strides = array<i32>} : memref<2x4x64x64xf32, #tpu.memory_space<vmem>>, vector<1x1x64x64xf32>,
    %cst_46 = arith.constant dense<0.000000e+00> : vector<64x8xf32>
    %106 = tpu.matmul %102, %87, %cst_46 {dimension_numbers = #tpu.dot_dimension_numbers<[1], [0], [0], [1], [0, 0, 1, 1], [], []>} : vector<64x64xf32>, vector<64x8xf32>, vector<64x8xf32> -> vector<64x8xf32>
    %107 = tpu.concatenate %84, %106 in 0 : vector<64x8xf32>, vector<64x8xf32> -> vector<128x8xf32>
    %108 = vector.extract_strided_slice %11 {offsets = [0, 16], sizes = [128, 8], strides = [1, 1]} : vector<128x96xf32> to vector<128x8xf32>
    %109 = vector.extract_strided_slice %11 {offsets = [0, 48], sizes = [128, 8], strides = [1, 1]} : vector<128x96xf32> to vector<128x8xf32>
    %110 = vector.extract_strided_slice %11 {offsets = [0, 80], sizes = [128, 8], strides = [1, 1]} : vector<128x96xf32> to vector<128x8xf32>
    %111 = vector.extract_strided_slice %108 {offsets = [0, 0], sizes = [64, 8], strides = [1, 1]} : vector<128x8xf32> to vector<64x8xf32>
    %112 = vector.extract_strided_slice %109 {offsets = [0, 0], sizes = [64, 8], strides = [1, 1]} : vector<128x8xf32> to vector<64x8xf32>
    %113 = vector.extract_strided_slice %110 {offsets = [0, 0], sizes = [64, 8], strides = [1, 1]} : vector<128x8xf32> to vector<64x8xf32>
    %cst_47 = arith.constant dense<0.000000e+00> : vector<64x64xf32>
    %114 = tpu.matmul %111, %112, %cst_47 {dimension_numbers = #tpu.dot_dimension_numbers<[1], [1], [0], [0], [0, 0, 1, 0], [], []>} : vector<64x8xf32>, vector<64x8xf32>, vector<64x64xf32> -> vector<64x64xf32>
    %cst_48 = arith.constant dense<0xFF800000> : vector<64xf32>
    %115 = vector.multi_reduction <maximumf>, %114, %cst_48 [1] : vector<64x64xf32> to vector<64xf32>
    %116 = vector.shape_cast %115 : vector<64xf32> to vector<64x1xf32>
    %117 = vector.broadcast %116 : vector<64x1xf32> to vector<64x64xf32>
    %118 = arith.subf %114, %117 : vector<64x64xf32>
    %119 = math.exp %118 : vector<64x64xf32>
    %cst_49 = arith.constant dense<0.000000e+00> : vector<64xf32>
    %120 = vector.multi_reduction <add>, %119, %cst_49 [1] : vector<64x64xf32> to vector<64xf32>
    %121 = vector.shape_cast %120 : vector<64xf32> to vector<64x1xf32>
    %122 = tpu.reciprocal %121 {approx = true} : vector<64x1xf32> -> vector<64x1xf32>
    %123 = arith.mulf %121, %122 : vector<64x1xf32>
    %cst_50 = arith.constant 2.000000e+00 : f32
    %124 = vector.broadcast %cst_50 : f32 to vector<64x1xf32>
    %125 = arith.subf %124, %123 : vector<64x1xf32>
    %126 = arith.mulf %122, %125 : vector<64x1xf32>
    %127 = vector.broadcast %126 : vector<64x1xf32> to vector<64x64xf32>
    %128 = arith.mulf %119, %127 : vector<64x64xf32>
    %c0_51 = arith.constant 0 : index
    %c2 = arith.constant 2 : index
    %c0_52 = arith.constant 0 : index
    %c0_53 = arith.constant 0 : index
    %129 = vector.load %arg18[%c0_51, %c2, %c0_52, %c0_53] : memref<2x4x64x64xf32, #tpu.memory_space<vmem>>, vector<1x1x64x64xf32>
    %130 = vector.shape_cast %129 : vector<1x1x64x64xf32> to vector<64x64xf32>
    %131 = vector.shape_cast %128 : vector<64x64xf32> to vector<1x1x64x64xf32>
    tpu.vector_store %arg18[%c0_51, %c2, %c0_52, %c0_53], %131 {strides = array<i32>} : memref<2x4x64x64xf32, #tpu.memory_space<vmem>>, vector<1x1x64x64xf32>,
    %cst_54 = arith.constant dense<0.000000e+00> : vector<64x8xf32>
    %132 = tpu.matmul %128, %113, %cst_54 {dimension_numbers = #tpu.dot_dimension_numbers<[1], [0], [0], [1], [0, 0, 1, 1], [], []>} : vector<64x64xf32>, vector<64x8xf32>, vector<64x8xf32> -> vector<64x8xf32>
    %133 = vector.extract_strided_slice %108 {offsets = [64, 0], sizes = [64, 8], strides = [1, 1]} : vector<128x8xf32> to vector<64x8xf32>
    %134 = vector.extract_strided_slice %109 {offsets = [64, 0], sizes = [64, 8], strides = [1, 1]} : vector<128x8xf32> to vector<64x8xf32>
    %135 = vector.extract_strided_slice %110 {offsets = [64, 0], sizes = [64, 8], strides = [1, 1]} : vector<128x8xf32> to vector<64x8xf32>
    %cst_55 = arith.constant dense<0.000000e+00> : vector<64x64xf32>
    %136 = tpu.matmul %133, %134, %cst_55 {dimension_numbers = #tpu.dot_dimension_numbers<[1], [1], [0], [0], [0, 0, 1, 0], [], []>} : vector<64x8xf32>, vector<64x8xf32>, vector<64x64xf32> -> vector<64x64xf32>
    %cst_56 = arith.constant dense<0xFF800000> : vector<64xf32>
    %137 = vector.multi_reduction <maximumf>, %136, %cst_56 [1] : vector<64x64xf32> to vector<64xf32>
    %138 = vector.shape_cast %137 : vector<64xf32> to vector<64x1xf32>
    %139 = vector.broadcast %138 : vector<64x1xf32> to vector<64x64xf32>
    %140 = arith.subf %136, %139 : vector<64x64xf32>
    %141 = math.exp %140 : vector<64x64xf32>
    %cst_57 = arith.constant dense<0.000000e+00> : vector<64xf32>
    %142 = vector.multi_reduction <add>, %141, %cst_57 [1] : vector<64x64xf32> to vector<64xf32>
    %143 = vector.shape_cast %142 : vector<64xf32> to vector<64x1xf32>
    %144 = tpu.reciprocal %143 {approx = true} : vector<64x1xf32> -> vector<64x1xf32>
    %145 = arith.mulf %143, %144 : vector<64x1xf32>
    %cst_58 = arith.constant 2.000000e+00 : f32
    %146 = vector.broadcast %cst_58 : f32 to vector<64x1xf32>
    %147 = arith.subf %146, %145 : vector<64x1xf32>
    %148 = arith.mulf %144, %147 : vector<64x1xf32>
    %149 = vector.broadcast %148 : vector<64x1xf32> to vector<64x64xf32>
    %150 = arith.mulf %141, %149 : vector<64x64xf32>
    %c1_59 = arith.constant 1 : index
    %c2_60 = arith.constant 2 : index
    %c0_61 = arith.constant 0 : index
    %c0_62 = arith.constant 0 : index
    %151 = vector.load %arg18[%c1_59, %c2_60, %c0_61, %c0_62] : memref<2x4x64x64xf32, #tpu.memory_space<vmem>>, vector<1x1x64x64xf32>
    %152 = vector.shape_cast %151 : vector<1x1x64x64xf32> to vector<64x64xf32>
    %153 = vector.shape_cast %150 : vector<64x64xf32> to vector<1x1x64x64xf32>
    tpu.vector_store %arg18[%c1_59, %c2_60, %c0_61, %c0_62], %153 {strides = array<i32>} : memref<2x4x64x64xf32, #tpu.memory_space<vmem>>, vector<1x1x64x64xf32>,
    %cst_63 = arith.constant dense<0.000000e+00> : vector<64x8xf32>
    %154 = tpu.matmul %150, %135, %cst_63 {dimension_numbers = #tpu.dot_dimension_numbers<[1], [0], [0], [1], [0, 0, 1, 1], [], []>} : vector<64x64xf32>, vector<64x8xf32>, vector<64x8xf32> -> vector<64x8xf32>
    %155 = tpu.concatenate %132, %154 in 0 : vector<64x8xf32>, vector<64x8xf32> -> vector<128x8xf32>
    %156 = vector.extract_strided_slice %11 {offsets = [0, 24], sizes = [128, 8], strides = [1, 1]} : vector<128x96xf32> to vector<128x8xf32>
    %157 = vector.extract_strided_slice %11 {offsets = [0, 56], sizes = [128, 8], strides = [1, 1]} : vector<128x96xf32> to vector<128x8xf32>
    %158 = vector.extract_strided_slice %11 {offsets = [0, 88], sizes = [128, 8], strides = [1, 1]} : vector<128x96xf32> to vector<128x8xf32>
    %159 = vector.extract_strided_slice %156 {offsets = [0, 0], sizes = [64, 8], strides = [1, 1]} : vector<128x8xf32> to vector<64x8xf32>
    %160 = vector.extract_strided_slice %157 {offsets = [0, 0], sizes = [64, 8], strides = [1, 1]} : vector<128x8xf32> to vector<64x8xf32>
    %161 = vector.extract_strided_slice %158 {offsets = [0, 0], sizes = [64, 8], strides = [1, 1]} : vector<128x8xf32> to vector<64x8xf32>
    %cst_64 = arith.constant dense<0.000000e+00> : vector<64x64xf32>
    %162 = tpu.matmul %159, %160, %cst_64 {dimension_numbers = #tpu.dot_dimension_numbers<[1], [1], [0], [0], [0, 0, 1, 0], [], []>} : vector<64x8xf32>, vector<64x8xf32>, vector<64x64xf32> -> vector<64x64xf32>
    %cst_65 = arith.constant dense<0xFF800000> : vector<64xf32>
    %163 = vector.multi_reduction <maximumf>, %162, %cst_65 [1] : vector<64x64xf32> to vector<64xf32>
    %164 = vector.shape_cast %163 : vector<64xf32> to vector<64x1xf32>
    %165 = vector.broadcast %164 : vector<64x1xf32> to vector<64x64xf32>
    %166 = arith.subf %162, %165 : vector<64x64xf32>
    %167 = math.exp %166 : vector<64x64xf32>
    %cst_66 = arith.constant dense<0.000000e+00> : vector<64xf32>
    %168 = vector.multi_reduction <add>, %167, %cst_66 [1] : vector<64x64xf32> to vector<64xf32>
    %169 = vector.shape_cast %168 : vector<64xf32> to vector<64x1xf32>
    %170 = tpu.reciprocal %169 {approx = true} : vector<64x1xf32> -> vector<64x1xf32>
    %171 = arith.mulf %169, %170 : vector<64x1xf32>
    %cst_67 = arith.constant 2.000000e+00 : f32
    %172 = vector.broadcast %cst_67 : f32 to vector<64x1xf32>
    %173 = arith.subf %172, %171 : vector<64x1xf32>
    %174 = arith.mulf %170, %173 : vector<64x1xf32>
    %175 = vector.broadcast %174 : vector<64x1xf32> to vector<64x64xf32>
    %176 = arith.mulf %167, %175 : vector<64x64xf32>
    %c0_68 = arith.constant 0 : index
    %c3 = arith.constant 3 : index
    %c0_69 = arith.constant 0 : index
    %c0_70 = arith.constant 0 : index
    %177 = vector.load %arg18[%c0_68, %c3, %c0_69, %c0_70] : memref<2x4x64x64xf32, #tpu.memory_space<vmem>>, vector<1x1x64x64xf32>
    %178 = vector.shape_cast %177 : vector<1x1x64x64xf32> to vector<64x64xf32>
    %179 = vector.shape_cast %176 : vector<64x64xf32> to vector<1x1x64x64xf32>
    tpu.vector_store %arg18[%c0_68, %c3, %c0_69, %c0_70], %179 {strides = array<i32>} : memref<2x4x64x64xf32, #tpu.memory_space<vmem>>, vector<1x1x64x64xf32>,
    %cst_71 = arith.constant dense<0.000000e+00> : vector<64x8xf32>
    %180 = tpu.matmul %176, %161, %cst_71 {dimension_numbers = #tpu.dot_dimension_numbers<[1], [0], [0], [1], [0, 0, 1, 1], [], []>} : vector<64x64xf32>, vector<64x8xf32>, vector<64x8xf32> -> vector<64x8xf32>
    %181 = vector.extract_strided_slice %156 {offsets = [64, 0], sizes = [64, 8], strides = [1, 1]} : vector<128x8xf32> to vector<64x8xf32>
    %182 = vector.extract_strided_slice %157 {offsets = [64, 0], sizes = [64, 8], strides = [1, 1]} : vector<128x8xf32> to vector<64x8xf32>
    %183 = vector.extract_strided_slice %158 {offsets = [64, 0], sizes = [64, 8], strides = [1, 1]} : vector<128x8xf32> to vector<64x8xf32>
    %cst_72 = arith.constant dense<0.000000e+00> : vector<64x64xf32>
    %184 = tpu.matmul %181, %182, %cst_72 {dimension_numbers = #tpu.dot_dimension_numbers<[1], [1], [0], [0], [0, 0, 1, 0], [], []>} : vector<64x8xf32>, vector<64x8xf32>, vector<64x64xf32> -> vector<64x64xf32>
    %cst_73 = arith.constant dense<0xFF800000> : vector<64xf32>
    %185 = vector.multi_reduction <maximumf>, %184, %cst_73 [1] : vector<64x64xf32> to vector<64xf32>
    %186 = vector.shape_cast %185 : vector<64xf32> to vector<64x1xf32>
    %187 = vector.broadcast %186 : vector<64x1xf32> to vector<64x64xf32>
    %188 = arith.subf %184, %187 : vector<64x64xf32>
    %189 = math.exp %188 : vector<64x64xf32>
    %cst_74 = arith.constant dense<0.000000e+00> : vector<64xf32>
    %190 = vector.multi_reduction <add>, %189, %cst_74 [1] : vector<64x64xf32> to vector<64xf32>
    %191 = vector.shape_cast %190 : vector<64xf32> to vector<64x1xf32>
    %192 = tpu.reciprocal %191 {approx = true} : vector<64x1xf32> -> vector<64x1xf32>
    %193 = arith.mulf %191, %192 : vector<64x1xf32>
    %cst_75 = arith.constant 2.000000e+00 : f32
    %194 = vector.broadcast %cst_75 : f32 to vector<64x1xf32>
    %195 = arith.subf %194, %193 : vector<64x1xf32>
    %196 = arith.mulf %192, %195 : vector<64x1xf32>
    %197 = vector.broadcast %196 : vector<64x1xf32> to vector<64x64xf32>
    %198 = arith.mulf %189, %197 : vector<64x64xf32>
    %c1_76 = arith.constant 1 : index
    %c3_77 = arith.constant 3 : index
    %c0_78 = arith.constant 0 : index
    %c0_79 = arith.constant 0 : index
    %199 = vector.load %arg18[%c1_76, %c3_77, %c0_78, %c0_79] : memref<2x4x64x64xf32, #tpu.memory_space<vmem>>, vector<1x1x64x64xf32>
    %200 = vector.shape_cast %199 : vector<1x1x64x64xf32> to vector<64x64xf32>
    %201 = vector.shape_cast %198 : vector<64x64xf32> to vector<1x1x64x64xf32>
    tpu.vector_store %arg18[%c1_76, %c3_77, %c0_78, %c0_79], %201 {strides = array<i32>} : memref<2x4x64x64xf32, #tpu.memory_space<vmem>>, vector<1x1x64x64xf32>,
    %cst_80 = arith.constant dense<0.000000e+00> : vector<64x8xf32>
    %202 = tpu.matmul %198, %183, %cst_80 {dimension_numbers = #tpu.dot_dimension_numbers<[1], [0], [0], [1], [0, 0, 1, 1], [], []>} : vector<64x64xf32>, vector<64x8xf32>, vector<64x8xf32> -> vector<64x8xf32>
    %203 = tpu.concatenate %180, %202 in 0 : vector<64x8xf32>, vector<64x8xf32> -> vector<128x8xf32>
    %204 = tpu.concatenate %59, %107, %155, %203 in 1 : vector<128x8xf32>, vector<128x8xf32>, vector<128x8xf32>, vector<128x8xf32> -> vector<128x32xf32>
    %c0_81 = arith.constant 0 : index
    %c0_82 = arith.constant 0 : index
    %c0_83 = arith.constant 0 : index
    %205 = vector.load %arg5[%c0_81, %c0_82, %c0_83] : memref<2x32x32xf32, #tpu.memory_space<vmem>>, vector<1x32x32xf32>
    %206 = vector.shape_cast %205 : vector<1x32x32xf32> to vector<32x32xf32>
    %cst_84 = arith.constant dense<0.000000e+00> : vector<128x32xf32>
    %207 = tpu.matmul %204, %206, %cst_84 {dimension_numbers = #tpu.dot_dimension_numbers<[1], [0], [0], [1], [0, 0, 1, 1], [], []>} : vector<128x32xf32>, vector<32x32xf32>, vector<128x32xf32> -> vector<128x32xf32>
    %c0_85 = arith.constant 0 : index
    %c0_86 = arith.constant 0 : index
    %c0_87 = arith.constant 0 : index
    %208 = vector.load %arg6[%c0_85, %c0_86, %c0_87] : memref<2x1x32xf32, #tpu.memory_space<vmem>>, vector<1x1x32xf32>
    %209 = vector.shape_cast %208 : vector<1x1x32xf32> to vector<1x32xf32>
    %210 = vector.broadcast %209 : vector<1x32xf32> to vector<128x32xf32>
    %211 = arith.addf %207, %210 : vector<128x32xf32>
    %212 = arith.addf %4, %211 : vector<128x32xf32>
    %c0_88 = arith.constant 0 : index
    %c0_89 = arith.constant 0 : index
    %c0_90 = arith.constant 0 : index
    %213 = vector.load %arg7[%c0_88, %c0_89, %c0_90] : memref<2x1x32xf32, #tpu.memory_space<vmem>>, vector<1x1x32xf32>
    %214 = vector.shape_cast %213 : vector<1x1x32xf32> to vector<1x32xf32>
    %c0_91 = arith.constant 0 : index
    %c0_92 = arith.constant 0 : index
    %c0_93 = arith.constant 0 : index
    %215 = vector.load %arg8[%c0_91, %c0_92, %c0_93] : memref<2x1x32xf32, #tpu.memory_space<vmem>>, vector<1x1x32xf32>
    %216 = vector.shape_cast %215 : vector<1x1x32xf32> to vector<1x32xf32>
    %cst_94 = arith.constant dense<0.000000e+00> : vector<128xf32>
    %217 = vector.multi_reduction <add>, %212, %cst_94 [1] : vector<128x32xf32> to vector<128xf32>
    %218 = vector.shape_cast %217 : vector<128xf32> to vector<128x1xf32>
    %cst_95 = arith.constant 3.200000e+01 : f32
    %219 = vector.broadcast %cst_95 : f32 to vector<128x1xf32>
    %220 = arith.divf %218, %219 : vector<128x1xf32>
    %221 = vector.broadcast %220 : vector<128x1xf32> to vector<128x32xf32>
    %222 = arith.subf %212, %221 : vector<128x32xf32>
    %223 = arith.mulf %222, %222 : vector<128x32xf32>
    %cst_96 = arith.constant dense<0.000000e+00> : vector<128xf32>
    %224 = vector.multi_reduction <add>, %223, %cst_96 [1] : vector<128x32xf32> to vector<128xf32>
    %225 = vector.shape_cast %224 : vector<128xf32> to vector<128x1xf32>
    %cst_97 = arith.constant 3.200000e+01 : f32
    %226 = vector.broadcast %cst_97 : f32 to vector<128x1xf32>
    %227 = arith.divf %225, %226 : vector<128x1xf32>
    %cst_98 = arith.constant 9.99999971E-10 : f32
    %228 = vector.broadcast %cst_98 : f32 to vector<128x1xf32>
    %229 = arith.addf %227, %228 : vector<128x1xf32>
    %230 = math.rsqrt %229 : vector<128x1xf32>
    %231 = vector.broadcast %230 : vector<128x1xf32> to vector<128x32xf32>
    %232 = arith.mulf %222, %231 : vector<128x32xf32>
    %233 = vector.broadcast %214 : vector<1x32xf32> to vector<128x32xf32>
    %234 = arith.mulf %232, %233 : vector<128x32xf32>
    %235 = vector.broadcast %216 : vector<1x32xf32> to vector<128x32xf32>
    %236 = arith.addf %234, %235 : vector<128x32xf32>
    %c0_99 = arith.constant 0 : index
    %c0_100 = arith.constant 0 : index
    %c0_101 = arith.constant 0 : index
    %237 = vector.load %arg9[%c0_99, %c0_100, %c0_101] : memref<2x32x64xf32, #tpu.memory_space<vmem>>, vector<1x32x64xf32>
    %238 = vector.shape_cast %237 : vector<1x32x64xf32> to vector<32x64xf32>
    %cst_102 = arith.constant dense<0.000000e+00> : vector<128x64xf32>
    %239 = tpu.matmul %236, %238, %cst_102 {dimension_numbers = #tpu.dot_dimension_numbers<[1], [0], [0], [1], [0, 0, 1, 1], [], []>} : vector<128x32xf32>, vector<32x64xf32>, vector<128x64xf32> -> vector<128x64xf32>
    %c0_103 = arith.constant 0 : index
    %c0_104 = arith.constant 0 : index
    %c0_105 = arith.constant 0 : index
    %240 = vector.load %arg10[%c0_103, %c0_104, %c0_105] : memref<2x1x64xf32, #tpu.memory_space<vmem>>, vector<1x1x64xf32>
    %241 = vector.shape_cast %240 : vector<1x1x64xf32> to vector<1x64xf32>
    %242 = vector.broadcast %241 : vector<1x64xf32> to vector<128x64xf32>
    %243 = arith.addf %239, %242 : vector<128x64xf32>
    %cst_106 = arith.constant 0.000000e+00 : f32
    %244 = vector.broadcast %cst_106 : f32 to vector<128x64xf32>
    %245 = arith.maximumf %243, %244 : vector<128x64xf32>
    %c0_107 = arith.constant 0 : index
    %c0_108 = arith.constant 0 : index
    %c0_109 = arith.constant 0 : index
    %246 = vector.load %arg11[%c0_107, %c0_108, %c0_109] : memref<2x64x32xf32, #tpu.memory_space<vmem>>, vector<1x64x32xf32>
    %247 = vector.shape_cast %246 : vector<1x64x32xf32> to vector<64x32xf32>
    %cst_110 = arith.constant dense<0.000000e+00> : vector<128x32xf32>
    %248 = tpu.matmul %245, %247, %cst_110 {dimension_numbers = #tpu.dot_dimension_numbers<[1], [0], [0], [1], [0, 0, 1, 1], [], []>} : vector<128x64xf32>, vector<64x32xf32>, vector<128x32xf32> -> vector<128x32xf32>
    %c0_111 = arith.constant 0 : index
    %c0_112 = arith.constant 0 : index
    %c0_113 = arith.constant 0 : index
    %249 = vector.load %arg12[%c0_111, %c0_112, %c0_113] : memref<2x1x32xf32, #tpu.memory_space<vmem>>, vector<1x1x32xf32>
    %250 = vector.shape_cast %249 : vector<1x1x32xf32> to vector<1x32xf32>
    %251 = vector.broadcast %250 : vector<1x32xf32> to vector<128x32xf32>
    %252 = arith.addf %248, %251 : vector<128x32xf32>
    %253 = arith.addf %236, %252 : vector<128x32xf32>
    %c0_114 = arith.constant 0 : index
    %c0_115 = arith.constant 0 : index
    %c0_116 = arith.constant 0 : index
    %254 = vector.load %arg13[%c0_114, %c0_115, %c0_116] : memref<2x1x32xf32, #tpu.memory_space<vmem>>, vector<1x1x32xf32>
    %255 = vector.shape_cast %254 : vector<1x1x32xf32> to vector<1x32xf32>
    %c0_117 = arith.constant 0 : index
    %c0_118 = arith.constant 0 : index
    %c0_119 = arith.constant 0 : index
    %256 = vector.load %arg14[%c0_117, %c0_118, %c0_119] : memref<2x1x32xf32, #tpu.memory_space<vmem>>, vector<1x1x32xf32>
    %257 = vector.shape_cast %256 : vector<1x1x32xf32> to vector<1x32xf32>
    %cst_120 = arith.constant dense<0.000000e+00> : vector<128xf32>
    %258 = vector.multi_reduction <add>, %253, %cst_120 [1] : vector<128x32xf32> to vector<128xf32>
    %259 = vector.shape_cast %258 : vector<128xf32> to vector<128x1xf32>
    %cst_121 = arith.constant 3.200000e+01 : f32
    %260 = vector.broadcast %cst_121 : f32 to vector<128x1xf32>
    %261 = arith.divf %259, %260 : vector<128x1xf32>
    %262 = vector.broadcast %261 : vector<128x1xf32> to vector<128x32xf32>
    %263 = arith.subf %253, %262 : vector<128x32xf32>
    %264 = arith.mulf %263, %263 : vector<128x32xf32>
    %cst_122 = arith.constant dense<0.000000e+00> : vector<128xf32>
    %265 = vector.multi_reduction <add>, %264, %cst_122 [1] : vector<128x32xf32> to vector<128xf32>
    %266 = vector.shape_cast %265 : vector<128xf32> to vector<128x1xf32>
    %cst_123 = arith.constant 3.200000e+01 : f32
    %267 = vector.broadcast %cst_123 : f32 to vector<128x1xf32>
    %268 = arith.divf %266, %267 : vector<128x1xf32>
    %cst_124 = arith.constant 9.99999971E-10 : f32
    %269 = vector.broadcast %cst_124 : f32 to vector<128x1xf32>
    %270 = arith.addf %268, %269 : vector<128x1xf32>
    %271 = math.rsqrt %270 : vector<128x1xf32>
    %272 = vector.broadcast %271 : vector<128x1xf32> to vector<128x32xf32>
    %273 = arith.mulf %263, %272 : vector<128x32xf32>
    %274 = vector.broadcast %255 : vector<1x32xf32> to vector<128x32xf32>
    %275 = arith.mulf %273, %274 : vector<128x32xf32>
    %276 = vector.broadcast %257 : vector<1x32xf32> to vector<128x32xf32>
    %277 = arith.addf %275, %276 : vector<128x32xf32>
    %c1_125 = arith.constant 1 : index
    %c0_126 = arith.constant 0 : index
    %c0_127 = arith.constant 0 : index
    %278 = vector.load %arg3[%c1_125, %c0_126, %c0_127] : memref<2x32x96xf32, #tpu.memory_space<vmem>>, vector<1x32x96xf32>
    %279 = vector.shape_cast %278 : vector<1x32x96xf32> to vector<32x96xf32>
    %cst_128 = arith.constant dense<0.000000e+00> : vector<128x96xf32>
    %280 = tpu.matmul %277, %279, %cst_128 {dimension_numbers = #tpu.dot_dimension_numbers<[1], [0], [0], [1], [0, 0, 1, 1], [], []>} : vector<128x32xf32>, vector<32x96xf32>, vector<128x96xf32> -> vector<128x96xf32>
    %c1_129 = arith.constant 1 : index
    %c0_130 = arith.constant 0 : index
    %c0_131 = arith.constant 0 : index
    %281 = vector.load %arg4[%c1_129, %c0_130, %c0_131] : memref<2x1x96xf32, #tpu.memory_space<vmem>>, vector<1x1x96xf32>
    %282 = vector.shape_cast %281 : vector<1x1x96xf32> to vector<1x96xf32>
    %283 = vector.broadcast %282 : vector<1x96xf32> to vector<128x96xf32>
    %284 = arith.addf %280, %283 : vector<128x96xf32>
    %285 = vector.extract_strided_slice %284 {offsets = [0, 0], sizes = [128, 8], strides = [1, 1]} : vector<128x96xf32> to vector<128x8xf32>
    %286 = vector.extract_strided_slice %284 {offsets = [0, 32], sizes = [128, 8], strides = [1, 1]} : vector<128x96xf32> to vector<128x8xf32>
    %287 = vector.extract_strided_slice %284 {offsets = [0, 64], sizes = [128, 8], strides = [1, 1]} : vector<128x96xf32> to vector<128x8xf32>
    %288 = vector.extract_strided_slice %285 {offsets = [0, 0], sizes = [64, 8], strides = [1, 1]} : vector<128x8xf32> to vector<64x8xf32>
    %289 = vector.extract_strided_slice %286 {offsets = [0, 0], sizes = [64, 8], strides = [1, 1]} : vector<128x8xf32> to vector<64x8xf32>
    %290 = vector.extract_strided_slice %287 {offsets = [0, 0], sizes = [64, 8], strides = [1, 1]} : vector<128x8xf32> to vector<64x8xf32>
    %cst_132 = arith.constant dense<0.000000e+00> : vector<64x64xf32>
    %291 = tpu.matmul %288, %289, %cst_132 {dimension_numbers = #tpu.dot_dimension_numbers<[1], [1], [0], [0], [0, 0, 1, 0], [], []>} : vector<64x8xf32>, vector<64x8xf32>, vector<64x64xf32> -> vector<64x64xf32>
    %cst_133 = arith.constant dense<0xFF800000> : vector<64xf32>
    %292 = vector.multi_reduction <maximumf>, %291, %cst_133 [1] : vector<64x64xf32> to vector<64xf32>
    %293 = vector.shape_cast %292 : vector<64xf32> to vector<64x1xf32>
    %294 = vector.broadcast %293 : vector<64x1xf32> to vector<64x64xf32>
    %295 = arith.subf %291, %294 : vector<64x64xf32>
    %296 = math.exp %295 : vector<64x64xf32>
    %cst_134 = arith.constant dense<0.000000e+00> : vector<64xf32>
    %297 = vector.multi_reduction <add>, %296, %cst_134 [1] : vector<64x64xf32> to vector<64xf32>
    %298 = vector.shape_cast %297 : vector<64xf32> to vector<64x1xf32>
    %299 = tpu.reciprocal %298 {approx = true} : vector<64x1xf32> -> vector<64x1xf32>
    %300 = arith.mulf %298, %299 : vector<64x1xf32>
    %cst_135 = arith.constant 2.000000e+00 : f32
    %301 = vector.broadcast %cst_135 : f32 to vector<64x1xf32>
    %302 = arith.subf %301, %300 : vector<64x1xf32>
    %303 = arith.mulf %299, %302 : vector<64x1xf32>
    %304 = vector.broadcast %303 : vector<64x1xf32> to vector<64x64xf32>
    %305 = arith.mulf %296, %304 : vector<64x64xf32>
    %c0_136 = arith.constant 0 : index
    %c0_137 = arith.constant 0 : index
    %c0_138 = arith.constant 0 : index
    %c0_139 = arith.constant 0 : index
    %306 = vector.load %arg19[%c0_136, %c0_137, %c0_138, %c0_139] : memref<2x4x64x64xf32, #tpu.memory_space<vmem>>, vector<1x1x64x64xf32>
    %307 = vector.shape_cast %306 : vector<1x1x64x64xf32> to vector<64x64xf32>
    %308 = vector.shape_cast %305 : vector<64x64xf32> to vector<1x1x64x64xf32>
    tpu.vector_store %arg19[%c0_136, %c0_137, %c0_138, %c0_139], %308 {strides = array<i32>} : memref<2x4x64x64xf32, #tpu.memory_space<vmem>>, vector<1x1x64x64xf32>,
    %cst_140 = arith.constant dense<0.000000e+00> : vector<64x8xf32>
    %309 = tpu.matmul %305, %290, %cst_140 {dimension_numbers = #tpu.dot_dimension_numbers<[1], [0], [0], [1], [0, 0, 1, 1], [], []>} : vector<64x64xf32>, vector<64x8xf32>, vector<64x8xf32> -> vector<64x8xf32>
    %310 = vector.extract_strided_slice %285 {offsets = [64, 0], sizes = [64, 8], strides = [1, 1]} : vector<128x8xf32> to vector<64x8xf32>
    %311 = vector.extract_strided_slice %286 {offsets = [64, 0], sizes = [64, 8], strides = [1, 1]} : vector<128x8xf32> to vector<64x8xf32>
    %312 = vector.extract_strided_slice %287 {offsets = [64, 0], sizes = [64, 8], strides = [1, 1]} : vector<128x8xf32> to vector<64x8xf32>
    %cst_141 = arith.constant dense<0.000000e+00> : vector<64x64xf32>
    %313 = tpu.matmul %310, %311, %cst_141 {dimension_numbers = #tpu.dot_dimension_numbers<[1], [1], [0], [0], [0, 0, 1, 0], [], []>} : vector<64x8xf32>, vector<64x8xf32>, vector<64x64xf32> -> vector<64x64xf32>
    %cst_142 = arith.constant dense<0xFF800000> : vector<64xf32>
    %314 = vector.multi_reduction <maximumf>, %313, %cst_142 [1] : vector<64x64xf32> to vector<64xf32>
    %315 = vector.shape_cast %314 : vector<64xf32> to vector<64x1xf32>
    %316 = vector.broadcast %315 : vector<64x1xf32> to vector<64x64xf32>
    %317 = arith.subf %313, %316 : vector<64x64xf32>
    %318 = math.exp %317 : vector<64x64xf32>
    %cst_143 = arith.constant dense<0.000000e+00> : vector<64xf32>
    %319 = vector.multi_reduction <add>, %318, %cst_143 [1] : vector<64x64xf32> to vector<64xf32>
    %320 = vector.shape_cast %319 : vector<64xf32> to vector<64x1xf32>
    %321 = tpu.reciprocal %320 {approx = true} : vector<64x1xf32> -> vector<64x1xf32>
    %322 = arith.mulf %320, %321 : vector<64x1xf32>
    %cst_144 = arith.constant 2.000000e+00 : f32
    %323 = vector.broadcast %cst_144 : f32 to vector<64x1xf32>
    %324 = arith.subf %323, %322 : vector<64x1xf32>
    %325 = arith.mulf %321, %324 : vector<64x1xf32>
    %326 = vector.broadcast %325 : vector<64x1xf32> to vector<64x64xf32>
    %327 = arith.mulf %318, %326 : vector<64x64xf32>
    %c1_145 = arith.constant 1 : index
    %c0_146 = arith.constant 0 : index
    %c0_147 = arith.constant 0 : index
    %c0_148 = arith.constant 0 : index
    %328 = vector.load %arg19[%c1_145, %c0_146, %c0_147, %c0_148] : memref<2x4x64x64xf32, #tpu.memory_space<vmem>>, vector<1x1x64x64xf32>
    %329 = vector.shape_cast %328 : vector<1x1x64x64xf32> to vector<64x64xf32>
    %330 = vector.shape_cast %327 : vector<64x64xf32> to vector<1x1x64x64xf32>
    tpu.vector_store %arg19[%c1_145, %c0_146, %c0_147, %c0_148], %330 {strides = array<i32>} : memref<2x4x64x64xf32, #tpu.memory_space<vmem>>, vector<1x1x64x64xf32>,
    %cst_149 = arith.constant dense<0.000000e+00> : vector<64x8xf32>
    %331 = tpu.matmul %327, %312, %cst_149 {dimension_numbers = #tpu.dot_dimension_numbers<[1], [0], [0], [1], [0, 0, 1, 1], [], []>} : vector<64x64xf32>, vector<64x8xf32>, vector<64x8xf32> -> vector<64x8xf32>
    %332 = tpu.concatenate %309, %331 in 0 : vector<64x8xf32>, vector<64x8xf32> -> vector<128x8xf32>
    %333 = vector.extract_strided_slice %284 {offsets = [0, 8], sizes = [128, 8], strides = [1, 1]} : vector<128x96xf32> to vector<128x8xf32>
    %334 = vector.extract_strided_slice %284 {offsets = [0, 40], sizes = [128, 8], strides = [1, 1]} : vector<128x96xf32> to vector<128x8xf32>
    %335 = vector.extract_strided_slice %284 {offsets = [0, 72], sizes = [128, 8], strides = [1, 1]} : vector<128x96xf32> to vector<128x8xf32>
    %336 = vector.extract_strided_slice %333 {offsets = [0, 0], sizes = [64, 8], strides = [1, 1]} : vector<128x8xf32> to vector<64x8xf32>
    %337 = vector.extract_strided_slice %334 {offsets = [0, 0], sizes = [64, 8], strides = [1, 1]} : vector<128x8xf32> to vector<64x8xf32>
    %338 = vector.extract_strided_slice %335 {offsets = [0, 0], sizes = [64, 8], strides = [1, 1]} : vector<128x8xf32> to vector<64x8xf32>
    %cst_150 = arith.constant dense<0.000000e+00> : vector<64x64xf32>
    %339 = tpu.matmul %336, %337, %cst_150 {dimension_numbers = #tpu.dot_dimension_numbers<[1], [1], [0], [0], [0, 0, 1, 0], [], []>} : vector<64x8xf32>, vector<64x8xf32>, vector<64x64xf32> -> vector<64x64xf32>
    %cst_151 = arith.constant dense<0xFF800000> : vector<64xf32>
    %340 = vector.multi_reduction <maximumf>, %339, %cst_151 [1] : vector<64x64xf32> to vector<64xf32>
    %341 = vector.shape_cast %340 : vector<64xf32> to vector<64x1xf32>
    %342 = vector.broadcast %341 : vector<64x1xf32> to vector<64x64xf32>
    %343 = arith.subf %339, %342 : vector<64x64xf32>
    %344 = math.exp %343 : vector<64x64xf32>
    %cst_152 = arith.constant dense<0.000000e+00> : vector<64xf32>
    %345 = vector.multi_reduction <add>, %344, %cst_152 [1] : vector<64x64xf32> to vector<64xf32>
    %346 = vector.shape_cast %345 : vector<64xf32> to vector<64x1xf32>
    %347 = tpu.reciprocal %346 {approx = true} : vector<64x1xf32> -> vector<64x1xf32>
    %348 = arith.mulf %346, %347 : vector<64x1xf32>
    %cst_153 = arith.constant 2.000000e+00 : f32
    %349 = vector.broadcast %cst_153 : f32 to vector<64x1xf32>
    %350 = arith.subf %349, %348 : vector<64x1xf32>
    %351 = arith.mulf %347, %350 : vector<64x1xf32>
    %352 = vector.broadcast %351 : vector<64x1xf32> to vector<64x64xf32>
    %353 = arith.mulf %344, %352 : vector<64x64xf32>
    %c0_154 = arith.constant 0 : index
    %c1_155 = arith.constant 1 : index
    %c0_156 = arith.constant 0 : index
    %c0_157 = arith.constant 0 : index
    %354 = vector.load %arg19[%c0_154, %c1_155, %c0_156, %c0_157] : memref<2x4x64x64xf32, #tpu.memory_space<vmem>>, vector<1x1x64x64xf32>
    %355 = vector.shape_cast %354 : vector<1x1x64x64xf32> to vector<64x64xf32>
    %356 = vector.shape_cast %353 : vector<64x64xf32> to vector<1x1x64x64xf32>
    tpu.vector_store %arg19[%c0_154, %c1_155, %c0_156, %c0_157], %356 {strides = array<i32>} : memref<2x4x64x64xf32, #tpu.memory_space<vmem>>, vector<1x1x64x64xf32>,
    %cst_158 = arith.constant dense<0.000000e+00> : vector<64x8xf32>
    %357 = tpu.matmul %353, %338, %cst_158 {dimension_numbers = #tpu.dot_dimension_numbers<[1], [0], [0], [1], [0, 0, 1, 1], [], []>} : vector<64x64xf32>, vector<64x8xf32>, vector<64x8xf32> -> vector<64x8xf32>
    %358 = vector.extract_strided_slice %333 {offsets = [64, 0], sizes = [64, 8], strides = [1, 1]} : vector<128x8xf32> to vector<64x8xf32>
    %359 = vector.extract_strided_slice %334 {offsets = [64, 0], sizes = [64, 8], strides = [1, 1]} : vector<128x8xf32> to vector<64x8xf32>
    %360 = vector.extract_strided_slice %335 {offsets = [64, 0], sizes = [64, 8], strides = [1, 1]} : vector<128x8xf32> to vector<64x8xf32>
    %cst_159 = arith.constant dense<0.000000e+00> : vector<64x64xf32>
    %361 = tpu.matmul %358, %359, %cst_159 {dimension_numbers = #tpu.dot_dimension_numbers<[1], [1], [0], [0], [0, 0, 1, 0], [], []>} : vector<64x8xf32>, vector<64x8xf32>, vector<64x64xf32> -> vector<64x64xf32>
    %cst_160 = arith.constant dense<0xFF800000> : vector<64xf32>
    %362 = vector.multi_reduction <maximumf>, %361, %cst_160 [1] : vector<64x64xf32> to vector<64xf32>
    %363 = vector.shape_cast %362 : vector<64xf32> to vector<64x1xf32>
    %364 = vector.broadcast %363 : vector<64x1xf32> to vector<64x64xf32>
    %365 = arith.subf %361, %364 : vector<64x64xf32>
    %366 = math.exp %365 : vector<64x64xf32>
    %cst_161 = arith.constant dense<0.000000e+00> : vector<64xf32>
    %367 = vector.multi_reduction <add>, %366, %cst_161 [1] : vector<64x64xf32> to vector<64xf32>
    %368 = vector.shape_cast %367 : vector<64xf32> to vector<64x1xf32>
    %369 = tpu.reciprocal %368 {approx = true} : vector<64x1xf32> -> vector<64x1xf32>
    %370 = arith.mulf %368, %369 : vector<64x1xf32>
    %cst_162 = arith.constant 2.000000e+00 : f32
    %371 = vector.broadcast %cst_162 : f32 to vector<64x1xf32>
    %372 = arith.subf %371, %370 : vector<64x1xf32>
    %373 = arith.mulf %369, %372 : vector<64x1xf32>
    %374 = vector.broadcast %373 : vector<64x1xf32> to vector<64x64xf32>
    %375 = arith.mulf %366, %374 : vector<64x64xf32>
    %c1_163 = arith.constant 1 : index
    %c1_164 = arith.constant 1 : index
    %c0_165 = arith.constant 0 : index
    %c0_166 = arith.constant 0 : index
    %376 = vector.load %arg19[%c1_163, %c1_164, %c0_165, %c0_166] : memref<2x4x64x64xf32, #tpu.memory_space<vmem>>, vector<1x1x64x64xf32>
    %377 = vector.shape_cast %376 : vector<1x1x64x64xf32> to vector<64x64xf32>
    %378 = vector.shape_cast %375 : vector<64x64xf32> to vector<1x1x64x64xf32>
    tpu.vector_store %arg19[%c1_163, %c1_164, %c0_165, %c0_166], %378 {strides = array<i32>} : memref<2x4x64x64xf32, #tpu.memory_space<vmem>>, vector<1x1x64x64xf32>,
    %cst_167 = arith.constant dense<0.000000e+00> : vector<64x8xf32>
    %379 = tpu.matmul %375, %360, %cst_167 {dimension_numbers = #tpu.dot_dimension_numbers<[1], [0], [0], [1], [0, 0, 1, 1], [], []>} : vector<64x64xf32>, vector<64x8xf32>, vector<64x8xf32> -> vector<64x8xf32>
    %380 = tpu.concatenate %357, %379 in 0 : vector<64x8xf32>, vector<64x8xf32> -> vector<128x8xf32>
    %381 = vector.extract_strided_slice %284 {offsets = [0, 16], sizes = [128, 8], strides = [1, 1]} : vector<128x96xf32> to vector<128x8xf32>
    %382 = vector.extract_strided_slice %284 {offsets = [0, 48], sizes = [128, 8], strides = [1, 1]} : vector<128x96xf32> to vector<128x8xf32>
    %383 = vector.extract_strided_slice %284 {offsets = [0, 80], sizes = [128, 8], strides = [1, 1]} : vector<128x96xf32> to vector<128x8xf32>
    %384 = vector.extract_strided_slice %381 {offsets = [0, 0], sizes = [64, 8], strides = [1, 1]} : vector<128x8xf32> to vector<64x8xf32>
    %385 = vector.extract_strided_slice %382 {offsets = [0, 0], sizes = [64, 8], strides = [1, 1]} : vector<128x8xf32> to vector<64x8xf32>
    %386 = vector.extract_strided_slice %383 {offsets = [0, 0], sizes = [64, 8], strides = [1, 1]} : vector<128x8xf32> to vector<64x8xf32>
    %cst_168 = arith.constant dense<0.000000e+00> : vector<64x64xf32>
    %387 = tpu.matmul %384, %385, %cst_168 {dimension_numbers = #tpu.dot_dimension_numbers<[1], [1], [0], [0], [0, 0, 1, 0], [], []>} : vector<64x8xf32>, vector<64x8xf32>, vector<64x64xf32> -> vector<64x64xf32>
    %cst_169 = arith.constant dense<0xFF800000> : vector<64xf32>
    %388 = vector.multi_reduction <maximumf>, %387, %cst_169 [1] : vector<64x64xf32> to vector<64xf32>
    %389 = vector.shape_cast %388 : vector<64xf32> to vector<64x1xf32>
    %390 = vector.broadcast %389 : vector<64x1xf32> to vector<64x64xf32>
    %391 = arith.subf %387, %390 : vector<64x64xf32>
    %392 = math.exp %391 : vector<64x64xf32>
    %cst_170 = arith.constant dense<0.000000e+00> : vector<64xf32>
    %393 = vector.multi_reduction <add>, %392, %cst_170 [1] : vector<64x64xf32> to vector<64xf32>
    %394 = vector.shape_cast %393 : vector<64xf32> to vector<64x1xf32>
    %395 = tpu.reciprocal %394 {approx = true} : vector<64x1xf32> -> vector<64x1xf32>
    %396 = arith.mulf %394, %395 : vector<64x1xf32>
    %cst_171 = arith.constant 2.000000e+00 : f32
    %397 = vector.broadcast %cst_171 : f32 to vector<64x1xf32>
    %398 = arith.subf %397, %396 : vector<64x1xf32>
    %399 = arith.mulf %395, %398 : vector<64x1xf32>
    %400 = vector.broadcast %399 : vector<64x1xf32> to vector<64x64xf32>
    %401 = arith.mulf %392, %400 : vector<64x64xf32>
    %c0_172 = arith.constant 0 : index
    %c2_173 = arith.constant 2 : index
    %c0_174 = arith.constant 0 : index
    %c0_175 = arith.constant 0 : index
    %402 = vector.load %arg19[%c0_172, %c2_173, %c0_174, %c0_175] : memref<2x4x64x64xf32, #tpu.memory_space<vmem>>, vector<1x1x64x64xf32>
    %403 = vector.shape_cast %402 : vector<1x1x64x64xf32> to vector<64x64xf32>
    %404 = vector.shape_cast %401 : vector<64x64xf32> to vector<1x1x64x64xf32>
    tpu.vector_store %arg19[%c0_172, %c2_173, %c0_174, %c0_175], %404 {strides = array<i32>} : memref<2x4x64x64xf32, #tpu.memory_space<vmem>>, vector<1x1x64x64xf32>,
    %cst_176 = arith.constant dense<0.000000e+00> : vector<64x8xf32>
    %405 = tpu.matmul %401, %386, %cst_176 {dimension_numbers = #tpu.dot_dimension_numbers<[1], [0], [0], [1], [0, 0, 1, 1], [], []>} : vector<64x64xf32>, vector<64x8xf32>, vector<64x8xf32> -> vector<64x8xf32>
    %406 = vector.extract_strided_slice %381 {offsets = [64, 0], sizes = [64, 8], strides = [1, 1]} : vector<128x8xf32> to vector<64x8xf32>
    %407 = vector.extract_strided_slice %382 {offsets = [64, 0], sizes = [64, 8], strides = [1, 1]} : vector<128x8xf32> to vector<64x8xf32>
    %408 = vector.extract_strided_slice %383 {offsets = [64, 0], sizes = [64, 8], strides = [1, 1]} : vector<128x8xf32> to vector<64x8xf32>
    %cst_177 = arith.constant dense<0.000000e+00> : vector<64x64xf32>
    %409 = tpu.matmul %406, %407, %cst_177 {dimension_numbers = #tpu.dot_dimension_numbers<[1], [1], [0], [0], [0, 0, 1, 0], [], []>} : vector<64x8xf32>, vector<64x8xf32>, vector<64x64xf32> -> vector<64x64xf32>
    %cst_178 = arith.constant dense<0xFF800000> : vector<64xf32>
    %410 = vector.multi_reduction <maximumf>, %409, %cst_178 [1] : vector<64x64xf32> to vector<64xf32>
    %411 = vector.shape_cast %410 : vector<64xf32> to vector<64x1xf32>
    %412 = vector.broadcast %411 : vector<64x1xf32> to vector<64x64xf32>
    %413 = arith.subf %409, %412 : vector<64x64xf32>
    %414 = math.exp %413 : vector<64x64xf32>
    %cst_179 = arith.constant dense<0.000000e+00> : vector<64xf32>
    %415 = vector.multi_reduction <add>, %414, %cst_179 [1] : vector<64x64xf32> to vector<64xf32>
    %416 = vector.shape_cast %415 : vector<64xf32> to vector<64x1xf32>
    %417 = tpu.reciprocal %416 {approx = true} : vector<64x1xf32> -> vector<64x1xf32>
    %418 = arith.mulf %416, %417 : vector<64x1xf32>
    %cst_180 = arith.constant 2.000000e+00 : f32
    %419 = vector.broadcast %cst_180 : f32 to vector<64x1xf32>
    %420 = arith.subf %419, %418 : vector<64x1xf32>
    %421 = arith.mulf %417, %420 : vector<64x1xf32>
    %422 = vector.broadcast %421 : vector<64x1xf32> to vector<64x64xf32>
    %423 = arith.mulf %414, %422 : vector<64x64xf32>
    %c1_181 = arith.constant 1 : index
    %c2_182 = arith.constant 2 : index
    %c0_183 = arith.constant 0 : index
    %c0_184 = arith.constant 0 : index
    %424 = vector.load %arg19[%c1_181, %c2_182, %c0_183, %c0_184] : memref<2x4x64x64xf32, #tpu.memory_space<vmem>>, vector<1x1x64x64xf32>
    %425 = vector.shape_cast %424 : vector<1x1x64x64xf32> to vector<64x64xf32>
    %426 = vector.shape_cast %423 : vector<64x64xf32> to vector<1x1x64x64xf32>
    tpu.vector_store %arg19[%c1_181, %c2_182, %c0_183, %c0_184], %426 {strides = array<i32>} : memref<2x4x64x64xf32, #tpu.memory_space<vmem>>, vector<1x1x64x64xf32>,
    %cst_185 = arith.constant dense<0.000000e+00> : vector<64x8xf32>
    %427 = tpu.matmul %423, %408, %cst_185 {dimension_numbers = #tpu.dot_dimension_numbers<[1], [0], [0], [1], [0, 0, 1, 1], [], []>} : vector<64x64xf32>, vector<64x8xf32>, vector<64x8xf32> -> vector<64x8xf32>
    %428 = tpu.concatenate %405, %427 in 0 : vector<64x8xf32>, vector<64x8xf32> -> vector<128x8xf32>
    %429 = vector.extract_strided_slice %284 {offsets = [0, 24], sizes = [128, 8], strides = [1, 1]} : vector<128x96xf32> to vector<128x8xf32>
    %430 = vector.extract_strided_slice %284 {offsets = [0, 56], sizes = [128, 8], strides = [1, 1]} : vector<128x96xf32> to vector<128x8xf32>
    %431 = vector.extract_strided_slice %284 {offsets = [0, 88], sizes = [128, 8], strides = [1, 1]} : vector<128x96xf32> to vector<128x8xf32>
    %432 = vector.extract_strided_slice %429 {offsets = [0, 0], sizes = [64, 8], strides = [1, 1]} : vector<128x8xf32> to vector<64x8xf32>
    %433 = vector.extract_strided_slice %430 {offsets = [0, 0], sizes = [64, 8], strides = [1, 1]} : vector<128x8xf32> to vector<64x8xf32>
    %434 = vector.extract_strided_slice %431 {offsets = [0, 0], sizes = [64, 8], strides = [1, 1]} : vector<128x8xf32> to vector<64x8xf32>
    %cst_186 = arith.constant dense<0.000000e+00> : vector<64x64xf32>
    %435 = tpu.matmul %432, %433, %cst_186 {dimension_numbers = #tpu.dot_dimension_numbers<[1], [1], [0], [0], [0, 0, 1, 0], [], []>} : vector<64x8xf32>, vector<64x8xf32>, vector<64x64xf32> -> vector<64x64xf32>
    %cst_187 = arith.constant dense<0xFF800000> : vector<64xf32>
    %436 = vector.multi_reduction <maximumf>, %435, %cst_187 [1] : vector<64x64xf32> to vector<64xf32>
    %437 = vector.shape_cast %436 : vector<64xf32> to vector<64x1xf32>
    %438 = vector.broadcast %437 : vector<64x1xf32> to vector<64x64xf32>
    %439 = arith.subf %435, %438 : vector<64x64xf32>
    %440 = math.exp %439 : vector<64x64xf32>
    %cst_188 = arith.constant dense<0.000000e+00> : vector<64xf32>
    %441 = vector.multi_reduction <add>, %440, %cst_188 [1] : vector<64x64xf32> to vector<64xf32>
    %442 = vector.shape_cast %441 : vector<64xf32> to vector<64x1xf32>
    %443 = tpu.reciprocal %442 {approx = true} : vector<64x1xf32> -> vector<64x1xf32>
    %444 = arith.mulf %442, %443 : vector<64x1xf32>
    %cst_189 = arith.constant 2.000000e+00 : f32
    %445 = vector.broadcast %cst_189 : f32 to vector<64x1xf32>
    %446 = arith.subf %445, %444 : vector<64x1xf32>
    %447 = arith.mulf %443, %446 : vector<64x1xf32>
    %448 = vector.broadcast %447 : vector<64x1xf32> to vector<64x64xf32>
    %449 = arith.mulf %440, %448 : vector<64x64xf32>
    %c0_190 = arith.constant 0 : index
    %c3_191 = arith.constant 3 : index
    %c0_192 = arith.constant 0 : index
    %c0_193 = arith.constant 0 : index
    %450 = vector.load %arg19[%c0_190, %c3_191, %c0_192, %c0_193] : memref<2x4x64x64xf32, #tpu.memory_space<vmem>>, vector<1x1x64x64xf32>
    %451 = vector.shape_cast %450 : vector<1x1x64x64xf32> to vector<64x64xf32>
    %452 = vector.shape_cast %449 : vector<64x64xf32> to vector<1x1x64x64xf32>
    tpu.vector_store %arg19[%c0_190, %c3_191, %c0_192, %c0_193], %452 {strides = array<i32>} : memref<2x4x64x64xf32, #tpu.memory_space<vmem>>, vector<1x1x64x64xf32>,
    %cst_194 = arith.constant dense<0.000000e+00> : vector<64x8xf32>
    %453 = tpu.matmul %449, %434, %cst_194 {dimension_numbers = #tpu.dot_dimension_numbers<[1], [0], [0], [1], [0, 0, 1, 1], [], []>} : vector<64x64xf32>, vector<64x8xf32>, vector<64x8xf32> -> vector<64x8xf32>
    %454 = vector.extract_strided_slice %429 {offsets = [64, 0], sizes = [64, 8], strides = [1, 1]} : vector<128x8xf32> to vector<64x8xf32>
    %455 = vector.extract_strided_slice %430 {offsets = [64, 0], sizes = [64, 8], strides = [1, 1]} : vector<128x8xf32> to vector<64x8xf32>
    %456 = vector.extract_strided_slice %431 {offsets = [64, 0], sizes = [64, 8], strides = [1, 1]} : vector<128x8xf32> to vector<64x8xf32>
    %cst_195 = arith.constant dense<0.000000e+00> : vector<64x64xf32>
    %457 = tpu.matmul %454, %455, %cst_195 {dimension_numbers = #tpu.dot_dimension_numbers<[1], [1], [0], [0], [0, 0, 1, 0], [], []>} : vector<64x8xf32>, vector<64x8xf32>, vector<64x64xf32> -> vector<64x64xf32>
    %cst_196 = arith.constant dense<0xFF800000> : vector<64xf32>
    %458 = vector.multi_reduction <maximumf>, %457, %cst_196 [1] : vector<64x64xf32> to vector<64xf32>
    %459 = vector.shape_cast %458 : vector<64xf32> to vector<64x1xf32>
    %460 = vector.broadcast %459 : vector<64x1xf32> to vector<64x64xf32>
    %461 = arith.subf %457, %460 : vector<64x64xf32>
    %462 = math.exp %461 : vector<64x64xf32>
    %cst_197 = arith.constant dense<0.000000e+00> : vector<64xf32>
    %463 = vector.multi_reduction <add>, %462, %cst_197 [1] : vector<64x64xf32> to vector<64xf32>
    %464 = vector.shape_cast %463 : vector<64xf32> to vector<64x1xf32>
    %465 = tpu.reciprocal %464 {approx = true} : vector<64x1xf32> -> vector<64x1xf32>
    %466 = arith.mulf %464, %465 : vector<64x1xf32>
    %cst_198 = arith.constant 2.000000e+00 : f32
    %467 = vector.broadcast %cst_198 : f32 to vector<64x1xf32>
    %468 = arith.subf %467, %466 : vector<64x1xf32>
    %469 = arith.mulf %465, %468 : vector<64x1xf32>
    %470 = vector.broadcast %469 : vector<64x1xf32> to vector<64x64xf32>
    %471 = arith.mulf %462, %470 : vector<64x64xf32>
    %c1_199 = arith.constant 1 : index
    %c3_200 = arith.constant 3 : index
    %c0_201 = arith.constant 0 : index
    %c0_202 = arith.constant 0 : index
    %472 = vector.load %arg19[%c1_199, %c3_200, %c0_201, %c0_202] : memref<2x4x64x64xf32, #tpu.memory_space<vmem>>, vector<1x1x64x64xf32>
    %473 = vector.shape_cast %472 : vector<1x1x64x64xf32> to vector<64x64xf32>
    %474 = vector.shape_cast %471 : vector<64x64xf32> to vector<1x1x64x64xf32>
    tpu.vector_store %arg19[%c1_199, %c3_200, %c0_201, %c0_202], %474 {strides = array<i32>} : memref<2x4x64x64xf32, #tpu.memory_space<vmem>>, vector<1x1x64x64xf32>,
    %cst_203 = arith.constant dense<0.000000e+00> : vector<64x8xf32>
    %475 = tpu.matmul %471, %456, %cst_203 {dimension_numbers = #tpu.dot_dimension_numbers<[1], [0], [0], [1], [0, 0, 1, 1], [], []>} : vector<64x64xf32>, vector<64x8xf32>, vector<64x8xf32> -> vector<64x8xf32>
    %476 = tpu.concatenate %453, %475 in 0 : vector<64x8xf32>, vector<64x8xf32> -> vector<128x8xf32>
    %477 = tpu.concatenate %332, %380, %428, %476 in 1 : vector<128x8xf32>, vector<128x8xf32>, vector<128x8xf32>, vector<128x8xf32> -> vector<128x32xf32>
    %c1_204 = arith.constant 1 : index
    %c0_205 = arith.constant 0 : index
    %c0_206 = arith.constant 0 : index
    %478 = vector.load %arg5[%c1_204, %c0_205, %c0_206] : memref<2x32x32xf32, #tpu.memory_space<vmem>>, vector<1x32x32xf32>
    %479 = vector.shape_cast %478 : vector<1x32x32xf32> to vector<32x32xf32>
    %cst_207 = arith.constant dense<0.000000e+00> : vector<128x32xf32>
    %480 = tpu.matmul %477, %479, %cst_207 {dimension_numbers = #tpu.dot_dimension_numbers<[1], [0], [0], [1], [0, 0, 1, 1], [], []>} : vector<128x32xf32>, vector<32x32xf32>, vector<128x32xf32> -> vector<128x32xf32>
    %c1_208 = arith.constant 1 : index
    %c0_209 = arith.constant 0 : index
    %c0_210 = arith.constant 0 : index
    %481 = vector.load %arg6[%c1_208, %c0_209, %c0_210] : memref<2x1x32xf32, #tpu.memory_space<vmem>>, vector<1x1x32xf32>
    %482 = vector.shape_cast %481 : vector<1x1x32xf32> to vector<1x32xf32>
    %483 = vector.broadcast %482 : vector<1x32xf32> to vector<128x32xf32>
    %484 = arith.addf %480, %483 : vector<128x32xf32>
    %485 = arith.addf %277, %484 : vector<128x32xf32>
    %c1_211 = arith.constant 1 : index
    %c0_212 = arith.constant 0 : index
    %c0_213 = arith.constant 0 : index
    %486 = vector.load %arg7[%c1_211, %c0_212, %c0_213] : memref<2x1x32xf32, #tpu.memory_space<vmem>>, vector<1x1x32xf32>
    %487 = vector.shape_cast %486 : vector<1x1x32xf32> to vector<1x32xf32>
    %c1_214 = arith.constant 1 : index
    %c0_215 = arith.constant 0 : index
    %c0_216 = arith.constant 0 : index
    %488 = vector.load %arg8[%c1_214, %c0_215, %c0_216] : memref<2x1x32xf32, #tpu.memory_space<vmem>>, vector<1x1x32xf32>
    %489 = vector.shape_cast %488 : vector<1x1x32xf32> to vector<1x32xf32>
    %cst_217 = arith.constant dense<0.000000e+00> : vector<128xf32>
    %490 = vector.multi_reduction <add>, %485, %cst_217 [1] : vector<128x32xf32> to vector<128xf32>
    %491 = vector.shape_cast %490 : vector<128xf32> to vector<128x1xf32>
    %cst_218 = arith.constant 3.200000e+01 : f32
    %492 = vector.broadcast %cst_218 : f32 to vector<128x1xf32>
    %493 = arith.divf %491, %492 : vector<128x1xf32>
    %494 = vector.broadcast %493 : vector<128x1xf32> to vector<128x32xf32>
    %495 = arith.subf %485, %494 : vector<128x32xf32>
    %496 = arith.mulf %495, %495 : vector<128x32xf32>
    %cst_219 = arith.constant dense<0.000000e+00> : vector<128xf32>
    %497 = vector.multi_reduction <add>, %496, %cst_219 [1] : vector<128x32xf32> to vector<128xf32>
    %498 = vector.shape_cast %497 : vector<128xf32> to vector<128x1xf32>
    %cst_220 = arith.constant 3.200000e+01 : f32
    %499 = vector.broadcast %cst_220 : f32 to vector<128x1xf32>
    %500 = arith.divf %498, %499 : vector<128x1xf32>
    %cst_221 = arith.constant 9.99999971E-10 : f32
    %501 = vector.broadcast %cst_221 : f32 to vector<128x1xf32>
    %502 = arith.addf %500, %501 : vector<128x1xf32>
    %503 = math.rsqrt %502 : vector<128x1xf32>
    %504 = vector.broadcast %503 : vector<128x1xf32> to vector<128x32xf32>
    %505 = arith.mulf %495, %504 : vector<128x32xf32>
    %506 = vector.broadcast %487 : vector<1x32xf32> to vector<128x32xf32>
    %507 = arith.mulf %505, %506 : vector<128x32xf32>
    %508 = vector.broadcast %489 : vector<1x32xf32> to vector<128x32xf32>
    %509 = arith.addf %507, %508 : vector<128x32xf32>
    %c1_222 = arith.constant 1 : index
    %c0_223 = arith.constant 0 : index
    %c0_224 = arith.constant 0 : index
    %510 = vector.load %arg9[%c1_222, %c0_223, %c0_224] : memref<2x32x64xf32, #tpu.memory_space<vmem>>, vector<1x32x64xf32>
    %511 = vector.shape_cast %510 : vector<1x32x64xf32> to vector<32x64xf32>
    %cst_225 = arith.constant dense<0.000000e+00> : vector<128x64xf32>
    %512 = tpu.matmul %509, %511, %cst_225 {dimension_numbers = #tpu.dot_dimension_numbers<[1], [0], [0], [1], [0, 0, 1, 1], [], []>} : vector<128x32xf32>, vector<32x64xf32>, vector<128x64xf32> -> vector<128x64xf32>
    %c1_226 = arith.constant 1 : index
    %c0_227 = arith.constant 0 : index
    %c0_228 = arith.constant 0 : index
    %513 = vector.load %arg10[%c1_226, %c0_227, %c0_228] : memref<2x1x64xf32, #tpu.memory_space<vmem>>, vector<1x1x64xf32>
    %514 = vector.shape_cast %513 : vector<1x1x64xf32> to vector<1x64xf32>
    %515 = vector.broadcast %514 : vector<1x64xf32> to vector<128x64xf32>
    %516 = arith.addf %512, %515 : vector<128x64xf32>
    %cst_229 = arith.constant 0.000000e+00 : f32
    %517 = vector.broadcast %cst_229 : f32 to vector<128x64xf32>
    %518 = arith.maximumf %516, %517 : vector<128x64xf32>
    %c1_230 = arith.constant 1 : index
    %c0_231 = arith.constant 0 : index
    %c0_232 = arith.constant 0 : index
    %519 = vector.load %arg11[%c1_230, %c0_231, %c0_232] : memref<2x64x32xf32, #tpu.memory_space<vmem>>, vector<1x64x32xf32>
    %520 = vector.shape_cast %519 : vector<1x64x32xf32> to vector<64x32xf32>
    %cst_233 = arith.constant dense<0.000000e+00> : vector<128x32xf32>
    %521 = tpu.matmul %518, %520, %cst_233 {dimension_numbers = #tpu.dot_dimension_numbers<[1], [0], [0], [1], [0, 0, 1, 1], [], []>} : vector<128x64xf32>, vector<64x32xf32>, vector<128x32xf32> -> vector<128x32xf32>
    %c1_234 = arith.constant 1 : index
    %c0_235 = arith.constant 0 : index
    %c0_236 = arith.constant 0 : index
    %522 = vector.load %arg12[%c1_234, %c0_235, %c0_236] : memref<2x1x32xf32, #tpu.memory_space<vmem>>, vector<1x1x32xf32>
    %523 = vector.shape_cast %522 : vector<1x1x32xf32> to vector<1x32xf32>
    %524 = vector.broadcast %523 : vector<1x32xf32> to vector<128x32xf32>
    %525 = arith.addf %521, %524 : vector<128x32xf32>
    %526 = arith.addf %509, %525 : vector<128x32xf32>
    %c1_237 = arith.constant 1 : index
    %c0_238 = arith.constant 0 : index
    %c0_239 = arith.constant 0 : index
    %527 = vector.load %arg13[%c1_237, %c0_238, %c0_239] : memref<2x1x32xf32, #tpu.memory_space<vmem>>, vector<1x1x32xf32>
    %528 = vector.shape_cast %527 : vector<1x1x32xf32> to vector<1x32xf32>
    %c1_240 = arith.constant 1 : index
    %c0_241 = arith.constant 0 : index
    %c0_242 = arith.constant 0 : index
    %529 = vector.load %arg14[%c1_240, %c0_241, %c0_242] : memref<2x1x32xf32, #tpu.memory_space<vmem>>, vector<1x1x32xf32>
    %530 = vector.shape_cast %529 : vector<1x1x32xf32> to vector<1x32xf32>
    %cst_243 = arith.constant dense<0.000000e+00> : vector<128xf32>
    %531 = vector.multi_reduction <add>, %526, %cst_243 [1] : vector<128x32xf32> to vector<128xf32>
    %532 = vector.shape_cast %531 : vector<128xf32> to vector<128x1xf32>
    %cst_244 = arith.constant 3.200000e+01 : f32
    %533 = vector.broadcast %cst_244 : f32 to vector<128x1xf32>
    %534 = arith.divf %532, %533 : vector<128x1xf32>
    %535 = vector.broadcast %534 : vector<128x1xf32> to vector<128x32xf32>
    %536 = arith.subf %526, %535 : vector<128x32xf32>
    %537 = arith.mulf %536, %536 : vector<128x32xf32>
    %cst_245 = arith.constant dense<0.000000e+00> : vector<128xf32>
    %538 = vector.multi_reduction <add>, %537, %cst_245 [1] : vector<128x32xf32> to vector<128xf32>
    %539 = vector.shape_cast %538 : vector<128xf32> to vector<128x1xf32>
    %cst_246 = arith.constant 3.200000e+01 : f32
    %540 = vector.broadcast %cst_246 : f32 to vector<128x1xf32>
    %541 = arith.divf %539, %540 : vector<128x1xf32>
    %cst_247 = arith.constant 9.99999971E-10 : f32
    %542 = vector.broadcast %cst_247 : f32 to vector<128x1xf32>
    %543 = arith.addf %541, %542 : vector<128x1xf32>
    %544 = math.rsqrt %543 : vector<128x1xf32>
    %545 = vector.broadcast %544 : vector<128x1xf32> to vector<128x32xf32>
    %546 = arith.mulf %536, %545 : vector<128x32xf32>
    %547 = vector.broadcast %528 : vector<1x32xf32> to vector<128x32xf32>
    %548 = arith.mulf %546, %547 : vector<128x32xf32>
    %549 = vector.broadcast %530 : vector<1x32xf32> to vector<128x32xf32>
    %550 = arith.addf %548, %549 : vector<128x32xf32>
    %c0_248 = arith.constant 0 : index
    %c0_249 = arith.constant 0 : index
    %551 = vector.load %arg15[%c0_248, %c0_249] : memref<32x4xf32, #tpu.memory_space<vmem>>, vector<32x4xf32>
    %cst_250 = arith.constant dense<0.000000e+00> : vector<128x4xf32>
    %552 = tpu.matmul %550, %551, %cst_250 {dimension_numbers = #tpu.dot_dimension_numbers<[1], [0], [0], [1], [0, 0, 1, 1], [], []>} : vector<128x32xf32>, vector<32x4xf32>, vector<128x4xf32> -> vector<128x4xf32>
    %c0_251 = arith.constant 0 : index
    %c0_252 = arith.constant 0 : index
    %553 = vector.load %arg16[%c0_251, %c0_252] : memref<1x4xf32, #tpu.memory_space<vmem>>, vector<1x4xf32>
    %554 = vector.broadcast %553 : vector<1x4xf32> to vector<128x4xf32>
    %555 = arith.addf %552, %554 : vector<128x4xf32>
    %c0_253 = arith.constant 0 : index
    %c0_254 = arith.constant 0 : index
    %556 = vector.load %arg17[%c0_253, %c0_254] : memref<128x4xf32, #tpu.memory_space<vmem>>, vector<128x4xf32>
    tpu.vector_store %arg17[%c0_253, %c0_254], %555 {strides = array<i32>} : memref<128x4xf32, #tpu.memory_space<vmem>>, vector<128x4xf32>,
    return
  }
}

</mosaic_0001>

<bundles_post_ra>
// kernel: tpu_custom_call.1
= control target key start
LH: loop header
LB: loop body
LE: loop exit
PB: predicated region body
PF: predicated region fallthrough
CT: control target
= control target key end

     0   :  { %s18970_s0 = inlined_call_operand.vmem [shape: f32[128,8], index: 0, kind: input, shape index: {}]   ;;  %s18971_s1 = inlined_call_operand.vmem [shape: f32[8,32], index: 1, kind: input, shape index: {}]   ;;  %s18972_s2 = inlined_call_operand.vmem [shape: f32[128,32], index: 2, kind: input, shape index: {}]   ;;  %s18973_s3 = inlined_call_operand.vmem [shape: f32[2,32,96], index: 3, kind: input, shape index: {}]   ;;  %s18974_s4 = inlined_call_operand.vmem [shape: f32[2,1,96], index: 4, kind: input, shape index: {}]   ;;  %s18975_s5 = inlined_call_operand.vmem [shape: f32[2,32,32], index: 5, kind: input, shape index: {}]   ;;  %s18976_s6 = inlined_call_operand.vmem [shape: f32[2,1,32], index: 6, kind: input, shape index: {}]   ;;  %s18977_s7 = inlined_call_operand.vmem [shape: f32[2,1,32], index: 7, kind: input, shape index: {}]   ;;  %s18978_s8 = inlined_call_operand.vmem [shape: f32[2,1,32], index: 8, kind: input, shape index: {}]   ;;  %s18979_s9 = inlined_call_operand.vmem [shape: f32[2,32,64], index: 9, kind: input, shape index: {}]   ;;  %s18980_s10 = inlined_call_operand.vmem [shape: f32[2,1,64], index: 10, kind: input, shape index: {}]   ;;  %s18981_s11 = inlined_call_operand.vmem [shape: f32[2,64,32], index: 11, kind: input, shape index: {}]   ;;  %s18982_s12 = inlined_call_operand.vmem [shape: f32[2,1,32], index: 12, kind: input, shape index: {}]   ;;  %s18983_s13 = inlined_call_operand.vmem [shape: f32[2,1,32], index: 13, kind: input, shape index: {}]   ;;  %s18984_s14 = inlined_call_operand.vmem [shape: f32[2,1,32], index: 14, kind: input, shape index: {}]   ;;  %s18985_s15 = inlined_call_operand.vmem [shape: f32[32,4], index: 15, kind: input, shape index: {}]   ;;  %s18986_s16 = inlined_call_operand.vmem [shape: f32[1,4], index: 16, kind: input, shape index: {}]   ;;  %s18987_s17 = inlined_call_operand.vmem [shape: f32[128,4], index: 17, kind: output, shape index: {0}]   ;;  %s18988_s18 = inlined_call_operand.hbm [shape: f32[2,4,64,64], index: 18, kind: output, shape index: {1}]   ;;  %s18989_s19 = inlined_call_operand.hbm [shape: f32[2,4,64,64], index: 19, kind: output, shape index: {2}]  }
   0x1   :  { %19047 = sst [smem:[#allocation45_spill]] %s18970_s0 }
   0x2   :  { %19048 = sst [smem:[#allocation46_spill]] %s18971_s1 }
   0x3   :  { %19049 = sst [smem:[#allocation47_spill]] %s18972_s2 }
   0x4   :  { %19050 = sst [smem:[#allocation48_spill]] %s18973_s3 }
   0x5   :  { %25 = vsyncpa [#allocation3], 0  ;;  %s19051_s20 = sld [smem:[#allocation46_spill]]  ;;  %vm94_vm0 = vcmask 64512  }
   0x6   :  { %s19052_s22 = sld [smem:[#allocation45_spill]] }
   0x7   :  { %s19053_s30 = sld [smem:[#allocation48_spill]] }
   0xb   :  { %v77_v0 = vld [vmem:[%s19051_s20] sm:$0xff] }
   0xc   :  { %v61_v1 = vld [vmem:[%s19052_s22] sm:$0xff]  ;;  %v62_v2 = vld [vmem:[%s19052_s22 + $0x8] sm:$0xff]  ;;  %12154 = vmatprep.subr.mxu0 %v77_v0  ;;  %v63_v3 = vld [vmem:[%s19052_s22 + $0x10] sm:$0xff] }
   0xd   :  { %12156 = vmatprep.mubr.msk.f32.mxu0 %vm94_vm0, %v61_v1  ;;  %12155 = vmatpush3.msra.mxu0 %v77_v0  ;;  %v64_v4 = vld [vmem:[%s19052_s22 + $0x18] sm:$0xff]  ;;  %v65_v5 = vld [vmem:[%s19052_s22 + $0x20] sm:$0xff] }
   0xe   :  { %12157 = vmatmul.mubr.msk.f32.vlgmr.msra.gmra.mxu0 %vm94_vm0, %v62_v2  ;;  %v291_v6 = vld [vmem:[%s19053_s30 + $0x18] sm:$0xff] }
   0xf   :  { %12159 = vmatprep.mubr.msk.f32.mxu0 %vm94_vm0, %v63_v3  ;;  %12180 = vmatprep.subr.mxu1 %v291_v6 }
  0x10   :  { %26 = vsyncpa [#allocation5], 0  ;;  %12181 = vmatpush3.msra.mxu1 %v291_v6  ;;  %v66_v7 = vld [vmem:[%s19052_s22 + $0x28] sm:$0xff]  ;;  %v67_v8 = vld [vmem:[%s19052_s22 + $0x30] sm:$0xff]  ;;  %s19054_s2 = sld [smem:[#allocation47_spill]]  ;;  %vm299_vm1 = vcmask 261120  }
  0x11   :  { %v68_v9 = vld [vmem:[%s19052_s22 + $0x38] sm:$0xff]  ;;  %v69_v10 = vld [vmem:[%s19052_s22 + $0x40] sm:$0xff]  ;;  %v70_v11 = vld [vmem:[%s19052_s22 + $0x48] sm:$0xff]  ;;  %s14081_s27 = smov 96   ;;  %s14082_s28 = smov 64   ;;  %vm654_vm2 = vcmask 523264  }
  0x12   :  { %12160 = vmatmul.mubr.msk.f32.gmra.mxu0 %vm94_vm0, %v64_v4  ;;  %v71_v12 = vld [vmem:[%s19052_s22 + $0x50] sm:$0xff]  ;;  %v72_v13 = vld [vmem:[%s19052_s22 + $0x58] sm:$0xff]  ;;  %v73_v14 = vld [vmem:[%s19052_s22 + $0x60] sm:$0xff]  ;;  %s14083_s29 = smov 88   ;;  %s14084_s0 = smov 120   ;;  %vm4229_vm3 = vcmask 130048  }
  0x13   :  { %12162 = vmatprep.mubr.msk.f32.mxu0 %vm94_vm0, %v65_v5  ;;  %v74_v15 = vld [vmem:[%s19052_s22 + $0x68] sm:$0xff]  ;;  %v75_v16 = vld [vmem:[%s19052_s22 + $0x70] sm:$0xff]  ;;  %v76_v17 = vld [vmem:[%s19052_s22 + $0x78] sm:$0xff]  ;;  %s14085_s20 = smov 56   ;;  %s14086_s21 = smov 80   ;;  %vm4246_vm4 = vcmask 195584  }
  0x14   :  { %v290_v18 = vld [vmem:[%s19053_s30 + $0x10] sm:$0xff]  ;;  %v289_v19 = vld [vmem:[%s19053_s30 + $0x8] sm:$0xff]  ;;  %v288_v20 = vld [vmem:[%s19053_s30] sm:$0xff]  ;;  %s19025_s22 = smov 112   ;;  %s19023_s1 = smov 48   ;;  %vm10795_vm5 = vcmask 31744  }
  0x15   :  { %12182 = vmatprep.subr.mxu1 %v290_v18  ;;  %v10864_v6 = vld [vmem:[%s18974_s4] ss:$0 sm:$0xff]  ;;  %s19021_s23 = smov 72   ;;  %s19017_s24 = smov 104  }
  0x16   :  { %12163 = vmatmul.mubr.msk.f32.gmra.mxu0 %vm94_vm0, %v66_v7  ;;  %12183 = vmatpush3.msra.mxu1 %v290_v18  ;;  %v78_v22 = vld [vmem:[%s19054_s2] sm:$0xff]  ;;  %v79_v23 = vld [vmem:[%s19054_s2 + $0x8] sm:$0xff]  ;;  %v80_v28 = vld [vmem:[%s19054_s2 + $0x10] sm:$0xff]  ;;  %s19015_s25 = smov 40   ;;  %s19013_s3 = smov 8  }
  0x17   :  { %12165 = vmatprep.mubr.msk.f32.mxu0 %vm94_vm0, %v67_v8  ;;  %12184 = vmatprep.subr.mxu1 %v289_v19  ;;  %v81_v29 = vld [vmem:[%s19054_s2 + $0x18] sm:$0xff]  ;;  %v82_v34 = vld [vmem:[%s19054_s2 + $0x20] sm:$0xff]  ;;  %v83_v35 = vld [vmem:[%s19054_s2 + $0x28] sm:$0xff]  ;;  %s19011_s26 = smov 16  }
  0x18   :  { %12185 = vmatpush3.msra.mxu1 %v289_v19  ;;  %v84_v40 = vld [vmem:[%s19054_s2 + $0x30] sm:$0xff]  ;;  %v85_v41 = vld [vmem:[%s19054_s2 + $0x38] sm:$0xff]  ;;  %v87_v44 = vld [vmem:[%s19054_s2 + $0x48] sm:$0xff] }
  0x19   :  { %12186 = vmatprep.subr.mxu1 %v288_v20  ;;  %v86_v47 = vld [vmem:[%s19054_s2 + $0x40] sm:$0xff]  ;;  %v89_v51 = vld [vmem:[%s19054_s2 + $0x58] sm:$0xff]  ;;  %v88_v53 = vld [vmem:[%s19054_s2 + $0x50] sm:$0xff] }
  0x1a   :  { %12166 = vmatmul.mubr.msk.f32.gmra.mxu0 %vm94_vm0, %v68_v9  ;;  %12187 = vmatpush3.msra.mxu1 %v288_v20  ;;  %v91_v57 = vld [vmem:[%s19054_s2 + $0x68] sm:$0xff]  ;;  %v90_v59 = vld [vmem:[%s19054_s2 + $0x60] sm:$0xff]  ;;  %v93_v63 = vld [vmem:[%s19054_s2 + $0x78] sm:$0xff] }
  0x1b   :  { %12168 = vmatprep.mubr.msk.f32.mxu0 %vm94_vm0, %v69_v10  ;;  %v92_v1 = vld [vmem:[%s19054_s2 + $0x70] sm:$0xff]  ;;  %s19019_s2 = smov 24  }
  0x1e   :  { %12169 = vmatmul.mubr.msk.f32.gmra.mxu0 %vm94_vm0, %v70_v11 }
  0x1f   :  { %12171 = vmatprep.mubr.msk.f32.mxu0 %vm94_vm0, %v71_v12 }
  0x22   :  { %12172 = vmatmul.mubr.msk.f32.gmra.mxu0 %vm94_vm0, %v72_v13 }
  0x23   :  { %12174 = vmatprep.mubr.msk.f32.mxu0 %vm94_vm0, %v73_v14 }
  0x26   :  { %12175 = vmatmul.mubr.msk.f32.gmra.mxu0 %vm94_vm0, %v74_v15 }
  0x27   :  { %12177 = vmatprep.mubr.msk.f32.mxu0 %vm94_vm0, %v75_v16 }
  0x2a   :  { %12178 = vmatmul.mubr.msk.f32.gmra.mxu0 %vm94_vm0, %v76_v17 }
  0xce   :  { %v12158_v21 = vpop.f32.mrf.mxu0 }
  0xcf   :  { %v14285_v26 = vadd.f32 %v12158_v21, %v79_v23 }
  0xd0   :  { %v209_v24 = vpop.f32.mrf.mxu0 }
  0xd1   :  { %v14283_v25 = vadd.f32 %v209_v24, %v78_v22  ;;  %19056 = vst [vmem:[#allocation9_spill] sm:$0xff] %v14285_v26 }
  0xd2   :  { %v12161_v27 = vpop.f32.mrf.mxu0 }
  0xd3   :  { %19055 = vst [vmem:[#allocation8_spill] sm:$0xff] %v14283_v25  ;;  %12188 = vmatprep.mubr.msk.f32.mxu1 %vm299_vm1, %v14283_v25  ;;  %v14299_v32 = vadd.f32 %v12161_v27, %v81_v29 }
  0xd4   :  { %v219_v30 = vpop.f32.mrf.mxu0  ;;  %12189 = vmatmul.mubr.msk.f32.vlgmr.msra.gmra.mxu1 %vm299_vm1, %v14285_v26 }
  0xd5   :  { %v14297_v31 = vadd.f32 %v219_v30, %v80_v28  ;;  %19058 = vst [vmem:[#allocation11_spill] sm:$0xff] %v14299_v32 }
  0xd6   :  { %v12164_v33 = vpop.f32.mrf.mxu0 }
  0xd7   :  { %19057 = vst [vmem:[#allocation10_spill] sm:$0xff] %v14297_v31  ;;  %12191 = vmatprep.mubr.msk.f32.mxu1 %vm299_vm1, %v14297_v31  ;;  %v14313_v38 = vadd.f32 %v12164_v33, %v83_v35 }
  0xd8   :  { %v229_v36 = vpop.f32.mrf.mxu0  ;;  %12192 = vmatmul.mubr.msk.f32.gmra.mxu1 %vm299_vm1, %v14299_v32 }
  0xd9   :  { %v14311_v37 = vadd.f32 %v229_v36, %v82_v34  ;;  %19060 = vst [vmem:[#allocation13_spill] sm:$0xff] %v14313_v38 }
  0xda   :  { %v12167_v39 = vpop.f32.mrf.mxu0 }
  0xdb   :  { %19059 = vst [vmem:[#allocation12_spill] sm:$0xff] %v14311_v37  ;;  %12194 = vmatprep.mubr.msk.f32.mxu1 %vm299_vm1, %v14311_v37  ;;  %v14330_v45 = vadd.f32 %v12167_v39, %v85_v41 }
  0xdc   :  { %v239_v42 = vpop.f32.mrf.mxu0  ;;  %12195 = vmatmul.mubr.msk.f32.gmra.mxu1 %vm299_vm1, %v14313_v38 }
  0xdd   :  { %v14325_v43 = vadd.f32 %v239_v42, %v84_v40  ;;  %19062 = vst [vmem:[#allocation15_spill] sm:$0xff] %v14330_v45 }
  0xde   :  { %v12170_v46 = vpop.f32.mrf.mxu0 }
  0xdf   :  { %19061 = vst [vmem:[#allocation14_spill] sm:$0xff] %v14325_v43  ;;  %12197 = vmatprep.mubr.msk.f32.mxu1 %vm299_vm1, %v14325_v43  ;;  %v14337_v48 = vadd.f32 %v12170_v46, %v87_v44 }
  0xe0   :  { %v249_v49 = vpop.f32.mrf.mxu0  ;;  %12198 = vmatmul.mubr.msk.f32.gmra.mxu1 %vm299_vm1, %v14330_v45 }
  0xe1   :  { %19063 = vst [vmem:[#allocation16_spill] sm:$0xff] %v14337_v48  ;;  %v14341_v50 = vadd.f32 %v249_v49, %v86_v47 }
  0xe2   :  { %v12173_v52 = vpop.f32.mrf.mxu0 }
  0xe3   :  { %19064 = vst [vmem:[#allocation17_spill] sm:$0xff] %v14341_v50  ;;  %12200 = vmatprep.mubr.msk.f32.mxu1 %vm299_vm1, %v14341_v50  ;;  %v14351_v54 = vadd.f32 %v12173_v52, %v89_v51 }
  0xe4   :  { %v259_v55 = vpop.f32.mrf.mxu0  ;;  %12201 = vmatmul.mubr.msk.f32.gmra.mxu1 %vm299_vm1, %v14337_v48 }
  0xe5   :  { %19065 = vst [vmem:[#allocation18_spill] sm:$0xff] %v14351_v54  ;;  %v14355_v56 = vadd.f32 %v259_v55, %v88_v53 }
  0xe6   :  { %v12176_v58 = vpop.f32.mrf.mxu0 }
  0xe7   :  { %19066 = vst [vmem:[#allocation19_spill] sm:$0xff] %v14355_v56  ;;  %12203 = vmatprep.mubr.msk.f32.mxu1 %vm299_vm1, %v14355_v56  ;;  %v14365_v60 = vadd.f32 %v12176_v58, %v91_v57 }
  0xe8   :  { %v269_v61 = vpop.f32.mrf.mxu0  ;;  %12204 = vmatmul.mubr.msk.f32.gmra.mxu1 %vm299_vm1, %v14351_v54 }
  0xe9   :  { %19067 = vst [vmem:[#allocation20_spill] sm:$0xff] %v14365_v60  ;;  %v14369_v62 = vadd.f32 %v269_v61, %v90_v59 }
  0xea   :  { %v12179_v0 = vpop.f32.mrf.mxu0 }
  0xeb   :  { %19068 = vst [vmem:[#allocation21_spill] sm:$0xff] %v14369_v62  ;;  %12206 = vmatprep.mubr.msk.f32.mxu1 %vm299_vm1, %v14369_v62  ;;  %v14379_v2 = vadd.f32 %v12179_v0, %v93_v63 }
  0xec   :  { %v279_v3 = vpop.f32.mrf.mxu0  ;;  %12207 = vmatmul.mubr.msk.f32.gmra.mxu1 %vm299_vm1, %v14365_v60 }
  0xed   :  { %19069 = vst [vmem:[#allocation22_spill] sm:$0xff] %v14379_v2  ;;  %v14383_v4 = vadd.f32 %v279_v3, %v92_v1 }
  0xef   :  { %19070 = vst [vmem:[#allocation23_spill] sm:$0xff] %v14383_v4  ;;  %12209 = vmatprep.mubr.msk.f32.mxu1 %vm299_vm1, %v14383_v4 }
  0xf0   :  { %12210 = vmatmul.mubr.msk.f32.gmra.mxu1 %vm299_vm1, %v14379_v2 }
 0x194   :  { %v12190_v5 = vpop.f32.mrf.mxu1 }
 0x195   :  { %v14422_v28 = vadd.f32 %v12190_v5, %v10864_v6 }
 0x196   :  { %v414_v7 = vpop.f32.mrf.mxu1 }
 0x197   :  { %v14392_v8 = vadd.f32 %v10864_v6, %v414_v7  ;;  %19071 = vst [vmem:[#allocation24_spill] sm:$0xff] %v14422_v28 }
 0x198   :  { %v12193_v9 = vpop.f32.mrf.mxu1 }
 0x199   :  { %12228 = vmatprep.mubr.msk.f32.mxu0 %vm94_vm0, %v14392_v8  ;;  %v14416_v23 = vadd.f32 %v12193_v9, %v10864_v6 }
 0x19a   :  { %v424_v10 = vpop.f32.mrf.mxu1 }
 0x19b   :  { %v14408_v19 = vadd.f32 %v10864_v6, %v424_v10 }
 0x19c   :  { %v12196_v11 = vpop.f32.mrf.mxu1 }
 0x19d   :  { %v14396_v12 = vadd.f32 %v12196_v11, %v10864_v6 }
 0x19e   :  { %v434_v13 = vpop.f32.mrf.mxu1 }
 0x19f   :  { %511 = vrot.lane.b32.xlu1 %v14396_v12, %s14081_s27  ;;  %v14400_v15 = vadd.f32 %v10864_v6, %v434_v13 }
 0x1a0   :  { %v12199_v14 = vpop.f32.mrf.mxu1 }
 0x1a1   :  { %v14402_v16 = vadd.f32 %v12199_v14, %v10864_v6 }
 0x1a2   :  { %v444_v17 = vpop.f32.mrf.mxu1 }
 0x1a3   :  { %515 = vrot.lane.b32.xlu0 %v14402_v16, %s14081_s27  ;;  %509 = vrot.lane.b32.xlu1 %v14400_v15, %s14081_s27  ;;  %v14410_v20 = vadd.f32 %v10864_v6, %v444_v17 }
 0x1a4   :  { %v12202_v18 = vpop.f32.mrf.mxu1 }
 0x1a5   :  { %v14448_v42 = vadd.f32 %v12202_v18, %v10864_v6 }
 0x1a6   :  { %v454_v21 = vpop.f32.mrf.mxu1 }
 0x1a7   :  { %513 = vrot.lane.b32.xlu0 %v14410_v20, %s14081_s27  ;;  %505 = vrot.lane.b32.xlu1 %v14408_v19, %s14081_s27  ;;  %v14452_v44 = vadd.f32 %v10864_v6, %v454_v21 }
 0x1a8   :  { %v12205_v22 = vpop.f32.mrf.mxu1 }
 0x1a9   :  { %v14440_v40 = vadd.f32 %v12205_v22, %v10864_v6 }
 0x1aa   :  { %v464_v24 = vpop.f32.mrf.mxu1 }
 0x1ab   :  { %507 = vrot.lane.b32.xlu0 %v14416_v23, %s14081_s27  ;;  %501 = vrot.lane.b32.xlu1 %v14392_v8, %s14081_s27  ;;  %v14444_v41 = vadd.f32 %v10864_v6, %v464_v24 }
 0x1ac   :  { %v12208_v27 = vpop.f32.mrf.mxu1 }
 0x1ad   :  { %v14428_v35 = vadd.f32 %v12208_v27, %v10864_v6 }
 0x1ae   :  { %v474_v29 = vpop.f32.mrf.mxu1 }
 0x1af   :  { %503 = vrot.lane.b32.xlu0 %v14422_v28, %s14081_s27  ;;  %v14434_v39 = vadd.f32 %v10864_v6, %v474_v29 }
 0x1b0   :  { %v12211_v30 = vpop.f32.mrf.mxu1 }
 0x1b1   :  { %v14426_v33 = vadd.f32 %v12211_v30, %v10864_v6 }
 0x1b2   :  { %v484_v34 = vpop.f32.mrf.mxu1 }
 0x1b3   :  { %v14430_v36 = vadd.f32 %v10864_v6, %v484_v34  ;;  %950 = vrot.lane.b32.xlu0 %v14426_v33, %s14081_s27 }
 0x1b5   :  { %948 = vrot.lane.b32.xlu1 %v14430_v36, %s14081_s27 }
 0x1b7   :  { %946 = vrot.lane.b32.xlu0 %v14428_v35, %s14081_s27 }
 0x1b9   :  { %944 = vrot.lane.b32.xlu1 %v14434_v39, %s14081_s27 }
 0x1bb   :  { %942 = vrot.lane.b32.xlu0 %v14440_v40, %s14081_s27 }
 0x1bd   :  { %940 = vrot.lane.b32.xlu1 %v14444_v41, %s14081_s27 }
 0x1bf   :  { %938 = vrot.lane.b32.xlu0 %v14448_v42, %s14081_s27 }
 0x1c1   :  { %936 = vrot.lane.b32.xlu1 %v14452_v44, %s14081_s27 }
 0x1c3   :  { %787 = vrot.lane.b32.xlu0 %v14410_v20, %s14082_s28 }
 0x1c5   :  { %789 = vrot.lane.b32.xlu1 %v14402_v16, %s14082_s28 }
 0x1c7   :  { %781 = vrot.lane.b32.xlu0 %v14416_v23, %s14082_s28 }
 0x1c9   :  { %785 = vrot.lane.b32.xlu1 %v14396_v12, %s14082_s28 }
 0x1cb   :  { %777 = vrot.lane.b32.xlu0 %v14422_v28, %s14082_s28 }
 0x1cd   :  { %783 = vrot.lane.b32.xlu1 %v14400_v15, %s14082_s28 }
 0x1cf   :  { %1224 = vrot.lane.b32.xlu0 %v14426_v33, %s14082_s28 }
 0x1d1   :  { %779 = vrot.lane.b32.xlu1 %v14408_v19, %s14082_s28 }
 0x1d3   :  { %1218 = vrot.lane.b32.xlu0 %v14434_v39, %s14082_s28 }
 0x1d5   :  { %775 = vrot.lane.b32.xlu1 %v14392_v8, %s14082_s28 }
 0x1d7   :  { %1214 = vrot.lane.b32.xlu0 %v14444_v41, %s14082_s28 }
 0x1d9   :  { %1220 = vrot.lane.b32.xlu1 %v14428_v35, %s14082_s28 }
 0x1db   :  { %1393 = vrot.lane.b32.xlu0 %v14402_v16, %s14083_s29 }
 0x1dd   :  { %1216 = vrot.lane.b32.xlu1 %v14440_v40, %s14082_s28 }
 0x1df   :  { %1222 = vrot.lane.b32.xlu0 %v14430_v36, %s14082_s28 }
 0x1e1   :  { %1212 = vrot.lane.b32.xlu1 %v14448_v42, %s14082_s28 }
 0x1e5   :  { %1210 = vrot.lane.b32.xlu1 %v14452_v44, %s14082_s28 }
 0x1e9   :  { %1391 = vrot.lane.b32.xlu1 %v14410_v20, %s14083_s29 }
 0x211   :  { %v512_v46 = vpop.permute.xlu1 %511 }
 0x215   :  { %v516_v47 = vpop.permute.xlu0 %515  ;;  %v510_v49 = vpop.permute.xlu1 %509 }
 0x216   :  { %12212 = vmatprep.subr.msk.mxu0 %vm94_vm0, %v516_v47 }
 0x217   :  { %12213 = vmatpush3.xpose.msk.msra.mxu0 %vm94_vm0, %v516_v47 }
 0x219   :  { %v514_v51 = vpop.permute.xlu0 %513  ;;  %v506_v52 = vpop.permute.xlu1 %505 }
 0x21a   :  { %12214 = vmatprep.subr.msk.mxu0 %vm94_vm0, %v514_v51 }
 0x21b   :  { %12215 = vmatpush3.xpose.msk.msra.mxu0 %vm94_vm0, %v514_v51 }
 0x21c   :  { %12216 = vmatprep.subr.msk.mxu0 %vm94_vm0, %v512_v46 }
 0x21d   :  { %v508_v53 = vpop.permute.xlu0 %507  ;;  %v502_v57 = vpop.permute.xlu1 %501 }
 0x21f   :  { %12217 = vmatpush3.xpose.msk.msra.mxu0 %vm94_vm0, %v512_v46 }
 0x220   :  { %12218 = vmatprep.subr.msk.mxu0 %vm94_vm0, %v510_v49 }
 0x221   :  { %v504_v55 = vpop.permute.xlu0 %503 }
 0x223   :  { %12219 = vmatpush3.xpose.msk.msra.mxu0 %vm94_vm0, %v510_v49 }
 0x224   :  { %12220 = vmatprep.subr.msk.mxu0 %vm94_vm0, %v508_v53 }
 0x225   :  { %v951_v58 = vpop.permute.xlu0 %950 }
 0x227   :  { %12221 = vmatpush3.xpose.msk.msra.mxu0 %vm94_vm0, %v508_v53  ;;  %v949_v59 = vpop.permute.xlu1 %948 }
 0x228   :  { %12222 = vmatprep.subr.msk.mxu0 %vm94_vm0, %v506_v52 }
 0x229   :  { %v947_v61 = vpop.permute.xlu0 %946 }
 0x22b   :  { %12223 = vmatpush3.xpose.msk.msra.mxu0 %vm94_vm0, %v506_v52  ;;  %v945_v63 = vpop.permute.xlu1 %944 }
 0x22c   :  { %12224 = vmatprep.subr.msk.mxu0 %vm94_vm0, %v504_v55 }
 0x22d   :  { %v943_v0 = vpop.permute.xlu0 %942 }
 0x22f   :  { %12225 = vmatpush3.xpose.msk.msra.mxu0 %vm94_vm0, %v504_v55  ;;  %v941_v1 = vpop.permute.xlu1 %940 }
 0x230   :  { %12226 = vmatprep.subr.msk.mxu0 %vm94_vm0, %v502_v57 }
 0x231   :  { %v939_v3 = vpop.permute.xlu0 %938 }
 0x233   :  { %12227 = vmatpush3.xpose.msk.msra.mxu0 %vm94_vm0, %v502_v57  ;;  %v937_v5 = vpop.permute.xlu1 %936 }
 0x234   :  { %12268 = vmatprep.subr.msk.mxu0 %vm94_vm0, %v951_v58 }
 0x235   :  { %v788_v6 = vpop.permute.xlu0 %787 }
 0x236   :  { %12229 = vmatmul.mubr.msk.f32.vlgmr.msra.gmra.mxu0 %vm94_vm0, %v14422_v28 }
 0x237   :  { %v790_v7 = vpop.permute.xlu1 %789  ;;  %12231 = vmatprep.mubr.msk.f32.mxu0 %vm94_vm0, %v14408_v19  ;;  %12269 = vmatpush3.xpose.msk.msra.mxu0 %vm94_vm0, %v951_v58 }
 0x238   :  { %12240 = vmatprep.subr.mxu1 %v790_v7  ;;  %12270 = vmatprep.subr.msk.mxu0 %vm94_vm0, %v949_v59 }
 0x239   :  { %12241 = vmatpush3.msra.mxu1 %v790_v7  ;;  %v782_v10 = vpop.permute.xlu0 %781 }
 0x23a   :  { %12232 = vmatmul.mubr.msk.f32.gmra.mxu0 %vm94_vm0, %v14416_v23  ;;  %12242 = vmatprep.subr.mxu1 %v788_v6 }
 0x23b   :  { %12243 = vmatpush3.msra.mxu1 %v788_v6  ;;  %v786_v9 = vpop.permute.xlu1 %785  ;;  %12234 = vmatprep.mubr.msk.f32.mxu0 %vm94_vm0, %v14400_v15 }
 0x23c   :  { %12271 = vmatpush3.xpose.msk.msra.mxu0 %vm94_vm0, %v949_v59  ;;  %12244 = vmatprep.subr.mxu1 %v786_v9 }
 0x23d   :  { %12272 = vmatprep.subr.msk.mxu0 %vm94_vm0, %v947_v61  ;;  %12245 = vmatpush3.msra.mxu1 %v786_v9  ;;  %v778_v13 = vpop.permute.xlu0 %777 }
 0x23e   :  { %12235 = vmatmul.mubr.msk.f32.gmra.mxu0 %vm94_vm0, %v14396_v12 }
 0x23f   :  { %v784_v11 = vpop.permute.xlu1 %783  ;;  %12237 = vmatprep.mubr.msk.f32.mxu0 %vm94_vm0, %v14410_v20 }
 0x240   :  { %12273 = vmatpush3.xpose.msk.msra.mxu0 %vm94_vm0, %v947_v61  ;;  %12246 = vmatprep.subr.mxu1 %v784_v11 }
 0x241   :  { %12274 = vmatprep.subr.msk.mxu0 %vm94_vm0, %v945_v63  ;;  %12247 = vmatpush3.msra.mxu1 %v784_v11  ;;  %v14536_v18 = vpop.permute.xlu0 %1224 }
 0x242   :  { %12238 = vmatmul.mubr.msk.f32.gmra.mxu0 %vm94_vm0, %v14402_v16  ;;  %12248 = vmatprep.subr.mxu1 %v782_v10 }
 0x243   :  { %12249 = vmatpush3.msra.mxu1 %v782_v10  ;;  %v780_v14 = vpop.permute.xlu1 %779  ;;  %12284 = vmatprep.mubr.msk.f32.mxu0 %vm94_vm0, %v14452_v44 }
 0x244   :  { %12275 = vmatpush3.xpose.msk.msra.mxu0 %vm94_vm0, %v945_v63  ;;  %12250 = vmatprep.subr.mxu1 %v780_v14 }
 0x245   :  { %12276 = vmatprep.subr.msk.mxu0 %vm94_vm0, %v943_v0  ;;  %12251 = vmatpush3.msra.mxu1 %v780_v14 }
 0x246   :  { %12252 = vmatprep.subr.mxu1 %v778_v13 }
 0x247   :  { %12253 = vmatpush3.msra.mxu1 %v778_v13  ;;  %v776_v17 = vpop.permute.xlu1 %775 }
 0x248   :  { %12277 = vmatpush3.xpose.msk.msra.mxu0 %vm94_vm0, %v943_v0  ;;  %12254 = vmatprep.subr.mxu1 %v776_v17 }
 0x249   :  { %12278 = vmatprep.subr.msk.mxu0 %vm94_vm0, %v941_v1  ;;  %12255 = vmatpush3.msra.mxu1 %v776_v17 }
 0x24a   :  { %12296 = vmatprep.subr.mxu1 %v14536_v18 }
 0x24c   :  { %12279 = vmatpush3.xpose.msk.msra.mxu0 %vm94_vm0, %v941_v1 }
 0x24d   :  { %12280 = vmatprep.subr.msk.mxu0 %vm94_vm0, %v939_v3 }
 0x250   :  { %12281 = vmatpush3.xpose.msk.msra.mxu0 %vm94_vm0, %v939_v3 }
 0x251   :  { %12282 = vmatprep.subr.msk.mxu0 %vm94_vm0, %v937_v5 }
 0x254   :  { %12283 = vmatpush3.xpose.msk.msra.mxu0 %vm94_vm0, %v937_v5 }
 0x257   :  { %12285 = vmatmul.mubr.msk.f32.vlgmr.msra.gmra.mxu0 %vm94_vm0, %v14448_v42 }
 0x258   :  { %12287 = vmatprep.mubr.msk.f32.mxu0 %vm94_vm0, %v14444_v41 }
 0x25b   :  { %12288 = vmatmul.mubr.msk.f32.gmra.mxu0 %vm94_vm0, %v14440_v40 }
 0x25c   :  { %12290 = vmatprep.mubr.msk.f32.mxu0 %vm94_vm0, %v14434_v39 }
 0x25f   :  { %12291 = vmatmul.mubr.msk.f32.gmra.mxu0 %vm94_vm0, %v14428_v35 }
 0x260   :  { %12293 = vmatprep.mubr.msk.f32.mxu0 %vm94_vm0, %v14430_v36 }
 0x263   :  { %12294 = vmatmul.mubr.msk.f32.gmra.mxu0 %vm94_vm0, %v14426_v33 }
 0x2f6   :  { %v12230_v21 = vpop.f32.mrf.mxu0 }
 0x2f7   :  { %v658_v22 = vsel %vm654_vm2, %v12230_v21, -inf }
 0x2f8   :  { %659 = vmax.xlane.f32.xlu1 %v658_v22  ;;  %v615_v24 = vpop.f32.mrf.mxu0 }
 0x2f9   :  { %v655_v27 = vsel %vm654_vm2, %v615_v24, -inf }
 0x2fa   :  { %656 = vmax.xlane.f32.xlu0 %v655_v27  ;;  %v14561_v29 = vpop.f32.mrf.mxu0  ;;  %v14621_v27 = vpop.permute.xlu1 %1220 }
 0x2fb   :  { %v664_v34 = vsel %vm654_vm2, %v14561_v29, -inf }
 0x2fc   :  { %v14563_v30 = vpop.f32.mrf.mxu0 }
 0x2fd   :  { %v661_v49 = vsel %vm654_vm2, %v14563_v30, -inf }
 0x2fe   :  { %665 = vmax.xlane.f32.xlu0 %v664_v34  ;;  %v14567_v46 = vpop.f32.mrf.mxu0  ;;  %v14623_v34 = vpop.permute.xlu1 %1216 }
 0x2ff   :  { %v670_v55 = vsel %vm654_vm2, %v14567_v46, -inf }
 0x300   :  { %v14569_v47 = vpop.f32.mrf.mxu0 }
 0x301   :  { %v667_v51 = vsel %vm654_vm2, %v14569_v47, -inf }
 0x302   :  { %662 = vmax.xlane.f32.xlu0 %v661_v49  ;;  %668 = vmax.xlane.f32.xlu1 %v667_v51  ;;  %v14575_v52 = vpop.f32.mrf.mxu0  ;;  %v14625_v49 = vpop.permute.xlu0 %1218 }
 0x303   :  { %v676_v58 = vsel %vm654_vm2, %v14575_v52, -inf  ;;  %v14627_v51 = vpop.permute.xlu1 %1212 }
 0x304   :  { %v14577_v53 = vpop.f32.mrf.mxu0 }
 0x305   :  { %v673_v57 = vsel %vm654_vm2, %v14577_v53, -inf }
 0x306   :  { %671 = vmax.xlane.f32.xlu0 %v670_v55  ;;  %674 = vmax.xlane.f32.xlu1 %v673_v57  ;;  %v14629_v55 = vpop.permute.xlu0 %1214 }
 0x307   :  { %v14631_v57 = vpop.permute.xlu1 %1210 }
 0x30a   :  { %677 = vmax.xlane.f32.xlu0 %v676_v58  ;;  %v14633_v58 = vpop.permute.xlu0 %1393 }
 0x317   :  { %v14585_v59 = vpop.f32.mrf.mxu0 }
 0x318   :  { %v1092_v61 = vsel %vm654_vm2, %v14585_v59, -inf }
 0x319   :  { %1093 = vmax.xlane.f32.xlu0 %v1092_v61  ;;  %v14589_v63 = vpop.f32.mrf.mxu0  ;;  %v14635_v61 = vpop.permute.xlu1 %1391 }
 0x31a   :  { %v1089_v0 = vsel %vm654_vm2, %v14589_v63, -inf }
 0x31b   :  { %v14593_v1 = vpop.f32.mrf.mxu0  ;;  %1090 = vmax.xlane.f32.xlu1 %v1089_v0  ;;  %v14637_v0 = vpop.permute.xlu0 %1222 }
 0x31c   :  { %v1098_v3 = vsel %vm654_vm2, %v14593_v1, -inf }
 0x31d   :  { %1099 = vmax.xlane.f32.xlu0 %v1098_v3  ;;  %v14597_v5 = vpop.f32.mrf.mxu0 }
 0x31e   :  { %v1095_v6 = vsel %vm654_vm2, %v14597_v5, -inf }
 0x31f   :  { %v14601_v7 = vpop.f32.mrf.mxu0  ;;  %1096 = vmax.xlane.f32.xlu1 %v1095_v6 }
 0x320   :  { %v1104_v9 = vsel %vm654_vm2, %v14601_v7, -inf }
 0x321   :  { %1105 = vmax.xlane.f32.xlu0 %v1104_v9  ;;  %v14605_v10 = vpop.f32.mrf.mxu0 }
 0x322   :  { %v1101_v11 = vsel %vm654_vm2, %v14605_v10, -inf }
 0x323   :  { %v14609_v13 = vpop.f32.mrf.mxu0  ;;  %1102 = vmax.xlane.f32.xlu1 %v1101_v11 }
 0x324   :  { %v1110_v14 = vsel %vm654_vm2, %v14609_v13, -inf }
 0x325   :  { %1111 = vmax.xlane.f32.xlu0 %v1110_v14  ;;  %v14613_v17 = vpop.f32.mrf.mxu0 }
 0x326   :  { %v1107_v22 = vsel %vm654_vm2, %v14613_v17, -inf }
 0x327   :  { %1108 = vmax.xlane.f32.xlu1 %v1107_v22 }
 0x338   :  { %1387 = vrot.lane.b32.xlu1 %v14400_v15, %s14083_s29 }
 0x33b   :  { %1389 = vrot.lane.b32.xlu0 %v14396_v12, %s14083_s29 }
 0x381   :  { %v660_v3 = vpop.xlane.xlu1 %659 }
 0x382   :  { %v680_v6 = vsub.f32 %v12230_v21, %v660_v3 }
 0x383   :  { %v657_v9 = vpop.xlane.xlu0 %656 }
 0x384   :  { %v689_v11 = vmul.f32 1.442695, %v680_v6  ;;  %v679_v14 = vsub.f32 %v615_v24, %v657_v9 }
 0x386   :  { %13397 = vpow2.f32 %v689_v11  ;;  %v687_v22 = vmul.f32 1.442695, %v679_v14 }
 0x387   :  { %v666_v4 = vpop.xlane.xlu0 %665 }
 0x388   :  { %13399 = vpow2.f32 %v687_v22  ;;  %v682_v2 = vsub.f32 %v14561_v29, %v666_v4 }
 0x38a   :  { %v693_v62 = vmul.f32 1.442695, %v682_v2 }
 0x38b   :  { %v663_v60 = vpop.xlane.xlu0 %662  ;;  %v669_v56 = vpop.xlane.xlu1 %668 }
 0x38c   :  { %13401 = vpow2.f32 %v693_v62  ;;  %v681_v54 = vsub.f32 %v14563_v30, %v663_v60  ;;  %v683_v50 = vsub.f32 %v14569_v47, %v669_v56 }
 0x38e   :  { %v691_v48 = vmul.f32 1.442695, %v681_v54  ;;  %v695_v45 = vmul.f32 1.442695, %v683_v50 }
 0x38f   :  { %v672_v21 = vpop.xlane.xlu0 %671  ;;  %v675_v3 = vpop.xlane.xlu1 %674 }
 0x390   :  { %13403 = vpow2.f32 %v691_v48  ;;  %v684_v24 = vsub.f32 %v14567_v46, %v672_v21  ;;  %v685_v6 = vsub.f32 %v14577_v53, %v675_v3 }
 0x391   :  { %13405 = vpow2.f32 %v695_v45 }
 0x392   :  { %v697_v9 = vmul.f32 1.442695, %v684_v24  ;;  %v699_v4 = vmul.f32 1.442695, %v685_v6 }
 0x393   :  { %v14644_v2 = vpop.eup %13397  ;;  %v678_v29 = vpop.xlane.xlu0 %677 }
 0x394   :  { %13407 = vpow2.f32 %v697_v9  ;;  %v686_v60 = vsub.f32 %v14575_v52, %v678_v29  ;;  %v706_v54 = vsel %vm654_vm2, %v14644_v2, 0.0 }
 0x395   :  { %v14649_v50 = vpop.eup %13399  ;;  %707 = vadd.xlane.f32.xlu0 %v706_v54  ;;  %13409 = vpow2.f32 %v699_v4 }
 0x396   :  { %v701_v48 = vmul.f32 1.442695, %v686_v60  ;;  %v703_v56 = vsel %vm654_vm2, %v14649_v50, 0.0 }
 0x397   :  { %704 = vadd.xlane.f32.xlu1 %v703_v56 }
 0x398   :  { %13411 = vpow2.f32 %v701_v48 }
 0x399   :  { %v14653_v45 = vpop.eup %13401 }
 0x39a   :  { %v712_v62 = vsel %vm654_vm2, %v14653_v45, 0.0 }
 0x39b   :  { %713 = vadd.xlane.f32.xlu0 %v712_v62 }
 0x39d   :  { %v14657_v30 = vpop.eup %13403 }
 0x39e   :  { %v709_v46 = vsel %vm654_vm2, %v14657_v30, 0.0  ;;  %v14661_v47 = vpop.eup %13405 }
 0x39f   :  { %710 = vadd.xlane.f32.xlu1 %v709_v46  ;;  %v715_v14 = vsel %vm654_vm2, %v14661_v47, 0.0 }
 0x3a1   :  { %v14663_v52 = vpop.eup %13407 }
 0x3a2   :  { %v1094_v53 = vpop.xlane.xlu0 %1093  ;;  %v718_v11 = vsel %vm654_vm2, %v14663_v52, 0.0  ;;  %v14669_v22 = vpop.eup %13409 }
 0x3a3   :  { %v1114_v21 = vsub.f32 %v14585_v59, %v1094_v53  ;;  %719 = vadd.xlane.f32.xlu0 %v718_v11  ;;  %716 = vadd.xlane.f32.xlu1 %v715_v14  ;;  %v721_v29 = vsel %vm654_vm2, %v14669_v22, 0.0 }
 0x3a4   :  { %v1091_v3 = vpop.xlane.xlu1 %1090 }
 0x3a5   :  { %v14672_v24 = vpop.eup %13411  ;;  %v1123_v6 = vmul.f32 1.442695, %v1114_v21  ;;  %v1113_v9 = vsub.f32 %v14589_v63, %v1091_v3 }
 0x3a6   :  { %v724_v4 = vsel %vm654_vm2, %v14672_v24, 0.0  ;;  %v1100_v56 = vpop.xlane.xlu0 %1099 }
 0x3a7   :  { %13413 = vpow2.f32 %v1123_v6  ;;  %v1121_v60 = vmul.f32 1.442695, %v1113_v9  ;;  %725 = vadd.xlane.f32.xlu0 %v724_v4  ;;  %722 = vadd.xlane.f32.xlu1 %v721_v29  ;;  %v1116_v53 = vsub.f32 %v14593_v1, %v1100_v56 }
 0x3a8   :  { %v1097_v62 = vpop.xlane.xlu1 %1096 }
 0x3a9   :  { %13415 = vpow2.f32 %v1121_v60  ;;  %v1115_v14 = vsub.f32 %v14597_v5, %v1097_v62  ;;  %v1127_v21 = vmul.f32 1.442695, %v1116_v53 }
 0x3aa   :  { %v1106_v46 = vpop.xlane.xlu0 %1105 }
 0x3ab   :  { %v1118_v3 = vsub.f32 %v14601_v7, %v1106_v46  ;;  %v1125_v9 = vmul.f32 1.442695, %v1115_v14  ;;  %13417 = vpow2.f32 %v1127_v21 }
 0x3ac   :  { %v1103_v11 = vpop.xlane.xlu1 %1102 }
 0x3ad   :  { %v1117_v4 = vsub.f32 %v14605_v10, %v1103_v11  ;;  %v1131_v60 = vmul.f32 1.442695, %v1118_v3  ;;  %13419 = vpow2.f32 %v1125_v9 }
 0x3ae   :  { %v1112_v6 = vpop.xlane.xlu0 %1111 }
 0x3af   :  { %13421 = vpow2.f32 %v1131_v60 }
 0x3b0   :  { %v1109_v29 = vpop.xlane.xlu1 %1108 }
 0x3b1   :  { %v1119_v38 = vsub.f32 %v14613_v17, %v1109_v29 }
 0x3b2   :  { %v14741_v3 = vpop.permute.xlu0 %1389 }
 0x3b3   :  { %v1133_v5 = vmul.f32 1.442695, %v1119_v38 }
 0x3b4   :  { %v14679_v59 = vpop.eup %13413 }
 0x3b5   :  { %v1140_v54 = vsel %vm654_vm2, %v14679_v59, 0.0 }
 0x3b6   :  { %v14683_v48 = vpop.eup %13415  ;;  %1141 = vadd.xlane.f32.xlu0 %v1140_v54  ;;  %v1120_v54 = vsub.f32 %v14609_v13, %v1112_v6  ;;  %v14745_v6 = vpop.permute.xlu1 %1387 }
 0x3b7   :  { %v1137_v63 = vsel %vm654_vm2, %v14683_v48, 0.0 }
 0x3b8   :  { %1138 = vadd.xlane.f32.xlu1 %v1137_v63  ;;  %v1129_v63 = vmul.f32 1.442695, %v1117_v4  ;;  %v1135_v1 = vmul.f32 1.442695, %v1120_v54  ;;  %v14697_v7 = vpop.eup %13417 }
 0x3b9   :  { %v1146_v10 = vsel %vm654_vm2, %v14697_v7, 0.0 }
 0x3ba   :  { %13423 = vpow2.f32 %v1129_v63  ;;  %v14699_v56 = vpop.eup %13419 }
 0x3bb   :  { %13425 = vpow2.f32 %v1135_v1  ;;  %v1143_v13 = vsel %vm654_vm2, %v14699_v56, 0.0 }
 0x3bc   :  { %13427 = vpow2.f32 %v1133_v5  ;;  %v14703_v62 = vpop.eup %13421 }
 0x3bd   :  { %v1152_v38 = vsel %vm654_vm2, %v14703_v62, 0.0 }
 0x3c7   :  { %v14707_v17 = vpop.eup %13423 }
 0x3c8   :  { %v14711_v46 = vpop.eup %13425  ;;  %v1149_v53 = vsel %vm654_vm2, %v14707_v17, 0.0 }
 0x3c9   :  { %1383 = vrot.lane.b32.xlu1 %v14408_v19, %s14083_s29  ;;  %v14715_v11 = vpop.eup %13427  ;;  %v1158_v14 = vsel %vm654_vm2, %v14711_v46, 0.0 }
 0x3ca   :  { %v1155_v21 = vsel %vm654_vm2, %v14715_v11, 0.0 }
 0x3cc   :  { %1385 = vrot.lane.b32.xlu0 %v14416_v23, %s14083_s29 }
 0x3eb   :  { %1147 = vadd.xlane.f32.xlu0 %v1146_v10 }
 0x3ed   :  { %1144 = vadd.xlane.f32.xlu1 %v1143_v13 }
 0x3ef   :  { %1153 = vadd.xlane.f32.xlu0 %v1152_v38 }
 0x3f1   :  { %1150 = vadd.xlane.f32.xlu1 %v1149_v53 }
 0x3f3   :  { %1159 = vadd.xlane.f32.xlu0 %v1158_v14 }
 0x3f5   :  { %1156 = vadd.xlane.f32.xlu1 %v1155_v21 }
 0x406   :  { %1379 = vrot.lane.b32.xlu1 %v14392_v8, %s14083_s29 }
 0x409   :  { %1381 = vrot.lane.b32.xlu0 %v14422_v28, %s14083_s29 }
 0x40a   :  { %1365 = vrot.lane.b32.xlu1 %v14422_v28, %s14084_s0 }
 0x40d   :  { %1363 = vrot.lane.b32.xlu0 %v14392_v8, %s14084_s0 }
 0x40e   :  { %1369 = vrot.lane.b32.xlu1 %v14416_v23, %s14084_s0 }
 0x411   :  { %1367 = vrot.lane.b32.xlu0 %v14408_v19, %s14084_s0 }
 0x412   :  { %1373 = vrot.lane.b32.xlu1 %v14396_v12, %s14084_s0 }
 0x415   :  { %1371 = vrot.lane.b32.xlu0 %v14400_v15, %s14084_s0 }
 0x416   :  { %1377 = vrot.lane.b32.xlu1 %v14402_v16, %s14084_s0 }
 0x419   :  { %1375 = vrot.lane.b32.xlu0 %v14410_v20, %s14084_s0 }
 0x41a   :  { %1667 = vrot.lane.b32.xlu1 %v14402_v16, %s14085_s20 }
 0x41d   :  { %1665 = vrot.lane.b32.xlu0 %v14410_v20, %s14085_s20 }
 0x41e   :  { %1663 = vrot.lane.b32.xlu1 %v14396_v12, %s14085_s20  ;;  %v708_v9 = vpop.xlane.xlu0 %707 }
 0x41f   :  { %13429 = vrcp.f32 %v708_v9 }
 0x420   :  { %v705_v4 = vpop.xlane.xlu1 %704 }
 0x421   :  { %1659 = vrot.lane.b32.xlu0 %v14416_v23, %s14085_s20  ;;  %13431 = vrcp.f32 %v705_v4 }
 0x422   :  { %1661 = vrot.lane.b32.xlu1 %v14400_v15, %s14085_s20 }
 0x424   :  { %v714_v29 = vpop.xlane.xlu0 %713 }
 0x425   :  { %1655 = vrot.lane.b32.xlu0 %v14422_v28, %s14085_s20  ;;  %13433 = vrcp.f32 %v714_v29 }
 0x426   :  { %1657 = vrot.lane.b32.xlu1 %v14408_v19, %s14085_s20 }
 0x428   :  { %v711_v60 = vpop.xlane.xlu1 %710 }
 0x429   :  { %13435 = vrcp.f32 %v711_v60 }
 0x42a   :  { %1653 = vrot.lane.b32.xlu1 %v14392_v8, %s14085_s20 }
 0x42c   :  { %v13430_v54 = vpop.eup %13429  ;;  %v720_v63 = vpop.xlane.xlu0 %719 }
 0x42d   :  { %v717_v1 = vpop.xlane.xlu1 %716  ;;  %v736_v5 = vmul.f32 %v13430_v54, %v708_v9  ;;  %13437 = vrcp.f32 %v720_v63 }
 0x42e   :  { %v13432_v10 = vpop.eup %13431  ;;  %13439 = vrcp.f32 %v717_v1  ;;  %1836 = vrot.lane.b32.xlu1 %v14426_v33, %s14083_s29 }
 0x42f   :  { %v744_v13 = vsub.f32 2.0, %v736_v5  ;;  %v735_v38 = vmul.f32 %v13432_v10, %v705_v4 }
 0x430   :  { %v726_v53 = vpop.xlane.xlu0 %725 }
 0x431   :  { %v723_v14 = vpop.xlane.xlu1 %722  ;;  %v752_v21 = vmul.f32 %v13430_v54, %v744_v13  ;;  %v743_v43 = vsub.f32 2.0, %v735_v38  ;;  %13441 = vrcp.f32 %v726_v53 }
 0x432   :  { %v13434_v32 = vpop.eup %13433  ;;  %13443 = vrcp.f32 %v723_v14  ;;  %1834 = vrot.lane.b32.xlu1 %v14430_v36, %s14083_s29 }
 0x433   :  { %v760_v9 = vmul.f32 %v14644_v2, %v752_v21  ;;  %v751_v37 = vmul.f32 %v13432_v10, %v743_v43  ;;  %v738_v31 = vmul.f32 %v13434_v32, %v714_v29 }
 0x435   :  { %768 = vst.msk [vmem:[#allocation2 + $0x8] sm:$0xff] %vm654_vm2, %v760_v9  ;;  %v746_v26 = vsub.f32 2.0, %v738_v31  ;;  %v759_v5 = vmul.f32 %v14649_v50, %v751_v37 }
 0x436   :  { %v13436_v4 = vpop.eup %13435 }
 0x437   :  { %v754_v25 = vmul.f32 %v13434_v32, %v746_v26  ;;  %v737_v28 = vmul.f32 %v13436_v4, %v711_v60  ;;  %767 = vst.msk [vmem:[#allocation2] sm:$0xff] %vm654_vm2, %v759_v5  ;;  %12256 = vmatprep.mubr.msk.f32.mxu1 %vm654_vm2, %v759_v5 }
 0x438   :  { %12257 = vmatmul.mubr.msk.f32.vlgmr.msra.gmra.mxu1 %vm654_vm2, %v760_v9 }
 0x439   :  { %v745_v54 = vsub.f32 2.0, %v737_v28  ;;  %12297 = vmatpush3.msra.mxu1 %v14536_v18  ;;  %v762_v43 = vmul.f32 %v14653_v45, %v754_v25 }
 0x43a   :  { %v13438_v2 = vpop.eup %13437  ;;  %12298 = vmatprep.subr.mxu1 %v14637_v0 }
 0x43b   :  { %v13440_v31 = vpop.eup %13439  ;;  %v753_v29 = vmul.f32 %v13436_v4, %v745_v54  ;;  %v740_v37 = vmul.f32 %v13438_v2, %v720_v63  ;;  %12299 = vmatpush3.msra.mxu1 %v14637_v0  ;;  %770 = vst.msk [vmem:[#allocation2 + $0x18] sm:$0xff] %vm654_vm2, %v762_v43 }
 0x43c   :  { %v739_v26 = vmul.f32 %v13440_v31, %v717_v1  ;;  %12300 = vmatprep.subr.mxu1 %v14621_v27 }
 0x43d   :  { %v748_v32 = vsub.f32 2.0, %v740_v37  ;;  %12301 = vmatpush3.msra.mxu1 %v14621_v27  ;;  %v761_v28 = vmul.f32 %v14657_v30, %v753_v29 }
 0x43e   :  { %v13442_v18 = vpop.eup %13441  ;;  %v747_v25 = vsub.f32 2.0, %v739_v26  ;;  %12302 = vmatprep.subr.mxu1 %v14625_v49 }
 0x43f   :  { %v13444_v50 = vpop.eup %13443  ;;  %v756_v45 = vmul.f32 %v13438_v2, %v748_v32  ;;  %v742_v60 = vmul.f32 %v13442_v18, %v726_v53  ;;  %v1142_v63 = vpop.xlane.xlu0 %1141  ;;  %12303 = vmatpush3.msra.mxu1 %v14625_v49  ;;  %769 = vst.msk [vmem:[#allocation2 + $0x10] sm:$0xff] %vm654_vm2, %v761_v28  ;;  %12259 = vmatprep.mubr.msk.f32.mxu1 %vm654_vm2, %v761_v28 }
 0x440   :  { %v755_v0 = vmul.f32 %v13440_v31, %v747_v25  ;;  %v741_v1 = vmul.f32 %v13444_v50, %v723_v14  ;;  %13445 = vrcp.f32 %v1142_v63  ;;  %12304 = vmatprep.subr.mxu1 %v14623_v34  ;;  %12260 = vmatmul.mubr.msk.f32.gmra.mxu1 %vm654_vm2, %v762_v43 }
 0x441   :  { %v750_v27 = vsub.f32 2.0, %v742_v60  ;;  %12305 = vmatpush3.msra.mxu1 %v14623_v34  ;;  %v1139_v30 = vpop.xlane.xlu1 %1138  ;;  %v764_v10 = vmul.f32 %v14663_v52, %v756_v45 }
 0x442   :  { %v749_v13 = vsub.f32 2.0, %v741_v1  ;;  %13447 = vrcp.f32 %v1139_v30  ;;  %12306 = vmatprep.subr.mxu1 %v14629_v55  ;;  %v763_v49 = vmul.f32 %v14661_v47, %v755_v0 }
 0x443   :  { %v758_v38 = vmul.f32 %v13442_v18, %v750_v27  ;;  %12307 = vmatpush3.msra.mxu1 %v14629_v55  ;;  %772 = vst.msk [vmem:[#allocation2 + $0x28] sm:$0xff] %vm654_vm2, %v764_v10 }
 0x444   :  { %v757_v53 = vmul.f32 %v13444_v50, %v749_v13  ;;  %771 = vst.msk [vmem:[#allocation2 + $0x20] sm:$0xff] %vm654_vm2, %v763_v49  ;;  %12262 = vmatprep.mubr.msk.f32.mxu1 %vm654_vm2, %v763_v49  ;;  %12308 = vmatprep.subr.mxu1 %v14627_v51 }
 0x445   :  { %12263 = vmatmul.mubr.msk.f32.gmra.mxu1 %vm654_vm2, %v764_v10  ;;  %v766_v34 = vmul.f32 %v14672_v24, %v758_v38 }
 0x446   :  { %12309 = vmatpush3.msra.mxu1 %v14627_v51  ;;  %v765_v47 = vmul.f32 %v14669_v22, %v757_v53 }
 0x447   :  { %12310 = vmatprep.subr.mxu1 %v14631_v57  ;;  %774 = vst.msk [vmem:[#allocation2 + $0x38] sm:$0xff] %vm654_vm2, %v766_v34 }
 0x448   :  { %12311 = vmatpush3.msra.mxu1 %v14631_v57  ;;  %773 = vst.msk [vmem:[#allocation2 + $0x30] sm:$0xff] %vm654_vm2, %v765_v47  ;;  %12265 = vmatprep.mubr.msk.f32.mxu1 %vm654_vm2, %v765_v47 }
 0x449   :  { %12324 = vmatprep.subr.msk.mxu1 %vm94_vm0, %v14633_v58  ;;  %12266 = vmatmul.mubr.msk.f32.gmra.mxu1 %vm654_vm2, %v766_v34 }
 0x44d   :  { %v13446_v55 = vpop.eup %13445 }
 0x44e   :  { %v1170_v52 = vmul.f32 %v13446_v55, %v1142_v63 }
 0x44f   :  { %v13448_v51 = vpop.eup %13447 }
 0x450   :  { %v1178_v24 = vsub.f32 2.0, %v1170_v52  ;;  %v1169_v22 = vmul.f32 %v13448_v51, %v1139_v30 }
 0x452   :  { %v1186_v14 = vmul.f32 %v13446_v55, %v1178_v24  ;;  %v1177_v21 = vsub.f32 2.0, %v1169_v22 }
 0x454   :  { %v1194_v9 = vmul.f32 %v14679_v59, %v1186_v14  ;;  %v1185_v5 = vmul.f32 %v13448_v51, %v1177_v21  ;;  %v1386_v59 = vpop.permute.xlu0 %1385 }
 0x456   :  { %1203 = vst.msk [vmem:[#allocation2 + $0x108] sm:$0xff] %vm654_vm2, %v1194_v9  ;;  %v1193_v57 = vmul.f32 %v14683_v48, %v1185_v5 }
 0x458   :  { %1202 = vst.msk [vmem:[#allocation2 + $0x100] sm:$0xff] %vm654_vm2, %v1193_v57  ;;  %12312 = vmatprep.mubr.msk.f32.mxu1 %vm654_vm2, %v1193_v57 }
 0x459   :  { %12313 = vmatmul.mubr.msk.f32.vlgmr.msra.gmra.mxu1 %vm654_vm2, %v1194_v9 }
 0x45a   :  { %12325 = vmatpush3.xpose.msk.msra.mxu1 %vm94_vm0, %v14633_v58  ;;  %v1384_v58 = vpop.permute.xlu1 %1383 }
 0x45b   :  { %12326 = vmatprep.subr.msk.mxu1 %vm94_vm0, %v14635_v61 }
 0x45e   :  { %12327 = vmatpush3.xpose.msk.msra.mxu1 %vm94_vm0, %v14635_v61 }
 0x45f   :  { %12328 = vmatprep.subr.msk.mxu1 %vm94_vm0, %v14741_v3 }
 0x462   :  { %12329 = vmatpush3.xpose.msk.msra.mxu1 %vm94_vm0, %v14741_v3 }
 0x463   :  { %12330 = vmatprep.subr.msk.mxu1 %vm94_vm0, %v14745_v6 }
 0x466   :  { %12331 = vmatpush3.xpose.msk.msra.mxu1 %vm94_vm0, %v14745_v6 }
 0x467   :  { %12332 = vmatprep.subr.msk.mxu1 %vm94_vm0, %v1386_v59 }
 0x46a   :  { %12333 = vmatpush3.xpose.msk.msra.mxu1 %vm94_vm0, %v1386_v59 }
 0x46b   :  { %12334 = vmatprep.subr.msk.mxu1 %vm94_vm0, %v1384_v58 }
 0x46e   :  { %12335 = vmatpush3.xpose.msk.msra.mxu1 %vm94_vm0, %v1384_v58 }
 0x474   :  { %v1148_v61 = vpop.xlane.xlu0 %1147 }
 0x475   :  { %13449 = vrcp.f32 %v1148_v61 }
 0x476   :  { %v1145_v48 = vpop.xlane.xlu1 %1144 }
 0x477   :  { %13451 = vrcp.f32 %v1145_v48 }
 0x478   :  { %v1154_v3 = vpop.xlane.xlu0 %1153 }
 0x479   :  { %13453 = vrcp.f32 %v1154_v3 }
 0x47a   :  { %v1151_v4 = vpop.xlane.xlu1 %1150 }
 0x47b   :  { %13455 = vrcp.f32 %v1151_v4 }
 0x47c   :  { %v1160_v54 = vpop.xlane.xlu0 %1159 }
 0x47d   :  { %13457 = vrcp.f32 %v1160_v54 }
 0x47e   :  { %v1157_v6 = vpop.xlane.xlu1 %1156 }
 0x47f   :  { %13459 = vrcp.f32 %v1157_v6 }
 0x480   :  { %v1382_v43 = vpop.permute.xlu0 %1381 }
 0x481   :  { %12336 = vmatprep.subr.msk.mxu1 %vm94_vm0, %v1382_v43 }
 0x482   :  { %v13450_v2 = vpop.eup %13449  ;;  %12337 = vmatpush3.xpose.msk.msra.mxu1 %vm94_vm0, %v1382_v43  ;;  %v1380_v31 = vpop.permute.xlu1 %1379 }
 0x483   :  { %v1172_v29 = vmul.f32 %v13450_v2, %v1148_v61  ;;  %12338 = vmatprep.subr.msk.mxu1 %vm94_vm0, %v1380_v31 }
 0x484   :  { %v13452_v37 = vpop.eup %13451  ;;  %v1364_v26 = vpop.permute.xlu0 %1363 }
 0x485   :  { %v1180_v32 = vsub.f32 2.0, %v1172_v29  ;;  %v1171_v28 = vmul.f32 %v13452_v37, %v1145_v48 }
 0x486   :  { %v13454_v18 = vpop.eup %13453  ;;  %12339 = vmatpush3.xpose.msk.msra.mxu1 %vm94_vm0, %v1380_v31  ;;  %v1366_v25 = vpop.permute.xlu1 %1365 }
 0x487   :  { %v1188_v50 = vmul.f32 %v13450_v2, %v1180_v32  ;;  %v1179_v45 = vsub.f32 2.0, %v1171_v28  ;;  %v1174_v60 = vmul.f32 %v13454_v18, %v1154_v3 }
 0x488   :  { %v13456_v63 = vpop.eup %13455  ;;  %v1368_v0 = vpop.permute.xlu0 %1367 }
 0x489   :  { %v1187_v1 = vmul.f32 %v13452_v37, %v1179_v45  ;;  %v1182_v27 = vsub.f32 2.0, %v1174_v60  ;;  %v1173_v30 = vmul.f32 %v13456_v63, %v1151_v4  ;;  %v1196_v10 = vmul.f32 %v14697_v7, %v1188_v50 }
 0x48a   :  { %v13458_v13 = vpop.eup %13457  ;;  %v1370_v49 = vpop.permute.xlu1 %1369 }
 0x48b   :  { %v1190_v38 = vmul.f32 %v13454_v18, %v1182_v27  ;;  %v1181_v53 = vsub.f32 2.0, %v1173_v30  ;;  %v1176_v34 = vmul.f32 %v13458_v13, %v1160_v54  ;;  %v1195_v47 = vmul.f32 %v14699_v56, %v1187_v1  ;;  %1205 = vst.msk [vmem:[#allocation2 + $0x118] sm:$0xff] %vm654_vm2, %v1196_v10 }
 0x48c   :  { %v13460_v55 = vpop.eup %13459  ;;  %v1372_v52 = vpop.permute.xlu0 %1371 }
 0x48d   :  { %v1189_v51 = vmul.f32 %v13456_v63, %v1181_v53  ;;  %v1184_v24 = vsub.f32 2.0, %v1176_v34  ;;  %v1175_v22 = vmul.f32 %v13460_v55, %v1157_v6  ;;  %1204 = vst.msk [vmem:[#allocation2 + $0x110] sm:$0xff] %vm654_vm2, %v1195_v47  ;;  %12315 = vmatprep.mubr.msk.f32.mxu1 %vm654_vm2, %v1195_v47  ;;  %v1198_v7 = vmul.f32 %v14703_v62, %v1190_v38 }
 0x48e   :  { %12316 = vmatmul.mubr.msk.f32.gmra.mxu1 %vm654_vm2, %v1196_v10  ;;  %v1374_v14 = vpop.permute.xlu1 %1373 }
 0x48f   :  { %v1192_v21 = vmul.f32 %v13458_v13, %v1184_v24  ;;  %v1183_v9 = vsub.f32 2.0, %v1175_v22  ;;  %v1197_v56 = vmul.f32 %v14707_v17, %v1189_v51  ;;  %1207 = vst.msk [vmem:[#allocation2 + $0x128] sm:$0xff] %vm654_vm2, %v1198_v7 }
 0x490   :  { %v1376_v59 = vpop.permute.xlu0 %1375 }
 0x491   :  { %v1191_v5 = vmul.f32 %v13460_v55, %v1183_v9  ;;  %1206 = vst.msk [vmem:[#allocation2 + $0x120] sm:$0xff] %vm654_vm2, %v1197_v56  ;;  %12318 = vmatprep.mubr.msk.f32.mxu1 %vm654_vm2, %v1197_v56  ;;  %v1200_v57 = vmul.f32 %v14711_v46, %v1192_v21 }
 0x492   :  { %12319 = vmatmul.mubr.msk.f32.gmra.mxu1 %vm654_vm2, %v1198_v7  ;;  %v1378_v62 = vpop.permute.xlu1 %1377 }
 0x493   :  { %v1199_v58 = vmul.f32 %v14715_v11, %v1191_v5  ;;  %1209 = vst.msk [vmem:[#allocation2 + $0x138] sm:$0xff] %vm654_vm2, %v1200_v57 }
 0x494   :  { %v1666_v61 = vpop.permute.xlu0 %1665 }
 0x495   :  { %1208 = vst.msk [vmem:[#allocation2 + $0x130] sm:$0xff] %vm654_vm2, %v1199_v58  ;;  %12321 = vmatprep.mubr.msk.f32.mxu1 %vm654_vm2, %v1199_v58 }
 0x496   :  { %12322 = vmatmul.mubr.msk.f32.gmra.mxu1 %vm654_vm2, %v1200_v57  ;;  %v1668_v17 = vpop.permute.xlu1 %1667 }
 0x497   :  { %12340 = vmatprep.mubr.msk.f32.mxu1 %vm94_vm0, %v1364_v26  ;;  %12352 = vmatprep.subr.mxu0 %v1668_v17 }
 0x498   :  { %12353 = vmatpush3.msra.mxu0 %v1668_v17  ;;  %v1660_v11 = vpop.permute.xlu0 %1659 }
 0x499   :  { %12354 = vmatprep.subr.mxu0 %v1666_v61 }
 0x49a   :  { %12341 = vmatmul.mubr.msk.f32.vlgmr.msra.gmra.mxu1 %vm94_vm0, %v1366_v25  ;;  %12355 = vmatpush3.msra.mxu0 %v1666_v61  ;;  %v1664_v46 = vpop.permute.xlu1 %1663 }
 0x49b   :  { %12343 = vmatprep.mubr.msk.f32.mxu1 %vm94_vm0, %v1368_v0  ;;  %12356 = vmatprep.subr.mxu0 %v1664_v46 }
 0x49c   :  { %12357 = vmatpush3.msra.mxu0 %v1664_v46  ;;  %v1656_v4 = vpop.permute.xlu0 %1655 }
 0x49e   :  { %12344 = vmatmul.mubr.msk.f32.gmra.mxu1 %vm94_vm0, %v1370_v49  ;;  %v1662_v48 = vpop.permute.xlu1 %1661 }
 0x49f   :  { %12346 = vmatprep.mubr.msk.f32.mxu1 %vm94_vm0, %v1372_v52  ;;  %12358 = vmatprep.subr.mxu0 %v1662_v48 }
 0x4a0   :  { %12359 = vmatpush3.msra.mxu0 %v1662_v48 }
 0x4a1   :  { %12360 = vmatprep.subr.mxu0 %v1660_v11 }
 0x4a2   :  { %12347 = vmatmul.mubr.msk.f32.gmra.mxu1 %vm94_vm0, %v1374_v14  ;;  %12361 = vmatpush3.msra.mxu0 %v1660_v11  ;;  %v1658_v3 = vpop.permute.xlu1 %1657 }
 0x4a3   :  { %12349 = vmatprep.mubr.msk.f32.mxu1 %vm94_vm0, %v1376_v59  ;;  %12362 = vmatprep.subr.mxu0 %v1658_v3 }
 0x4a4   :  { %12363 = vmatpush3.msra.mxu0 %v1658_v3 }
 0x4a5   :  { %12364 = vmatprep.subr.mxu0 %v1656_v4 }
 0x4a6   :  { %12350 = vmatmul.mubr.msk.f32.gmra.mxu1 %vm94_vm0, %v1378_v62  ;;  %12365 = vmatpush3.msra.mxu0 %v1656_v4  ;;  %v1654_v54 = vpop.permute.xlu1 %1653 }
 0x4a7   :  { %12366 = vmatprep.subr.mxu0 %v1654_v54 }
 0x4a8   :  { %12367 = vmatpush3.msra.mxu0 %v1654_v54 }
 0x4aa   :  { %v14860_v6 = vpop.permute.xlu1 %1836 }
 0x4ab   :  { %12380 = vmatprep.subr.msk.mxu0 %vm94_vm0, %v14860_v6 }
 0x4ae   :  { %v14908_v21 = vpop.permute.xlu1 %1834 }
 0x4f8   :  { %v14864_v43 = vpop.f32.mrf.mxu1 }
 0x4f9   :  { %19072 = vst [vmem:[#allocation25_spill] sm:$0xff] %v14864_v43 }
 0x4fa   :  { %v14866_v2 = vpop.f32.mrf.mxu1 }
 0x4fb   :  { %19073 = vst [vmem:[#allocation26_spill] sm:$0xff] %v14866_v2 }
 0x500   :  { %v14868_v31 = vpop.f32.mrf.mxu1 }
 0x501   :  { %19074 = vst [vmem:[#allocation27_spill] sm:$0xff] %v14868_v31 }
 0x502   :  { %v14870_v29 = vpop.f32.mrf.mxu1 }
 0x503   :  { %19075 = vst [vmem:[#allocation28_spill] sm:$0xff] %v14870_v29 }
 0x505   :  { %v14872_v37 = vpop.f32.mrf.mxu1 }
 0x506   :  { %19076 = vst [vmem:[#allocation29_spill] sm:$0xff] %v14872_v37 }
 0x507   :  { %v14874_v26 = vpop.f32.mrf.mxu1 }
 0x508   :  { %19077 = vst [vmem:[#allocation30_spill] sm:$0xff] %v14874_v26 }
 0x509   :  { %v14876_v32 = vpop.f32.mrf.mxu1 }
 0x50a   :  { %19078 = vst [vmem:[#allocation31_spill] sm:$0xff] %v14876_v32 }
 0x50b   :  { %v14878_v28 = vpop.f32.mrf.mxu1 }
 0x50c   :  { %19079 = vst [vmem:[#allocation32_spill] sm:$0xff] %v14878_v28 }
 0x519   :  { %v14880_v18 = vpop.f32.mrf.mxu1 }
 0x51a   :  { %19080 = vst [vmem:[#allocation33_spill] sm:$0xff] %v14880_v18 }
 0x51b   :  { %v14882_v25 = vpop.f32.mrf.mxu1 }
 0x51c   :  { %19081 = vst [vmem:[#allocation34_spill] sm:$0xff] %v14882_v25 }
 0x54e   :  { %v14884_v50 = vpop.f32.mrf.mxu1 }
 0x54f   :  { %19082 = vst [vmem:[#allocation35_spill] sm:$0xff] %v14884_v50 }
 0x550   :  { %v14886_v45 = vpop.f32.mrf.mxu1 }
 0x551   :  { %19083 = vst [vmem:[#allocation36_spill] sm:$0xff] %v14886_v45 }
 0x552   :  { %v14888_v60 = vpop.f32.mrf.mxu1 }
 0x553   :  { %19084 = vst [vmem:[#allocation37_spill] sm:$0xff] %v14888_v60 }
 0x554   :  { %v14890_v63 = vpop.f32.mrf.mxu1 }
 0x555   :  { %19085 = vst [vmem:[#allocation38_spill] sm:$0xff] %v14890_v63 }
 0x556   :  { %v14892_v0 = vpop.f32.mrf.mxu1 }
 0x557   :  { %19086 = vst [vmem:[#allocation39_spill] sm:$0xff] %v14892_v0 }
 0x558   :  { %v14894_v1 = vpop.f32.mrf.mxu1 }
 0x559   :  { %19087 = vst [vmem:[#allocation40_spill] sm:$0xff] %v14894_v1 }
 0x55a   :  { %v12342_v27 = vpop.f32.mrf.mxu1 }
 0x55b   :  { %v1535_v30 = vsel %vm654_vm2, %v12342_v27, -inf }
 0x55c   :  { %1536 = vmax.xlane.f32.xlu1 %v1535_v30  ;;  %v1493_v10 = vpop.f32.mrf.mxu1 }
 0x55d   :  { %v1532_v13 = vsel %vm654_vm2, %v1493_v10, -inf }
 0x55e   :  { %1533 = vmax.xlane.f32.xlu0 %v1532_v13  ;;  %v12345_v49 = vpop.f32.mrf.mxu1 }
 0x55f   :  { %v1541_v53 = vsel %vm654_vm2, %v12345_v49, -inf }
 0x560   :  { %v1503_v38 = vpop.f32.mrf.mxu1 }
 0x561   :  { %v1538_v55 = vsel %vm654_vm2, %v1503_v38, -inf }
 0x562   :  { %1542 = vmax.xlane.f32.xlu0 %v1541_v53  ;;  %v12348_v34 = vpop.f32.mrf.mxu1 }
 0x563   :  { %v1547_v22 = vsel %vm654_vm2, %v12348_v34, -inf }
 0x564   :  { %v1513_v47 = vpop.f32.mrf.mxu1 }
 0x565   :  { %v1544_v52 = vsel %vm654_vm2, %v1513_v47, -inf }
 0x566   :  { %1539 = vmax.xlane.f32.xlu0 %v1538_v55  ;;  %1545 = vmax.xlane.f32.xlu1 %v1544_v52  ;;  %v12351_v51 = vpop.f32.mrf.mxu1 }
 0x567   :  { %v1553_v14 = vsel %vm654_vm2, %v12351_v51, -inf }
 0x568   :  { %v1523_v24 = vpop.f32.mrf.mxu1 }
 0x569   :  { %v1550_v7 = vsel %vm654_vm2, %v1523_v24, -inf }
 0x56a   :  { %1548 = vmax.xlane.f32.xlu0 %v1547_v22  ;;  %1551 = vmax.xlane.f32.xlu1 %v1550_v7 }
 0x56e   :  { %1554 = vmax.xlane.f32.xlu0 %v1553_v14 }
 0x57b   :  { %1830 = vrot.lane.b32.xlu1 %v14434_v39, %s14083_s29 }
 0x584   :  { %1832 = vrot.lane.b32.xlu0 %v14428_v35, %s14083_s29 }
 0x5e5   :  { %v1537_v9 = vpop.xlane.xlu1 %1536 }
 0x5e6   :  { %v1557_v56 = vsub.f32 %v12342_v27, %v1537_v9 }
 0x5e7   :  { %v1534_v5 = vpop.xlane.xlu0 %1533 }
 0x5e8   :  { %v1566_v57 = vmul.f32 1.442695, %v1557_v56  ;;  %v1556_v59 = vsub.f32 %v1493_v10, %v1534_v5 }
 0x5ea   :  { %13461 = vpow2.f32 %v1566_v57  ;;  %v1564_v62 = vmul.f32 1.442695, %v1556_v59 }
 0x5eb   :  { %v1543_v11 = vpop.xlane.xlu0 %1542 }
 0x5ec   :  { %13463 = vpow2.f32 %v1564_v62  ;;  %v1559_v4 = vsub.f32 %v12345_v49, %v1543_v11 }
 0x5ee   :  { %v1570_v10 = vmul.f32 1.442695, %v1559_v4 }
 0x5ef   :  { %v1540_v48 = vpop.xlane.xlu0 %1539  ;;  %v1546_v3 = vpop.xlane.xlu1 %1545 }
 0x5f0   :  { %v1560_v54 = vsub.f32 %v1513_v47, %v1546_v3  ;;  %v1558_v13 = vsub.f32 %v1503_v38, %v1540_v48  ;;  %13465 = vpow2.f32 %v1570_v10 }
 0x5f2   :  { %v1572_v53 = vmul.f32 1.442695, %v1560_v54  ;;  %v1568_v52 = vmul.f32 1.442695, %v1558_v13 }
 0x5f3   :  { %v1549_v27 = vpop.xlane.xlu0 %1548  ;;  %v1552_v30 = vpop.xlane.xlu1 %1551 }
 0x5f4   :  { %v1562_v55 = vsub.f32 %v1523_v24, %v1552_v30  ;;  %v1561_v22 = vsub.f32 %v12348_v34, %v1549_v27  ;;  %13467 = vpow2.f32 %v1572_v53 }
 0x5f5   :  { %13469 = vpow2.f32 %v1568_v52 }
 0x5f6   :  { %v1576_v14 = vmul.f32 1.442695, %v1562_v55  ;;  %v1574_v9 = vmul.f32 1.442695, %v1561_v22 }
 0x5f7   :  { %v14910_v58 = vpop.eup %13461  ;;  %v1555_v7 = vpop.xlane.xlu0 %1554 }
 0x5f8   :  { %v1583_v17 = vsel %vm654_vm2, %v14910_v58, 0.0  ;;  %v1563_v56 = vsub.f32 %v12351_v51, %v1555_v7  ;;  %13471 = vpow2.f32 %v1576_v14  ;;  %v1831_v3 = vpop.permute.xlu1 %1830 }
 0x5f9   :  { %v14914_v61 = vpop.eup %13463  ;;  %1584 = vadd.xlane.f32.xlu0 %v1583_v17  ;;  %13473 = vpow2.f32 %v1574_v9 }
 0x5fa   :  { %v1580_v46 = vsel %vm654_vm2, %v14914_v61, 0.0  ;;  %v1578_v5 = vmul.f32 1.442695, %v1563_v56 }
 0x5fb   :  { %1581 = vadd.xlane.f32.xlu1 %v1580_v46  ;;  %v1833_v48 = vpop.permute.xlu0 %1832 }
 0x5fc   :  { %13475 = vpow2.f32 %v1578_v5 }
 0x5fd   :  { %v14922_v49 = vpop.eup %13465 }
 0x5fe   :  { %v1589_v38 = vsel %vm654_vm2, %v14922_v49, 0.0 }
 0x601   :  { %v14924_v47 = vpop.eup %13467 }
 0x602   :  { %v14928_v24 = vpop.eup %13469  ;;  %v1592_v34 = vsel %vm654_vm2, %v14924_v47, 0.0 }
 0x603   :  { %v1586_v51 = vsel %vm654_vm2, %v14928_v24, 0.0 }
 0x605   :  { %v14932_v57 = vpop.eup %13471 }
 0x606   :  { %v14936_v59 = vpop.eup %13473  ;;  %v1598_v62 = vsel %vm654_vm2, %v14932_v57, 0.0 }
 0x607   :  { %v1595_v17 = vsel %vm654_vm2, %v14936_v59, 0.0 }
 0x609   :  { %v14942_v46 = vpop.eup %13475 }
 0x60a   :  { %v1601_v11 = vsel %vm654_vm2, %v14942_v46, 0.0 }
 0x60c   :  { %1826 = vrot.lane.b32.xlu1 %v14444_v41, %s14083_s29 }
 0x60f   :  { %1828 = vrot.lane.b32.xlu0 %v14440_v40, %s14083_s29 }
 0x62e   :  { %1590 = vadd.xlane.f32.xlu0 %v1589_v38 }
 0x630   :  { %1593 = vadd.xlane.f32.xlu1 %v1592_v34 }
 0x632   :  { %1587 = vadd.xlane.f32.xlu0 %v1586_v51 }
 0x634   :  { %1599 = vadd.xlane.f32.xlu1 %v1598_v62 }
 0x636   :  { %1596 = vadd.xlane.f32.xlu0 %v1595_v17 }
 0x63a   :  { %1602 = vadd.xlane.f32.xlu0 %v1601_v11 }
 0x645   :  { %1822 = vrot.lane.b32.xlu1 %v14452_v44, %s14083_s29 }
 0x649   :  { %1808 = vrot.lane.b32.xlu1 %v14448_v42, %s14084_s0 }
 0x64d   :  { %1812 = vrot.lane.b32.xlu1 %v14440_v40, %s14084_s0 }
 0x650   :  { %1824 = vrot.lane.b32.xlu0 %v14448_v42, %s14083_s29 }
 0x651   :  { %1816 = vrot.lane.b32.xlu1 %v14428_v35, %s14084_s0 }
 0x654   :  { %1806 = vrot.lane.b32.xlu0 %v14452_v44, %s14084_s0 }
 0x655   :  { %1820 = vrot.lane.b32.xlu1 %v14426_v33, %s14084_s0 }
 0x658   :  { %1810 = vrot.lane.b32.xlu0 %v14444_v41, %s14084_s0 }
 0x659   :  { %2110 = vrot.lane.b32.xlu1 %v14426_v33, %s14085_s20 }
 0x65c   :  { %1814 = vrot.lane.b32.xlu0 %v14434_v39, %s14084_s0 }
 0x65d   :  { %2106 = vrot.lane.b32.xlu1 %v14428_v35, %s14085_s20 }
 0x660   :  { %1818 = vrot.lane.b32.xlu0 %v14430_v36, %s14084_s0 }
 0x661   :  { %2104 = vrot.lane.b32.xlu1 %v14434_v39, %s14085_s20 }
 0x664   :  { %2108 = vrot.lane.b32.xlu0 %v14430_v36, %s14085_s20 }
 0x665   :  { %2100 = vrot.lane.b32.xlu1 %v14444_v41, %s14085_s20 }
 0x668   :  { %2102 = vrot.lane.b32.xlu0 %v14440_v40, %s14085_s20 }
 0x669   :  { %2096 = vrot.lane.b32.xlu1 %v14452_v44, %s14085_s20 }
 0x66c   :  { %2098 = vrot.lane.b32.xlu0 %v14448_v42, %s14085_s20 }
 0x66d   :  { %2279 = vrot.lane.b32.xlu1 %v14402_v16, %s14086_s21 }
 0x671   :  { %2277 = vrot.lane.b32.xlu1 %v14410_v20, %s14086_s21 }
 0x682   :  { %v1585_v4 = vpop.xlane.xlu0 %1584 }
 0x683   :  { %13477 = vrcp.f32 %v1585_v4 }
 0x684   :  { %v1582_v54 = vpop.xlane.xlu1 %1581 }
 0x685   :  { %13479 = vrcp.f32 %v1582_v54 }
 0x690   :  { %v13478_v27 = vpop.eup %13477 }
 0x691   :  { %v1613_v30 = vmul.f32 %v13478_v27, %v1585_v4 }
 0x692   :  { %v13480_v10 = vpop.eup %13479 }
 0x693   :  { %v1621_v13 = vsub.f32 2.0, %v1613_v30  ;;  %v1612_v53 = vmul.f32 %v13480_v10, %v1582_v54 }
 0x695   :  { %v1629_v55 = vmul.f32 %v13478_v27, %v1621_v13  ;;  %v1620_v52 = vsub.f32 2.0, %v1612_v53 }
 0x697   :  { %v1637_v22 = vmul.f32 %v14910_v58, %v1629_v55  ;;  %v1628_v7 = vmul.f32 %v13480_v10, %v1620_v52  ;;  %v1829_v58 = vpop.permute.xlu0 %1828 }
 0x699   :  { %1646 = vst.msk [vmem:[#allocation2 + $0x48] sm:$0xff] %vm654_vm2, %v1637_v22  ;;  %v1636_v14 = vmul.f32 %v14914_v61, %v1628_v7  ;;  %v1827_v61 = vpop.permute.xlu1 %1826 }
 0x69b   :  { %1645 = vst.msk [vmem:[#allocation2 + $0x40] sm:$0xff] %vm654_vm2, %v1636_v14  ;;  %12368 = vmatprep.mubr.msk.f32.mxu0 %vm654_vm2, %v1636_v14 }
 0x69c   :  { %12369 = vmatmul.mubr.msk.f32.vlgmr.msra.gmra.mxu0 %vm654_vm2, %v1637_v22 }
 0x69d   :  { %12381 = vmatpush3.xpose.msk.msra.mxu0 %vm94_vm0, %v14860_v6 }
 0x69e   :  { %12382 = vmatprep.subr.msk.mxu0 %vm94_vm0, %v14908_v21 }
 0x6a1   :  { %12383 = vmatpush3.xpose.msk.msra.mxu0 %vm94_vm0, %v14908_v21 }
 0x6a2   :  { %12384 = vmatprep.subr.msk.mxu0 %vm94_vm0, %v1833_v48 }
 0x6a5   :  { %12385 = vmatpush3.xpose.msk.msra.mxu0 %vm94_vm0, %v1833_v48 }
 0x6a6   :  { %12386 = vmatprep.subr.msk.mxu0 %vm94_vm0, %v1831_v3 }
 0x6a9   :  { %12387 = vmatpush3.xpose.msk.msra.mxu0 %vm94_vm0, %v1831_v3 }
 0x6aa   :  { %12388 = vmatprep.subr.msk.mxu0 %vm94_vm0, %v1829_v58 }
 0x6ad   :  { %12389 = vmatpush3.xpose.msk.msra.mxu0 %vm94_vm0, %v1829_v58 }
 0x6ae   :  { %12390 = vmatprep.subr.msk.mxu0 %vm94_vm0, %v1827_v61 }
 0x6b1   :  { %12391 = vmatpush3.xpose.msk.msra.mxu0 %vm94_vm0, %v1827_v61 }
 0x6b7   :  { %v1591_v6 = vpop.xlane.xlu0 %1590 }
 0x6b8   :  { %13481 = vrcp.f32 %v1591_v6 }
 0x6b9   :  { %v1594_v21 = vpop.xlane.xlu1 %1593 }
 0x6ba   :  { %13483 = vrcp.f32 %v1594_v21 }
 0x6bb   :  { %v1588_v9 = vpop.xlane.xlu0 %1587 }
 0x6bc   :  { %13485 = vrcp.f32 %v1588_v9 }
 0x6bd   :  { %v1600_v56 = vpop.xlane.xlu1 %1599 }
 0x6be   :  { %13487 = vrcp.f32 %v1600_v56 }
 0x6bf   :  { %v1597_v5 = vpop.xlane.xlu0 %1596 }
 0x6c0   :  { %13489 = vrcp.f32 %v1597_v5 }
 0x6c1   :  { %v1823_v38 = vpop.permute.xlu1 %1822 }
 0x6c3   :  { %v1603_v34 = vpop.xlane.xlu0 %1602 }
 0x6c4   :  { %13491 = vrcp.f32 %v1603_v34 }
 0x6c5   :  { %v13482_v51 = vpop.eup %13481  ;;  %v15006_v62 = vpop.permute.xlu1 %1808 }
 0x6c6   :  { %v1615_v17 = vmul.f32 %v13482_v51, %v1591_v6 }
 0x6c7   :  { %v13484_v11 = vpop.eup %13483  ;;  %v1825_v48 = vpop.permute.xlu0 %1824 }
 0x6c8   :  { %v1623_v3 = vsub.f32 2.0, %v1615_v17  ;;  %v1616_v4 = vmul.f32 %v13484_v11, %v1594_v21  ;;  %12392 = vmatprep.subr.msk.mxu0 %vm94_vm0, %v1825_v48 }
 0x6c9   :  { %v13486_v54 = vpop.eup %13485  ;;  %12393 = vmatpush3.xpose.msk.msra.mxu0 %vm94_vm0, %v1825_v48  ;;  %v15010_v27 = vpop.permute.xlu1 %1812 }
 0x6ca   :  { %v1631_v30 = vmul.f32 %v13482_v51, %v1623_v3  ;;  %v1624_v10 = vsub.f32 2.0, %v1616_v4  ;;  %v1614_v13 = vmul.f32 %v13486_v54, %v1588_v9  ;;  %12394 = vmatprep.subr.msk.mxu0 %vm94_vm0, %v1823_v38 }
 0x6cb   :  { %v13488_v53 = vpop.eup %13487  ;;  %v1807_v55 = vpop.permute.xlu0 %1806 }
 0x6cc   :  { %v1632_v52 = vmul.f32 %v13484_v11, %v1624_v10  ;;  %v1622_v22 = vsub.f32 2.0, %v1614_v13  ;;  %v1618_v7 = vmul.f32 %v13488_v53, %v1600_v56  ;;  %v1639_v14 = vmul.f32 %v14922_v49, %v1631_v30 }
 0x6cd   :  { %v13490_v58 = vpop.eup %13489  ;;  %12395 = vmatpush3.xpose.msk.msra.mxu0 %vm94_vm0, %v1823_v38  ;;  %v1817_v61 = vpop.permute.xlu1 %1816 }
 0x6ce   :  { %v1630_v6 = vmul.f32 %v13486_v54, %v1622_v22  ;;  %v1626_v21 = vsub.f32 2.0, %v1618_v7  ;;  %v1617_v17 = vmul.f32 %v13490_v58, %v1597_v5  ;;  %1648 = vst.msk [vmem:[#allocation2 + $0x58] sm:$0xff] %vm654_vm2, %v1639_v14  ;;  %v1640_v9 = vmul.f32 %v14924_v47, %v1632_v52 }
 0x6cf   :  { %v1811_v51 = vpop.permute.xlu0 %1810 }
 0x6d0   :  { %v1634_v48 = vmul.f32 %v13488_v53, %v1626_v21  ;;  %v1625_v3 = vsub.f32 2.0, %v1617_v17  ;;  %v1638_v11 = vmul.f32 %v14928_v24, %v1630_v6  ;;  %1649 = vst.msk [vmem:[#allocation2 + $0x60] sm:$0xff] %vm654_vm2, %v1640_v9 }
 0x6d1   :  { %v13492_v56 = vpop.eup %13491  ;;  %v1821_v49 = vpop.permute.xlu1 %1820 }
 0x6d2   :  { %v1633_v4 = vmul.f32 %v13490_v58, %v1625_v3  ;;  %v1619_v30 = vmul.f32 %v13492_v56, %v1603_v34  ;;  %1647 = vst.msk [vmem:[#allocation2 + $0x50] sm:$0xff] %vm654_vm2, %v1638_v11  ;;  %12371 = vmatprep.mubr.msk.f32.mxu0 %vm654_vm2, %v1638_v11  ;;  %v1642_v5 = vmul.f32 %v14932_v57, %v1634_v48 }
 0x6d3   :  { %v1815_v38 = vpop.permute.xlu0 %1814  ;;  %12372 = vmatmul.mubr.msk.f32.gmra.mxu0 %vm654_vm2, %v1639_v14 }
 0x6d4   :  { %v1627_v47 = vsub.f32 2.0, %v1619_v30  ;;  %12374 = vmatprep.mubr.msk.f32.mxu0 %vm654_vm2, %v1640_v9  ;;  %v1641_v24 = vmul.f32 %v14936_v59, %v1633_v4  ;;  %1651 = vst.msk [vmem:[#allocation2 + $0x70] sm:$0xff] %vm654_vm2, %v1642_v5 }
 0x6d5   :  { %v2111_v54 = vpop.permute.xlu1 %2110 }
 0x6d6   :  { %v1635_v10 = vmul.f32 %v13492_v56, %v1627_v47  ;;  %12408 = vmatprep.subr.mxu1 %v2111_v54  ;;  %1650 = vst.msk [vmem:[#allocation2 + $0x68] sm:$0xff] %vm654_vm2, %v1641_v24 }
 0x6d7   :  { %v1819_v34 = vpop.permute.xlu0 %1818  ;;  %12375 = vmatmul.mubr.msk.f32.gmra.mxu0 %vm654_vm2, %v1641_v24  ;;  %12409 = vmatpush3.msra.mxu1 %v2111_v54 }
 0x6d8   :  { %12377 = vmatprep.mubr.msk.f32.mxu0 %vm654_vm2, %v1642_v5  ;;  %v1643_v57 = vmul.f32 %v14942_v46, %v1635_v10 }
 0x6d9   :  { %v2107_v13 = vpop.permute.xlu1 %2106 }
 0x6da   :  { %1652 = vst.msk [vmem:[#allocation2 + $0x78] sm:$0xff] %vm654_vm2, %v1643_v57 }
 0x6db   :  { %v2109_v53 = vpop.permute.xlu0 %2108  ;;  %12378 = vmatmul.mubr.msk.f32.gmra.mxu0 %vm654_vm2, %v1643_v57 }
 0x6dc   :  { %12396 = vmatprep.mubr.msk.f32.mxu0 %vm94_vm0, %v1807_v55  ;;  %12410 = vmatprep.subr.mxu1 %v2109_v53 }
 0x6dd   :  { %12411 = vmatpush3.msra.mxu1 %v2109_v53  ;;  %v2105_v59 = vpop.permute.xlu1 %2104 }
 0x6de   :  { %12412 = vmatprep.subr.mxu1 %v2107_v13 }
 0x6df   :  { %v2103_v52 = vpop.permute.xlu0 %2102  ;;  %12397 = vmatmul.mubr.msk.f32.vlgmr.msra.gmra.mxu0 %vm94_vm0, %v15006_v62  ;;  %12413 = vmatpush3.msra.mxu1 %v2107_v13 }
 0x6e0   :  { %12399 = vmatprep.mubr.msk.f32.mxu0 %vm94_vm0, %v1811_v51  ;;  %12414 = vmatprep.subr.mxu1 %v2105_v59 }
 0x6e1   :  { %12415 = vmatpush3.msra.mxu1 %v2105_v59  ;;  %v2101_v46 = vpop.permute.xlu1 %2100 }
 0x6e2   :  { %12416 = vmatprep.subr.mxu1 %v2103_v52 }
 0x6e3   :  { %12400 = vmatmul.mubr.msk.f32.gmra.mxu0 %vm94_vm0, %v15010_v27  ;;  %12417 = vmatpush3.msra.mxu1 %v2103_v52  ;;  %v2099_v55 = vpop.permute.xlu0 %2098 }
 0x6e4   :  { %12402 = vmatprep.mubr.msk.f32.mxu0 %vm94_vm0, %v1815_v38  ;;  %12418 = vmatprep.subr.mxu1 %v2101_v46 }
 0x6e5   :  { %12419 = vmatpush3.msra.mxu1 %v2101_v46  ;;  %v2097_v22 = vpop.permute.xlu1 %2096 }
 0x6e6   :  { %12420 = vmatprep.subr.mxu1 %v2099_v55 }
 0x6e7   :  { %12403 = vmatmul.mubr.msk.f32.gmra.mxu0 %vm94_vm0, %v1817_v61  ;;  %12421 = vmatpush3.msra.mxu1 %v2099_v55 }
 0x6e8   :  { %12405 = vmatprep.mubr.msk.f32.mxu0 %vm94_vm0, %v1819_v34  ;;  %12422 = vmatprep.subr.mxu1 %v2097_v22 }
 0x6e9   :  { %12423 = vmatpush3.msra.mxu1 %v2097_v22  ;;  %v15041_v62 = vpop.permute.xlu1 %2279 }
 0x6ea   :  { %12436 = vmatprep.subr.msk.mxu1 %vm94_vm0, %v15041_v62 }
 0x6eb   :  { %12406 = vmatmul.mubr.msk.f32.gmra.mxu0 %vm94_vm0, %v1821_v49 }
 0x6ed   :  { %v15074_v57 = vpop.permute.xlu1 %2277 }
 0x75c   :  { %v15046_v27 = vpop.f32.mrf.mxu0 }
 0x75e   :  { %v15048_v7 = vpop.f32.mrf.mxu0 }
 0x793   :  { %v15050_v14 = vpop.f32.mrf.mxu0 }
 0x795   :  { %v15052_v58 = vpop.f32.mrf.mxu0 }
 0x797   :  { %v15054_v61 = vpop.f32.mrf.mxu0 }
 0x799   :  { %v15056_v6 = vpop.f32.mrf.mxu0 }
 0x79b   :  { %v15058_v21 = vpop.f32.mrf.mxu0 }
 0x79d   :  { %v15060_v17 = vpop.f32.mrf.mxu0 }
 0x79f   :  { %v12398_v9 = vpop.f32.mrf.mxu0 }
 0x7a0   :  { %v1978_v51 = vsel %vm654_vm2, %v12398_v9, -inf }
 0x7a1   :  { %1979 = vmax.xlane.f32.xlu1 %v1978_v51  ;;  %v1936_v48 = vpop.f32.mrf.mxu0 }
 0x7a2   :  { %v1975_v3 = vsel %vm654_vm2, %v1936_v48, -inf }
 0x7a3   :  { %1976 = vmax.xlane.f32.xlu0 %v1975_v3  ;;  %v12401_v11 = vpop.f32.mrf.mxu0 }
 0x7a4   :  { %v1984_v49 = vsel %vm654_vm2, %v12401_v11, -inf }
 0x7a5   :  { %v1946_v56 = vpop.f32.mrf.mxu0 }
 0x7a6   :  { %v1981_v5 = vsel %vm654_vm2, %v1946_v56, -inf }
 0x7a7   :  { %1985 = vmax.xlane.f32.xlu0 %v1984_v49  ;;  %v12404_v4 = vpop.f32.mrf.mxu0 }
 0x7a8   :  { %v1990_v54 = vsel %vm654_vm2, %v12404_v4, -inf }
 0x7a9   :  { %v1956_v30 = vpop.f32.mrf.mxu0 }
 0x7aa   :  { %v1987_v38 = vsel %vm654_vm2, %v1956_v30, -inf }
 0x7ab   :  { %1982 = vmax.xlane.f32.xlu0 %v1981_v5  ;;  %1988 = vmax.xlane.f32.xlu1 %v1987_v38  ;;  %v12407_v47 = vpop.f32.mrf.mxu0 }
 0x7ac   :  { %v1996_v34 = vsel %vm654_vm2, %v12407_v47, -inf }
 0x7ad   :  { %v1966_v24 = vpop.f32.mrf.mxu0 }
 0x7ae   :  { %v1993_v10 = vsel %vm654_vm2, %v1966_v24, -inf }
 0x7af   :  { %1991 = vmax.xlane.f32.xlu0 %v1990_v54  ;;  %1994 = vmax.xlane.f32.xlu1 %v1993_v10 }
 0x7b3   :  { %1997 = vmax.xlane.f32.xlu0 %v1996_v34 }
 0x7c0   :  { %2273 = vrot.lane.b32.xlu1 %v14400_v15, %s14086_s21 }
 0x7c9   :  { %2275 = vrot.lane.b32.xlu0 %v14396_v12, %s14086_s21 }
 0x82a   :  { %v1980_v13 = vpop.xlane.xlu1 %1979 }
 0x82b   :  { %v2000_v53 = vsub.f32 %v12398_v9, %v1980_v13 }
 0x82c   :  { %v1977_v59 = vpop.xlane.xlu0 %1976 }
 0x82d   :  { %v2009_v52 = vmul.f32 1.442695, %v2000_v53  ;;  %v1999_v46 = vsub.f32 %v1936_v48, %v1977_v59 }
 0x82f   :  { %13493 = vpow2.f32 %v2009_v52  ;;  %v2007_v55 = vmul.f32 1.442695, %v1999_v46 }
 0x830   :  { %v1986_v5 = vpop.xlane.xlu0 %1985 }
 0x831   :  { %13495 = vpow2.f32 %v2007_v55  ;;  %v2002_v38 = vsub.f32 %v12401_v11, %v1986_v5 }
 0x833   :  { %v2013_v13 = vmul.f32 1.442695, %v2002_v38  ;;  %v19088_v38 = vld [vmem:[#allocation24_spill] sm:$0xff] }
 0x834   :  { %v1983_v9 = vpop.xlane.xlu0 %1982  ;;  %v1989_v48 = vpop.xlane.xlu1 %1988 }
 0x835   :  { %v2003_v54 = vsub.f32 %v1956_v30, %v1989_v48  ;;  %v2001_v53 = vsub.f32 %v1946_v56, %v1983_v9  ;;  %13497 = vpow2.f32 %v2013_v13 }
 0x837   :  { %v2015_v59 = vmul.f32 1.442695, %v2003_v54  ;;  %v2011_v46 = vmul.f32 1.442695, %v2001_v53 }
 0x838   :  { %v1992_v10 = vpop.xlane.xlu0 %1991  ;;  %v1995_v34 = vpop.xlane.xlu1 %1994 }
 0x839   :  { %v2005_v52 = vsub.f32 %v1966_v24, %v1995_v34  ;;  %v2004_v55 = vsub.f32 %v12404_v4, %v1992_v10  ;;  %13499 = vpow2.f32 %v2015_v59 }
 0x83a   :  { %13501 = vpow2.f32 %v2011_v46 }
 0x83b   :  { %v2017_v0 = vmul.f32 1.442695, %v2004_v55 }
 0x83c   :  { %v15076_v22 = vpop.eup %13493  ;;  %v2274_v10 = vpop.permute.xlu1 %2273 }
 0x83d   :  { %v2026_v51 = vsel %vm654_vm2, %v15076_v22, 0.0 }
 0x83e   :  { %v15080_v3 = vpop.eup %13495  ;;  %2027 = vadd.xlane.f32.xlu0 %v2026_v51  ;;  %v1998_v51 = vpop.xlane.xlu0 %1997 }
 0x83f   :  { %v2023_v49 = vsel %vm654_vm2, %v15080_v3, 0.0  ;;  %v2006_v1 = vsub.f32 %v12407_v47, %v1998_v51 }
 0x840   :  { %2024 = vadd.xlane.f32.xlu1 %v2023_v49  ;;  %v2019_v49 = vmul.f32 1.442695, %v2005_v52 }
 0x841   :  { %v2021_v60 = vmul.f32 1.442695, %v2006_v1 }
 0x842   :  { %13503 = vpow2.f32 %v2019_v49  ;;  %v15088_v11 = vpop.eup %13497  ;;  %v2276_v54 = vpop.permute.xlu0 %2275 }
 0x843   :  { %13505 = vpow2.f32 %v2017_v0  ;;  %v2032_v56 = vsel %vm654_vm2, %v15088_v11, 0.0 }
 0x844   :  { %13507 = vpow2.f32 %v2021_v60 }
 0x846   :  { %v15090_v30 = vpop.eup %13499 }
 0x847   :  { %v15094_v24 = vpop.eup %13501  ;;  %v2035_v4 = vsel %vm654_vm2, %v15090_v30, 0.0 }
 0x848   :  { %v2029_v0 = vsel %vm654_vm2, %v15094_v24, 0.0 }
 0x84f   :  { %v15098_v5 = vpop.eup %13503 }
 0x850   :  { %v15102_v60 = vpop.eup %13505  ;;  %v2041_v1 = vsel %vm654_vm2, %v15098_v5, 0.0 }
 0x851   :  { %2269 = vrot.lane.b32.xlu1 %v14408_v19, %s14086_s21  ;;  %v2038_v47 = vsel %vm654_vm2, %v15102_v60, 0.0  ;;  %v15108_v9 = vpop.eup %13507 }
 0x852   :  { %v2044_v48 = vsel %vm654_vm2, %v15108_v9, 0.0 }
 0x854   :  { %2271 = vrot.lane.b32.xlu0 %v14416_v23, %s14086_s21 }
 0x873   :  { %2033 = vadd.xlane.f32.xlu0 %v2032_v56 }
 0x875   :  { %2036 = vadd.xlane.f32.xlu1 %v2035_v4 }
 0x877   :  { %2030 = vadd.xlane.f32.xlu0 %v2029_v0 }
 0x879   :  { %2042 = vadd.xlane.f32.xlu1 %v2041_v1 }
 0x87b   :  { %2039 = vadd.xlane.f32.xlu0 %v2038_v47 }
 0x87f   :  { %2045 = vadd.xlane.f32.xlu0 %v2044_v48 }
 0x88a   :  { %2265 = vrot.lane.b32.xlu1 %v14392_v8, %s14086_s21 }
 0x88e   :  { %2251 = vrot.lane.b32.xlu1 %v19088_v38, %s19025_s22 }
 0x892   :  { %2255 = vrot.lane.b32.xlu1 %v14416_v23, %s19025_s22 }
 0x895   :  { %2267 = vrot.lane.b32.xlu0 %v19088_v38, %s14086_s21 }
 0x896   :  { %2259 = vrot.lane.b32.xlu1 %v14396_v12, %s19025_s22 }
 0x899   :  { %2249 = vrot.lane.b32.xlu0 %v14392_v8, %s19025_s22 }
 0x89a   :  { %2263 = vrot.lane.b32.xlu1 %v14402_v16, %s19025_s22 }
 0x89d   :  { %2253 = vrot.lane.b32.xlu0 %v14408_v19, %s19025_s22 }
 0x89e   :  { %2553 = vrot.lane.b32.xlu1 %v14402_v16, %s19023_s1 }
 0x8a1   :  { %2257 = vrot.lane.b32.xlu0 %v14400_v15, %s19025_s22 }
 0x8a2   :  { %2549 = vrot.lane.b32.xlu1 %v14396_v12, %s19023_s1 }
 0x8a5   :  { %2261 = vrot.lane.b32.xlu0 %v14410_v20, %s19025_s22 }
 0x8a6   :  { %2547 = vrot.lane.b32.xlu1 %v14400_v15, %s19023_s1 }
 0x8a9   :  { %2551 = vrot.lane.b32.xlu0 %v14410_v20, %s19023_s1 }
 0x8aa   :  { %2543 = vrot.lane.b32.xlu1 %v14408_v19, %s19023_s1 }
 0x8ad   :  { %2545 = vrot.lane.b32.xlu0 %v14416_v23, %s19023_s1 }
 0x8ae   :  { %2539 = vrot.lane.b32.xlu1 %v14392_v8, %s19023_s1 }
 0x8b1   :  { %2541 = vrot.lane.b32.xlu0 %v19088_v38, %s19023_s1 }
 0x8b2   :  { %2722 = vrot.lane.b32.xlu1 %v14426_v33, %s14086_s21 }
 0x8b6   :  { %2720 = vrot.lane.b32.xlu1 %v14430_v36, %s14086_s21 }
 0x8c7   :  { %v2028_v34 = vpop.xlane.xlu0 %2027 }
 0x8c8   :  { %13509 = vrcp.f32 %v2028_v34 }
 0x8c9   :  { %v2025_v13 = vpop.xlane.xlu1 %2024 }
 0x8ca   :  { %13511 = vrcp.f32 %v2025_v13 }
 0x8d5   :  { %v13510_v53 = vpop.eup %13509 }
 0x8d6   :  { %v2056_v59 = vmul.f32 %v13510_v53, %v2028_v34 }
 0x8d7   :  { %v13512_v52 = vpop.eup %13511 }
 0x8d8   :  { %v2064_v46 = vsub.f32 2.0, %v2056_v59  ;;  %v2055_v55 = vmul.f32 %v13512_v52, %v2025_v13 }
 0x8da   :  { %v2072_v51 = vmul.f32 %v13510_v53, %v2064_v46  ;;  %v2063_v49 = vsub.f32 2.0, %v2055_v55 }
 0x8dc   :  { %v2080_v56 = vmul.f32 %v15076_v22, %v2072_v51  ;;  %v2071_v4 = vmul.f32 %v13512_v52, %v2063_v49  ;;  %v2272_v22 = vpop.permute.xlu0 %2271 }
 0x8de   :  { %2089 = vst.msk [vmem:[#allocation2 + $0x148] sm:$0xff] %vm654_vm2, %v2080_v56  ;;  %v2079_v0 = vmul.f32 %v15080_v3, %v2071_v4  ;;  %v2270_v3 = vpop.permute.xlu1 %2269 }
 0x8e0   :  { %2088 = vst.msk [vmem:[#allocation2 + $0x140] sm:$0xff] %vm654_vm2, %v2079_v0  ;;  %12424 = vmatprep.mubr.msk.f32.mxu1 %vm654_vm2, %v2079_v0 }
 0x8e1   :  { %12425 = vmatmul.mubr.msk.f32.vlgmr.msra.gmra.mxu1 %vm654_vm2, %v2080_v56 }
 0x8e2   :  { %12437 = vmatpush3.xpose.msk.msra.mxu1 %vm94_vm0, %v15041_v62 }
 0x8e3   :  { %12438 = vmatprep.subr.msk.mxu1 %vm94_vm0, %v15074_v57 }
 0x8e6   :  { %12439 = vmatpush3.xpose.msk.msra.mxu1 %vm94_vm0, %v15074_v57 }
 0x8e7   :  { %12440 = vmatprep.subr.msk.mxu1 %vm94_vm0, %v2276_v54 }
 0x8ea   :  { %12441 = vmatpush3.xpose.msk.msra.mxu1 %vm94_vm0, %v2276_v54 }
 0x8eb   :  { %12442 = vmatprep.subr.msk.mxu1 %vm94_vm0, %v2274_v10 }
 0x8ee   :  { %12443 = vmatpush3.xpose.msk.msra.mxu1 %vm94_vm0, %v2274_v10 }
 0x8ef   :  { %12444 = vmatprep.subr.msk.mxu1 %vm94_vm0, %v2272_v22 }
 0x8f2   :  { %12445 = vmatpush3.xpose.msk.msra.mxu1 %vm94_vm0, %v2272_v22 }
 0x8f3   :  { %12446 = vmatprep.subr.msk.mxu1 %vm94_vm0, %v2270_v3 }
 0x8f6   :  { %12447 = vmatpush3.xpose.msk.msra.mxu1 %vm94_vm0, %v2270_v3 }
 0x8fc   :  { %v2034_v62 = vpop.xlane.xlu0 %2033 }
 0x8fd   :  { %13513 = vrcp.f32 %v2034_v62 }
 0x8fe   :  { %v2037_v57 = vpop.xlane.xlu1 %2036 }
 0x8ff   :  { %13515 = vrcp.f32 %v2037_v57 }
 0x900   :  { %v2031_v1 = vpop.xlane.xlu0 %2030 }
 0x901   :  { %13517 = vrcp.f32 %v2031_v1 }
 0x902   :  { %v2043_v47 = vpop.xlane.xlu1 %2042 }
 0x903   :  { %13519 = vrcp.f32 %v2043_v47 }
 0x904   :  { %v2040_v48 = vpop.xlane.xlu0 %2039 }
 0x905   :  { %13521 = vrcp.f32 %v2040_v48 }
 0x906   :  { %v2266_v54 = vpop.permute.xlu1 %2265 }
 0x908   :  { %v2046_v10 = vpop.xlane.xlu0 %2045 }
 0x909   :  { %13523 = vrcp.f32 %v2046_v10 }
 0x90a   :  { %v13514_v34 = vpop.eup %13513  ;;  %v15172_v13 = vpop.permute.xlu1 %2251 }
 0x90b   :  { %v2058_v53 = vmul.f32 %v13514_v34, %v2034_v62 }
 0x90c   :  { %v13516_v59 = vpop.eup %13515  ;;  %v2268_v52 = vpop.permute.xlu0 %2267 }
 0x90d   :  { %v2066_v46 = vsub.f32 2.0, %v2058_v53  ;;  %v2059_v55 = vmul.f32 %v13516_v59, %v2037_v57  ;;  %12448 = vmatprep.subr.msk.mxu1 %vm94_vm0, %v2268_v52 }
 0x90e   :  { %v13518_v51 = vpop.eup %13517  ;;  %12449 = vmatpush3.xpose.msk.msra.mxu1 %vm94_vm0, %v2268_v52  ;;  %v15176_v49 = vpop.permute.xlu1 %2255 }
 0x90f   :  { %v2074_v56 = vmul.f32 %v13514_v34, %v2066_v46  ;;  %v2067_v4 = vsub.f32 2.0, %v2059_v55  ;;  %v2057_v0 = vmul.f32 %v13518_v51, %v2031_v1  ;;  %12450 = vmatprep.subr.msk.mxu1 %vm94_vm0, %v2266_v54 }
 0x910   :  { %v13520_v22 = vpop.eup %13519  ;;  %v2250_v3 = vpop.permute.xlu0 %2249 }
 0x911   :  { %v2075_v63 = vmul.f32 %v13516_v59, %v2067_v4  ;;  %v2065_v62 = vsub.f32 2.0, %v2057_v0  ;;  %v2061_v50 = vmul.f32 %v13520_v22, %v2043_v47  ;;  %v2082_v53 = vmul.f32 %v15088_v11, %v2074_v56 }
 0x912   :  { %v13522_v57 = vpop.eup %13521  ;;  %12451 = vmatpush3.xpose.msk.msra.mxu1 %vm94_vm0, %v2266_v54  ;;  %v2260_v45 = vpop.permute.xlu1 %2259 }
 0x913   :  { %v2073_v18 = vmul.f32 %v13518_v51, %v2065_v62  ;;  %v2069_v52 = vsub.f32 2.0, %v2061_v50  ;;  %v2060_v25 = vmul.f32 %v13522_v57, %v2040_v48  ;;  %2091 = vst.msk [vmem:[#allocation2 + $0x158] sm:$0xff] %vm654_vm2, %v2082_v53  ;;  %v2083_v1 = vmul.f32 %v15090_v30, %v2075_v63 }
 0x914   :  { %v2254_v34 = vpop.permute.xlu0 %2253 }
 0x915   :  { %v2077_v46 = vmul.f32 %v13520_v22, %v2069_v52  ;;  %v2068_v55 = vsub.f32 2.0, %v2060_v25  ;;  %v2081_v59 = vmul.f32 %v15094_v24, %v2073_v18  ;;  %2092 = vst.msk [vmem:[#allocation2 + $0x160] sm:$0xff] %vm654_vm2, %v2083_v1 }
 0x916   :  { %v13524_v47 = vpop.eup %13523  ;;  %v2264_v11 = vpop.permute.xlu1 %2263 }
 0x917   :  { %v2076_v56 = vmul.f32 %v13522_v57, %v2068_v55  ;;  %v2062_v4 = vmul.f32 %v13524_v47, %v2046_v10  ;;  %2090 = vst.msk [vmem:[#allocation2 + $0x150] sm:$0xff] %vm654_vm2, %v2081_v59  ;;  %12427 = vmatprep.mubr.msk.f32.mxu1 %vm654_vm2, %v2081_v59  ;;  %v2085_v50 = vmul.f32 %v15098_v5, %v2077_v46 }
 0x918   :  { %v2258_v48 = vpop.permute.xlu0 %2257  ;;  %12428 = vmatmul.mubr.msk.f32.gmra.mxu1 %vm654_vm2, %v2082_v53 }
 0x919   :  { %v2070_v63 = vsub.f32 2.0, %v2062_v4  ;;  %12430 = vmatprep.mubr.msk.f32.mxu1 %vm654_vm2, %v2083_v1  ;;  %v2084_v18 = vmul.f32 %v15102_v60, %v2076_v56  ;;  %2094 = vst.msk [vmem:[#allocation2 + $0x170] sm:$0xff] %vm654_vm2, %v2085_v50 }
 0x91a   :  { %v2554_v25 = vpop.permute.xlu1 %2553 }
 0x91b   :  { %v2078_v30 = vmul.f32 %v13524_v47, %v2070_v63  ;;  %12464 = vmatprep.subr.mxu0 %v2554_v25  ;;  %2093 = vst.msk [vmem:[#allocation2 + $0x168] sm:$0xff] %vm654_vm2, %v2084_v18 }
 0x91c   :  { %v2262_v24 = vpop.permute.xlu0 %2261  ;;  %12431 = vmatmul.mubr.msk.f32.gmra.mxu1 %vm654_vm2, %v2084_v18  ;;  %12465 = vmatpush3.msra.mxu0 %v2554_v25 }
 0x91d   :  { %12433 = vmatprep.mubr.msk.f32.mxu1 %vm654_vm2, %v2085_v50  ;;  %v2086_v5 = vmul.f32 %v15108_v9, %v2078_v30 }
 0x91e   :  { %v2550_v54 = vpop.permute.xlu1 %2549 }
 0x91f   :  { %2095 = vst.msk [vmem:[#allocation2 + $0x178] sm:$0xff] %vm654_vm2, %v2086_v5 }
 0x920   :  { %v2552_v10 = vpop.permute.xlu0 %2551  ;;  %12434 = vmatmul.mubr.msk.f32.gmra.mxu1 %vm654_vm2, %v2086_v5 }
 0x921   :  { %12452 = vmatprep.mubr.msk.f32.mxu1 %vm94_vm0, %v2250_v3  ;;  %12466 = vmatprep.subr.mxu0 %v2552_v10 }
 0x922   :  { %12467 = vmatpush3.msra.mxu0 %v2552_v10  ;;  %v2548_v60 = vpop.permute.xlu1 %2547 }
 0x923   :  { %12468 = vmatprep.subr.mxu0 %v2550_v54 }
 0x924   :  { %v2546_v51 = vpop.permute.xlu0 %2545  ;;  %12453 = vmatmul.mubr.msk.f32.vlgmr.msra.gmra.mxu1 %vm94_vm0, %v15172_v13  ;;  %12469 = vmatpush3.msra.mxu0 %v2550_v54 }
 0x925   :  { %12455 = vmatprep.mubr.msk.f32.mxu1 %vm94_vm0, %v2254_v34  ;;  %12470 = vmatprep.subr.mxu0 %v2548_v60 }
 0x926   :  { %12471 = vmatpush3.msra.mxu0 %v2548_v60  ;;  %v2544_v9 = vpop.permute.xlu1 %2543 }
 0x927   :  { %12472 = vmatprep.subr.mxu0 %v2546_v51 }
 0x928   :  { %12456 = vmatmul.mubr.msk.f32.gmra.mxu1 %vm94_vm0, %v15176_v49  ;;  %12473 = vmatpush3.msra.mxu0 %v2546_v51  ;;  %v2542_v0 = vpop.permute.xlu0 %2541 }
 0x929   :  { %12458 = vmatprep.mubr.msk.f32.mxu1 %vm94_vm0, %v2258_v48  ;;  %12474 = vmatprep.subr.mxu0 %v2544_v9 }
 0x92a   :  { %12475 = vmatpush3.msra.mxu0 %v2544_v9  ;;  %v2540_v22 = vpop.permute.xlu1 %2539 }
 0x92b   :  { %12476 = vmatprep.subr.mxu0 %v2542_v0 }
 0x92c   :  { %12459 = vmatmul.mubr.msk.f32.gmra.mxu1 %vm94_vm0, %v2260_v45  ;;  %12477 = vmatpush3.msra.mxu0 %v2542_v0 }
 0x92d   :  { %12461 = vmatprep.mubr.msk.f32.mxu1 %vm94_vm0, %v2262_v24  ;;  %12478 = vmatprep.subr.mxu0 %v2540_v22 }
 0x92e   :  { %12479 = vmatpush3.msra.mxu0 %v2540_v22  ;;  %v15207_v13 = vpop.permute.xlu1 %2722 }
 0x92f   :  { %12492 = vmatprep.subr.msk.mxu0 %vm94_vm0, %v15207_v13 }
 0x930   :  { %12462 = vmatmul.mubr.msk.f32.gmra.mxu1 %vm94_vm0, %v2264_v11 }
 0x932   :  { %v15240_v54 = vpop.permute.xlu1 %2720 }
 0x9a1   :  { %v15212_v49 = vpop.f32.mrf.mxu1 }
 0x9a3   :  { %v15214_v3 = vpop.f32.mrf.mxu1 }
 0x9d8   :  { %v15216_v62 = vpop.f32.mrf.mxu1 }
 0x9da   :  { %v15218_v53 = vpop.f32.mrf.mxu1 }
 0x9db   :  { %19089 = vst [vmem:[#allocation24_spill] sm:$0xff] %v15218_v53 }
 0x9dc   :  { %v15220_v45 = vpop.f32.mrf.mxu1 }
 0x9de   :  { %v15222_v57 = vpop.f32.mrf.mxu1 }
 0x9df   :  { %19090 = vst [vmem:[#allocation41_spill] sm:$0xff] %v15222_v57 }
 0x9e0   :  { %v15224_v52 = vpop.f32.mrf.mxu1 }
 0x9e1   :  { %19091 = vst [vmem:[#allocation42_spill] sm:$0xff] %v15224_v52 }
 0x9e2   :  { %v15226_v1 = vpop.f32.mrf.mxu1 }
 0x9e3   :  { %19092 = vst [vmem:[#allocation43_spill] sm:$0xff] %v15226_v1 }
 0x9e4   :  { %v12454_v34 = vpop.f32.mrf.mxu1 }
 0x9e5   :  { %v2421_v46 = vsel %vm654_vm2, %v12454_v34, -inf }
 0x9e6   :  { %2422 = vmax.xlane.f32.xlu1 %v2421_v46  ;;  %v2379_v55 = vpop.f32.mrf.mxu1 }
 0x9e7   :  { %v2418_v59 = vsel %vm654_vm2, %v2379_v55, -inf }
 0x9e8   :  { %2419 = vmax.xlane.f32.xlu0 %v2418_v59  ;;  %v12457_v47 = vpop.f32.mrf.mxu1 }
 0x9e9   :  { %v2427_v56 = vsel %vm654_vm2, %v12457_v47, -inf }
 0x9ea   :  { %v2389_v11 = vpop.f32.mrf.mxu1 }
 0x9eb   :  { %v2424_v48 = vsel %vm654_vm2, %v2389_v11, -inf }
 0x9ec   :  { %2428 = vmax.xlane.f32.xlu0 %v2427_v56  ;;  %v12460_v4 = vpop.f32.mrf.mxu1 }
 0x9ed   :  { %v2433_v30 = vsel %vm654_vm2, %v12460_v4, -inf }
 0x9ee   :  { %v2399_v50 = vpop.f32.mrf.mxu1 }
 0x9ef   :  { %v2430_v63 = vsel %vm654_vm2, %v2399_v50, -inf }
 0x9f0   :  { %2425 = vmax.xlane.f32.xlu0 %v2424_v48  ;;  %2431 = vmax.xlane.f32.xlu1 %v2430_v63  ;;  %v12463_v18 = vpop.f32.mrf.mxu1 }
 0x9f1   :  { %v2439_v5 = vsel %vm654_vm2, %v12463_v18, -inf }
 0x9f2   :  { %v2409_v25 = vpop.f32.mrf.mxu1 }
 0x9f3   :  { %v2436_v24 = vsel %vm654_vm2, %v2409_v25, -inf }
 0x9f4   :  { %2434 = vmax.xlane.f32.xlu0 %v2433_v30  ;;  %2437 = vmax.xlane.f32.xlu1 %v2436_v24 }
 0x9f8   :  { %2440 = vmax.xlane.f32.xlu0 %v2439_v5 }
 0xa05   :  { %2716 = vrot.lane.b32.xlu1 %v14434_v39, %s14086_s21 }
 0xa0e   :  { %2718 = vrot.lane.b32.xlu0 %v14428_v35, %s14086_s21 }
 0xa6f   :  { %v2423_v10 = vpop.xlane.xlu1 %2422 }
 0xa70   :  { %v2443_v60 = vsub.f32 %v12454_v34, %v2423_v10 }
 0xa71   :  { %v2420_v51 = vpop.xlane.xlu0 %2419 }
 0xa72   :  { %v2452_v9 = vmul.f32 1.442695, %v2443_v60  ;;  %v2442_v0 = vsub.f32 %v2379_v55, %v2420_v51 }
 0xa74   :  { %13525 = vpow2.f32 %v2452_v9  ;;  %v2450_v22 = vmul.f32 1.442695, %v2442_v0 }
 0xa75   :  { %v2429_v63 = vpop.xlane.xlu0 %2428 }
 0xa76   :  { %13527 = vpow2.f32 %v2450_v22  ;;  %v2445_v30 = vsub.f32 %v12457_v47, %v2429_v63 }
 0xa78   :  { %v2456_v60 = vmul.f32 1.442695, %v2445_v30 }
 0xa79   :  { %v2426_v34 = vpop.xlane.xlu0 %2425  ;;  %v2432_v55 = vpop.xlane.xlu1 %2431 }
 0xa7a   :  { %v2446_v24 = vsub.f32 %v2399_v50, %v2432_v55  ;;  %v2444_v51 = vsub.f32 %v2389_v11, %v2426_v34  ;;  %13529 = vpow2.f32 %v2456_v60 }
 0xa7c   :  { %v2458_v9 = vmul.f32 1.442695, %v2446_v24  ;;  %v2454_v22 = vmul.f32 1.442695, %v2444_v51 }
 0xa7d   :  { %v2435_v5 = vpop.xlane.xlu0 %2434  ;;  %v2438_v10 = vpop.xlane.xlu1 %2437 }
 0xa7e   :  { %v2448_v0 = vsub.f32 %v2409_v25, %v2438_v10  ;;  %13531 = vpow2.f32 %v2458_v9 }
 0xa7f   :  { %13533 = vpow2.f32 %v2454_v22 }
 0xa80   :  { %v2462_v32 = vmul.f32 1.442695, %v2448_v0 }
 0xa81   :  { %v15242_v46 = vpop.eup %13525  ;;  %v2717_v30 = vpop.permute.xlu1 %2716 }
 0xa82   :  { %v2469_v59 = vsel %vm654_vm2, %v15242_v46, 0.0  ;;  %13535 = vpow2.f32 %v2462_v32 }
 0xa83   :  { %v15246_v56 = vpop.eup %13527  ;;  %2470 = vadd.xlane.f32.xlu0 %v2469_v59  ;;  %v2447_v59 = vsub.f32 %v12460_v4, %v2435_v5 }
 0xa84   :  { %v2466_v48 = vsel %vm654_vm2, %v15246_v56, 0.0 }
 0xa85   :  { %2467 = vadd.xlane.f32.xlu1 %v2466_v48  ;;  %v2441_v48 = vpop.xlane.xlu0 %2440  ;;  %v2460_v28 = vmul.f32 1.442695, %v2447_v59 }
 0xa86   :  { %v2449_v37 = vsub.f32 %v12463_v18, %v2441_v48 }
 0xa87   :  { %13537 = vpow2.f32 %v2460_v28  ;;  %v15254_v47 = vpop.eup %13529 }
 0xa88   :  { %v2464_v26 = vmul.f32 1.442695, %v2449_v37  ;;  %v2475_v11 = vsel %vm654_vm2, %v15254_v47, 0.0 }
 0xa89   :  { %v2719_v55 = vpop.permute.xlu0 %2718 }
 0xa8a   :  { %13539 = vpow2.f32 %v2464_v26 }
 0xa8b   :  { %v15256_v50 = vpop.eup %13531 }
 0xa8c   :  { %v15260_v25 = vpop.eup %13533  ;;  %v2478_v4 = vsel %vm654_vm2, %v15256_v50, 0.0 }
 0xa8d   :  { %v2472_v37 = vsel %vm654_vm2, %v15260_v25, 0.0 }
 0xa8f   :  { %v15264_v63 = vpop.eup %13535 }
 0xa90   :  { %v2484_v32 = vsel %vm654_vm2, %v15264_v63, 0.0 }
 0xa94   :  { %v15268_v26 = vpop.eup %13537 }
 0xa95   :  { %v2481_v28 = vsel %vm654_vm2, %v15268_v26, 0.0 }
 0xa96   :  { %2712 = vrot.lane.b32.xlu1 %v14444_v41, %s14086_s21 }
 0xa97   :  { %v15274_v18 = vpop.eup %13539 }
 0xa98   :  { %v2487_v34 = vsel %vm654_vm2, %v15274_v18, 0.0 }
 0xa99   :  { %2714 = vrot.lane.b32.xlu0 %v14440_v40, %s14086_s21 }
 0xab8   :  { %2476 = vadd.xlane.f32.xlu0 %v2475_v11 }
 0xaba   :  { %2479 = vadd.xlane.f32.xlu1 %v2478_v4 }
 0xabc   :  { %2473 = vadd.xlane.f32.xlu0 %v2472_v37 }
 0xabe   :  { %2485 = vadd.xlane.f32.xlu1 %v2484_v32 }
 0xac0   :  { %2482 = vadd.xlane.f32.xlu0 %v2481_v28 }
 0xac4   :  { %2488 = vadd.xlane.f32.xlu0 %v2487_v34 }
 0xacf   :  { %2708 = vrot.lane.b32.xlu1 %v14452_v44, %s14086_s21 }
 0xad3   :  { %2694 = vrot.lane.b32.xlu1 %v14448_v42, %s19025_s22 }
 0xad7   :  { %2698 = vrot.lane.b32.xlu1 %v14440_v40, %s19025_s22 }
 0xada   :  { %2710 = vrot.lane.b32.xlu0 %v14448_v42, %s14086_s21 }
 0xadb   :  { %2702 = vrot.lane.b32.xlu1 %v14428_v35, %s19025_s22 }
 0xade   :  { %2692 = vrot.lane.b32.xlu0 %v14452_v44, %s19025_s22 }
 0xadf   :  { %2706 = vrot.lane.b32.xlu1 %v14426_v33, %s19025_s22 }
 0xae2   :  { %2696 = vrot.lane.b32.xlu0 %v14444_v41, %s19025_s22 }
 0xae3   :  { %2996 = vrot.lane.b32.xlu1 %v14426_v33, %s19023_s1 }
 0xae6   :  { %2700 = vrot.lane.b32.xlu0 %v14434_v39, %s19025_s22 }
 0xae7   :  { %2992 = vrot.lane.b32.xlu1 %v14428_v35, %s19023_s1 }
 0xaea   :  { %2704 = vrot.lane.b32.xlu0 %v14430_v36, %s19025_s22 }
 0xaeb   :  { %2990 = vrot.lane.b32.xlu1 %v14434_v39, %s19023_s1 }
 0xaee   :  { %2994 = vrot.lane.b32.xlu0 %v14430_v36, %s19023_s1 }
 0xaef   :  { %2986 = vrot.lane.b32.xlu1 %v14444_v41, %s19023_s1 }
 0xaf2   :  { %2988 = vrot.lane.b32.xlu0 %v14440_v40, %s19023_s1 }
 0xaf3   :  { %2982 = vrot.lane.b32.xlu1 %v14452_v44, %s19023_s1 }
 0xaf6   :  { %2984 = vrot.lane.b32.xlu0 %v14448_v42, %s19023_s1  ;;  %s14096_s1 = smov [#allocation4]  }
 0xaf7   :  { %3165 = vrot.lane.b32.xlu1 %v14402_v16, %s19021_s23 }
 0xafb   :  { %3163 = vrot.lane.b32.xlu1 %v14410_v20, %s19021_s23 }
 0xb0c   :  { %v2471_v24 = vpop.xlane.xlu0 %2470 }
 0xb0d   :  { %13541 = vrcp.f32 %v2471_v24 }
 0xb0e   :  { %v2468_v5 = vpop.xlane.xlu1 %2467 }
 0xb0f   :  { %13543 = vrcp.f32 %v2468_v5 }
 0xb1a   :  { %v13542_v10 = vpop.eup %13541 }
 0xb1b   :  { %v2499_v60 = vmul.f32 %v13542_v10, %v2471_v24 }
 0xb1c   :  { %v13544_v51 = vpop.eup %13543 }
 0xb1d   :  { %v2507_v9 = vsub.f32 2.0, %v2499_v60  ;;  %v2498_v0 = vmul.f32 %v13544_v51, %v2468_v5 }
 0xb1f   :  { %v2515_v22 = vmul.f32 %v13542_v10, %v2507_v9  ;;  %v2506_v59 = vsub.f32 2.0, %v2498_v0 }
 0xb21   :  { %v2523_v48 = vmul.f32 %v15242_v46, %v2515_v22  ;;  %v2514_v11 = vmul.f32 %v13544_v51, %v2506_v59  ;;  %v2715_v46 = vpop.permute.xlu0 %2714 }
 0xb23   :  { %2532 = vst.msk [vmem:[#allocation2 + $0x88] sm:$0xff] %vm654_vm2, %v2523_v48  ;;  %v2522_v4 = vmul.f32 %v15246_v56, %v2514_v11  ;;  %v2713_v56 = vpop.permute.xlu1 %2712 }
 0xb25   :  { %2531 = vst.msk [vmem:[#allocation2 + $0x80] sm:$0xff] %vm654_vm2, %v2522_v4  ;;  %12480 = vmatprep.mubr.msk.f32.mxu0 %vm654_vm2, %v2522_v4 }
 0xb26   :  { %12481 = vmatmul.mubr.msk.f32.vlgmr.msra.gmra.mxu0 %vm654_vm2, %v2523_v48 }
 0xb27   :  { %12493 = vmatpush3.xpose.msk.msra.mxu0 %vm94_vm0, %v15207_v13 }
 0xb28   :  { %12494 = vmatprep.subr.msk.mxu0 %vm94_vm0, %v15240_v54 }
 0xb2b   :  { %12495 = vmatpush3.xpose.msk.msra.mxu0 %vm94_vm0, %v15240_v54 }
 0xb2c   :  { %12496 = vmatprep.subr.msk.mxu0 %vm94_vm0, %v2719_v55 }
 0xb2f   :  { %12497 = vmatpush3.xpose.msk.msra.mxu0 %vm94_vm0, %v2719_v55 }
 0xb30   :  { %12498 = vmatprep.subr.msk.mxu0 %vm94_vm0, %v2717_v30 }
 0xb33   :  { %12499 = vmatpush3.xpose.msk.msra.mxu0 %vm94_vm0, %v2717_v30 }
 0xb34   :  { %12500 = vmatprep.subr.msk.mxu0 %vm94_vm0, %v2715_v46 }
 0xb37   :  { %12501 = vmatpush3.xpose.msk.msra.mxu0 %vm94_vm0, %v2715_v46 }
 0xb38   :  { %12502 = vmatprep.subr.msk.mxu0 %vm94_vm0, %v2713_v56 }
 0xb3b   :  { %12503 = vmatpush3.xpose.msk.msra.mxu0 %vm94_vm0, %v2713_v56 }
 0xb41   :  { %v2477_v13 = vpop.xlane.xlu0 %2476 }
 0xb42   :  { %13545 = vrcp.f32 %v2477_v13 }
 0xb43   :  { %v2480_v54 = vpop.xlane.xlu1 %2479 }
 0xb44   :  { %13547 = vrcp.f32 %v2480_v54 }
 0xb45   :  { %v2474_v37 = vpop.xlane.xlu0 %2473 }
 0xb46   :  { %13549 = vrcp.f32 %v2474_v37 }
 0xb47   :  { %v2486_v32 = vpop.xlane.xlu1 %2485 }
 0xb48   :  { %13551 = vrcp.f32 %v2486_v32 }
 0xb49   :  { %v2483_v28 = vpop.xlane.xlu0 %2482 }
 0xb4a   :  { %13553 = vrcp.f32 %v2483_v28 }
 0xb4b   :  { %v2709_v34 = vpop.permute.xlu1 %2708 }
 0xb4d   :  { %v2489_v55 = vpop.xlane.xlu0 %2488 }
 0xb4e   :  { %13555 = vrcp.f32 %v2489_v55 }
 0xb4f   :  { %v13546_v30 = vpop.eup %13545  ;;  %v15338_v24 = vpop.permute.xlu1 %2694 }
 0xb50   :  { %v2501_v5 = vmul.f32 %v13546_v30, %v2477_v13 }
 0xb51   :  { %v13548_v10 = vpop.eup %13547  ;;  %v2711_v60 = vpop.permute.xlu0 %2710 }
 0xb52   :  { %v2509_v51 = vsub.f32 2.0, %v2501_v5  ;;  %v2502_v9 = vmul.f32 %v13548_v10, %v2480_v54  ;;  %12504 = vmatprep.subr.msk.mxu0 %vm94_vm0, %v2711_v60 }
 0xb53   :  { %v13550_v0 = vpop.eup %13549  ;;  %12505 = vmatpush3.xpose.msk.msra.mxu0 %vm94_vm0, %v2711_v60  ;;  %v15342_v22 = vpop.permute.xlu1 %2698 }
 0xb54   :  { %v2517_v59 = vmul.f32 %v13546_v30, %v2509_v51  ;;  %v2510_v48 = vsub.f32 2.0, %v2502_v9  ;;  %v2500_v11 = vmul.f32 %v13550_v0, %v2474_v37  ;;  %12506 = vmatprep.subr.msk.mxu0 %vm94_vm0, %v2709_v34 }
 0xb55   :  { %v13552_v4 = vpop.eup %13551  ;;  %v2693_v46 = vpop.permute.xlu0 %2692 }
 0xb56   :  { %v2518_v56 = vmul.f32 %v13548_v10, %v2510_v48  ;;  %v2508_v13 = vsub.f32 2.0, %v2500_v11  ;;  %v2504_v31 = vmul.f32 %v13552_v4, %v2486_v32  ;;  %v2525_v5 = vmul.f32 %v15254_v47, %v2517_v59 }
 0xb57   :  { %v13554_v54 = vpop.eup %13553  ;;  %12507 = vmatpush3.xpose.msk.msra.mxu0 %vm94_vm0, %v2709_v34  ;;  %v2703_v29 = vpop.permute.xlu1 %2702 }
 0xb58   :  { %v2516_v43 = vmul.f32 %v13550_v0, %v2508_v13  ;;  %v2512_v60 = vsub.f32 2.0, %v2504_v31  ;;  %v2503_v2 = vmul.f32 %v13554_v54, %v2483_v28  ;;  %2534 = vst.msk [vmem:[#allocation2 + $0x98] sm:$0xff] %vm654_vm2, %v2525_v5  ;;  %v2526_v37 = vmul.f32 %v15256_v50, %v2518_v56 }
 0xb59   :  { %v2697_v30 = vpop.permute.xlu0 %2696 }
 0xb5a   :  { %v2520_v51 = vmul.f32 %v13552_v4, %v2512_v60  ;;  %v2511_v9 = vsub.f32 2.0, %v2503_v2  ;;  %v2524_v10 = vmul.f32 %v15260_v25, %v2516_v43  ;;  %2535 = vst.msk [vmem:[#allocation2 + $0xa0] sm:$0xff] %vm654_vm2, %v2526_v37 }
 0xb5b   :  { %v13556_v32 = vpop.eup %13555  ;;  %v2707_v47 = vpop.permute.xlu1 %2706 }
 0xb5c   :  { %v2519_v59 = vmul.f32 %v13554_v54, %v2511_v9  ;;  %v2505_v48 = vmul.f32 %v13556_v32, %v2489_v55  ;;  %2533 = vst.msk [vmem:[#allocation2 + $0x90] sm:$0xff] %vm654_vm2, %v2524_v10  ;;  %12483 = vmatprep.mubr.msk.f32.mxu0 %vm654_vm2, %v2524_v10  ;;  %v2528_v31 = vmul.f32 %v15264_v63, %v2520_v51 }
 0xb5d   :  { %v2701_v28 = vpop.permute.xlu0 %2700  ;;  %12484 = vmatmul.mubr.msk.f32.gmra.mxu0 %vm654_vm2, %v2525_v5 }
 0xb5e   :  { %v2513_v50 = vsub.f32 2.0, %v2505_v48  ;;  %12486 = vmatprep.mubr.msk.f32.mxu0 %vm654_vm2, %v2526_v37  ;;  %v2527_v43 = vmul.f32 %v15268_v26, %v2519_v59  ;;  %2537 = vst.msk [vmem:[#allocation2 + $0xb0] sm:$0xff] %vm654_vm2, %v2528_v31 }
 0xb5f   :  { %v2997_v2 = vpop.permute.xlu1 %2996 }
 0xb60   :  { %v2521_v25 = vmul.f32 %v13556_v32, %v2513_v50  ;;  %12520 = vmatprep.subr.mxu1 %v2997_v2  ;;  %2536 = vst.msk [vmem:[#allocation2 + $0xa8] sm:$0xff] %vm654_vm2, %v2527_v43 }
 0xb61   :  { %v2705_v34 = vpop.permute.xlu0 %2704  ;;  %12487 = vmatmul.mubr.msk.f32.gmra.mxu0 %vm654_vm2, %v2527_v43  ;;  %12521 = vmatpush3.msra.mxu1 %v2997_v2 }
 0xb62   :  { %12489 = vmatprep.mubr.msk.f32.mxu0 %vm654_vm2, %v2528_v31  ;;  %v2529_v63 = vmul.f32 %v15274_v18, %v2521_v25 }
 0xb63   :  { %v2993_v55 = vpop.permute.xlu1 %2992 }
 0xb64   :  { %2538 = vst.msk [vmem:[#allocation2 + $0xb8] sm:$0xff] %vm654_vm2, %v2529_v63 }
 0xb65   :  { %v2995_v0 = vpop.permute.xlu0 %2994  ;;  %12490 = vmatmul.mubr.msk.f32.gmra.mxu0 %vm654_vm2, %v2529_v63 }
 0xb66   :  { %12508 = vmatprep.mubr.msk.f32.mxu0 %vm94_vm0, %v2693_v46  ;;  %12522 = vmatprep.subr.mxu1 %v2995_v0 }
 0xb67   :  { %12523 = vmatpush3.msra.mxu1 %v2995_v0  ;;  %v2991_v26 = vpop.permute.xlu1 %2990 }
 0xb68   :  { %12524 = vmatprep.subr.mxu1 %v2993_v55 }
 0xb69   :  { %v2989_v11 = vpop.permute.xlu0 %2988  ;;  %12509 = vmatmul.mubr.msk.f32.vlgmr.msra.gmra.mxu0 %vm94_vm0, %v15338_v24  ;;  %12525 = vmatpush3.msra.mxu1 %v2993_v55 }
 0xb6a   :  { %12511 = vmatprep.mubr.msk.f32.mxu0 %vm94_vm0, %v2697_v30  ;;  %12526 = vmatprep.subr.mxu1 %v2991_v26 }
 0xb6b   :  { %12527 = vmatpush3.msra.mxu1 %v2991_v26  ;;  %v2987_v18 = vpop.permute.xlu1 %2986 }
 0xb6c   :  { %12528 = vmatprep.subr.mxu1 %v2989_v11 }
 0xb6d   :  { %12512 = vmatmul.mubr.msk.f32.gmra.mxu0 %vm94_vm0, %v15342_v22  ;;  %12529 = vmatpush3.msra.mxu1 %v2989_v11  ;;  %v2985_v4 = vpop.permute.xlu0 %2984 }
 0xb6e   :  { %12514 = vmatprep.mubr.msk.f32.mxu0 %vm94_vm0, %v2701_v28  ;;  %12530 = vmatprep.subr.mxu1 %v2987_v18 }
 0xb6f   :  { %12531 = vmatpush3.msra.mxu1 %v2987_v18  ;;  %v2983_v46 = vpop.permute.xlu1 %2982 }
 0xb70   :  { %12532 = vmatprep.subr.mxu1 %v2985_v4 }
 0xb71   :  { %12515 = vmatmul.mubr.msk.f32.gmra.mxu0 %vm94_vm0, %v2703_v29  ;;  %12533 = vmatpush3.msra.mxu1 %v2985_v4 }
 0xb72   :  { %12517 = vmatprep.mubr.msk.f32.mxu0 %vm94_vm0, %v2705_v34  ;;  %12534 = vmatprep.subr.mxu1 %v2983_v46 }
 0xb73   :  { %12535 = vmatpush3.msra.mxu1 %v2983_v46  ;;  %v15373_v24 = vpop.permute.xlu1 %3165 }
 0xb74   :  { %12548 = vmatprep.subr.msk.mxu1 %vm94_vm0, %v15373_v24 }
 0xb75   :  { %12518 = vmatmul.mubr.msk.f32.gmra.mxu0 %vm94_vm0, %v2707_v47 }
 0xb77   :  { %v15406_v55 = vpop.permute.xlu1 %3163 }
 0xbe6   :  { %v15378_v22 = vpop.f32.mrf.mxu0 }
 0xbe8   :  { %v15380_v56 = vpop.f32.mrf.mxu0 }
 0xc1d   :  { %v15382_v13 = vpop.f32.mrf.mxu0 }
 0xc1f   :  { %v15384_v5 = vpop.f32.mrf.mxu0 }
 0xc21   :  { %v15386_v29 = vpop.f32.mrf.mxu0 }
 0xc23   :  { %v15388_v54 = vpop.f32.mrf.mxu0 }
 0xc25   :  { %v15390_v60 = vpop.f32.mrf.mxu0 }
 0xc27   :  { %v15392_v37 = vpop.f32.mrf.mxu0 }
 0xc29   :  { %v12510_v30 = vpop.f32.mrf.mxu0 }
 0xc2a   :  { %v2864_v51 = vsel %vm654_vm2, %v12510_v30, -inf }
 0xc2b   :  { %2865 = vmax.xlane.f32.xlu1 %v2864_v51  ;;  %v2822_v9 = vpop.f32.mrf.mxu0 }
 0xc2c   :  { %v2861_v10 = vsel %vm654_vm2, %v2822_v9, -inf }
 0xc2d   :  { %2862 = vmax.xlane.f32.xlu0 %v2861_v10  ;;  %v12513_v32 = vpop.f32.mrf.mxu0 }
 0xc2e   :  { %v2870_v59 = vsel %vm654_vm2, %v12513_v32, -inf }
 0xc2f   :  { %v2832_v47 = vpop.f32.mrf.mxu0 }
 0xc30   :  { %v2867_v28 = vsel %vm654_vm2, %v2832_v47, -inf }
 0xc31   :  { %2871 = vmax.xlane.f32.xlu0 %v2870_v59  ;;  %v12516_v48 = vpop.f32.mrf.mxu0 }
 0xc32   :  { %v2876_v25 = vsel %vm654_vm2, %v12516_v48, -inf }
 0xc33   :  { %v2842_v31 = vpop.f32.mrf.mxu0 }
 0xc34   :  { %v2873_v50 = vsel %vm654_vm2, %v2842_v31, -inf }
 0xc35   :  { %2868 = vmax.xlane.f32.xlu0 %v2867_v28  ;;  %2874 = vmax.xlane.f32.xlu1 %v2873_v50  ;;  %v12519_v43 = vpop.f32.mrf.mxu0 }
 0xc36   :  { %v2882_v63 = vsel %vm654_vm2, %v12519_v43, -inf }
 0xc37   :  { %v2852_v2 = vpop.f32.mrf.mxu0 }
 0xc38   :  { %v2879_v34 = vsel %vm654_vm2, %v2852_v2, -inf }
 0xc39   :  { %2877 = vmax.xlane.f32.xlu0 %v2876_v25  ;;  %2880 = vmax.xlane.f32.xlu1 %v2879_v34 }
 0xc3d   :  { %2883 = vmax.xlane.f32.xlu0 %v2882_v63 }
 0xc4a   :  { %3159 = vrot.lane.b32.xlu1 %v14400_v15, %s19021_s23 }
 0xc53   :  { %3161 = vrot.lane.b32.xlu0 %v14396_v12, %s19021_s23 }
 0xcb4   :  { %v2866_v0 = vpop.xlane.xlu1 %2865 }
 0xcb5   :  { %v2886_v26 = vsub.f32 %v12510_v30, %v2866_v0 }
 0xcb6   :  { %v2863_v11 = vpop.xlane.xlu0 %2862 }
 0xcb7   :  { %v2895_v18 = vmul.f32 1.442695, %v2886_v26  ;;  %v2885_v4 = vsub.f32 %v2822_v9, %v2863_v11 }
 0xcb9   :  { %13557 = vpow2.f32 %v2895_v18  ;;  %v2893_v46 = vmul.f32 1.442695, %v2885_v4 }
 0xcba   :  { %v2872_v50 = vpop.xlane.xlu0 %2871 }
 0xcbb   :  { %13559 = vpow2.f32 %v2893_v46  ;;  %v2888_v25 = vsub.f32 %v12513_v32, %v2872_v50 }
 0xcbd   :  { %v2899_v26 = vmul.f32 1.442695, %v2888_v25 }
 0xcbe   :  { %v2869_v30 = vpop.xlane.xlu0 %2868  ;;  %v2875_v9 = vpop.xlane.xlu1 %2874 }
 0xcbf   :  { %v2889_v34 = vsub.f32 %v2842_v31, %v2875_v9  ;;  %v2887_v11 = vsub.f32 %v2832_v47, %v2869_v30  ;;  %13561 = vpow2.f32 %v2899_v26 }
 0xcc1   :  { %v2901_v18 = vmul.f32 1.442695, %v2889_v34  ;;  %v2897_v46 = vmul.f32 1.442695, %v2887_v11 }
 0xcc2   :  { %v2878_v63 = vpop.xlane.xlu0 %2877  ;;  %v2881_v0 = vpop.xlane.xlu1 %2880 }
 0xcc3   :  { %v2891_v4 = vsub.f32 %v2852_v2, %v2881_v0  ;;  %13563 = vpow2.f32 %v2901_v18 }
 0xcc4   :  { %13565 = vpow2.f32 %v2897_v46 }
 0xcc5   :  { %v2905_v1 = vmul.f32 1.442695, %v2891_v4 }
 0xcc6   :  { %v15408_v51 = vpop.eup %13557 }
 0xcc7   :  { %v2912_v10 = vsel %vm654_vm2, %v15408_v51, 0.0  ;;  %13567 = vpow2.f32 %v2905_v1 }
 0xcc8   :  { %v15412_v59 = vpop.eup %13559  ;;  %2913 = vadd.xlane.f32.xlu0 %v2912_v10  ;;  %v2890_v10 = vsub.f32 %v12516_v48, %v2878_v63 }
 0xcc9   :  { %v2909_v28 = vsel %vm654_vm2, %v15412_v59, 0.0 }
 0xcca   :  { %2910 = vadd.xlane.f32.xlu1 %v2909_v28  ;;  %v2884_v28 = vpop.xlane.xlu0 %2883  ;;  %v2903_v57 = vmul.f32 1.442695, %v2890_v10 }
 0xccb   :  { %v2892_v52 = vsub.f32 %v12519_v43, %v2884_v28 }
 0xccc   :  { %13569 = vpow2.f32 %v2903_v57  ;;  %v15420_v32 = vpop.eup %13561 }
 0xccd   :  { %v2907_v53 = vmul.f32 1.442695, %v2892_v52  ;;  %v2918_v47 = vsel %vm654_vm2, %v15420_v32, 0.0 }
 0xccf   :  { %13571 = vpow2.f32 %v2907_v53 }
 0xcd0   :  { %v15422_v31 = vpop.eup %13563 }
 0xcd1   :  { %v15426_v2 = vpop.eup %13565  ;;  %v2921_v48 = vsel %vm654_vm2, %v15422_v31, 0.0 }
 0xcd2   :  { %v2915_v57 = vsel %vm654_vm2, %v15426_v2, 0.0 }
 0xcd4   :  { %v15430_v50 = vpop.eup %13567 }
 0xcd5   :  { %v2927_v52 = vsel %vm654_vm2, %v15430_v50, 0.0 }
 0xcd9   :  { %v15434_v53 = vpop.eup %13569 }
 0xcda   :  { %v2924_v1 = vsel %vm654_vm2, %v15434_v53, 0.0 }
 0xcdb   :  { %3155 = vrot.lane.b32.xlu1 %v14408_v19, %s19021_s23 }
 0xcdc   :  { %v15440_v43 = vpop.eup %13571 }
 0xcdd   :  { %v2930_v30 = vsel %vm654_vm2, %v15440_v43, 0.0 }
 0xcde   :  { %3157 = vrot.lane.b32.xlu0 %v14416_v23, %s19021_s23 }
 0xcfd   :  { %2919 = vadd.xlane.f32.xlu0 %v2918_v47 }
 0xcff   :  { %2922 = vadd.xlane.f32.xlu1 %v2921_v48 }
 0xd01   :  { %2916 = vadd.xlane.f32.xlu0 %v2915_v57 }
 0xd03   :  { %2928 = vadd.xlane.f32.xlu1 %v2927_v52 }
 0xd05   :  { %2925 = vadd.xlane.f32.xlu0 %v2924_v1 }
 0xd09   :  { %2931 = vadd.xlane.f32.xlu0 %v2930_v30 }
 0xd14   :  { %3151 = vrot.lane.b32.xlu1 %v14392_v8, %s19021_s23 }
 0xd18   :  { %3137 = vrot.lane.b32.xlu1 %v19088_v38, %s19017_s24 }
 0xd1c   :  { %3141 = vrot.lane.b32.xlu1 %v14416_v23, %s19017_s24 }
 0xd1f   :  { %3153 = vrot.lane.b32.xlu0 %v19088_v38, %s19021_s23 }
 0xd20   :  { %3145 = vrot.lane.b32.xlu1 %v14396_v12, %s19017_s24 }
 0xd23   :  { %3135 = vrot.lane.b32.xlu0 %v14392_v8, %s19017_s24 }
 0xd24   :  { %3149 = vrot.lane.b32.xlu1 %v14402_v16, %s19017_s24 }
 0xd27   :  { %3139 = vrot.lane.b32.xlu0 %v14408_v19, %s19017_s24 }
 0xd28   :  { %3439 = vrot.lane.b32.xlu1 %v14402_v16, %s19015_s25 }
 0xd2b   :  { %3143 = vrot.lane.b32.xlu0 %v14400_v15, %s19017_s24 }
 0xd2c   :  { %3435 = vrot.lane.b32.xlu1 %v14396_v12, %s19015_s25  ;;  %v3162_v12 = vpop.permute.xlu0 %3161 }
 0xd2f   :  { %3147 = vrot.lane.b32.xlu0 %v14410_v20, %s19017_s24 }
 0xd30   :  { %3433 = vrot.lane.b32.xlu1 %v14400_v15, %s19015_s25  ;;  %v3160_v15 = vpop.permute.xlu1 %3159 }
 0xd33   :  { %3437 = vrot.lane.b32.xlu0 %v14410_v20, %s19015_s25 }
 0xd34   :  { %3429 = vrot.lane.b32.xlu1 %v14408_v19, %s19015_s25 }
 0xd37   :  { %3431 = vrot.lane.b32.xlu0 %v14416_v23, %s19015_s25 }
 0xd38   :  { %3425 = vrot.lane.b32.xlu1 %v14392_v8, %s19015_s25 }
 0xd3b   :  { %3427 = vrot.lane.b32.xlu0 %v19088_v38, %s19015_s25 }
 0xd3c   :  { %3608 = vrot.lane.b32.xlu1 %v14426_v33, %s19021_s23 }
 0xd40   :  { %3606 = vrot.lane.b32.xlu1 %v14430_v36, %s19021_s23 }
 0xd51   :  { %v2914_v16 = vpop.xlane.xlu0 %2913 }
 0xd52   :  { %13573 = vrcp.f32 %v2914_v16 }
 0xd53   :  { %v2911_v19 = vpop.xlane.xlu1 %2910 }
 0xd54   :  { %13575 = vrcp.f32 %v2911_v19 }
 0xd5f   :  { %v13574_v20 = vpop.eup %13573 }
 0xd60   :  { %v2942_v23 = vmul.f32 %v13574_v20, %v2914_v16 }
 0xd61   :  { %v13576_v9 = vpop.eup %13575 }
 0xd62   :  { %v2950_v25 = vsub.f32 2.0, %v2942_v23  ;;  %v2941_v8 = vmul.f32 %v13576_v9, %v2911_v19 }
 0xd64   :  { %v2958_v34 = vmul.f32 %v13574_v20, %v2950_v25  ;;  %v2949_v63 = vsub.f32 2.0, %v2941_v8 }
 0xd66   :  { %v2966_v38 = vmul.f32 %v15408_v51, %v2958_v34  ;;  %v2957_v0 = vmul.f32 %v13576_v9, %v2949_v63  ;;  %v3158_v51 = vpop.permute.xlu0 %3157 }
 0xd68   :  { %2975 = vst.msk [vmem:[#allocation2 + $0x188] sm:$0xff] %vm654_vm2, %v2966_v38  ;;  %v2965_v26 = vmul.f32 %v15412_v59, %v2957_v0  ;;  %v3156_v59 = vpop.permute.xlu1 %3155 }
 0xd6a   :  { %2974 = vst.msk [vmem:[#allocation2 + $0x180] sm:$0xff] %vm654_vm2, %v2965_v26  ;;  %12536 = vmatprep.mubr.msk.f32.mxu1 %vm654_vm2, %v2965_v26 }
 0xd6b   :  { %12537 = vmatmul.mubr.msk.f32.vlgmr.msra.gmra.mxu1 %vm654_vm2, %v2966_v38 }
 0xd6c   :  { %12549 = vmatpush3.xpose.msk.msra.mxu1 %vm94_vm0, %v15373_v24 }
 0xd6d   :  { %12550 = vmatprep.subr.msk.mxu1 %vm94_vm0, %v15406_v55 }
 0xd70   :  { %12551 = vmatpush3.xpose.msk.msra.mxu1 %vm94_vm0, %v15406_v55 }
 0xd71   :  { %12552 = vmatprep.subr.msk.mxu1 %vm94_vm0, %v3162_v12 }
 0xd74   :  { %12553 = vmatpush3.xpose.msk.msra.mxu1 %vm94_vm0, %v3162_v12 }
 0xd75   :  { %12554 = vmatprep.subr.msk.mxu1 %vm94_vm0, %v3160_v15 }
 0xd78   :  { %12555 = vmatpush3.xpose.msk.msra.mxu1 %vm94_vm0, %v3160_v15 }
 0xd79   :  { %12556 = vmatprep.subr.msk.mxu1 %vm94_vm0, %v3158_v51 }
 0xd7c   :  { %12557 = vmatpush3.xpose.msk.msra.mxu1 %vm94_vm0, %v3158_v51 }
 0xd7d   :  { %12558 = vmatprep.subr.msk.mxu1 %vm94_vm0, %v3156_v59 }
 0xd80   :  { %12559 = vmatpush3.xpose.msk.msra.mxu1 %vm94_vm0, %v3156_v59 }
 0xd86   :  { %v2920_v24 = vpop.xlane.xlu0 %2919 }
 0xd87   :  { %13577 = vrcp.f32 %v2920_v24 }
 0xd88   :  { %v2923_v55 = vpop.xlane.xlu1 %2922 }
 0xd89   :  { %13579 = vrcp.f32 %v2923_v55 }
 0xd8a   :  { %v2917_v11 = vpop.xlane.xlu0 %2916 }
 0xd8b   :  { %13581 = vrcp.f32 %v2917_v11 }
 0xd8c   :  { %v2929_v18 = vpop.xlane.xlu1 %2928 }
 0xd8d   :  { %13583 = vrcp.f32 %v2929_v18 }
 0xd8e   :  { %v2926_v4 = vpop.xlane.xlu0 %2925 }
 0xd8f   :  { %13585 = vrcp.f32 %v2926_v4 }
 0xd90   :  { %v3152_v46 = vpop.permute.xlu1 %3151 }
 0xd92   :  { %v2932_v10 = vpop.xlane.xlu0 %2931 }
 0xd93   :  { %13587 = vrcp.f32 %v2932_v10 }
 0xd94   :  { %v13578_v28 = vpop.eup %13577  ;;  %v15504_v47 = vpop.permute.xlu1 %3137 }
 0xd95   :  { %v2944_v48 = vmul.f32 %v13578_v28, %v2920_v24 }
 0xd96   :  { %v13580_v57 = vpop.eup %13579  ;;  %v3154_v52 = vpop.permute.xlu0 %3153 }
 0xd97   :  { %v2952_v1 = vsub.f32 2.0, %v2944_v48  ;;  %v2945_v30 = vmul.f32 %v13580_v57, %v2923_v55  ;;  %12560 = vmatprep.subr.msk.mxu1 %vm94_vm0, %v3154_v52 }
 0xd98   :  { %v13582_v12 = vpop.eup %13581  ;;  %12561 = vmatpush3.xpose.msk.msra.mxu1 %vm94_vm0, %v3154_v52  ;;  %v15508_v15 = vpop.permute.xlu1 %3141 }
 0xd99   :  { %v2960_v16 = vmul.f32 %v13578_v28, %v2952_v1  ;;  %v2953_v19 = vsub.f32 2.0, %v2945_v30  ;;  %v2943_v20 = vmul.f32 %v13582_v12, %v2917_v11  ;;  %12562 = vmatprep.subr.msk.mxu1 %vm94_vm0, %v3152_v46 }
 0xd9a   :  { %v13584_v23 = vpop.eup %13583  ;;  %v3136_v9 = vpop.permute.xlu0 %3135 }
 0xd9b   :  { %v2961_v25 = vmul.f32 %v13580_v57, %v2953_v19  ;;  %v2951_v8 = vsub.f32 2.0, %v2943_v20  ;;  %v2947_v34 = vmul.f32 %v13584_v23, %v2929_v18  ;;  %v2968_v63 = vmul.f32 %v15420_v32, %v2960_v16 }
 0xd9c   :  { %v13586_v38 = vpop.eup %13585  ;;  %12563 = vmatpush3.xpose.msk.msra.mxu1 %vm94_vm0, %v3152_v46  ;;  %v3146_v0 = vpop.permute.xlu1 %3145 }
 0xd9d   :  { %v2959_v26 = vmul.f32 %v13582_v12, %v2951_v8  ;;  %v2955_v51 = vsub.f32 2.0, %v2947_v34  ;;  %v2946_v59 = vmul.f32 %v13586_v38, %v2926_v4  ;;  %2977 = vst.msk [vmem:[#allocation2 + $0x198] sm:$0xff] %vm654_vm2, %v2968_v63  ;;  %v2969_v24 = vmul.f32 %v15422_v31, %v2961_v25 }
 0xd9e   :  { %v3140_v55 = vpop.permute.xlu0 %3139 }
 0xd9f   :  { %v2963_v11 = vmul.f32 %v13584_v23, %v2955_v51  ;;  %v2954_v28 = vsub.f32 2.0, %v2946_v59  ;;  %v2967_v48 = vmul.f32 %v15426_v2, %v2959_v26  ;;  %2978 = vst.msk [vmem:[#allocation2 + $0x1a0] sm:$0xff] %vm654_vm2, %v2969_v24 }
 0xda0   :  { %v13588_v18 = vpop.eup %13587  ;;  %v3150_v32 = vpop.permute.xlu1 %3149 }
 0xda1   :  { %v2962_v57 = vmul.f32 %v13586_v38, %v2954_v28  ;;  %v2948_v52 = vmul.f32 %v13588_v18, %v2932_v10  ;;  %2976 = vst.msk [vmem:[#allocation2 + $0x190] sm:$0xff] %vm654_vm2, %v2967_v48  ;;  %12539 = vmatprep.mubr.msk.f32.mxu1 %vm654_vm2, %v2967_v48  ;;  %v2971_v4 = vmul.f32 %v15430_v50, %v2963_v11 }
 0xda2   :  { %v3144_v46 = vpop.permute.xlu0 %3143  ;;  %12540 = vmatmul.mubr.msk.f32.gmra.mxu1 %vm654_vm2, %v2968_v63 }
 0xda3   :  { %v2956_v31 = vsub.f32 2.0, %v2948_v52  ;;  %12542 = vmatprep.mubr.msk.f32.mxu1 %vm654_vm2, %v2969_v24  ;;  %v2970_v2 = vmul.f32 %v15434_v53, %v2962_v57  ;;  %2980 = vst.msk [vmem:[#allocation2 + $0x1b0] sm:$0xff] %vm654_vm2, %v2971_v4 }
 0xda4   :  { %v3440_v1 = vpop.permute.xlu1 %3439 }
 0xda5   :  { %v2964_v30 = vmul.f32 %v13588_v18, %v2956_v31  ;;  %12576 = vmatprep.subr.mxu0 %v3440_v1  ;;  %2979 = vst.msk [vmem:[#allocation2 + $0x1a8] sm:$0xff] %vm654_vm2, %v2970_v2 }
 0xda6   :  { %v3148_v10 = vpop.permute.xlu0 %3147  ;;  %12543 = vmatmul.mubr.msk.f32.gmra.mxu1 %vm654_vm2, %v2970_v2  ;;  %12577 = vmatpush3.msra.mxu0 %v3440_v1 }
 0xda7   :  { %12545 = vmatprep.mubr.msk.f32.mxu1 %vm654_vm2, %v2971_v4  ;;  %v2972_v50 = vmul.f32 %v15440_v43, %v2964_v30 }
 0xda8   :  { %v3436_v12 = vpop.permute.xlu1 %3435 }
 0xda9   :  { %2981 = vst.msk [vmem:[#allocation2 + $0x1b8] sm:$0xff] %vm654_vm2, %v2972_v50 }
 0xdaa   :  { %v3438_v16 = vpop.permute.xlu0 %3437  ;;  %12546 = vmatmul.mubr.msk.f32.gmra.mxu1 %vm654_vm2, %v2972_v50 }
 0xdab   :  { %12564 = vmatprep.mubr.msk.f32.mxu1 %vm94_vm0, %v3136_v9  ;;  %12578 = vmatprep.subr.mxu0 %v3438_v16 }
 0xdac   :  { %12579 = vmatpush3.msra.mxu0 %v3438_v16  ;;  %v3434_v53 = vpop.permute.xlu1 %3433 }
 0xdad   :  { %12580 = vmatprep.subr.mxu0 %v3436_v12 }
 0xdae   :  { %v3432_v19 = vpop.permute.xlu0 %3431  ;;  %12565 = vmatmul.mubr.msk.f32.vlgmr.msra.gmra.mxu1 %vm94_vm0, %v15504_v47  ;;  %12581 = vmatpush3.msra.mxu0 %v3436_v12 }
 0xdaf   :  { %12567 = vmatprep.mubr.msk.f32.mxu1 %vm94_vm0, %v3140_v55  ;;  %12582 = vmatprep.subr.mxu0 %v3434_v53 }
 0xdb0   :  { %12583 = vmatpush3.msra.mxu0 %v3434_v53  ;;  %v3430_v43 = vpop.permute.xlu1 %3429 }
 0xdb1   :  { %12584 = vmatprep.subr.mxu0 %v3432_v19 }
 0xdb2   :  { %12568 = vmatmul.mubr.msk.f32.gmra.mxu1 %vm94_vm0, %v15508_v15  ;;  %12585 = vmatpush3.msra.mxu0 %v3432_v19  ;;  %v3428_v20 = vpop.permute.xlu0 %3427 }
 0xdb3   :  { %12570 = vmatprep.mubr.msk.f32.mxu1 %vm94_vm0, %v3144_v46  ;;  %12586 = vmatprep.subr.mxu0 %v3430_v43 }
 0xdb4   :  { %12587 = vmatpush3.msra.mxu0 %v3430_v43  ;;  %v3426_v23 = vpop.permute.xlu1 %3425 }
 0xdb5   :  { %12588 = vmatprep.subr.mxu0 %v3428_v20 }
 0xdb6   :  { %12571 = vmatmul.mubr.msk.f32.gmra.mxu1 %vm94_vm0, %v3146_v0  ;;  %12589 = vmatpush3.msra.mxu0 %v3428_v20 }
 0xdb7   :  { %12573 = vmatprep.mubr.msk.f32.mxu1 %vm94_vm0, %v3148_v10  ;;  %12590 = vmatprep.subr.mxu0 %v3426_v23 }
 0xdb8   :  { %12591 = vmatpush3.msra.mxu0 %v3426_v23  ;;  %v15539_v47 = vpop.permute.xlu1 %3608 }
 0xdb9   :  { %12604 = vmatprep.subr.msk.mxu0 %vm94_vm0, %v15539_v47 }
 0xdba   :  { %12574 = vmatmul.mubr.msk.f32.gmra.mxu1 %vm94_vm0, %v3150_v32 }
 0xdbc   :  { %v15572_v1 = vpop.permute.xlu1 %3606 }
 0xe2b   :  { %v15544_v15 = vpop.f32.mrf.mxu1 }
 0xe2d   :  { %v15546_v9 = vpop.f32.mrf.mxu1 }
 0xe62   :  { %v15548_v25 = vpop.f32.mrf.mxu1 }
 0xe64   :  { %v15550_v8 = vpop.f32.mrf.mxu1 }
 0xe66   :  { %v15552_v34 = vpop.f32.mrf.mxu1 }
 0xe68   :  { %v15554_v63 = vpop.f32.mrf.mxu1 }
 0xe6a   :  { %v15556_v38 = vpop.f32.mrf.mxu1 }
 0xe6c   :  { %v15558_v0 = vpop.f32.mrf.mxu1 }
 0xe6d   :  { %19093 = vst [vmem:[#allocation44_spill] sm:$0xff] %v15558_v0 }
 0xe6e   :  { %v12566_v26 = vpop.f32.mrf.mxu1 }
 0xe6f   :  { %v3307_v51 = vsel %vm654_vm2, %v12566_v26, -inf }
 0xe70   :  { %3308 = vmax.xlane.f32.xlu1 %v3307_v51  ;;  %v3265_v59 = vpop.f32.mrf.mxu1 }
 0xe71   :  { %v3304_v24 = vsel %vm654_vm2, %v3265_v59, -inf }
 0xe72   :  { %3305 = vmax.xlane.f32.xlu0 %v3304_v24  ;;  %v12569_v55 = vpop.f32.mrf.mxu1 }
 0xe73   :  { %v3313_v28 = vsel %vm654_vm2, %v12569_v55, -inf }
 0xe74   :  { %v3275_v11 = vpop.f32.mrf.mxu1 }
 0xe75   :  { %v3310_v32 = vsel %vm654_vm2, %v3275_v11, -inf }
 0xe76   :  { %3314 = vmax.xlane.f32.xlu0 %v3313_v28  ;;  %v12572_v48 = vpop.f32.mrf.mxu1 }
 0xe77   :  { %v3319_v46 = vsel %vm654_vm2, %v12572_v48, -inf }
 0xe78   :  { %v3285_v18 = vpop.f32.mrf.mxu1 }
 0xe79   :  { %v3316_v57 = vsel %vm654_vm2, %v3285_v18, -inf }
 0xe7a   :  { %3311 = vmax.xlane.f32.xlu0 %v3310_v32  ;;  %3317 = vmax.xlane.f32.xlu1 %v3316_v57  ;;  %v12575_v52 = vpop.f32.mrf.mxu1 }
 0xe7b   :  { %v3325_v2 = vsel %vm654_vm2, %v12575_v52, -inf }
 0xe7c   :  { %v3295_v4 = vpop.f32.mrf.mxu1 }
 0xe7d   :  { %v3322_v31 = vsel %vm654_vm2, %v3295_v4, -inf }
 0xe7e   :  { %3320 = vmax.xlane.f32.xlu0 %v3319_v46  ;;  %3323 = vmax.xlane.f32.xlu1 %v3322_v31 }
 0xe82   :  { %3326 = vmax.xlane.f32.xlu0 %v3325_v2 }
 0xe8f   :  { %3602 = vrot.lane.b32.xlu1 %v14434_v39, %s19021_s23 }
 0xe98   :  { %3604 = vrot.lane.b32.xlu0 %v14428_v35, %s19021_s23 }
 0xef9   :  { %v3309_v30 = vpop.xlane.xlu1 %3308 }
 0xefa   :  { %v3329_v10 = vsub.f32 %v12566_v26, %v3309_v30 }
 0xefb   :  { %v3306_v50 = vpop.xlane.xlu0 %3305 }
 0xefc   :  { %v3338_v12 = vmul.f32 1.442695, %v3329_v10  ;;  %v3328_v16 = vsub.f32 %v3265_v59, %v3306_v50 }
 0xefe   :  { %13589 = vpow2.f32 %v3338_v12  ;;  %v3336_v53 = vmul.f32 1.442695, %v3328_v16 }
 0xeff   :  { %v3315_v51 = vpop.xlane.xlu0 %3314 }
 0xf00   :  { %13591 = vpow2.f32 %v3336_v53  ;;  %v3331_v24 = vsub.f32 %v12569_v55, %v3315_v51 }
 0xf02   :  { %v3342_v46 = vmul.f32 1.442695, %v3331_v24 }
 0xf03   :  { %v3312_v26 = vpop.xlane.xlu0 %3311  ;;  %v3318_v59 = vpop.xlane.xlu1 %3317 }
 0xf04   :  { %v3332_v28 = vsub.f32 %v3285_v18, %v3318_v59  ;;  %v3330_v31 = vsub.f32 %v3275_v11, %v3312_v26  ;;  %13593 = vpow2.f32 %v3342_v46 }
 0xf06   :  { %v3344_v2 = vmul.f32 1.442695, %v3332_v28  ;;  %v3340_v10 = vmul.f32 1.442695, %v3330_v31 }
 0xf07   :  { %v3321_v32 = vpop.xlane.xlu0 %3320  ;;  %v3324_v57 = vpop.xlane.xlu1 %3323 }
 0xf08   :  { %v3334_v30 = vsub.f32 %v3295_v4, %v3324_v57  ;;  %v3333_v50 = vsub.f32 %v12572_v48, %v3321_v32  ;;  %13595 = vpow2.f32 %v3344_v2 }
 0xf09   :  { %13597 = vpow2.f32 %v3340_v10 }
 0xf0a   :  { %v3348_v16 = vmul.f32 1.442695, %v3334_v30  ;;  %v3346_v53 = vmul.f32 1.442695, %v3333_v50 }
 0xf0b   :  { %v15574_v19 = vpop.eup %13589  ;;  %v3327_v12 = vpop.xlane.xlu0 %3326 }
 0xf0c   :  { %v3355_v43 = vsel %vm654_vm2, %v15574_v19, 0.0  ;;  %13599 = vpow2.f32 %v3348_v16  ;;  %v3603_v46 = vpop.permute.xlu1 %3602 }
 0xf0d   :  { %v15578_v20 = vpop.eup %13591  ;;  %3356 = vadd.xlane.f32.xlu0 %v3355_v43  ;;  %v3335_v43 = vsub.f32 %v12575_v52, %v3327_v12  ;;  %13601 = vpow2.f32 %v3346_v53 }
 0xf0e   :  { %v3352_v23 = vsel %vm654_vm2, %v15578_v20, 0.0 }
 0xf0f   :  { %3353 = vadd.xlane.f32.xlu1 %v3352_v23  ;;  %v3350_v23 = vmul.f32 1.442695, %v3335_v43  ;;  %v3605_v57 = vpop.permute.xlu0 %3604 }
 0xf11   :  { %13603 = vpow2.f32 %v3350_v23  ;;  %v15586_v55 = vpop.eup %13593 }
 0xf12   :  { %v3361_v11 = vsel %vm654_vm2, %v15586_v55, 0.0 }
 0xf15   :  { %v15588_v18 = vpop.eup %13595 }
 0xf16   :  { %v15592_v4 = vpop.eup %13597  ;;  %v3364_v48 = vsel %vm654_vm2, %v15588_v18, 0.0 }
 0xf17   :  { %v3358_v52 = vsel %vm654_vm2, %v15592_v4, 0.0 }
 0xf19   :  { %v15596_v51 = vpop.eup %13599 }
 0xf1a   :  { %v15600_v26 = vpop.eup %13601  ;;  %v3370_v59 = vsel %vm654_vm2, %v15596_v51, 0.0 }
 0xf1b   :  { %v3367_v24 = vsel %vm654_vm2, %v15600_v26, 0.0 }
 0xf1e   :  { %v15606_v28 = vpop.eup %13603 }
 0xf1f   :  { %v3373_v32 = vsel %vm654_vm2, %v15606_v28, 0.0 }
 0xf20   :  { %3598 = vrot.lane.b32.xlu1 %v14444_v41, %s19021_s23 }
 0xf23   :  { %3600 = vrot.lane.b32.xlu0 %v14440_v40, %s19021_s23 }
 0xf42   :  { %3362 = vadd.xlane.f32.xlu0 %v3361_v11 }
 0xf44   :  { %3365 = vadd.xlane.f32.xlu1 %v3364_v48 }
 0xf46   :  { %3359 = vadd.xlane.f32.xlu0 %v3358_v52 }
 0xf48   :  { %3371 = vadd.xlane.f32.xlu1 %v3370_v59 }
 0xf4a   :  { %3368 = vadd.xlane.f32.xlu0 %v3367_v24 }
 0xf4e   :  { %3374 = vadd.xlane.f32.xlu0 %v3373_v32 }
 0xf59   :  { %3594 = vrot.lane.b32.xlu1 %v14452_v44, %s19021_s23 }
 0xf5d   :  { %3580 = vrot.lane.b32.xlu1 %v14448_v42, %s19017_s24 }
 0xf61   :  { %3584 = vrot.lane.b32.xlu1 %v14440_v40, %s19017_s24 }
 0xf64   :  { %3596 = vrot.lane.b32.xlu0 %v14448_v42, %s19021_s23  ;;  %s10831_s23 = sshll.u32 %s14096_s1, 4  ;;  %s10832_s23 = int_to_ptr.vmem [resolvable:$true] %s10831_s23 }
 0xf65   :  { %3588 = vrot.lane.b32.xlu1 %v14428_v35, %s19017_s24 }
 0xf68   :  { %3578 = vrot.lane.b32.xlu0 %v14452_v44, %s19017_s24 }
 0xf69   :  { %3592 = vrot.lane.b32.xlu1 %v14426_v33, %s19017_s24 }
 0xf6c   :  { %3582 = vrot.lane.b32.xlu0 %v14444_v41, %s19017_s24 }
 0xf70   :  { %3586 = vrot.lane.b32.xlu0 %v14434_v39, %s19017_s24 }
 0xf74   :  { %3590 = vrot.lane.b32.xlu0 %v14430_v36, %s19017_s24 }
 0xf96   :  { %v3357_v31 = vpop.xlane.xlu0 %3356 }
 0xf97   :  { %13605 = vrcp.f32 %v3357_v31 }
 0xf98   :  { %v3354_v2 = vpop.xlane.xlu1 %3353 }
 0xf99   :  { %13607 = vrcp.f32 %v3354_v2 }
 0xfa4   :  { %v13606_v30 = vpop.eup %13605 }
 0xfa5   :  { %v3385_v10 = vmul.f32 %v13606_v30, %v3357_v31 }
 0xfa6   :  { %v13608_v50 = vpop.eup %13607 }
 0xfa7   :  { %v3393_v12 = vsub.f32 2.0, %v3385_v10  ;;  %v3384_v16 = vmul.f32 %v13608_v50, %v3354_v2 }
 0xfa9   :  { %v3401_v53 = vmul.f32 %v13606_v30, %v3393_v12  ;;  %v3392_v43 = vsub.f32 2.0, %v3384_v16 }
 0xfab   :  { %v3409_v23 = vmul.f32 %v15574_v19, %v3401_v53  ;;  %v3400_v11 = vmul.f32 %v13608_v50, %v3392_v43  ;;  %v3601_v19 = vpop.permute.xlu0 %3600 }
 0xfad   :  { %3418 = vst.msk [vmem:[#allocation2 + $0xc8] sm:$0xff] %vm654_vm2, %v3409_v23  ;;  %v3408_v48 = vmul.f32 %v15578_v20, %v3400_v11  ;;  %v3599_v20 = vpop.permute.xlu1 %3598 }
 0xfaf   :  { %3417 = vst.msk [vmem:[#allocation2 + $0xc0] sm:$0xff] %vm654_vm2, %v3408_v48  ;;  %12592 = vmatprep.mubr.msk.f32.mxu0 %vm654_vm2, %v3408_v48 }
 0xfb0   :  { %12593 = vmatmul.mubr.msk.f32.vlgmr.msra.gmra.mxu0 %vm654_vm2, %v3409_v23 }
 0xfb1   :  { %12605 = vmatpush3.xpose.msk.msra.mxu0 %vm94_vm0, %v15539_v47 }
 0xfb2   :  { %12606 = vmatprep.subr.msk.mxu0 %vm94_vm0, %v15572_v1 }
 0xfb5   :  { %12607 = vmatpush3.xpose.msk.msra.mxu0 %vm94_vm0, %v15572_v1 }
 0xfb6   :  { %12608 = vmatprep.subr.msk.mxu0 %vm94_vm0, %v3605_v57 }
 0xfb9   :  { %12609 = vmatpush3.xpose.msk.msra.mxu0 %vm94_vm0, %v3605_v57 }
 0xfba   :  { %12610 = vmatprep.subr.msk.mxu0 %vm94_vm0, %v3603_v46 }
 0xfbd   :  { %12611 = vmatpush3.xpose.msk.msra.mxu0 %vm94_vm0, %v3603_v46 }
 0xfbe   :  { %12612 = vmatprep.subr.msk.mxu0 %vm94_vm0, %v3601_v19 }
 0xfc1   :  { %12613 = vmatpush3.xpose.msk.msra.mxu0 %vm94_vm0, %v3601_v19 }
 0xfc2   :  { %12614 = vmatprep.subr.msk.mxu0 %vm94_vm0, %v3599_v20 }
 0xfc5   :  { %12615 = vmatpush3.xpose.msk.msra.mxu0 %vm94_vm0, %v3599_v20 }
 0xfcb   :  { %v3363_v47 = vpop.xlane.xlu0 %3362 }
 0xfcc   :  { %13609 = vrcp.f32 %v3363_v47 }
 0xfcd   :  { %v3366_v1 = vpop.xlane.xlu1 %3365 }
 0xfce   :  { %13611 = vrcp.f32 %v3366_v1 }
 0xfcf   :  { %v3360_v52 = vpop.xlane.xlu0 %3359 }
 0xfd0   :  { %13613 = vrcp.f32 %v3360_v52 }
 0xfd1   :  { %v3372_v59 = vpop.xlane.xlu1 %3371 }
 0xfd2   :  { %13615 = vrcp.f32 %v3372_v59 }
 0xfd3   :  { %v3369_v24 = vpop.xlane.xlu0 %3368 }
 0xfd4   :  { %13617 = vrcp.f32 %v3369_v24 }
 0xfd5   :  { %v3595_v12 = vpop.permute.xlu1 %3594 }
 0xfd7   :  { %v3375_v32 = vpop.xlane.xlu0 %3374 }
 0xfd8   :  { %13619 = vrcp.f32 %v3375_v32 }
 0xfd9   :  { %v13610_v57 = vpop.eup %13609 }
 0xfda   :  { %v3387_v46 = vmul.f32 %v13610_v57, %v3363_v47 }
 0xfdb   :  { %v13612_v31 = vpop.eup %13611  ;;  %v3597_v2 = vpop.permute.xlu0 %3596 }
 0xfdc   :  { %v3395_v30 = vsub.f32 2.0, %v3387_v46  ;;  %v3388_v10 = vmul.f32 %v13612_v31, %v3366_v1  ;;  %12616 = vmatprep.subr.msk.mxu0 %vm94_vm0, %v3597_v2 }
 0xfdd   :  { %v13614_v50 = vpop.eup %13613  ;;  %12617 = vmatpush3.xpose.msk.msra.mxu0 %vm94_vm0, %v3597_v2 }
 0xfde   :  { %v3403_v16 = vmul.f32 %v13610_v57, %v3395_v30  ;;  %v3396_v53 = vsub.f32 2.0, %v3388_v10  ;;  %v3386_v43 = vmul.f32 %v13614_v50, %v3360_v52  ;;  %12618 = vmatprep.subr.msk.mxu0 %vm94_vm0, %v3595_v12 }
 0xfdf   :  { %v13616_v23 = vpop.eup %13615 }
 0xfe0   :  { %v3404_v11 = vmul.f32 %v13612_v31, %v3396_v53  ;;  %v3394_v48 = vsub.f32 2.0, %v3386_v43  ;;  %v3390_v19 = vmul.f32 %v13616_v23, %v3372_v59  ;;  %v3411_v20 = vmul.f32 %v15586_v55, %v3403_v16 }
 0xfe1   :  { %v13618_v47 = vpop.eup %13617  ;;  %12619 = vmatpush3.xpose.msk.msra.mxu0 %vm94_vm0, %v3595_v12 }
 0xfe2   :  { %v3402_v1 = vmul.f32 %v13614_v50, %v3394_v48  ;;  %v3398_v46 = vsub.f32 2.0, %v3390_v19  ;;  %v3389_v0 = vmul.f32 %v13618_v47, %v3369_v24  ;;  %3420 = vst.msk [vmem:[#allocation2 + $0xd8] sm:$0xff] %vm654_vm2, %v3411_v20  ;;  %v3412_v57 = vmul.f32 %v15588_v18, %v3404_v11  ;;  %v3579_v18 = vpop.permute.xlu0 %3578 }
 0xfe4   :  { %v3406_v2 = vmul.f32 %v13616_v23, %v3398_v46  ;;  %v3397_v52 = vsub.f32 2.0, %v3389_v0  ;;  %v3410_v30 = vmul.f32 %v15592_v4, %v3402_v1  ;;  %3421 = vst.msk [vmem:[#allocation2 + $0xe0] sm:$0xff] %vm654_vm2, %v3412_v57 }
 0xfe5   :  { %v13620_v31 = vpop.eup %13619 }
 0xfe6   :  { %v3405_v59 = vmul.f32 %v13618_v47, %v3397_v52  ;;  %v3391_v10 = vmul.f32 %v13620_v31, %v3375_v32  ;;  %3419 = vst.msk [vmem:[#allocation2 + $0xd0] sm:$0xff] %vm654_vm2, %v3410_v30  ;;  %12595 = vmatprep.mubr.msk.f32.mxu0 %vm654_vm2, %v3410_v30  ;;  %v3414_v55 = vmul.f32 %v15596_v51, %v3406_v2  ;;  %v3581_v32 = vpop.permute.xlu1 %3580  ;;  %v3583_v50 = vpop.permute.xlu0 %3582 }
 0xfe7   :  { %12596 = vmatmul.mubr.msk.f32.gmra.mxu0 %vm654_vm2, %v3411_v20 }
 0xfe8   :  { %v3399_v24 = vsub.f32 2.0, %v3391_v10  ;;  %12598 = vmatprep.mubr.msk.f32.mxu0 %vm654_vm2, %v3412_v57  ;;  %v3413_v0 = vmul.f32 %v15600_v26, %v3405_v59  ;;  %3423 = vst.msk [vmem:[#allocation2 + $0xf0] sm:$0xff] %vm654_vm2, %v3414_v55 }
 0xfea   :  { %v3407_v4 = vmul.f32 %v13620_v31, %v3399_v24  ;;  %3422 = vst.msk [vmem:[#allocation2 + $0xe8] sm:$0xff] %vm654_vm2, %v3413_v0  ;;  %v3585_v26 = vpop.permute.xlu1 %3584  ;;  %v3587_v12 = vpop.permute.xlu0 %3586 }
 0xfeb   :  { %12599 = vmatmul.mubr.msk.f32.gmra.mxu0 %vm654_vm2, %v3413_v0 }
 0xfec   :  { %12601 = vmatprep.mubr.msk.f32.mxu0 %vm654_vm2, %v3414_v55  ;;  %v3415_v51 = vmul.f32 %v15606_v28, %v3407_v4 }
 0xfee   :  { %3424 = vst.msk [vmem:[#allocation2 + $0xf8] sm:$0xff] %vm654_vm2, %v3415_v51  ;;  %v3589_v16 = vpop.permute.xlu1 %3588  ;;  %v3591_v53 = vpop.permute.xlu0 %3590 }
 0xfef   :  { %12602 = vmatmul.mubr.msk.f32.gmra.mxu0 %vm654_vm2, %v3415_v51 }
 0xff0   :  { %12620 = vmatprep.mubr.msk.f32.mxu0 %vm94_vm0, %v3579_v18 }
 0xff2   :  { %v3593_v28 = vpop.permute.xlu1 %3592 }
 0xff3   :  { %12621 = vmatmul.mubr.msk.f32.vlgmr.msra.gmra.mxu0 %vm94_vm0, %v3581_v32 }
 0xff4   :  { %12623 = vmatprep.mubr.msk.f32.mxu0 %vm94_vm0, %v3583_v50 }
 0xff7   :  { %12624 = vmatmul.mubr.msk.f32.gmra.mxu0 %vm94_vm0, %v3585_v26 }
 0xff8   :  { %12626 = vmatprep.mubr.msk.f32.mxu0 %vm94_vm0, %v3587_v12 }
 0xffb   :  { %12627 = vmatmul.mubr.msk.f32.gmra.mxu0 %vm94_vm0, %v3589_v16 }
 0xffc   :  { %12629 = vmatprep.mubr.msk.f32.mxu0 %vm94_vm0, %v3591_v53 }
 0xfff   :  { %12630 = vmatmul.mubr.msk.f32.gmra.mxu0 %vm94_vm0, %v3593_v28 }
0x1070   :  { %v15680_v43 = vpop.f32.mrf.mxu0 }
0x1072   :  { %v15682_v23 = vpop.f32.mrf.mxu0 }
0x10a7   :  { %v15684_v11 = vpop.f32.mrf.mxu0 }
0x10a9   :  { %v15686_v48 = vpop.f32.mrf.mxu0 }
0x10ab   :  { %v15688_v19 = vpop.f32.mrf.mxu0 }
0x10ad   :  { %v15690_v20 = vpop.f32.mrf.mxu0 }
0x10af   :  { %v15692_v47 = vpop.f32.mrf.mxu0 }
0x10b1   :  { %v15694_v1 = vpop.f32.mrf.mxu0 }
0x10b3   :  { %v12622_v46 = vpop.f32.mrf.mxu0 }
0x10b4   :  { %v3750_v57 = vsel %vm654_vm2, %v12622_v46, -inf }
0x10b5   :  { %3751 = vmax.xlane.f32.xlu1 %v3750_v57  ;;  %v3708_v2 = vpop.f32.mrf.mxu0 }
0x10b6   :  { %v3747_v52 = vsel %vm654_vm2, %v3708_v2, -inf }
0x10b7   :  { %3748 = vmax.xlane.f32.xlu0 %v3747_v52  ;;  %v12625_v30 = vpop.f32.mrf.mxu0 }
0x10b8   :  { %v3756_v24 = vsel %vm654_vm2, %v12625_v30, -inf }
0x10b9   :  { %v3718_v31 = vpop.f32.mrf.mxu0 }
0x10ba   :  { %v3753_v59 = vsel %vm654_vm2, %v3718_v31, -inf }
0x10bb   :  { %3754 = vmax.xlane.f32.xlu0 %v3753_v59  ;;  %v12628_v10 = vpop.f32.mrf.mxu0 }
0x10bc   :  { %v3762_v32 = vsel %vm654_vm2, %v12628_v10, -inf }
0x10bd   :  { %v3728_v55 = vpop.f32.mrf.mxu0 }
0x10be   :  { %v3759_v0 = vsel %vm654_vm2, %v3728_v55, -inf }
0x10bf   :  { %3757 = vmax.xlane.f32.xlu0 %v3756_v24  ;;  %3760 = vmax.xlane.f32.xlu1 %v3759_v0  ;;  %v12631_v18 = vpop.f32.mrf.mxu0 }
0x10c0   :  { %v3768_v50 = vsel %vm654_vm2, %v12631_v18, -inf }
0x10c1   :  { %v3738_v4 = vpop.f32.mrf.mxu0 }
0x10c2   :  { %v3765_v51 = vsel %vm654_vm2, %v3738_v4, -inf }
0x10c3   :  { %3763 = vmax.xlane.f32.xlu0 %v3762_v32  ;;  %3766 = vmax.xlane.f32.xlu1 %v3765_v51 }
0x10c7   :  { %3769 = vmax.xlane.f32.xlu0 %v3768_v50 }
0x10d4   :  { %3882 = vrot.lane.b32.xlu1 %v14426_v33, %s19015_s25 }
0x10d8   :  { %3878 = vrot.lane.b32.xlu1 %v14428_v35, %s19015_s25 }
0x10dc   :  { %3876 = vrot.lane.b32.xlu1 %v14434_v39, %s19015_s25 }
0x10dd   :  { %3880 = vrot.lane.b32.xlu0 %v14430_v36, %s19015_s25 }
0x10e0   :  { %3872 = vrot.lane.b32.xlu1 %v14444_v41, %s19015_s25 }
0x10e1   :  { %3874 = vrot.lane.b32.xlu0 %v14440_v40, %s19015_s25 }
0x113e   :  { %v3752_v26 = vpop.xlane.xlu1 %3751 }
0x113f   :  { %v3772_v12 = vsub.f32 %v12622_v46, %v3752_v26 }
0x1140   :  { %v3749_v16 = vpop.xlane.xlu0 %3748 }
0x1141   :  { %v3781_v53 = vmul.f32 1.442695, %v3772_v12  ;;  %v3771_v33 = vsub.f32 %v3708_v2, %v3749_v16 }
0x1143   :  { %13621 = vpow2.f32 %v3781_v53  ;;  %v3779_v28 = vmul.f32 1.442695, %v3771_v33 }
0x1144   :  { %v3755_v35 = vpop.xlane.xlu0 %3754 }
0x1145   :  { %13623 = vpow2.f32 %v3779_v28  ;;  %v3773_v57 = vsub.f32 %v3718_v31, %v3755_v35 }
0x1147   :  { %v3783_v39 = vmul.f32 1.442695, %v3773_v57 }
0x1148   :  { %v3758_v52 = vpop.xlane.xlu0 %3757  ;;  %v3761_v59 = vpop.xlane.xlu1 %3760 }
0x1149   :  { %13625 = vpow2.f32 %v3783_v39  ;;  %v3774_v36 = vsub.f32 %v12625_v30, %v3758_v52  ;;  %v3775_v24 = vsub.f32 %v3728_v55, %v3761_v59 }
0x114b   :  { %v3785_v41 = vmul.f32 1.442695, %v3774_v36  ;;  %v3787_v0 = vmul.f32 1.442695, %v3775_v24 }
0x114c   :  { %v3764_v32 = vpop.xlane.xlu0 %3763  ;;  %v3767_v40 = vpop.xlane.xlu1 %3766 }
0x114d   :  { %13627 = vpow2.f32 %v3785_v41  ;;  %v3776_v46 = vsub.f32 %v12628_v10, %v3764_v32  ;;  %v3777_v51 = vsub.f32 %v3738_v4, %v3767_v40 }
0x114e   :  { %13629 = vpow2.f32 %v3787_v0 }
0x114f   :  { %v3789_v2 = vmul.f32 1.442695, %v3776_v46  ;;  %v3791_v50 = vmul.f32 1.442695, %v3777_v51 }
0x1150   :  { %v15716_v26 = vpop.eup %13621  ;;  %v3770_v12 = vpop.xlane.xlu0 %3769 }
0x1151   :  { %v3883_v31 = vpop.permute.xlu1 %3882  ;;  %13631 = vpow2.f32 %v3789_v2  ;;  %v3778_v16 = vsub.f32 %v12631_v18, %v3770_v12  ;;  %v3798_v30 = vsel %vm654_vm2, %v15716_v26, 0.0 }
0x1152   :  { %12632 = vmatprep.subr.mxu1 %v3883_v31  ;;  %v15720_v55 = vpop.eup %13623  ;;  %13633 = vpow2.f32 %v3791_v50  ;;  %3799 = vadd.xlane.f32.xlu0 %v3798_v30 }
0x1153   :  { %12633 = vmatpush3.msra.mxu1 %v3883_v31  ;;  %v3793_v10 = vmul.f32 1.442695, %v3778_v16  ;;  %v3795_v4 = vsel %vm654_vm2, %v15720_v55, 0.0  ;;  %v4264_v16 = vld [vmem:[%s18975_s5 + $0x8] sm:$0xff] }
0x1154   :  { %v3881_v53 = vpop.permute.xlu0 %3880  ;;  %3796 = vadd.xlane.f32.xlu1 %v3795_v4 }
0x1155   :  { %v3879_v33 = vpop.permute.xlu1 %3878  ;;  %13635 = vpow2.f32 %v3793_v10  ;;  %12634 = vmatprep.subr.mxu1 %v3881_v53 }
0x1156   :  { %v15724_v28 = vpop.eup %13625  ;;  %12635 = vmatpush3.msra.mxu1 %v3881_v53 }
0x1157   :  { %12636 = vmatprep.subr.mxu1 %v3879_v33  ;;  %v3801_v18 = vsel %vm654_vm2, %v15724_v28, 0.0 }
0x1158   :  { %3802 = vadd.xlane.f32.xlu1 %v3801_v18  ;;  %12637 = vmatpush3.msra.mxu1 %v3879_v33  ;;  %v3875_v39 = vpop.permute.xlu0 %3874 }
0x1159   :  { %v3877_v35 = vpop.permute.xlu1 %3876 }
0x115a   :  { %12638 = vmatprep.subr.mxu1 %v3877_v35  ;;  %v15728_v57 = vpop.eup %13627 }
0x115b   :  { %12639 = vmatpush3.msra.mxu1 %v3877_v35  ;;  %v15730_v52 = vpop.eup %13629  ;;  %v3804_v59 = vsel %vm654_vm2, %v15728_v57, 0.0 }
0x115c   :  { %12640 = vmatprep.subr.mxu1 %v3875_v39  ;;  %3805 = vadd.xlane.f32.xlu0 %v3804_v59  ;;  %v3807_v36 = vsel %vm654_vm2, %v15730_v52, 0.0 }
0x115d   :  { %12641 = vmatpush3.msra.mxu1 %v3875_v39  ;;  %v3873_v24 = vpop.permute.xlu1 %3872  ;;  %3808 = vadd.xlane.f32.xlu1 %v3807_v36 }
0x115e   :  { %12642 = vmatprep.subr.mxu1 %v3873_v24  ;;  %v15736_v41 = vpop.eup %13631 }
0x115f   :  { %12643 = vmatpush3.msra.mxu1 %v3873_v24  ;;  %v15738_v0 = vpop.eup %13633  ;;  %v3810_v32 = vsel %vm654_vm2, %v15736_v41, 0.0 }
0x1160   :  { %3811 = vadd.xlane.f32.xlu0 %v3810_v32  ;;  %v3813_v40 = vsel %vm654_vm2, %v15738_v0, 0.0 }
0x1161   :  { %3814 = vadd.xlane.f32.xlu1 %v3813_v40 }
0x1162   :  { %v15744_v46 = vpop.eup %13635 }
0x1163   :  { %v3816_v51 = vsel %vm654_vm2, %v15744_v46, 0.0 }
0x1164   :  { %3817 = vadd.xlane.f32.xlu0 %v3816_v51 }
0x1172   :  { %3868 = vrot.lane.b32.xlu1 %v14452_v44, %s19015_s25  ;;  %v19095_v44 = vld [vmem:[#allocation42_spill] sm:$0xff] }
0x1176   :  { %4039 = vrot.lane.b32.xlu1 %v15046_v27, %s19013_s3  ;;  %v19096_v27 = vld [vmem:[#allocation41_spill] sm:$0xff] }
0x117a   :  { %4103 = vrot.lane.b32.xlu1 %v15378_v22, %s19011_s26  ;;  %3870 = vrot.lane.b32.xlu0 %v14448_v42, %s19015_s25  ;;  %v19094_v42 = vld [vmem:[#allocation24_spill] sm:$0xff]  ;;  %s19179_s25 = smov 24  }
0x117e   :  { %4167 = vrot.lane.b32.xlu1 %v15680_v43, %s19019_s2  ;;  %4037 = vrot.lane.b32.xlu0 %v15048_v7, %s19013_s3  ;;  %v19097_v7 = vld [vmem:[#allocation43_spill] sm:$0xff] }
0x1182   :  { %4043 = vrot.lane.b32.xlu1 %v15050_v14, %s19013_s3  ;;  %4101 = vrot.lane.b32.xlu0 %v15380_v56, %s19011_s26  ;;  %v19098_v14 = vld [vmem:[#allocation44_spill] sm:$0xff] }
0x1186   :  { %4107 = vrot.lane.b32.xlu1 %v15382_v13, %s19011_s26  ;;  %4165 = vrot.lane.b32.xlu0 %v15682_v23, %s19019_s2  ;;  %v4266_v23 = vld [vmem:[%s18975_s5 + $0x18] sm:$0xff] }
0x118a   :  { %4171 = vrot.lane.b32.xlu1 %v15684_v11, %s19019_s2  ;;  %4041 = vrot.lane.b32.xlu0 %v15052_v58, %s19013_s3 }
0x118e   :  { %4047 = vrot.lane.b32.xlu1 %v15054_v61, %s19013_s3  ;;  %4105 = vrot.lane.b32.xlu0 %v15384_v5, %s19011_s26 }
0x1192   :  { %4111 = vrot.lane.b32.xlu1 %v15386_v29, %s19011_s26  ;;  %4169 = vrot.lane.b32.xlu0 %v15686_v48, %s19019_s2 }
0x1196   :  { %4175 = vrot.lane.b32.xlu1 %v15688_v19, %s19019_s2  ;;  %4045 = vrot.lane.b32.xlu0 %v15056_v6, %s19013_s3 }
0x119a   :  { %4051 = vrot.lane.b32.xlu1 %v15058_v21, %s19013_s3  ;;  %4109 = vrot.lane.b32.xlu0 %v15388_v54, %s19011_s26 }
0x119e   :  { %4115 = vrot.lane.b32.xlu1 %v15390_v60, %s19011_s26  ;;  %4173 = vrot.lane.b32.xlu0 %v15690_v20, %s19019_s2 }
0x11a2   :  { %4179 = vrot.lane.b32.xlu1 %v15692_v47, %s19019_s2  ;;  %4049 = vrot.lane.b32.xlu0 %v15060_v17, %s19013_s3 }
0x11a6   :  { %4055 = vrot.lane.b32.xlu1 %v15212_v49, %s19013_s3  ;;  %4113 = vrot.lane.b32.xlu0 %v15392_v37, %s19011_s26 }
0x11aa   :  { %4119 = vrot.lane.b32.xlu1 %v15544_v15, %s19011_s26  ;;  %4177 = vrot.lane.b32.xlu0 %v15694_v1, %s19019_s2  ;;  %v4265_v1 = vld [vmem:[%s18975_s5 + $0x10] sm:$0xff] }
0x11ae   :  { %4059 = vrot.lane.b32.xlu1 %v15216_v62, %s19013_s3  ;;  %4053 = vrot.lane.b32.xlu0 %v15214_v3, %s19013_s3 }
0x11b2   :  { %4123 = vrot.lane.b32.xlu1 %v15548_v25, %s19011_s26  ;;  %4117 = vrot.lane.b32.xlu0 %v15546_v9, %s19011_s26 }
0x11b6   :  { %4063 = vrot.lane.b32.xlu1 %v15220_v45, %s19013_s3  ;;  %4057 = vrot.lane.b32.xlu0 %v19094_v42, %s19013_s3 }
0x11ba   :  { %4127 = vrot.lane.b32.xlu1 %v15552_v34, %s19011_s26  ;;  %4121 = vrot.lane.b32.xlu0 %v15550_v8, %s19011_s26 }
0x11be   :  { %4067 = vrot.lane.b32.xlu1 %v19095_v44, %s19013_s3  ;;  %4061 = vrot.lane.b32.xlu0 %v19096_v27, %s19013_s3 }
0x11c2   :  { %4131 = vrot.lane.b32.xlu1 %v15556_v38, %s19011_s26  ;;  %4125 = vrot.lane.b32.xlu0 %v15554_v63, %s19011_s26 }
0x11c6   :  { %4065 = vrot.lane.b32.xlu0 %v19097_v7, %s19013_s3 }
0x11ca   :  { %4129 = vrot.lane.b32.xlu0 %v19098_v14, %s19011_s26 }
0x11db   :  { %v3800_v58 = vpop.xlane.xlu0 %3799 }
0x11dc   :  { %13637 = vrcp.f32 %v3800_v58 }
0x11dd   :  { %v3797_v61 = vpop.xlane.xlu1 %3796 }
0x11de   :  { %13639 = vrcp.f32 %v3797_v61 }
0x11e1   :  { %v3803_v6 = vpop.xlane.xlu1 %3802 }
0x11e2   :  { %13641 = vrcp.f32 %v3803_v6 }
0x11e5   :  { %v3806_v21 = vpop.xlane.xlu0 %3805 }
0x11e6   :  { %13643 = vrcp.f32 %v3806_v21  ;;  %v3809_v17 = vpop.xlane.xlu1 %3808 }
0x11e7   :  { %13645 = vrcp.f32 %v3809_v17 }
0x11e9   :  { %v13638_v49 = vpop.eup %13637  ;;  %v3812_v3 = vpop.xlane.xlu0 %3811 }
0x11ea   :  { %v3828_v62 = vmul.f32 %v13638_v49, %v3800_v58  ;;  %13647 = vrcp.f32 %v3812_v3  ;;  %v3815_v45 = vpop.xlane.xlu1 %3814  ;;  %v19099_v58 = vld [vmem:[#allocation26_spill] sm:$0xff] }
0x11eb   :  { %v13640_v22 = vpop.eup %13639  ;;  %13649 = vrcp.f32 %v3815_v45 }
0x11ec   :  { %v3836_v56 = vsub.f32 2.0, %v3828_v62  ;;  %v3827_v13 = vmul.f32 %v13640_v22, %v3797_v61 }
0x11ed   :  { %v3818_v5 = vpop.xlane.xlu0 %3817 }
0x11ee   :  { %v3844_v29 = vmul.f32 %v13638_v49, %v3836_v56  ;;  %v3835_v54 = vsub.f32 2.0, %v3827_v13  ;;  %13651 = vrcp.f32 %v3818_v5  ;;  %v3869_v60 = vpop.permute.xlu1 %3868  ;;  %v19102_v13 = vld [vmem:[#allocation27_spill] sm:$0xff] }
0x11ef   :  { %v13642_v37 = vpop.eup %13641 }
0x11f0   :  { %v3852_v15 = vmul.f32 %v15716_v26, %v3844_v29  ;;  %v3843_v9 = vmul.f32 %v13640_v22, %v3835_v54  ;;  %v3829_v25 = vmul.f32 %v13642_v37, %v3803_v6  ;;  %v19101_v22 = vld [vmem:[#allocation28_spill] sm:$0xff] }
0x11f1   :  { %v3871_v8 = vpop.permute.xlu0 %3870 }
0x11f2   :  { %3861 = vst.msk [vmem:[#allocation2 + $0x1c8] sm:$0xff] %vm654_vm2, %v3852_v15  ;;  %v3837_v34 = vsub.f32 2.0, %v3829_v25  ;;  %v15834_v63 = vpop.permute.xlu1 %4039  ;;  %12644 = vmatprep.subr.mxu1 %v3871_v8  ;;  %v3851_v38 = vmul.f32 %v15720_v55, %v3843_v9 }
0x11f3   :  { %v13644_v43 = vpop.eup %13643  ;;  %12645 = vmatpush3.msra.mxu1 %v3871_v8 }
0x11f4   :  { %v13646_v11 = vpop.eup %13645  ;;  %v3845_v48 = vmul.f32 %v13642_v37, %v3837_v34  ;;  %v3830_v19 = vmul.f32 %v13644_v43, %v3806_v21  ;;  %12646 = vmatprep.subr.mxu1 %v3869_v60  ;;  %3860 = vst.msk [vmem:[#allocation2 + $0x1c0] sm:$0xff] %vm654_vm2, %v3851_v38  ;;  %12648 = vmatprep.mubr.msk.f32.mxu1 %vm654_vm2, %v3851_v38  ;;  %v19103_v38 = vld [vmem:[#allocation30_spill] sm:$0xff] }
0x11f5   :  { %v3831_v20 = vmul.f32 %v13646_v11, %v3809_v17  ;;  %v4038_v47 = vpop.permute.xlu0 %4037  ;;  %12647 = vmatpush3.msra.mxu1 %v3869_v60  ;;  %v19100_v17 = vld [vmem:[#allocation25_spill] sm:$0xff] }
0x11f6   :  { %v3838_v2 = vsub.f32 2.0, %v3830_v19  ;;  %v4104_v50 = vpop.permute.xlu1 %4103  ;;  %12649 = vmatmul.mubr.msk.f32.vlgmr.msra.gmra.mxu1 %vm654_vm2, %v3852_v15  ;;  %v3853_v26 = vmul.f32 %v15724_v28, %v3845_v48  ;;  %12660 = vmatprep.subr.mxu1 %v4266_v23  ;;  %v4263_v28 = vld [vmem:[%s18975_s5] sm:$0xff]  ;;  %v4213_v61 = vsel %vm94_vm0, %v19099_v58, %v4038_v47  ;;  %v4214_v49 = vsel %vm94_vm0, %v19100_v17, %v15834_v63 }
0x11f7   :  { %v13648_v12 = vpop.eup %13647  ;;  %v3839_v31 = vsub.f32 2.0, %v3831_v20  ;;  %12661 = vmatpush3.msra.mxu1 %v4266_v23  ;;  %v4231_v62 = vsel %vm4229_vm3, %v4214_v49, %v4104_v50  ;;  %v19104_v23 = vld [vmem:[#allocation29_spill] sm:$0xff] }
0x11f8   :  { %v13650_v30 = vpop.eup %13649  ;;  %v3846_v55 = vmul.f32 %v13644_v43, %v3838_v2  ;;  %v3832_v10 = vmul.f32 %v13648_v12, %v3812_v3  ;;  %3862 = vst.msk [vmem:[#allocation2 + $0x1d0] sm:$0xff] %vm654_vm2, %v3853_v26  ;;  %12651 = vmatprep.mubr.msk.f32.mxu1 %vm654_vm2, %v3853_v26  ;;  %12662 = vmatprep.subr.mxu1 %v4265_v1 }
0x11f9   :  { %v3847_v4 = vmul.f32 %v13646_v11, %v3839_v31  ;;  %v3833_v53 = vmul.f32 %v13650_v30, %v3815_v45  ;;  %v4102_v33 = vpop.permute.xlu0 %4101  ;;  %12663 = vmatpush3.msra.mxu1 %v4265_v1  ;;  %v19105_v31 = vld [vmem:[#allocation32_spill] sm:$0xff] }
0x11fa   :  { %v3840_v18 = vsub.f32 2.0, %v3832_v10  ;;  %v4168_v35 = vpop.permute.xlu1 %4167  ;;  %v3854_v39 = vmul.f32 %v15728_v57, %v3846_v55  ;;  %12664 = vmatprep.subr.mxu1 %v4264_v16  ;;  %v19106_v55 = vld [vmem:[#allocation31_spill] sm:$0xff] }
0x11fb   :  { %v13652_v59 = vpop.eup %13651  ;;  %v3841_v36 = vsub.f32 2.0, %v3833_v53  ;;  %v3855_v24 = vmul.f32 %v15730_v52, %v3847_v4  ;;  %12665 = vmatpush3.msra.mxu1 %v4264_v16 }
0x11fc   :  { %v3848_v32 = vmul.f32 %v13648_v12, %v3840_v18  ;;  %v3834_v40 = vmul.f32 %v13652_v59, %v3818_v5  ;;  %3863 = vst.msk [vmem:[#allocation2 + $0x1d8] sm:$0xff] %vm654_vm2, %v3854_v39  ;;  %12652 = vmatmul.mubr.msk.f32.gmra.mxu1 %vm654_vm2, %v3854_v39  ;;  %12666 = vmatprep.subr.mxu1 %v4263_v28 }
0x11fd   :  { %v3849_v51 = vmul.f32 %v13650_v30, %v3841_v36  ;;  %v4166_v42 = vpop.permute.xlu0 %4165  ;;  %3864 = vst.msk [vmem:[#allocation2 + $0x1e0] sm:$0xff] %vm654_vm2, %v3855_v24  ;;  %12654 = vmatprep.mubr.msk.f32.mxu1 %vm654_vm2, %v3855_v24  ;;  %12667 = vmatpush3.msra.mxu1 %v4263_v28 }
0x11fe   :  { %v3842_v57 = vsub.f32 2.0, %v3834_v40  ;;  %v4044_v44 = vpop.permute.xlu1 %4043  ;;  %v3856_v27 = vmul.f32 %v15736_v41, %v3848_v32  ;;  %v4230_v41 = vsel %vm4229_vm3, %v4213_v61, %v4102_v33 }
0x11ff   :  { %v3857_v52 = vmul.f32 %v15738_v0, %v3849_v51  ;;  %v4247_v0 = vsel %vm4246_vm4, %v4230_v41, %v4166_v42  ;;  %v4216_v5 = vsel %vm94_vm0, %v19102_v13, %v4044_v44 }
0x1200   :  { %v3850_v7 = vmul.f32 %v13652_v59, %v3842_v57  ;;  %3865 = vst.msk [vmem:[#allocation2 + $0x1e8] sm:$0xff] %vm654_vm2, %v3856_v27  ;;  %12655 = vmatmul.mubr.msk.f32.gmra.mxu1 %vm654_vm2, %v3856_v27 }
0x1201   :  { %v4042_v14 = vpop.permute.xlu0 %4041  ;;  %3866 = vst.msk [vmem:[#allocation2 + $0x1f0] sm:$0xff] %vm654_vm2, %v3857_v52  ;;  %12657 = vmatprep.mubr.msk.f32.mxu1 %vm654_vm2, %v3857_v52  ;;  %v15922_v52 = vld [vmem:[%s18976_s6] ss:$0 sm:$0xff] }
0x1202   :  { %v4108_v6 = vpop.permute.xlu1 %4107  ;;  %v3858_v21 = vmul.f32 %v15744_v46, %v3850_v7  ;;  %v4248_v46 = vsel %vm4246_vm4, %v4231_v62, %v4168_v35  ;;  %v4215_v56 = vsel %vm94_vm0, %v19101_v22, %v4042_v14 }
0x1203   :  { %v4233_v60 = vsel %vm4229_vm3, %v4216_v5, %v4108_v6 }
0x1204   :  { %3867 = vst.msk [vmem:[#allocation2 + $0x1f8] sm:$0xff] %vm654_vm2, %v3858_v21  ;;  %12658 = vmatmul.mubr.msk.f32.gmra.mxu1 %vm654_vm2, %v3858_v21  ;;  %v19107_v21 = vld [vmem:[#allocation8_spill] sm:$0xff] }
0x1205   :  { %v4106_v3 = vpop.permute.xlu0 %4105  ;;  %12668 = vmatprep.mubr.msk.f32.mxu1 %vm299_vm1, %v4247_v0  ;;  %v19108_v0 = vld [vmem:[#allocation9_spill] sm:$0xff] }
0x1206   :  { %v4172_v45 = vpop.permute.xlu1 %4171  ;;  %v4232_v29 = vsel %vm4229_vm3, %v4215_v56, %v4106_v3 }
0x1207   :  { %v4250_v9 = vsel %vm4246_vm4, %v4233_v60, %v4172_v45  ;;  %v19111_v60 = vld [vmem:[#allocation11_spill] sm:$0xff] }
0x1208   :  { %12669 = vmatmul.mubr.msk.f32.vlgmr.msra.gmra.mxu1 %vm299_vm1, %v4248_v46  ;;  %v19109_v46 = vld [vmem:[#allocation10_spill] sm:$0xff] }
0x1209   :  { %v4170_v54 = vpop.permute.xlu0 %4169 }
0x120a   :  { %v4249_v37 = vsel %vm4246_vm4, %v4232_v29, %v4170_v54  ;;  %v4048_v15 = vpop.permute.xlu1 %4047  ;;  %v19110_v29 = vld [vmem:[#allocation12_spill] sm:$0xff] }
0x120b   :  { %12671 = vmatprep.mubr.msk.f32.mxu1 %vm299_vm1, %v4249_v37  ;;  %v4218_v11 = vsel %vm94_vm0, %v19104_v23, %v4048_v15 }
0x120c   :  { %12672 = vmatmul.mubr.msk.f32.gmra.mxu1 %vm299_vm1, %v4250_v9 }
0x120d   :  { %v4046_v25 = vpop.permute.xlu0 %4045 }
0x120e   :  { %v4112_v8 = vpop.permute.xlu1 %4111  ;;  %v4217_v43 = vsel %vm94_vm0, %v19103_v38, %v4046_v25 }
0x120f   :  { %v4235_v20 = vsel %vm4229_vm3, %v4218_v11, %v4112_v8  ;;  %v19112_v8 = vld [vmem:[#allocation14_spill] sm:$0xff] }
0x1211   :  { %v4110_v34 = vpop.permute.xlu0 %4109 }
0x1212   :  { %v4176_v63 = vpop.permute.xlu1 %4175  ;;  %v4234_v48 = vsel %vm4229_vm3, %v4217_v43, %v4110_v34 }
0x1213   :  { %v4252_v2 = vsel %vm4246_vm4, %v4235_v20, %v4176_v63  ;;  %v19113_v63 = vld [vmem:[#allocation13_spill] sm:$0xff] }
0x1215   :  { %v4174_v19 = vpop.permute.xlu0 %4173 }
0x1216   :  { %v4251_v47 = vsel %vm4246_vm4, %v4234_v48, %v4174_v19  ;;  %v4052_v1 = vpop.permute.xlu1 %4051  ;;  %v19114_v48 = vld [vmem:[#allocation15_spill] sm:$0xff] }
0x1217   :  { %12674 = vmatprep.mubr.msk.f32.mxu1 %vm299_vm1, %v4251_v47  ;;  %v4220_v10 = vsel %vm94_vm0, %v19106_v55, %v4052_v1 }
0x1218   :  { %12675 = vmatmul.mubr.msk.f32.gmra.mxu1 %vm299_vm1, %v4252_v2 }
0x1219   :  { %v4050_v50 = vpop.permute.xlu0 %4049 }
0x121a   :  { %v4116_v26 = vpop.permute.xlu1 %4115  ;;  %v4219_v16 = vsel %vm94_vm0, %v19105_v31, %v4050_v50 }
0x121b   :  { %v4237_v33 = vsel %vm4229_vm3, %v4220_v10, %v4116_v26 }
0x121d   :  { %v4114_v12 = vpop.permute.xlu0 %4113 }
0x121e   :  { %v4180_v30 = vpop.permute.xlu1 %4179  ;;  %v4236_v4 = vsel %vm4229_vm3, %v4219_v16, %v4114_v12 }
0x121f   :  { %v4254_v18 = vsel %vm4246_vm4, %v4237_v33, %v4180_v30 }
0x1221   :  { %v4178_v53 = vpop.permute.xlu0 %4177 }
0x1222   :  { %v4253_v28 = vsel %vm4246_vm4, %v4236_v4, %v4178_v53  ;;  %v4056_v1 = vpop.permute.xlu1 %4055 }
0x1223   :  { %12677 = vmatprep.mubr.msk.f32.mxu1 %vm299_vm1, %v4253_v28 }
0x1224   :  { %12678 = vmatmul.mubr.msk.f32.gmra.mxu1 %vm299_vm1, %v4254_v18 }
0x1225   :  { %v4054_v2 = vpop.permute.xlu0 %4053 }
0x1226   :  { %v4120_v50 = vpop.permute.xlu1 %4119 }
0x1229   :  { %v4118_v26 = vpop.permute.xlu0 %4117 }
0x122a   :  { %v4060_v12 = vpop.permute.xlu1 %4059 }
0x122d   :  { %v4058_v31 = vpop.permute.xlu0 %4057 }
0x122e   :  { %v4124_v16 = vpop.permute.xlu1 %4123 }
0x1231   :  { %v4122_v30 = vpop.permute.xlu0 %4121 }
0x1232   :  { %v4064_v55 = vpop.permute.xlu1 %4063 }
0x1235   :  { %v4062_v10 = vpop.permute.xlu0 %4061 }
0x1236   :  { %v4128_v4 = vpop.permute.xlu1 %4127 }
0x1239   :  { %v4126_v53 = vpop.permute.xlu0 %4125 }
0x123a   :  { %v4068_v33 = vpop.permute.xlu1 %4067 }
0x123d   :  { %v4066_v28 = vpop.permute.xlu0 %4065 }
0x123e   :  { %v4132_v18 = vpop.permute.xlu1 %4131 }
0x12b6   :  { %v12650_v35 = vpop.f32.mrf.mxu1 }
0x12b7   :  { %4183 = vrot.lane.b32.xlu1 %v12650_v35, %s19019_s2  ;;  %v4130_v35 = vpop.permute.xlu0 %4129 }
0x12b8   :  { %v3982_v39 = vpop.f32.mrf.mxu1 }
0x12b9   :  { %4181 = vrot.lane.b32.xlu0 %v3982_v39, %s19019_s2  ;;  %v19115_v39 = vld [vmem:[#allocation34_spill] sm:$0xff] }
0x12bc   :  { %v12653_v59 = vpop.f32.mrf.mxu1 }
0x12bd   :  { %4187 = vrot.lane.b32.xlu1 %v12653_v59, %s19019_s2  ;;  %v4221_v59 = vsel %vm94_vm0, %v19115_v39, %v4054_v2 }
0x12be   :  { %v3992_v36 = vpop.f32.mrf.mxu1 }
0x12bf   :  { %4185 = vrot.lane.b32.xlu0 %v3992_v36, %s19019_s2 }
0x12c0   :  { %v12656_v24 = vpop.f32.mrf.mxu1 }
0x12c1   :  { %4191 = vrot.lane.b32.xlu1 %v12656_v24, %s19019_s2  ;;  %v19116_v24 = vld [vmem:[#allocation33_spill] sm:$0xff] }
0x12c2   :  { %v4002_v32 = vpop.f32.mrf.mxu1 }
0x12c3   :  { %4189 = vrot.lane.b32.xlu0 %v4002_v32, %s19019_s2  ;;  %v4222_v32 = vsel %vm94_vm0, %v19116_v24, %v4056_v1 }
0x12c4   :  { %v12659_v40 = vpop.f32.mrf.mxu1 }
0x12c5   :  { %4195 = vrot.lane.b32.xlu1 %v12659_v40, %s19019_s2  ;;  %v4238_v40 = vsel %vm4229_vm3, %v4221_v59, %v4118_v26 }
0x12c6   :  { %v4012_v51 = vpop.f32.mrf.mxu1 }
0x12c7   :  { %4193 = vrot.lane.b32.xlu0 %v4012_v51, %s19019_s2 }
0x12c8   :  { %v12670_v42 = vpop.f32.mrf.mxu1 }
0x12c9   :  { %v4394_v58 = vadd.f32 %v12670_v42, %v15922_v52  ;;  %v4239_v42 = vsel %vm4229_vm3, %v4222_v32, %v4120_v50 }
0x12ca   :  { %v4388_v57 = vpop.f32.mrf.mxu1 }
0x12cb   :  { %v4389_v7 = vadd.f32 %v15922_v52, %v4388_v57  ;;  %v15931_v17 = vadd.f32 %v4394_v58, %v19108_v0  ;;  %v19118_v58 = vld [vmem:[#allocation35_spill] sm:$0xff] }
0x12cc   :  { %v12673_v44 = vpop.f32.mrf.mxu1 }
0x12cd   :  { %v15928_v41 = vadd.f32 %v4389_v7, %v19107_v21  ;;  %v4404_v62 = vadd.f32 %v12673_v44, %v15922_v52  ;;  %v4488_v5 = vsel %vm299_vm1, %v15931_v17, 0.0  ;;  %v19117_v7 = vld [vmem:[#allocation36_spill] sm:$0xff] }
0x12ce   :  { %v4398_v27 = vpop.f32.mrf.mxu1 }
0x12cf   :  { %v4399_v61 = vadd.f32 %v15922_v52, %v4398_v27  ;;  %v4485_v45 = vsel %vm299_vm1, %v15928_v41, 0.0  ;;  %v15947_v37 = vadd.f32 %v4404_v62, %v19111_v60 }
0x12d1   :  { %v15938_v22 = vadd.f32 %v4399_v61, %v19109_v46  ;;  %v4494_v23 = vsel %vm299_vm1, %v15947_v37, 0.0  ;;  %v4224_v61 = vsel %vm94_vm0, %v19118_v58, %v4060_v12  ;;  %v19127_v58 = vld [vmem:[#allocation20_spill] sm:$0xff] }
0x12d2   :  { %v4241_v0 = vsel %vm4229_vm3, %v4224_v61, %v4124_v16  ;;  %v19123_v16 = vld [vmem:[#allocation16_spill] sm:$0xff] }
0x12d3   :  { %v4491_v9 = vsel %vm299_vm1, %v15938_v22, 0.0 }
0x12d8   :  { %v12676_v14 = vpop.f32.mrf.mxu1 }
0x12d9   :  { %v4414_v15 = vadd.f32 %v12676_v14, %v15922_v52  ;;  %v4223_v14 = vsel %vm94_vm0, %v19117_v7, %v4058_v31 }
0x12da   :  { %v4408_v6 = vpop.f32.mrf.mxu1 }
0x12db   :  { %v4409_v49 = vadd.f32 %v15922_v52, %v4408_v6  ;;  %v15958_v38 = vadd.f32 %v4414_v15, %v19113_v63  ;;  %v4240_v6 = vsel %vm4229_vm3, %v4223_v14, %v4122_v30 }
0x12dd   :  { %v15944_v54 = vadd.f32 %v4409_v49, %v19110_v29  ;;  %v4500_v20 = vsel %vm299_vm1, %v15958_v38, 0.0 }
0x12df   :  { %v4497_v25 = vsel %vm299_vm1, %v15944_v54, 0.0 }
0x12e4   :  { %v12679_v3 = vpop.f32.mrf.mxu1 }
0x12e5   :  { %v4424_v43 = vadd.f32 %v12679_v3, %v15922_v52 }
0x12e6   :  { %4486 = vadd.xlane.f32.xlu0 %v4485_v45  ;;  %v4418_v56 = vpop.f32.mrf.mxu1  ;;  %v19119_v45 = vld [vmem:[#allocation38_spill] sm:$0xff] }
0x12e7   :  { %v4419_v13 = vadd.f32 %v15922_v52, %v4418_v56  ;;  %v15966_v19 = vadd.f32 %v4424_v43, %v19114_v48  ;;  %v4225_v46 = vsel %vm94_vm0, %v19119_v45, %v4062_v10  ;;  %v19120_v56 = vld [vmem:[#allocation37_spill] sm:$0xff]  ;;  %v19122_v43 = vld [vmem:[#allocation39_spill] sm:$0xff] }
0x12e9   :  { %4489 = vadd.xlane.f32.xlu1 %v4488_v5  ;;  %v15955_v34 = vadd.f32 %v4419_v13, %v19112_v8  ;;  %v4506_v47 = vsel %vm299_vm1, %v15966_v19, 0.0  ;;  %v4226_v13 = vsel %vm94_vm0, %v19120_v56, %v4064_v55  ;;  %v4242_v5 = vsel %vm4229_vm3, %v4225_v46, %v4126_v53  ;;  %v19128_v56 = vld [vmem:[#allocation21_spill] sm:$0xff] }
0x12ea   :  { %4492 = vadd.xlane.f32.xlu0 %v4491_v9  ;;  %v4243_v60 = vsel %vm4229_vm3, %v4226_v13, %v4128_v4  ;;  %v19124_v4 = vld [vmem:[#allocation17_spill] sm:$0xff] }
0x12eb   :  { %v4503_v11 = vsel %vm299_vm1, %v15955_v34, 0.0 }
0x12ed   :  { %4498 = vadd.xlane.f32.xlu1 %v4497_v25  ;;  %v19121_v25 = vld [vmem:[#allocation40_spill] sm:$0xff] }
0x12ee   :  { %4495 = vadd.xlane.f32.xlu0 %v4494_v23  ;;  %v4227_v8 = vsel %vm94_vm0, %v19121_v25, %v4066_v28  ;;  %v4228_v23 = vsel %vm94_vm0, %v19122_v43, %v4068_v33 }
0x12f1   :  { %4504 = vadd.xlane.f32.xlu1 %v4503_v11  ;;  %v4244_v11 = vsel %vm4229_vm3, %v4227_v8, %v4130_v35 }
0x12f2   :  { %4501 = vadd.xlane.f32.xlu0 %v4500_v20  ;;  %v4245_v20 = vsel %vm4229_vm3, %v4228_v23, %v4132_v18 }
0x12f6   :  { %4507 = vadd.xlane.f32.xlu0 %v4506_v47 }
0x1329   :  { %v4184_v36 = vpop.permute.xlu1 %4183 }
0x132a   :  { %v4256_v44 = vsel %vm4246_vm4, %v4239_v42, %v4184_v36  ;;  %v19125_v36 = vld [vmem:[#allocation18_spill] sm:$0xff] }
0x132b   :  { %v4182_v51 = vpop.permute.xlu0 %4181 }
0x132c   :  { %v4255_v57 = vsel %vm4246_vm4, %v4238_v40, %v4182_v51 }
0x132d   :  { %12680 = vmatprep.mubr.msk.f32.mxu1 %vm299_vm1, %v4255_v57 }
0x132e   :  { %12681 = vmatmul.mubr.msk.f32.gmra.mxu1 %vm299_vm1, %v4256_v44  ;;  %v19126_v44 = vld [vmem:[#allocation19_spill] sm:$0xff] }
0x132f   :  { %v4188_v27 = vpop.permute.xlu1 %4187 }
0x1330   :  { %v4258_v3 = vsel %vm4246_vm4, %v4241_v0, %v4188_v27 }
0x1331   :  { %v4186_v21 = vpop.permute.xlu0 %4185 }
0x1332   :  { %v4257_v49 = vsel %vm4246_vm4, %v4240_v6, %v4186_v21 }
0x1333   :  { %12683 = vmatprep.mubr.msk.f32.mxu1 %vm299_vm1, %v4257_v49  ;;  %v4192_v62 = vpop.permute.xlu1 %4191 }
0x1334   :  { %12684 = vmatmul.mubr.msk.f32.gmra.mxu1 %vm299_vm1, %v4258_v3  ;;  %v4260_v9 = vsel %vm4246_vm4, %v4243_v60, %v4192_v62 }
0x1335   :  { %v4190_v29 = vpop.permute.xlu0 %4189 }
0x1336   :  { %v4259_v15 = vsel %vm4246_vm4, %v4242_v5, %v4190_v29 }
0x1337   :  { %12686 = vmatprep.mubr.msk.f32.mxu1 %vm299_vm1, %v4259_v15  ;;  %v4196_v63 = vpop.permute.xlu1 %4195  ;;  %v19129_v15 = vld [vmem:[#allocation22_spill] sm:$0xff] }
0x1338   :  { %12687 = vmatmul.mubr.msk.f32.gmra.mxu1 %vm299_vm1, %v4260_v9  ;;  %v4262_v1 = vsel %vm4246_vm4, %v4245_v20, %v4196_v63 }
0x1339   :  { %v4194_v48 = vpop.permute.xlu0 %4193 }
0x133a   :  { %v4261_v47 = vsel %vm4246_vm4, %v4244_v11, %v4194_v48  ;;  %v19130_v11 = vld [vmem:[#allocation23_spill] sm:$0xff] }
0x133b   :  { %12689 = vmatprep.mubr.msk.f32.mxu1 %vm299_vm1, %v4261_v47 }
0x133c   :  { %12690 = vmatmul.mubr.msk.f32.gmra.mxu1 %vm299_vm1, %v4262_v1 }
0x136f   :  { %v4487_v2 = vpop.xlane.xlu0 %4486 }
0x1370   :  { %v4534_v7 = vmul.f32 0.03125, %v4487_v2 }
0x1372   :  { %v4490_v28 = vpop.xlane.xlu1 %4489  ;;  %v16051_v5 = vsub.f32 %v15928_v41, %v4534_v7 }
0x1373   :  { %v4493_v12 = vpop.xlane.xlu0 %4492  ;;  %v4535_v40 = vmul.f32 0.03125, %v4490_v28 }
0x1375   :  { %v16042_v0 = vsub.f32 %v15931_v17, %v4535_v40  ;;  %v4536_v17 = vmul.f32 0.03125, %v4493_v12  ;;  %v4740_v40 = vld [vmem:[%s18979_s9 + $0x10] sm:$0xff] }
0x1376   :  { %v4499_v29 = vpop.xlane.xlu1 %4498 }
0x1377   :  { %v4496_v39 = vpop.xlane.xlu0 %4495  ;;  %v4567_v63 = vmul.f32 %v16042_v0, %v16042_v0  ;;  %v4538_v47 = vmul.f32 0.03125, %v4499_v29 }
0x1378   :  { %v4537_v62 = vmul.f32 0.03125, %v4496_v39 }
0x1379   :  { %v4585_v12 = vsel %vm299_vm1, %v4567_v63, 0.0 }
0x137a   :  { %v16062_v43 = vsub.f32 %v15947_v37, %v4537_v62  ;;  %v4566_v37 = vmul.f32 %v16051_v5, %v16051_v5  ;;  %v4505_v2 = vpop.xlane.xlu1 %4504 }
0x137b   :  { %v4502_v49 = vpop.xlane.xlu0 %4501 }
0x137c   :  { %v4539_v41 = vmul.f32 0.03125, %v4502_v49 }
0x137f   :  { %v4508_v20 = vpop.xlane.xlu0 %4507 }
0x13ee   :  { %v12682_v50 = vpop.f32.mrf.mxu1 }
0x13ef   :  { %v4434_v26 = vadd.f32 %v12682_v50, %v15922_v52  ;;  %v16077_v50 = vsub.f32 %v15958_v38, %v4539_v41 }
0x13f0   :  { %v4428_v31 = vpop.f32.mrf.mxu1 }
0x13f1   :  { %v16014_v30 = vadd.f32 %v4434_v26, %v19123_v16  ;;  %v4429_v55 = vadd.f32 %v15922_v52, %v4428_v31  ;;  %v4541_v26 = vmul.f32 0.03125, %v4508_v20  ;;  %v4569_v31 = vmul.f32 %v16062_v43, %v16062_v43 }
0x13f2   :  { %v4540_v16 = vmul.f32 0.03125, %v4505_v2 }
0x13f3   :  { %v4512_v10 = vsel %vm299_vm1, %v16014_v30, 0.0  ;;  %v16020_v53 = vadd.f32 %v4429_v55, %v19124_v4  ;;  %v4582_v55 = vsel %vm299_vm1, %v4566_v37, 0.0  ;;  %v16089_v38 = vsub.f32 %v15966_v19, %v4541_v26 }
0x13f4   :  { %4513 = vadd.xlane.f32.xlu0 %v4512_v10  ;;  %v12685_v33 = vpop.f32.mrf.mxu1  ;;  %v4591_v4 = vsel %vm299_vm1, %v4569_v31, 0.0  ;;  %v16095_v28 = vsub.f32 %v15955_v34, %v4540_v16 }
0x13f5   :  { %v4444_v18 = vadd.f32 %v12685_v33, %v15922_v52  ;;  %v4509_v35 = vsel %vm299_vm1, %v16020_v53, 0.0  ;;  %v4571_v33 = vmul.f32 %v16077_v50, %v16077_v50  ;;  %v4573_v19 = vmul.f32 %v16089_v38, %v16089_v38 }
0x13f6   :  { %4510 = vadd.xlane.f32.xlu1 %v4509_v35  ;;  %v4438_v59 = vpop.f32.mrf.mxu1 }
0x13f7   :  { %v16026_v24 = vadd.f32 %v4444_v18, %v19125_v36  ;;  %v4439_v32 = vadd.f32 %v15922_v52, %v4438_v59  ;;  %v4597_v35 = vsel %vm299_vm1, %v4571_v33, 0.0  ;;  %v4572_v59 = vmul.f32 %v16095_v28, %v16095_v28 }
0x13f8   :  { %v12688_v51 = vpop.f32.mrf.mxu1  ;;  %v4603_v34 = vsel %vm299_vm1, %v4573_v19, 0.0 }
0x13f9   :  { %v4454_v42 = vadd.f32 %v12688_v51, %v15922_v52  ;;  %v4518_v57 = vsel %vm299_vm1, %v16026_v24, 0.0  ;;  %v16033_v27 = vadd.f32 %v4439_v32, %v19126_v44  ;;  %v4600_v36 = vsel %vm299_vm1, %v4572_v59, 0.0  ;;  %v4741_v32 = vld [vmem:[%s18979_s9 + $0x18] sm:$0xff]  ;;  %v4739_v51 = vld [vmem:[%s18979_s9 + $0x8] sm:$0xff] }
0x13fa   :  { %4519 = vadd.xlane.f32.xlu0 %v4518_v57  ;;  %v4448_v14 = vpop.f32.mrf.mxu1  ;;  %12692 = vmatprep.subr.mxu0 %v4741_v32 }
0x13fb   :  { %v16036_v61 = vadd.f32 %v4454_v42, %v19127_v58  ;;  %v4449_v6 = vadd.f32 %v15922_v52, %v4448_v14  ;;  %v4515_v21 = vsel %vm299_vm1, %v16033_v27, 0.0  ;;  %12693 = vmatpush3.msra.mxu0 %v4741_v32  ;;  %v4738_v42 = vld [vmem:[%s18979_s9] sm:$0xff] }
0x13fc   :  { %4516 = vadd.xlane.f32.xlu1 %v4515_v21  ;;  %v12691_v3 = vpop.f32.mrf.mxu1  ;;  %12694 = vmatprep.subr.mxu0 %v4740_v40 }
0x13fd   :  { %v4464_v45 = vadd.f32 %v12691_v3, %v15922_v52  ;;  %v4524_v46 = vsel %vm299_vm1, %v16036_v61, 0.0  ;;  %v16048_v13 = vadd.f32 %v4449_v6, %v19128_v56  ;;  %12695 = vmatpush3.msra.mxu0 %v4740_v40 }
0x13fe   :  { %4525 = vadd.xlane.f32.xlu0 %v4524_v46  ;;  %v4458_v60 = vpop.f32.mrf.mxu1  ;;  %12696 = vmatprep.subr.mxu0 %v4739_v51 }
0x13ff   :  { %v16054_v9 = vadd.f32 %v4464_v45, %v19129_v15  ;;  %v4459_v25 = vadd.f32 %v15922_v52, %v4458_v60  ;;  %v4521_v8 = vsel %vm299_vm1, %v16048_v13, 0.0  ;;  %v16070_v52 = vsub.f32 %v15938_v22, %v4536_v17  ;;  %12697 = vmatpush3.msra.mxu0 %v4739_v51 }
0x1400   :  { %4522 = vadd.xlane.f32.xlu1 %v4521_v8  ;;  %v16083_v22 = vsub.f32 %v15944_v54, %v4538_v47  ;;  %12698 = vmatprep.subr.mxu0 %v4738_v42 }
0x1401   :  { %v4530_v23 = vsel %vm299_vm1, %v16054_v9, 0.0  ;;  %v16067_v48 = vadd.f32 %v4459_v25, %v19130_v11  ;;  %v4568_v10 = vmul.f32 %v16070_v52, %v16070_v52  ;;  %12699 = vmatpush3.msra.mxu0 %v4738_v42 }
0x1402   :  { %4531 = vadd.xlane.f32.xlu0 %v4530_v23  ;;  %v4570_v18 = vmul.f32 %v16083_v22, %v16083_v22 }
0x1403   :  { %v4527_v1 = vsel %vm299_vm1, %v16067_v48, 0.0  ;;  %v4588_v54 = vsel %vm299_vm1, %v4568_v10, 0.0 }
0x1404   :  { %4528 = vadd.xlane.f32.xlu1 %v4527_v1  ;;  %v4594_v39 = vsel %vm299_vm1, %v4570_v18, 0.0 }
0x1406   :  { %4586 = vadd.xlane.f32.xlu0 %v4585_v12 }
0x1408   :  { %4583 = vadd.xlane.f32.xlu1 %v4582_v55 }
0x140a   :  { %4592 = vadd.xlane.f32.xlu0 %v4591_v4 }
0x140c   :  { %4589 = vadd.xlane.f32.xlu1 %v4588_v54 }
0x140e   :  { %4598 = vadd.xlane.f32.xlu0 %v4597_v35 }
0x1410   :  { %4595 = vadd.xlane.f32.xlu1 %v4594_v39 }
0x1412   :  { %4604 = vadd.xlane.f32.xlu0 %v4603_v34 }
0x1414   :  { %4601 = vadd.xlane.f32.xlu1 %v4600_v36 }
0x147d   :  { %v4514_v57 = vpop.xlane.xlu0 %4513 }
0x147e   :  { %v4543_v44 = vmul.f32 0.03125, %v4514_v57 }
0x147f   :  { %v4511_v7 = vpop.xlane.xlu1 %4510 }
0x1480   :  { %v16121_v14 = vsub.f32 %v16014_v30, %v4543_v44  ;;  %v4542_v58 = vmul.f32 0.03125, %v4511_v7 }
0x1482   :  { %v16124_v6 = vsub.f32 %v16020_v53, %v4542_v58  ;;  %v4575_v21 = vmul.f32 %v16121_v14, %v16121_v14 }
0x1483   :  { %v4520_v49 = vpop.xlane.xlu0 %4519 }
0x1484   :  { %v4545_v3 = vmul.f32 0.03125, %v4520_v49  ;;  %v4609_v62 = vsel %vm299_vm1, %v4575_v21, 0.0  ;;  %v4574_v45 = vmul.f32 %v16124_v6, %v16124_v6 }
0x1485   :  { %4610 = vadd.xlane.f32.xlu0 %v4609_v62  ;;  %v4517_v46 = vpop.xlane.xlu1 %4516 }
0x1486   :  { %v16132_v56 = vsub.f32 %v16026_v24, %v4545_v3  ;;  %v4544_v30 = vmul.f32 0.03125, %v4517_v46  ;;  %v4606_v29 = vsel %vm299_vm1, %v4574_v45, 0.0  ;;  %v16171_v46 = vld [vmem:[%s18977_s7] ss:$0 sm:$0xff] }
0x1487   :  { %v4526_v53 = vpop.xlane.xlu0 %4525  ;;  %4607 = vadd.xlane.f32.xlu1 %v4606_v29 }
0x1488   :  { %v16136_v60 = vsub.f32 %v16033_v27, %v4544_v30  ;;  %v4547_v17 = vmul.f32 0.03125, %v4526_v53  ;;  %v4577_v15 = vmul.f32 %v16132_v56, %v16132_v56 }
0x1489   :  { %v4523_v25 = vpop.xlane.xlu1 %4522 }
0x148a   :  { %v16141_v8 = vsub.f32 %v16036_v61, %v4547_v17  ;;  %v4546_v63 = vmul.f32 0.03125, %v4523_v25  ;;  %v4615_v24 = vsel %vm299_vm1, %v4577_v15, 0.0  ;;  %v4576_v41 = vmul.f32 %v16136_v60, %v16136_v60  ;;  %v16179_v25 = vld [vmem:[%s18978_s8] ss:$0 sm:$0xff] }
0x148b   :  { %v4532_v23 = vpop.xlane.xlu0 %4531  ;;  %4616 = vadd.xlane.f32.xlu0 %v4615_v24 }
0x148c   :  { %v16147_v11 = vsub.f32 %v16048_v13, %v4546_v63  ;;  %v4549_v27 = vmul.f32 0.03125, %v4532_v23  ;;  %v4612_v20 = vsel %vm299_vm1, %v4576_v41, 0.0  ;;  %v4579_v47 = vmul.f32 %v16141_v8, %v16141_v8 }
0x148d   :  { %4613 = vadd.xlane.f32.xlu1 %v4612_v20  ;;  %v4529_v61 = vpop.xlane.xlu1 %4528 }
0x148e   :  { %v16153_v1 = vsub.f32 %v16054_v9, %v4549_v27  ;;  %v4548_v37 = vmul.f32 0.03125, %v4529_v61  ;;  %v4621_v2 = vsel %vm299_vm1, %v4579_v47, 0.0  ;;  %v4578_v26 = vmul.f32 %v16147_v11, %v16147_v11 }
0x148f   :  { %4622 = vadd.xlane.f32.xlu0 %v4621_v2  ;;  %v4587_v13 = vpop.xlane.xlu0 %4586 }
0x1490   :  { %v16159_v12 = vsub.f32 %v16067_v48, %v4548_v37  ;;  %v4631_v31 = vmul.f32 0.03125, %v4587_v13  ;;  %v4618_v16 = vsel %vm299_vm1, %v4578_v26, 0.0  ;;  %v4581_v55 = vmul.f32 %v16153_v1, %v16153_v1 }
0x1491   :  { %4619 = vadd.xlane.f32.xlu1 %v4618_v16  ;;  %v4584_v9 = vpop.xlane.xlu1 %4583 }
0x1492   :  { %v4647_v10 = vadd.f32 1e-09, %v4631_v31  ;;  %v4630_v4 = vmul.f32 0.03125, %v4584_v9  ;;  %v4627_v33 = vsel %vm299_vm1, %v4581_v55, 0.0  ;;  %v4580_v54 = vmul.f32 %v16159_v12, %v16159_v12 }
0x1493   :  { %4628 = vadd.xlane.f32.xlu0 %v4627_v33  ;;  %v4593_v18 = vpop.xlane.xlu0 %4592 }
0x1494   :  { %13653 = vrsqrt.f32 %v4647_v10  ;;  %v4646_v48 = vadd.f32 1e-09, %v4630_v4  ;;  %v4633_v35 = vmul.f32 0.03125, %v4593_v18  ;;  %v4624_v19 = vsel %vm299_vm1, %v4580_v54, 0.0  ;;  %v4964_v54 = vld [vmem:[%s18981_s11 + $0x30] sm:$0xff]  ;;  %v4963_v18 = vld [vmem:[%s18981_s11 + $0x28] sm:$0xff] }
0x1495   :  { %4625 = vadd.xlane.f32.xlu1 %v4624_v19  ;;  %v4590_v39 = vpop.xlane.xlu1 %4589  ;;  %v4960_v19 = vld [vmem:[%s18981_s11 + $0x10] sm:$0xff] }
0x1496   :  { %13655 = vrsqrt.f32 %v4646_v48  ;;  %v4649_v59 = vadd.f32 1e-09, %v4633_v35  ;;  %v4632_v34 = vmul.f32 0.03125, %v4590_v39  ;;  %v4962_v48 = vld [vmem:[%s18981_s11 + $0x20] sm:$0xff]  ;;  %v4961_v35 = vld [vmem:[%s18981_s11 + $0x18] sm:$0xff]  ;;  %v4959_v39 = vld [vmem:[%s18981_s11 + $0x8] sm:$0xff] }
0x1497   :  { %v4599_v36 = vpop.xlane.xlu0 %4598 }
0x1498   :  { %13657 = vrsqrt.f32 %v4649_v59  ;;  %v4648_v32 = vadd.f32 1e-09, %v4632_v34  ;;  %v4635_v40 = vmul.f32 0.03125, %v4599_v36  ;;  %v4958_v59 = vld [vmem:[%s18981_s11] sm:$0xff] }
0x1499   :  { %v4596_v51 = vpop.xlane.xlu1 %4595 }
0x149a   :  { %13659 = vrsqrt.f32 %v4648_v32  ;;  %v4651_v42 = vadd.f32 1e-09, %v4635_v40  ;;  %v4634_v57 = vmul.f32 0.03125, %v4596_v51 }
0x149b   :  { %v4605_v44 = vpop.xlane.xlu0 %4604 }
0x149c   :  { %13661 = vrsqrt.f32 %v4651_v42  ;;  %v4650_v7 = vadd.f32 1e-09, %v4634_v57  ;;  %v4637_v58 = vmul.f32 0.03125, %v4605_v44 }
0x149d   :  { %v4602_v21 = vpop.xlane.xlu1 %4601 }
0x149e   :  { %13663 = vrsqrt.f32 %v4650_v7  ;;  %v4653_v49 = vadd.f32 1e-09, %v4637_v58  ;;  %v4636_v3 = vmul.f32 0.03125, %v4602_v21 }
0x14a0   :  { %13665 = vrsqrt.f32 %v4653_v49  ;;  %v4652_v62 = vadd.f32 1e-09, %v4636_v3 }
0x14a1   :  { %v13654_v45 = vpop.eup %13653 }
0x14a2   :  { %v4679_v30 = vmul.f32 %v13654_v45, %v16042_v0  ;;  %13667 = vrsqrt.f32 %v4652_v62 }
0x14a3   :  { %v13656_v29 = vpop.eup %13655 }
0x14a4   :  { %v4678_v53 = vmul.f32 %v13656_v29, %v16051_v5  ;;  %v4701_v15 = vmul.f32 %v16171_v46, %v4679_v30 }
0x14a5   :  { %v13658_v17 = vpop.eup %13657 }
0x14a6   :  { %v4700_v63 = vmul.f32 %v16171_v46, %v4678_v53  ;;  %v4681_v24 = vmul.f32 %v13658_v17, %v16062_v43  ;;  %v16188_v5 = vadd.f32 %v16179_v25, %v4701_v15 }
0x14a7   :  { %v13660_v41 = vpop.eup %13659 }
0x14a8   :  { %v16184_v23 = vadd.f32 %v16179_v25, %v4700_v63  ;;  %v4680_v0 = vmul.f32 %v13660_v41, %v16070_v52  ;;  %v4703_v20 = vmul.f32 %v16171_v46, %v4681_v24 }
0x14a9   :  { %v13662_v27 = vpop.eup %13661 }
0x14aa   :  { %12700 = vmatprep.mubr.msk.f32.mxu0 %vm299_vm1, %v16184_v23  ;;  %v4702_v47 = vmul.f32 %v16171_v46, %v4680_v0  ;;  %v4683_v61 = vmul.f32 %v13662_v27, %v16077_v50  ;;  %v16202_v26 = vadd.f32 %v16179_v25, %v4703_v20 }
0x14ab   :  { %v13664_v43 = vpop.eup %13663  ;;  %12701 = vmatmul.mubr.msk.f32.vlgmr.msra.gmra.mxu0 %vm299_vm1, %v16188_v5 }
0x14ac   :  { %v16198_v37 = vadd.f32 %v16179_v25, %v4702_v47  ;;  %v4682_v52 = vmul.f32 %v13664_v43, %v16083_v22  ;;  %v4705_v13 = vmul.f32 %v16171_v46, %v4683_v61 }
0x14ad   :  { %v13666_v2 = vpop.eup %13665 }
0x14ae   :  { %12703 = vmatprep.mubr.msk.f32.mxu0 %vm299_vm1, %v16198_v37  ;;  %v4704_v50 = vmul.f32 %v16171_v46, %v4682_v52  ;;  %v4685_v31 = vmul.f32 %v13666_v2, %v16089_v38  ;;  %v16216_v9 = vadd.f32 %v16179_v25, %v4705_v13 }
0x14af   :  { %v13668_v16 = vpop.eup %13667  ;;  %12704 = vmatmul.mubr.msk.f32.gmra.mxu0 %vm299_vm1, %v16202_v26 }
0x14b0   :  { %v16212_v55 = vadd.f32 %v16179_v25, %v4704_v50  ;;  %v4684_v22 = vmul.f32 %v13668_v16, %v16095_v28  ;;  %v4707_v10 = vmul.f32 %v16171_v46, %v4685_v31  ;;  %v4965_v28 = vld [vmem:[%s18981_s11 + $0x38] sm:$0xff] }
0x14b1   :  { %12724 = vmatprep.subr.mxu1 %v4965_v28 }
0x14b2   :  { %12706 = vmatprep.mubr.msk.f32.mxu0 %vm299_vm1, %v16212_v55  ;;  %v4706_v4 = vmul.f32 %v16171_v46, %v4684_v22  ;;  %v16228_v33 = vadd.f32 %v16179_v25, %v4707_v10  ;;  %12725 = vmatpush3.msra.mxu1 %v4965_v28 }
0x14b3   :  { %12707 = vmatmul.mubr.msk.f32.gmra.mxu0 %vm299_vm1, %v16216_v9  ;;  %12726 = vmatprep.subr.mxu1 %v4964_v54 }
0x14b4   :  { %v16225_v38 = vadd.f32 %v16179_v25, %v4706_v4  ;;  %12727 = vmatpush3.msra.mxu1 %v4964_v54 }
0x14b5   :  { %12728 = vmatprep.subr.mxu1 %v4963_v18 }
0x14b6   :  { %12709 = vmatprep.mubr.msk.f32.mxu0 %vm299_vm1, %v16225_v38  ;;  %12729 = vmatpush3.msra.mxu1 %v4963_v18 }
0x14b7   :  { %12710 = vmatmul.mubr.msk.f32.gmra.mxu0 %vm299_vm1, %v16228_v33  ;;  %12730 = vmatprep.subr.mxu1 %v4962_v48 }
0x14b8   :  { %12731 = vmatpush3.msra.mxu1 %v4962_v48 }
0x14b9   :  { %12732 = vmatprep.subr.mxu1 %v4961_v35 }
0x14ba   :  { %12733 = vmatpush3.msra.mxu1 %v4961_v35 }
0x14bb   :  { %12734 = vmatprep.subr.mxu1 %v4960_v19 }
0x14bc   :  { %12735 = vmatpush3.msra.mxu1 %v4960_v19 }
0x14bd   :  { %12736 = vmatprep.subr.mxu1 %v4959_v39 }
0x14be   :  { %12737 = vmatpush3.msra.mxu1 %v4959_v39 }
0x14bf   :  { %12738 = vmatprep.subr.mxu1 %v4958_v59 }
0x14c0   :  { %12739 = vmatpush3.msra.mxu1 %v4958_v59 }
0x150e   :  { %v4611_v34 = vpop.xlane.xlu0 %4610 }
0x150f   :  { %v4639_v36 = vmul.f32 0.03125, %v4611_v34 }
0x1510   :  { %v4608_v32 = vpop.xlane.xlu1 %4607 }
0x1511   :  { %v4655_v40 = vadd.f32 1e-09, %v4639_v36  ;;  %v4638_v51 = vmul.f32 0.03125, %v4608_v32 }
0x1513   :  { %13669 = vrsqrt.f32 %v4655_v40  ;;  %v4654_v42 = vadd.f32 1e-09, %v4638_v51 }
0x1514   :  { %v4617_v57 = vpop.xlane.xlu0 %4616 }
0x1515   :  { %13671 = vrsqrt.f32 %v4654_v42  ;;  %v4641_v44 = vmul.f32 0.03125, %v4617_v57 }
0x1516   :  { %v4614_v7 = vpop.xlane.xlu1 %4613 }
0x1517   :  { %v4657_v58 = vadd.f32 1e-09, %v4641_v44  ;;  %v4640_v21 = vmul.f32 0.03125, %v4614_v7 }
0x1518   :  { %v4623_v49 = vpop.xlane.xlu0 %4622 }
0x1519   :  { %13673 = vrsqrt.f32 %v4657_v58  ;;  %v4656_v3 = vadd.f32 1e-09, %v4640_v21  ;;  %v4643_v62 = vmul.f32 0.03125, %v4623_v49 }
0x151a   :  { %v4620_v45 = vpop.xlane.xlu1 %4619 }
0x151b   :  { %13675 = vrsqrt.f32 %v4656_v3  ;;  %v4659_v30 = vadd.f32 1e-09, %v4643_v62  ;;  %v4642_v29 = vmul.f32 0.03125, %v4620_v45 }
0x151c   :  { %v4629_v53 = vpop.xlane.xlu0 %4628 }
0x151d   :  { %13677 = vrsqrt.f32 %v4659_v30  ;;  %v4658_v17 = vadd.f32 1e-09, %v4642_v29  ;;  %v4645_v15 = vmul.f32 0.03125, %v4629_v53 }
0x151e   :  { %v4626_v63 = vpop.xlane.xlu1 %4625 }
0x151f   :  { %13679 = vrsqrt.f32 %v4658_v17  ;;  %v4661_v24 = vadd.f32 1e-09, %v4645_v15  ;;  %v4644_v41 = vmul.f32 0.03125, %v4626_v63 }
0x1520   :  { %v13670_v0 = vpop.eup %13669 }
0x1521   :  { %13681 = vrsqrt.f32 %v4661_v24  ;;  %v4660_v27 = vadd.f32 1e-09, %v4644_v41  ;;  %v4687_v20 = vmul.f32 %v13670_v0, %v16121_v14 }
0x1522   :  { %v13672_v47 = vpop.eup %13671 }
0x1523   :  { %13683 = vrsqrt.f32 %v4660_v27  ;;  %v4686_v61 = vmul.f32 %v13672_v47, %v16124_v6  ;;  %v4709_v43 = vmul.f32 %v16171_v46, %v4687_v20 }
0x1525   :  { %v4708_v52 = vmul.f32 %v16171_v46, %v4686_v61  ;;  %v16267_v16 = vadd.f32 %v16179_v25, %v4709_v43 }
0x1526   :  { %v13674_v2 = vpop.eup %13673 }
0x1527   :  { %v16263_v13 = vadd.f32 %v16179_v25, %v4708_v52  ;;  %v4689_v50 = vmul.f32 %v13674_v2, %v16132_v56 }
0x1528   :  { %v13676_v31 = vpop.eup %13675 }
0x1529   :  { %12712 = vmatprep.mubr.msk.f32.mxu0 %vm299_vm1, %v16263_v13  ;;  %v4688_v14 = vmul.f32 %v13676_v31, %v16136_v60  ;;  %v4711_v22 = vmul.f32 %v16171_v46, %v4689_v50 }
0x152a   :  { %v13678_v6 = vpop.eup %13677  ;;  %12713 = vmatmul.mubr.msk.f32.gmra.mxu0 %vm299_vm1, %v16267_v16 }
0x152b   :  { %v4710_v10 = vmul.f32 %v16171_v46, %v4688_v14  ;;  %v4691_v4 = vmul.f32 %v13678_v6, %v16141_v8  ;;  %v16282_v48 = vadd.f32 %v16179_v25, %v4711_v22 }
0x152c   :  { %v13680_v56 = vpop.eup %13679 }
0x152d   :  { %v16278_v28 = vadd.f32 %v16179_v25, %v4710_v10  ;;  %v4690_v54 = vmul.f32 %v13680_v56, %v16147_v11  ;;  %v4713_v60 = vmul.f32 %v16171_v46, %v4691_v4 }
0x152e   :  { %v13682_v18 = vpop.eup %13681 }
0x152f   :  { %12715 = vmatprep.mubr.msk.f32.mxu0 %vm299_vm1, %v16278_v28  ;;  %v4712_v35 = vmul.f32 %v16171_v46, %v4690_v54  ;;  %v4693_v19 = vmul.f32 %v13682_v18, %v16153_v1  ;;  %v16296_v59 = vadd.f32 %v16179_v25, %v4713_v60 }
0x1530   :  { %v13684_v8 = vpop.eup %13683  ;;  %12716 = vmatmul.mubr.msk.f32.gmra.mxu0 %vm299_vm1, %v16282_v48 }
0x1531   :  { %v16292_v39 = vadd.f32 %v16179_v25, %v4712_v35  ;;  %v4692_v11 = vmul.f32 %v13684_v8, %v16159_v12  ;;  %v4715_v34 = vmul.f32 %v16171_v46, %v4693_v19  ;;  %v11092_v12 = vld [vmem:[%s18980_s10] ss:$0 sm:$0xff] }
0x1533   :  { %12718 = vmatprep.mubr.msk.f32.mxu0 %vm299_vm1, %v16292_v39  ;;  %v4714_v36 = vmul.f32 %v16171_v46, %v4692_v11  ;;  %v16308_v32 = vadd.f32 %v16179_v25, %v4715_v34 }
0x1534   :  { %12719 = vmatmul.mubr.msk.f32.gmra.mxu0 %vm299_vm1, %v16296_v59 }
0x1535   :  { %v16305_v1 = vadd.f32 %v16179_v25, %v4714_v36 }
0x1537   :  { %12721 = vmatprep.mubr.msk.f32.mxu0 %vm299_vm1, %v16305_v1 }
0x1538   :  { %12722 = vmatmul.mubr.msk.f32.gmra.mxu0 %vm299_vm1, %v16308_v32 }
0x156b   :  { %v12702_v46 = vpop.f32.mrf.mxu0 }
0x156c   :  { %v4869_v40 = vadd.f32 %v12702_v46, %v11092_v12 }
0x156d   :  { %v4863_v51 = vpop.f32.mrf.mxu0 }
0x156e   :  { %v4864_v42 = vadd.f32 %v11092_v12, %v4863_v51  ;;  %v4943_v7 = vmax.f32 %v4869_v40, 0.0  ;;  %v16336_v40 = vld [vmem:[%s18982_s12] ss:$0 sm:$0xff] }
0x156f   :  { %v12705_v57 = vpop.f32.mrf.mxu0 }
0x1570   :  { %v4942_v44 = vmax.f32 %v4864_v42, 0.0  ;;  %v4879_v58 = vadd.f32 %v12705_v57, %v11092_v12 }
0x1571   :  { %v4873_v25 = vpop.f32.mrf.mxu0 }
0x1572   :  { %v4874_v21 = vadd.f32 %v11092_v12, %v4873_v25  ;;  %12740 = vmatprep.mubr.msk.f32.mxu1 %vm654_vm2, %v4942_v44  ;;  %v4945_v62 = vmax.f32 %v4879_v58, 0.0 }
0x1573   :  { %v12708_v49 = vpop.f32.mrf.mxu0  ;;  %12741 = vmatmul.mubr.msk.f32.vlgmr.msra.gmra.mxu1 %vm654_vm2, %v4943_v7 }
0x1574   :  { %v4944_v3 = vmax.f32 %v4874_v21, 0.0  ;;  %v4889_v45 = vadd.f32 %v12708_v49, %v11092_v12 }
0x1575   :  { %v4883_v30 = vpop.f32.mrf.mxu0 }
0x1576   :  { %v4884_v29 = vadd.f32 %v11092_v12, %v4883_v30  ;;  %12743 = vmatprep.mubr.msk.f32.mxu1 %vm654_vm2, %v4944_v3  ;;  %v4947_v15 = vmax.f32 %v4889_v45, 0.0 }
0x1577   :  { %v12711_v53 = vpop.f32.mrf.mxu0  ;;  %12744 = vmatmul.mubr.msk.f32.gmra.mxu1 %vm654_vm2, %v4945_v62 }
0x1578   :  { %v4946_v17 = vmax.f32 %v4884_v29, 0.0  ;;  %v4899_v63 = vadd.f32 %v12711_v53, %v11092_v12 }
0x1579   :  { %v4893_v24 = vpop.f32.mrf.mxu0 }
0x157a   :  { %v4894_v41 = vadd.f32 %v11092_v12, %v4893_v24  ;;  %12746 = vmatprep.mubr.msk.f32.mxu1 %vm654_vm2, %v4946_v17  ;;  %v4949_v27 = vmax.f32 %v4899_v63, 0.0 }
0x157b   :  { %12747 = vmatmul.mubr.msk.f32.gmra.mxu1 %vm654_vm2, %v4947_v15 }
0x157c   :  { %v4948_v0 = vmax.f32 %v4894_v41, 0.0 }
0x157e   :  { %12749 = vmatprep.mubr.msk.f32.mxu1 %vm654_vm2, %v4948_v0 }
0x157f   :  { %12750 = vmatmul.mubr.msk.f32.gmra.mxu1 %vm654_vm2, %v4949_v27 }
0x15ea   :  { %v12714_v20 = vpop.f32.mrf.mxu0 }
0x15eb   :  { %v4909_v47 = vadd.f32 %v12714_v20, %v11092_v12 }
0x15ec   :  { %v4903_v61 = vpop.f32.mrf.mxu0 }
0x15ed   :  { %v4904_v43 = vadd.f32 %v11092_v12, %v4903_v61  ;;  %v4951_v2 = vmax.f32 %v4909_v47, 0.0 }
0x15ef   :  { %v4950_v52 = vmax.f32 %v4904_v43, 0.0 }
0x15f0   :  { %v12717_v50 = vpop.f32.mrf.mxu0 }
0x15f1   :  { %12752 = vmatprep.mubr.msk.f32.mxu1 %vm654_vm2, %v4950_v52  ;;  %v4919_v31 = vadd.f32 %v12717_v50, %v11092_v12 }
0x15f2   :  { %v4913_v14 = vpop.f32.mrf.mxu0  ;;  %12753 = vmatmul.mubr.msk.f32.gmra.mxu1 %vm654_vm2, %v4951_v2 }
0x15f3   :  { %v4914_v6 = vadd.f32 %v11092_v12, %v4913_v14  ;;  %v4953_v4 = vmax.f32 %v4919_v31, 0.0 }
0x15f4   :  { %v12720_v22 = vpop.f32.mrf.mxu0 }
0x15f5   :  { %v4952_v10 = vmax.f32 %v4914_v6, 0.0  ;;  %v4929_v56 = vadd.f32 %v12720_v22, %v11092_v12 }
0x15f6   :  { %v4923_v54 = vpop.f32.mrf.mxu0 }
0x15f7   :  { %v4924_v18 = vadd.f32 %v11092_v12, %v4923_v54  ;;  %12755 = vmatprep.mubr.msk.f32.mxu1 %vm654_vm2, %v4952_v10  ;;  %v4955_v19 = vmax.f32 %v4929_v56, 0.0 }
0x15f8   :  { %v12723_v60 = vpop.f32.mrf.mxu0  ;;  %12756 = vmatmul.mubr.msk.f32.gmra.mxu1 %vm654_vm2, %v4953_v4 }
0x15f9   :  { %v4954_v35 = vmax.f32 %v4924_v18, 0.0  ;;  %v4939_v8 = vadd.f32 %v12723_v60, %v11092_v12 }
0x15fa   :  { %v4933_v11 = vpop.f32.mrf.mxu0 }
0x15fb   :  { %v4934_v34 = vadd.f32 %v11092_v12, %v4933_v11  ;;  %12758 = vmatprep.mubr.msk.f32.mxu1 %vm654_vm2, %v4954_v35  ;;  %v4957_v46 = vmax.f32 %v4939_v8, 0.0 }
0x15fc   :  { %12759 = vmatmul.mubr.msk.f32.gmra.mxu1 %vm654_vm2, %v4955_v19 }
0x15fd   :  { %v4956_v36 = vmax.f32 %v4934_v34, 0.0 }
0x15ff   :  { %12761 = vmatprep.mubr.msk.f32.mxu1 %vm654_vm2, %v4956_v36 }
0x1600   :  { %12762 = vmatmul.mubr.msk.f32.gmra.mxu1 %vm654_vm2, %v4957_v46 }
0x1633   :  { %v12742_v51 = vpop.f32.mrf.mxu1 }
0x1634   :  { %v5093_v42 = vadd.f32 %v12742_v51, %v16336_v40 }
0x1635   :  { %v5087_v57 = vpop.f32.mrf.mxu1 }
0x1636   :  { %v16340_v12 = vadd.f32 %v5093_v42, %v16188_v5  ;;  %v5088_v44 = vadd.f32 %v16336_v40, %v5087_v57 }
0x1637   :  { %v12745_v7 = vpop.f32.mrf.mxu1 }
0x1638   :  { %v16344_v58 = vadd.f32 %v5088_v44, %v16184_v23  ;;  %v5103_v25 = vadd.f32 %v12745_v7, %v16336_v40  ;;  %v5187_v21 = vsel %vm299_vm1, %v16340_v12, 0.0 }
0x1639   :  { %5188 = vadd.xlane.f32.xlu0 %v5187_v21  ;;  %v5097_v49 = vpop.f32.mrf.mxu1 }
0x163a   :  { %v16350_v3 = vadd.f32 %v5103_v25, %v16202_v26  ;;  %v5098_v62 = vadd.f32 %v16336_v40, %v5097_v49  ;;  %v5184_v5 = vsel %vm299_vm1, %v16344_v58, 0.0 }
0x163b   :  { %5185 = vadd.xlane.f32.xlu1 %v5184_v5  ;;  %v12748_v45 = vpop.f32.mrf.mxu1 }
0x163c   :  { %v16356_v23 = vadd.f32 %v5098_v62, %v16198_v37  ;;  %v5113_v30 = vadd.f32 %v12748_v45, %v16336_v40  ;;  %v5193_v29 = vsel %vm299_vm1, %v16350_v3, 0.0 }
0x163d   :  { %5194 = vadd.xlane.f32.xlu0 %v5193_v29  ;;  %v5107_v53 = vpop.f32.mrf.mxu1 }
0x163e   :  { %v16362_v26 = vadd.f32 %v5113_v30, %v16216_v9  ;;  %v5108_v17 = vadd.f32 %v16336_v40, %v5107_v53  ;;  %v5190_v15 = vsel %vm299_vm1, %v16356_v23, 0.0 }
0x163f   :  { %5191 = vadd.xlane.f32.xlu1 %v5190_v15  ;;  %v12751_v63 = vpop.f32.mrf.mxu1 }
0x1640   :  { %v16368_v37 = vadd.f32 %v5108_v17, %v16212_v55  ;;  %v5123_v24 = vadd.f32 %v12751_v63, %v16336_v40  ;;  %v5199_v41 = vsel %vm299_vm1, %v16362_v26, 0.0 }
0x1641   :  { %5200 = vadd.xlane.f32.xlu0 %v5199_v41  ;;  %v5117_v0 = vpop.f32.mrf.mxu1 }
0x1642   :  { %v16374_v9 = vadd.f32 %v5123_v24, %v16228_v33  ;;  %v5118_v27 = vadd.f32 %v16336_v40, %v5117_v0  ;;  %v5196_v20 = vsel %vm299_vm1, %v16368_v37, 0.0 }
0x1643   :  { %5197 = vadd.xlane.f32.xlu1 %v5196_v20 }
0x1644   :  { %v16380_v47 = vadd.f32 %v5118_v27, %v16225_v38  ;;  %v5205_v55 = vsel %vm299_vm1, %v16374_v9, 0.0 }
0x1645   :  { %5206 = vadd.xlane.f32.xlu0 %v5205_v55 }
0x1646   :  { %v5202_v61 = vsel %vm299_vm1, %v16380_v47, 0.0 }
0x1647   :  { %5203 = vadd.xlane.f32.xlu1 %v5202_v61 }
0x16b2   :  { %v12754_v43 = vpop.f32.mrf.mxu1 }
0x16b3   :  { %v5133_v33 = vadd.f32 %v12754_v43, %v16336_v40 }
0x16b4   :  { %v5127_v52 = vpop.f32.mrf.mxu1 }
0x16b5   :  { %v16388_v2 = vadd.f32 %v5133_v33, %v16267_v16  ;;  %v5128_v50 = vadd.f32 %v16336_v40, %v5127_v52  ;;  %v11131_v33 = vld [vmem:[%s19053_s30 + $0x38] sm:$0xff] }
0x16b6   :  { %12764 = vmatprep.subr.mxu0 %v11131_v33 }
0x16b7   :  { %v16392_v38 = vadd.f32 %v5128_v50, %v16263_v13  ;;  %v5211_v31 = vsel %vm299_vm1, %v16388_v2, 0.0  ;;  %12765 = vmatpush3.msra.mxu0 %v11131_v33 }
0x16b8   :  { %5212 = vadd.xlane.f32.xlu0 %v5211_v31  ;;  %v12757_v14 = vpop.f32.mrf.mxu1 }
0x16b9   :  { %v5143_v6 = vadd.f32 %v12757_v14, %v16336_v40  ;;  %v5208_v22 = vsel %vm299_vm1, %v16392_v38, 0.0 }
0x16ba   :  { %5209 = vadd.xlane.f32.xlu1 %v5208_v22  ;;  %v5137_v10 = vpop.f32.mrf.mxu1 }
0x16bb   :  { %v16400_v16 = vadd.f32 %v5143_v6, %v16282_v48  ;;  %v5138_v4 = vadd.f32 %v16336_v40, %v5137_v10 }
0x16bc   :  { %v12760_v56 = vpop.f32.mrf.mxu1 }
0x16bd   :  { %v16404_v13 = vadd.f32 %v5138_v4, %v16278_v28  ;;  %v5153_v54 = vadd.f32 %v12760_v56, %v16336_v40  ;;  %v5217_v18 = vsel %vm299_vm1, %v16400_v16, 0.0  ;;  %v11129_v56 = vld [vmem:[%s19053_s30 + $0x28] sm:$0xff] }
0x16be   :  { %5218 = vadd.xlane.f32.xlu0 %v5217_v18  ;;  %v5147_v60 = vpop.f32.mrf.mxu1 }
0x16bf   :  { %v16410_v35 = vadd.f32 %v5153_v54, %v16296_v59  ;;  %v5148_v19 = vadd.f32 %v16336_v40, %v5147_v60  ;;  %v5214_v48 = vsel %vm299_vm1, %v16404_v13, 0.0  ;;  %v11128_v54 = vld [vmem:[%s19053_s30 + $0x20] sm:$0xff] }
0x16c0   :  { %5215 = vadd.xlane.f32.xlu1 %v5214_v48  ;;  %v12763_v8 = vpop.f32.mrf.mxu1 }
0x16c1   :  { %v16416_v28 = vadd.f32 %v5148_v19, %v16292_v39  ;;  %v5163_v11 = vadd.f32 %v12763_v8, %v16336_v40  ;;  %v5223_v34 = vsel %vm299_vm1, %v16410_v35, 0.0 }
0x16c2   :  { %v5189_v36 = vpop.xlane.xlu0 %5188  ;;  %5224 = vadd.xlane.f32.xlu0 %v5223_v34  ;;  %v5157_v46 = vpop.f32.mrf.mxu1 }
0x16c3   :  { %v16422_v59 = vadd.f32 %v5163_v11, %v16308_v32  ;;  %v5233_v51 = vmul.f32 0.03125, %v5189_v36  ;;  %v5158_v42 = vadd.f32 %v16336_v40, %v5157_v46  ;;  %v5220_v57 = vsel %vm299_vm1, %v16416_v28, 0.0 }
0x16c4   :  { %5221 = vadd.xlane.f32.xlu1 %v5220_v57  ;;  %v5186_v39 = vpop.xlane.xlu1 %5185 }
0x16c5   :  { %v16428_v44 = vsub.f32 %v16340_v12, %v5233_v51  ;;  %v16431_v7 = vadd.f32 %v5158_v42, %v16305_v1  ;;  %v5232_v25 = vmul.f32 0.03125, %v5186_v39  ;;  %v5229_v21 = vsel %vm299_vm1, %v16422_v59, 0.0 }
0x16c6   :  { %v5195_v32 = vpop.xlane.xlu0 %5194  ;;  %5230 = vadd.xlane.f32.xlu0 %v5229_v21 }
0x16c7   :  { %v16436_v49 = vsub.f32 %v16344_v58, %v5232_v25  ;;  %v5235_v40 = vmul.f32 0.03125, %v5195_v32  ;;  %v5226_v62 = vsel %vm299_vm1, %v16431_v7, 0.0  ;;  %v5265_v12 = vmul.f32 %v16428_v44, %v16428_v44 }
0x16c8   :  { %5227 = vadd.xlane.f32.xlu1 %v5226_v62  ;;  %v5192_v5 = vpop.xlane.xlu1 %5191 }
0x16c9   :  { %v16443_v1 = vsub.f32 %v16350_v3, %v5235_v40  ;;  %v5234_v45 = vmul.f32 0.03125, %v5192_v5  ;;  %v5283_v30 = vsel %vm299_vm1, %v5265_v12, 0.0  ;;  %v5264_v29 = vmul.f32 %v16436_v49, %v16436_v49 }
0x16ca   :  { %v5201_v58 = vpop.xlane.xlu0 %5200  ;;  %5284 = vadd.xlane.f32.xlu0 %v5283_v30 }
0x16cb   :  { %v16449_v53 = vsub.f32 %v16356_v23, %v5234_v45  ;;  %v5237_v17 = vmul.f32 0.03125, %v5201_v58  ;;  %v5280_v15 = vsel %vm299_vm1, %v5264_v29, 0.0  ;;  %v5267_v63 = vmul.f32 %v16443_v1, %v16443_v1 }
0x16cc   :  { %5281 = vadd.xlane.f32.xlu1 %v5280_v15  ;;  %v5198_v3 = vpop.xlane.xlu1 %5197 }
0x16cd   :  { %v16455_v24 = vsub.f32 %v16362_v26, %v5237_v17  ;;  %v5236_v41 = vmul.f32 0.03125, %v5198_v3  ;;  %v5289_v0 = vsel %vm299_vm1, %v5267_v63, 0.0  ;;  %v5266_v27 = vmul.f32 %v16449_v53, %v16449_v53 }
0x16ce   :  { %v5207_v20 = vpop.xlane.xlu0 %5206  ;;  %5290 = vadd.xlane.f32.xlu0 %v5289_v0 }
0x16cf   :  { %v16461_v23 = vsub.f32 %v16368_v37, %v5236_v41  ;;  %v5239_v55 = vmul.f32 0.03125, %v5207_v20  ;;  %v5286_v61 = vsel %vm299_vm1, %v5266_v27, 0.0  ;;  %v5269_v43 = vmul.f32 %v16455_v24, %v16455_v24 }
0x16d0   :  { %5287 = vadd.xlane.f32.xlu1 %v5286_v61  ;;  %v5204_v26 = vpop.xlane.xlu1 %5203 }
0x16d1   :  { %v16470_v52 = vsub.f32 %v16374_v9, %v5239_v55  ;;  %v5238_v50 = vmul.f32 0.03125, %v5204_v26  ;;  %v5295_v31 = vsel %vm299_vm1, %v5269_v43, 0.0  ;;  %v5268_v37 = vmul.f32 %v16461_v23, %v16461_v23 }
0x16d2   :  { %5296 = vadd.xlane.f32.xlu0 %v5295_v31 }
0x16d3   :  { %v16476_v14 = vsub.f32 %v16380_v47, %v5238_v50  ;;  %v5292_v6 = vsel %vm299_vm1, %v5268_v37, 0.0  ;;  %v5271_v22 = vmul.f32 %v16470_v52, %v16470_v52  ;;  %v11130_v47 = vld [vmem:[%s19053_s30 + $0x30] sm:$0xff] }
0x16d4   :  { %5293 = vadd.xlane.f32.xlu1 %v5292_v6  ;;  %12766 = vmatprep.subr.mxu0 %v11130_v47 }
0x16d5   :  { %v5301_v9 = vsel %vm299_vm1, %v5271_v22, 0.0  ;;  %v5270_v10 = vmul.f32 %v16476_v14, %v16476_v14  ;;  %12767 = vmatpush3.msra.mxu0 %v11130_v47 }
0x16d6   :  { %5302 = vadd.xlane.f32.xlu0 %v5301_v9  ;;  %12768 = vmatprep.subr.mxu0 %v11129_v56 }
0x16d7   :  { %v5298_v4 = vsel %vm299_vm1, %v5270_v10, 0.0  ;;  %12769 = vmatpush3.msra.mxu0 %v11129_v56 }
0x16d8   :  { %5299 = vadd.xlane.f32.xlu1 %v5298_v4  ;;  %12770 = vmatprep.subr.mxu0 %v11128_v54 }
0x16d9   :  { %12771 = vmatpush3.msra.mxu0 %v11128_v54 }
0x1741   :  { %v5213_v18 = vpop.xlane.xlu0 %5212 }
0x1742   :  { %v5241_v60 = vmul.f32 0.03125, %v5213_v18 }
0x1743   :  { %v5210_v19 = vpop.xlane.xlu1 %5209 }
0x1744   :  { %v16495_v48 = vsub.f32 %v16388_v2, %v5241_v60  ;;  %v5240_v8 = vmul.f32 0.03125, %v5210_v19 }
0x1746   :  { %v16498_v11 = vsub.f32 %v16392_v38, %v5240_v8  ;;  %v5273_v34 = vmul.f32 %v16495_v48, %v16495_v48 }
0x1747   :  { %v5219_v36 = vpop.xlane.xlu0 %5218 }
0x1748   :  { %v5243_v46 = vmul.f32 0.03125, %v5219_v36  ;;  %v5307_v51 = vsel %vm299_vm1, %v5273_v34, 0.0  ;;  %v5272_v42 = vmul.f32 %v16498_v11, %v16498_v11 }
0x1749   :  { %5308 = vadd.xlane.f32.xlu0 %v5307_v51  ;;  %v5216_v57 = vpop.xlane.xlu1 %5215 }
0x174a   :  { %v16506_v39 = vsub.f32 %v16400_v16, %v5243_v46  ;;  %v5242_v2 = vmul.f32 0.03125, %v5216_v57  ;;  %v5304_v25 = vsel %vm299_vm1, %v5272_v42, 0.0  ;;  %v16545_v57 = vld [vmem:[%s18983_s13] ss:$0 sm:$0xff] }
0x174b   :  { %v5225_v38 = vpop.xlane.xlu0 %5224  ;;  %5305 = vadd.xlane.f32.xlu1 %v5304_v25 }
0x174c   :  { %v16510_v21 = vsub.f32 %v16404_v13, %v5242_v2  ;;  %v5245_v32 = vmul.f32 0.03125, %v5225_v38  ;;  %v5275_v40 = vmul.f32 %v16506_v39, %v16506_v39 }
0x174d   :  { %v5222_v62 = vpop.xlane.xlu1 %5221 }
0x174e   :  { %v16515_v12 = vsub.f32 %v16410_v35, %v5245_v32  ;;  %v5244_v5 = vmul.f32 0.03125, %v5222_v62  ;;  %v5313_v16 = vsel %vm299_vm1, %v5275_v40, 0.0  ;;  %v5274_v45 = vmul.f32 %v16510_v21, %v16510_v21  ;;  %v16553_v62 = vld [vmem:[%s18984_s14] ss:$0 sm:$0xff] }
0x174f   :  { %5314 = vadd.xlane.f32.xlu0 %v5313_v16  ;;  %v5231_v30 = vpop.xlane.xlu0 %5230 }
0x1750   :  { %v16521_v29 = vsub.f32 %v16416_v28, %v5244_v5  ;;  %v5247_v13 = vmul.f32 0.03125, %v5231_v30  ;;  %v5310_v58 = vsel %vm299_vm1, %v5274_v45, 0.0  ;;  %v5277_v17 = vmul.f32 %v16515_v12, %v16515_v12 }
0x1751   :  { %5311 = vadd.xlane.f32.xlu1 %v5310_v58  ;;  %v5228_v35 = vpop.xlane.xlu1 %5227 }
0x1752   :  { %v16527_v15 = vsub.f32 %v16422_v59, %v5247_v13  ;;  %v5246_v63 = vmul.f32 0.03125, %v5228_v35  ;;  %v5319_v3 = vsel %vm299_vm1, %v5277_v17, 0.0  ;;  %v5276_v41 = vmul.f32 %v16521_v29, %v16521_v29 }
0x1753   :  { %5320 = vadd.xlane.f32.xlu0 %v5319_v3  ;;  %v5285_v28 = vpop.xlane.xlu0 %5284 }
0x1754   :  { %v16533_v0 = vsub.f32 %v16431_v7, %v5246_v63  ;;  %v5329_v27 = vmul.f32 0.03125, %v5285_v28  ;;  %v5316_v20 = vsel %vm299_vm1, %v5276_v41, 0.0  ;;  %v5279_v55 = vmul.f32 %v16527_v15, %v16527_v15 }
0x1755   :  { %5317 = vadd.xlane.f32.xlu1 %v5316_v20  ;;  %v5282_v59 = vpop.xlane.xlu1 %5281 }
0x1756   :  { %v5345_v61 = vadd.f32 1e-09, %v5329_v27  ;;  %v5328_v43 = vmul.f32 0.03125, %v5282_v59  ;;  %v5325_v26 = vsel %vm299_vm1, %v5279_v55, 0.0  ;;  %v5278_v33 = vmul.f32 %v16533_v0, %v16533_v0 }
0x1757   :  { %5326 = vadd.xlane.f32.xlu0 %v5325_v26  ;;  %v5291_v50 = vpop.xlane.xlu0 %5290 }
0x1758   :  { %13685 = vrsqrt.f32 %v5345_v61  ;;  %v5344_v7 = vadd.f32 1e-09, %v5328_v43  ;;  %v5331_v31 = vmul.f32 0.03125, %v5291_v50  ;;  %v5322_v37 = vsel %vm299_vm1, %v5278_v33, 0.0 }
0x1759   :  { %5323 = vadd.xlane.f32.xlu1 %v5322_v37  ;;  %v5288_v6 = vpop.xlane.xlu1 %5287 }
0x175a   :  { %13687 = vrsqrt.f32 %v5344_v7  ;;  %v5347_v22 = vadd.f32 1e-09, %v5331_v31  ;;  %v5330_v9 = vmul.f32 0.03125, %v5288_v6 }
0x175b   :  { %v5297_v10 = vpop.xlane.xlu0 %5296 }
0x175c   :  { %13689 = vrsqrt.f32 %v5347_v22  ;;  %v5346_v4 = vadd.f32 1e-09, %v5330_v9  ;;  %v5333_v47 = vmul.f32 0.03125, %v5297_v10 }
0x175d   :  { %v5294_v56 = vpop.xlane.xlu1 %5293 }
0x175e   :  { %13691 = vrsqrt.f32 %v5346_v4  ;;  %v5349_v54 = vadd.f32 1e-09, %v5333_v47  ;;  %v5332_v18 = vmul.f32 0.03125, %v5294_v56 }
0x175f   :  { %v5303_v60 = vpop.xlane.xlu0 %5302 }
0x1760   :  { %13693 = vrsqrt.f32 %v5349_v54  ;;  %v5348_v19 = vadd.f32 1e-09, %v5332_v18  ;;  %v5335_v8 = vmul.f32 0.03125, %v5303_v60 }
0x1761   :  { %v5300_v34 = vpop.xlane.xlu1 %5299 }
0x1762   :  { %13695 = vrsqrt.f32 %v5348_v19  ;;  %v5351_v36 = vadd.f32 1e-09, %v5335_v8  ;;  %v5334_v46 = vmul.f32 0.03125, %v5300_v34 }
0x1764   :  { %13697 = vrsqrt.f32 %v5351_v36  ;;  %v5350_v51 = vadd.f32 1e-09, %v5334_v46 }
0x1765   :  { %v13686_v42 = vpop.eup %13685 }
0x1766   :  { %v5377_v2 = vmul.f32 %v13686_v42, %v16428_v44  ;;  %13699 = vrsqrt.f32 %v5350_v51 }
0x1767   :  { %v13688_v25 = vpop.eup %13687 }
0x1768   :  { %v5376_v38 = vmul.f32 %v13688_v25, %v16436_v49  ;;  %v5399_v40 = vmul.f32 %v16545_v57, %v5377_v2 }
0x1769   :  { %v13690_v32 = vpop.eup %13689 }
0x176a   :  { %v5398_v5 = vmul.f32 %v16545_v57, %v5376_v38  ;;  %v5379_v16 = vmul.f32 %v13690_v32, %v16443_v1  ;;  %v16562_v49 = vadd.f32 %v16553_v62, %v5399_v40 }
0x176b   :  { %v13692_v45 = vpop.eup %13691 }
0x176c   :  { %v16558_v30 = vadd.f32 %v16553_v62, %v5398_v5  ;;  %v5378_v44 = vmul.f32 %v13692_v45, %v16449_v53  ;;  %19132 = vst [vmem:[#allocation42_spill] sm:$0xff] %v16562_v49  ;;  %v5401_v58 = vmul.f32 %v16545_v57, %v5379_v16 }
0x176d   :  { %v13694_v13 = vpop.eup %13693 }
0x176e   :  { %19131 = vst [vmem:[#allocation24_spill] sm:$0xff] %v16558_v30  ;;  %12772 = vmatprep.mubr.msk.f32.mxu0 %vm299_vm1, %v16558_v30  ;;  %v5400_v17 = vmul.f32 %v16545_v57, %v5378_v44  ;;  %v5381_v35 = vmul.f32 %v13694_v13, %v16455_v24  ;;  %v16576_v41 = vadd.f32 %v16553_v62, %v5401_v58 }
0x176f   :  { %v13696_v1 = vpop.eup %13695  ;;  %12773 = vmatmul.mubr.msk.f32.vlgmr.msra.gmra.mxu0 %vm299_vm1, %v16562_v49 }
0x1770   :  { %v16572_v63 = vadd.f32 %v16553_v62, %v5400_v17  ;;  %v5380_v53 = vmul.f32 %v13696_v1, %v16461_v23  ;;  %19134 = vst [vmem:[#allocation43_spill] sm:$0xff] %v16576_v41  ;;  %v5403_v28 = vmul.f32 %v16545_v57, %v5381_v35 }
0x1771   :  { %v13698_v3 = vpop.eup %13697 }
0x1772   :  { %19133 = vst [vmem:[#allocation41_spill] sm:$0xff] %v16572_v63  ;;  %12775 = vmatprep.mubr.msk.f32.mxu0 %vm299_vm1, %v16572_v63  ;;  %v5402_v24 = vmul.f32 %v16545_v57, %v5380_v53  ;;  %v5383_v27 = vmul.f32 %v13698_v3, %v16470_v52  ;;  %v16590_v59 = vadd.f32 %v16553_v62, %v5403_v28 }
0x1773   :  { %v13700_v20 = vpop.eup %13699  ;;  %12776 = vmatmul.mubr.msk.f32.gmra.mxu0 %vm299_vm1, %v16576_v41 }
0x1774   :  { %v16586_v55 = vadd.f32 %v16553_v62, %v5402_v24  ;;  %v5382_v23 = vmul.f32 %v13700_v20, %v16476_v14  ;;  %19136 = vst [vmem:[#allocation26_spill] sm:$0xff] %v16590_v59  ;;  %v5405_v61 = vmul.f32 %v16545_v57, %v5383_v27 }
0x1776   :  { %19135 = vst [vmem:[#allocation44_spill] sm:$0xff] %v16586_v55  ;;  %12778 = vmatprep.mubr.msk.f32.mxu0 %vm299_vm1, %v16586_v55  ;;  %v5404_v43 = vmul.f32 %v16545_v57, %v5382_v23  ;;  %v16602_v26 = vadd.f32 %v16553_v62, %v5405_v61 }
0x1777   :  { %12779 = vmatmul.mubr.msk.f32.gmra.mxu0 %vm299_vm1, %v16590_v59 }
0x1778   :  { %v16599_v52 = vadd.f32 %v16553_v62, %v5404_v43  ;;  %19138 = vst [vmem:[#allocation28_spill] sm:$0xff] %v16602_v26 }
0x177a   :  { %19137 = vst [vmem:[#allocation25_spill] sm:$0xff] %v16599_v52  ;;  %12781 = vmatprep.mubr.msk.f32.mxu0 %vm299_vm1, %v16599_v52 }
0x177b   :  { %12782 = vmatmul.mubr.msk.f32.gmra.mxu0 %vm299_vm1, %v16602_v26 }
0x17d2   :  { %v5309_v14 = vpop.xlane.xlu0 %5308 }
0x17d3   :  { %v5337_v33 = vmul.f32 0.03125, %v5309_v14 }
0x17d4   :  { %v5306_v50 = vpop.xlane.xlu1 %5305 }
0x17d5   :  { %v5353_v7 = vadd.f32 1e-09, %v5337_v33  ;;  %v5336_v31 = vmul.f32 0.03125, %v5306_v50 }
0x17d7   :  { %13701 = vrsqrt.f32 %v5353_v7  ;;  %v5352_v37 = vadd.f32 1e-09, %v5336_v31 }
0x17d8   :  { %v5315_v6 = vpop.xlane.xlu0 %5314 }
0x17d9   :  { %13703 = vrsqrt.f32 %v5352_v37  ;;  %v5339_v22 = vmul.f32 0.03125, %v5315_v6 }
0x17da   :  { %v5312_v9 = vpop.xlane.xlu1 %5311 }
0x17db   :  { %v5355_v10 = vadd.f32 1e-09, %v5339_v22  ;;  %v5338_v4 = vmul.f32 0.03125, %v5312_v9 }
0x17dc   :  { %v5321_v47 = vpop.xlane.xlu0 %5320 }
0x17dd   :  { %13705 = vrsqrt.f32 %v5355_v10  ;;  %v5354_v56 = vadd.f32 1e-09, %v5338_v4  ;;  %v5341_v54 = vmul.f32 0.03125, %v5321_v47 }
0x17de   :  { %v5318_v18 = vpop.xlane.xlu1 %5317 }
0x17df   :  { %13707 = vrsqrt.f32 %v5354_v56  ;;  %v5357_v60 = vadd.f32 1e-09, %v5341_v54  ;;  %v5340_v19 = vmul.f32 0.03125, %v5318_v18 }
0x17e0   :  { %v5327_v8 = vpop.xlane.xlu0 %5326 }
0x17e1   :  { %13709 = vrsqrt.f32 %v5357_v60  ;;  %v5356_v34 = vadd.f32 1e-09, %v5340_v19  ;;  %v5343_v36 = vmul.f32 0.03125, %v5327_v8 }
0x17e2   :  { %v5324_v46 = vpop.xlane.xlu1 %5323 }
0x17e3   :  { %13711 = vrsqrt.f32 %v5356_v34  ;;  %v5359_v51 = vadd.f32 1e-09, %v5343_v36  ;;  %v5342_v42 = vmul.f32 0.03125, %v5324_v46 }
0x17e4   :  { %v13702_v2 = vpop.eup %13701 }
0x17e5   :  { %13713 = vrsqrt.f32 %v5359_v51  ;;  %v5358_v25 = vadd.f32 1e-09, %v5342_v42  ;;  %v5385_v38 = vmul.f32 %v13702_v2, %v16495_v48 }
0x17e6   :  { %v13704_v32 = vpop.eup %13703 }
0x17e7   :  { %13715 = vrsqrt.f32 %v5358_v25  ;;  %v5384_v40 = vmul.f32 %v13704_v32, %v16498_v11  ;;  %v5407_v5 = vmul.f32 %v16545_v57, %v5385_v38 }
0x17e9   :  { %v5406_v16 = vmul.f32 %v16545_v57, %v5384_v40  ;;  %v16617_v17 = vadd.f32 %v16553_v62, %v5407_v5 }
0x17ea   :  { %v13706_v45 = vpop.eup %13705 }
0x17eb   :  { %v16613_v44 = vadd.f32 %v16553_v62, %v5406_v16  ;;  %v5387_v13 = vmul.f32 %v13706_v45, %v16506_v39  ;;  %19140 = vst [vmem:[#allocation30_spill] sm:$0xff] %v16617_v17 }
0x17ec   :  { %v13708_v58 = vpop.eup %13707 }
0x17ed   :  { %19139 = vst [vmem:[#allocation27_spill] sm:$0xff] %v16613_v44  ;;  %12784 = vmatprep.mubr.msk.f32.mxu0 %vm299_vm1, %v16613_v44  ;;  %v5386_v48 = vmul.f32 %v13708_v58, %v16510_v21  ;;  %v5409_v35 = vmul.f32 %v16545_v57, %v5387_v13 }
0x17ee   :  { %v13710_v11 = vpop.eup %13709  ;;  %12785 = vmatmul.mubr.msk.f32.gmra.mxu0 %vm299_vm1, %v16617_v17 }
0x17ef   :  { %v5408_v1 = vmul.f32 %v16545_v57, %v5386_v48  ;;  %v5389_v53 = vmul.f32 %v13710_v11, %v16515_v12  ;;  %v16632_v27 = vadd.f32 %v16553_v62, %v5409_v35 }
0x17f0   :  { %v13712_v39 = vpop.eup %13711 }
0x17f1   :  { %v16628_v3 = vadd.f32 %v16553_v62, %v5408_v1  ;;  %v5388_v28 = vmul.f32 %v13712_v39, %v16521_v29  ;;  %19142 = vst [vmem:[#allocation32_spill] sm:$0xff] %v16632_v27  ;;  %v5411_v21 = vmul.f32 %v16545_v57, %v5389_v53 }
0x17f2   :  { %v13714_v24 = vpop.eup %13713 }
0x17f3   :  { %19141 = vst [vmem:[#allocation29_spill] sm:$0xff] %v16628_v3  ;;  %12787 = vmatprep.mubr.msk.f32.mxu0 %vm299_vm1, %v16628_v3  ;;  %v5410_v20 = vmul.f32 %v16545_v57, %v5388_v28  ;;  %v5391_v23 = vmul.f32 %v13714_v24, %v16527_v15  ;;  %v16646_v43 = vadd.f32 %v16553_v62, %v5411_v21 }
0x17f4   :  { %v13716_v12 = vpop.eup %13715  ;;  %12788 = vmatmul.mubr.msk.f32.gmra.mxu0 %vm299_vm1, %v16632_v27 }
0x17f5   :  { %v16642_v61 = vadd.f32 %v16553_v62, %v5410_v20  ;;  %v5390_v29 = vmul.f32 %v13716_v12, %v16533_v0  ;;  %19144 = vst [vmem:[#allocation8_spill] sm:$0xff] %v16646_v43  ;;  %v5413_v14 = vmul.f32 %v16545_v57, %v5391_v23 }
0x17f7   :  { %19143 = vst [vmem:[#allocation31_spill] sm:$0xff] %v16642_v61  ;;  %12790 = vmatprep.mubr.msk.f32.mxu0 %vm299_vm1, %v16642_v61  ;;  %v5412_v33 = vmul.f32 %v16545_v57, %v5390_v29  ;;  %v16658_v50 = vadd.f32 %v16553_v62, %v5413_v14  ;;  %v16667_v57 = vld [vmem:[%s18974_s4 + $0x1] ss:$0 sm:$0xff]  ;;  %s19167_s4 = smov 112  }
0x17f8   :  { %12791 = vmatmul.mubr.msk.f32.gmra.mxu0 %vm299_vm1, %v16646_v43 }
0x17f9   :  { %v16655_v15 = vadd.f32 %v16553_v62, %v5412_v33  ;;  %19146 = vst [vmem:[#allocation10_spill] sm:$0xff] %v16658_v50 }
0x17fb   :  { %19145 = vst [vmem:[#allocation9_spill] sm:$0xff] %v16655_v15  ;;  %12793 = vmatprep.mubr.msk.f32.mxu0 %vm299_vm1, %v16655_v15 }
0x17fc   :  { %12794 = vmatmul.mubr.msk.f32.gmra.mxu0 %vm299_vm1, %v16658_v50 }
0x182f   :  { %v12774_v0 = vpop.f32.mrf.mxu0 }
0x1830   :  { %v16698_v60 = vadd.f32 %v12774_v0, %v16667_v57 }
0x1831   :  { %v5563_v7 = vpop.f32.mrf.mxu0 }
0x1832   :  { %v16670_v31 = vadd.f32 %v16667_v57, %v5563_v7 }
0x1833   :  { %v12777_v37 = vpop.f32.mrf.mxu0 }
0x1834   :  { %12812 = vmatprep.mubr.msk.f32.mxu1 %vm94_vm0, %v16670_v31  ;;  %v16688_v54 = vadd.f32 %v12777_v37, %v16667_v57 }
0x1835   :  { %v5573_v62 = vpop.f32.mrf.mxu0 }
0x1836   :  { %v16703_v19 = vadd.f32 %v16667_v57, %v5573_v62 }
0x1837   :  { %v12780_v6 = vpop.f32.mrf.mxu0 }
0x1838   :  { %v16683_v56 = vadd.f32 %v12780_v6, %v16667_v57 }
0x1839   :  { %v5583_v22 = vpop.f32.mrf.mxu0 }
0x183a   :  { %v16693_v18 = vadd.f32 %v16667_v57, %v5583_v22 }
0x183b   :  { %v12783_v9 = vpop.f32.mrf.mxu0 }
0x183c   :  { %v16675_v10 = vadd.f32 %v12783_v9, %v16667_v57 }
0x183d   :  { %v5593_v4 = vpop.f32.mrf.mxu0 }
0x183e   :  { %v16678_v47 = vadd.f32 %v16667_v57, %v5593_v4  ;;  %5664 = vrot.lane.b32.xlu1 %v16675_v10, %s14081_s27 }
0x1840   :  { %5662 = vrot.lane.b32.xlu0 %v16678_v47, %s14081_s27 }
0x1842   :  { %5660 = vrot.lane.b32.xlu1 %v16683_v56, %s14081_s27 }
0x1844   :  { %5656 = vrot.lane.b32.xlu0 %v16688_v54, %s14081_s27 }
0x1846   :  { %5658 = vrot.lane.b32.xlu1 %v16693_v18, %s14081_s27 }
0x1848   :  { %5652 = vrot.lane.b32.xlu0 %v16698_v60, %s14081_s27 }
0x184a   :  { %5654 = vrot.lane.b32.xlu1 %v16703_v19, %s14081_s27 }
0x184e   :  { %5650 = vrot.lane.b32.xlu1 %v16670_v31, %s14081_s27 }
0x18ae   :  { %v12786_v8 = vpop.f32.mrf.mxu0 }
0x18af   :  { %v16753_v39 = vadd.f32 %v12786_v8, %v16667_v57 }
0x18b0   :  { %v5665_v34 = vpop.permute.xlu1 %5664  ;;  %v5603_v36 = vpop.f32.mrf.mxu0 }
0x18b1   :  { %12796 = vmatprep.subr.msk.mxu1 %vm94_vm0, %v5665_v34  ;;  %19147 = vst [vmem:[#allocation12_spill] sm:$0xff] %v16753_v39  ;;  %v16759_v24 = vadd.f32 %v16667_v57, %v5603_v36 }
0x18b2   :  { %v5663_v46 = vpop.permute.xlu0 %5662  ;;  %12797 = vmatpush3.xpose.msk.msra.mxu1 %vm94_vm0, %v5665_v34 }
0x18b3   :  { %12798 = vmatprep.subr.msk.mxu1 %vm94_vm0, %v5663_v46  ;;  %19148 = vst [vmem:[#allocation11_spill] sm:$0xff] %v16759_v24 }
0x18b4   :  { %v12789_v51 = vpop.f32.mrf.mxu0  ;;  %v5661_v42 = vpop.permute.xlu1 %5660 }
0x18b5   :  { %v16741_v35 = vadd.f32 %v12789_v51, %v16667_v57 }
0x18b6   :  { %v5613_v2 = vpop.f32.mrf.mxu0  ;;  %12799 = vmatpush3.xpose.msk.msra.mxu1 %vm94_vm0, %v5663_v46  ;;  %v5657_v16 = vpop.permute.xlu0 %5656 }
0x18b7   :  { %12800 = vmatprep.subr.msk.mxu1 %vm94_vm0, %v5661_v42  ;;  %v16747_v53 = vadd.f32 %v16667_v57, %v5613_v2 }
0x18b8   :  { %v12792_v25 = vpop.f32.mrf.mxu0  ;;  %v5659_v38 = vpop.permute.xlu1 %5658 }
0x18b9   :  { %v16729_v58 = vadd.f32 %v12792_v25, %v16667_v57 }
0x18ba   :  { %v5623_v32 = vpop.f32.mrf.mxu0  ;;  %12801 = vmatpush3.xpose.msk.msra.mxu1 %vm94_vm0, %v5661_v42  ;;  %v5653_v1 = vpop.permute.xlu0 %5652 }
0x18bb   :  { %12802 = vmatprep.subr.msk.mxu1 %vm94_vm0, %v5659_v38  ;;  %v16735_v11 = vadd.f32 %v16667_v57, %v5623_v32 }
0x18bc   :  { %v12795_v40 = vpop.f32.mrf.mxu0  ;;  %v5655_v48 = vpop.permute.xlu1 %5654 }
0x18bd   :  { %v16719_v5 = vadd.f32 %v12795_v40, %v16667_v57 }
0x18be   :  { %v5633_v45 = vpop.f32.mrf.mxu0  ;;  %12803 = vmatpush3.xpose.msk.msra.mxu1 %vm94_vm0, %v5659_v38 }
0x18bf   :  { %v16723_v13 = vadd.f32 %v16667_v57, %v5633_v45  ;;  %6098 = vrot.lane.b32.xlu0 %v16719_v5, %s14081_s27  ;;  %12804 = vmatprep.subr.msk.mxu1 %vm94_vm0, %v5657_v16 }
0x18c0   :  { %v5651_v28 = vpop.permute.xlu1 %5650 }
0x18c1   :  { %6096 = vrot.lane.b32.xlu1 %v16723_v13, %s14081_s27 }
0x18c2   :  { %12805 = vmatpush3.xpose.msk.msra.mxu1 %vm94_vm0, %v5657_v16 }
0x18c3   :  { %6094 = vrot.lane.b32.xlu0 %v16729_v58, %s14081_s27  ;;  %12806 = vmatprep.subr.msk.mxu1 %vm94_vm0, %v5655_v48 }
0x18c5   :  { %6092 = vrot.lane.b32.xlu1 %v16735_v11, %s14081_s27 }
0x18c6   :  { %12807 = vmatpush3.xpose.msk.msra.mxu1 %vm94_vm0, %v5655_v48 }
0x18c7   :  { %6090 = vrot.lane.b32.xlu0 %v16741_v35, %s14081_s27  ;;  %12808 = vmatprep.subr.msk.mxu1 %vm94_vm0, %v5653_v1 }
0x18c9   :  { %6088 = vrot.lane.b32.xlu1 %v16747_v53, %s14081_s27 }
0x18ca   :  { %12809 = vmatpush3.xpose.msk.msra.mxu1 %vm94_vm0, %v5653_v1 }
0x18cb   :  { %6086 = vrot.lane.b32.xlu0 %v16753_v39, %s14081_s27  ;;  %12810 = vmatprep.subr.msk.mxu1 %vm94_vm0, %v5651_v28 }
0x18cd   :  { %6084 = vrot.lane.b32.xlu1 %v16759_v24, %s14081_s27  ;;  %s19168_s27 = smov 48  }
0x18ce   :  { %12811 = vmatpush3.xpose.msk.msra.mxu1 %vm94_vm0, %v5651_v28 }
0x18cf   :  { %5935 = vrot.lane.b32.xlu0 %v16678_v47, %s14082_s28 }
0x18d1   :  { %5937 = vrot.lane.b32.xlu1 %v16675_v10, %s14082_s28  ;;  %12813 = vmatmul.mubr.msk.f32.vlgmr.msra.gmra.mxu1 %vm94_vm0, %v16698_v60 }
0x18d2   :  { %12815 = vmatprep.mubr.msk.f32.mxu1 %vm94_vm0, %v16703_v19 }
0x18d3   :  { %5929 = vrot.lane.b32.xlu0 %v16688_v54, %s14082_s28 }
0x18d5   :  { %5933 = vrot.lane.b32.xlu1 %v16683_v56, %s14082_s28  ;;  %12816 = vmatmul.mubr.msk.f32.gmra.mxu1 %vm94_vm0, %v16688_v54 }
0x18d6   :  { %12818 = vmatprep.mubr.msk.f32.mxu1 %vm94_vm0, %v16693_v18 }
0x18d7   :  { %5925 = vrot.lane.b32.xlu0 %v16698_v60, %s14082_s28 }
0x18d9   :  { %5931 = vrot.lane.b32.xlu1 %v16693_v18, %s14082_s28  ;;  %12819 = vmatmul.mubr.msk.f32.gmra.mxu1 %vm94_vm0, %v16683_v56 }
0x18da   :  { %12821 = vmatprep.mubr.msk.f32.mxu1 %vm94_vm0, %v16678_v47 }
0x18db   :  { %6372 = vrot.lane.b32.xlu0 %v16719_v5, %s14082_s28 }
0x18dd   :  { %5927 = vrot.lane.b32.xlu1 %v16703_v19, %s14082_s28  ;;  %12822 = vmatmul.mubr.msk.f32.gmra.mxu1 %vm94_vm0, %v16675_v10 }
0x18de   :  { %12868 = vmatprep.mubr.msk.f32.mxu1 %vm94_vm0, %v16759_v24 }
0x18df   :  { %6366 = vrot.lane.b32.xlu0 %v16735_v11, %s14082_s28 }
0x18e1   :  { %5923 = vrot.lane.b32.xlu1 %v16670_v31, %s14082_s28 }
0x18e3   :  { %6362 = vrot.lane.b32.xlu0 %v16747_v53, %s14082_s28 }
0x18e5   :  { %6368 = vrot.lane.b32.xlu1 %v16729_v58, %s14082_s28 }
0x18e7   :  { %6541 = vrot.lane.b32.xlu0 %v16675_v10, %s14083_s29 }
0x18e9   :  { %6364 = vrot.lane.b32.xlu1 %v16741_v35, %s14082_s28 }
0x18eb   :  { %6370 = vrot.lane.b32.xlu0 %v16723_v13, %s14082_s28 }
0x18ed   :  { %6360 = vrot.lane.b32.xlu1 %v16753_v39, %s14082_s28 }
0x18f1   :  { %6358 = vrot.lane.b32.xlu1 %v16759_v24, %s14082_s28  ;;  %s19173_s28 = smov 72  }
0x18f5   :  { %6539 = vrot.lane.b32.xlu1 %v16678_v47, %s14083_s29 }
0x1931   :  { %v6099_v21 = vpop.permute.xlu0 %6098 }
0x1932   :  { %12852 = vmatprep.subr.msk.mxu1 %vm94_vm0, %v6099_v21 }
0x1933   :  { %12853 = vmatpush3.xpose.msk.msra.mxu1 %vm94_vm0, %v6099_v21  ;;  %v6097_v20 = vpop.permute.xlu1 %6096 }
0x1934   :  { %12854 = vmatprep.subr.msk.mxu1 %vm94_vm0, %v6097_v20 }
0x1935   :  { %v6095_v23 = vpop.permute.xlu0 %6094 }
0x1937   :  { %12855 = vmatpush3.xpose.msk.msra.mxu1 %vm94_vm0, %v6097_v20  ;;  %v6093_v12 = vpop.permute.xlu1 %6092 }
0x1938   :  { %12856 = vmatprep.subr.msk.mxu1 %vm94_vm0, %v6095_v23 }
0x1939   :  { %v6091_v29 = vpop.permute.xlu0 %6090 }
0x193b   :  { %12857 = vmatpush3.xpose.msk.msra.mxu1 %vm94_vm0, %v6095_v23  ;;  %v6089_v14 = vpop.permute.xlu1 %6088 }
0x193c   :  { %12858 = vmatprep.subr.msk.mxu1 %vm94_vm0, %v6093_v12 }
0x193d   :  { %v6087_v33 = vpop.permute.xlu0 %6086 }
0x193f   :  { %12859 = vmatpush3.xpose.msk.msra.mxu1 %vm94_vm0, %v6093_v12  ;;  %v6085_v0 = vpop.permute.xlu1 %6084 }
0x1940   :  { %12860 = vmatprep.subr.msk.mxu1 %vm94_vm0, %v6091_v29 }
0x1941   :  { %v5936_v57 = vpop.permute.xlu0 %5935 }
0x1943   :  { %12861 = vmatpush3.xpose.msk.msra.mxu1 %vm94_vm0, %v6091_v29  ;;  %v5938_v7 = vpop.permute.xlu1 %5937 }
0x1944   :  { %12824 = vmatprep.subr.mxu0 %v5938_v7  ;;  %12862 = vmatprep.subr.msk.mxu1 %vm94_vm0, %v6089_v14 }
0x1945   :  { %12825 = vmatpush3.msra.mxu0 %v5938_v7  ;;  %v5930_v62 = vpop.permute.xlu0 %5929 }
0x1946   :  { %12826 = vmatprep.subr.mxu0 %v5936_v57 }
0x1947   :  { %12827 = vmatpush3.msra.mxu0 %v5936_v57  ;;  %12863 = vmatpush3.xpose.msk.msra.mxu1 %vm94_vm0, %v6089_v14  ;;  %v5934_v37 = vpop.permute.xlu1 %5933 }
0x1948   :  { %12828 = vmatprep.subr.mxu0 %v5934_v37  ;;  %12864 = vmatprep.subr.msk.mxu1 %vm94_vm0, %v6087_v33 }
0x1949   :  { %12829 = vmatpush3.msra.mxu0 %v5934_v37  ;;  %v5926_v22 = vpop.permute.xlu0 %5925 }
0x194b   :  { %12865 = vmatpush3.xpose.msk.msra.mxu1 %vm94_vm0, %v6087_v33  ;;  %v5932_v6 = vpop.permute.xlu1 %5931 }
0x194c   :  { %12830 = vmatprep.subr.mxu0 %v5932_v6  ;;  %12866 = vmatprep.subr.msk.mxu1 %vm94_vm0, %v6085_v0 }
0x194d   :  { %12831 = vmatpush3.msra.mxu0 %v5932_v6  ;;  %v16839_v8 = vpop.permute.xlu0 %6372 }
0x194e   :  { %12832 = vmatprep.subr.mxu0 %v5930_v62 }
0x194f   :  { %12833 = vmatpush3.msra.mxu0 %v5930_v62  ;;  %12867 = vmatpush3.xpose.msk.msra.mxu1 %vm94_vm0, %v6085_v0  ;;  %v5928_v9 = vpop.permute.xlu1 %5927 }
0x1950   :  { %12834 = vmatprep.subr.mxu0 %v5928_v9 }
0x1951   :  { %12835 = vmatpush3.msra.mxu0 %v5928_v9  ;;  %v16864_v12 = vpop.permute.xlu0 %6366 }
0x1952   :  { %12836 = vmatprep.subr.mxu0 %v5926_v22  ;;  %12869 = vmatmul.mubr.msk.f32.vlgmr.msra.gmra.mxu1 %vm94_vm0, %v16753_v39 }
0x1953   :  { %12837 = vmatpush3.msra.mxu0 %v5926_v22  ;;  %12871 = vmatprep.mubr.msk.f32.mxu1 %vm94_vm0, %v16747_v53  ;;  %v5924_v4 = vpop.permute.xlu1 %5923 }
0x1954   :  { %12838 = vmatprep.subr.mxu0 %v5924_v4 }
0x1955   :  { %12839 = vmatpush3.msra.mxu0 %v5924_v4  ;;  %v16868_v14 = vpop.permute.xlu0 %6362 }
0x1956   :  { %12872 = vmatmul.mubr.msk.f32.gmra.mxu1 %vm94_vm0, %v16741_v35  ;;  %12880 = vmatprep.subr.mxu0 %v16839_v8 }
0x1957   :  { %12874 = vmatprep.mubr.msk.f32.mxu1 %vm94_vm0, %v16735_v11  ;;  %v16860_v20 = vpop.permute.xlu1 %6368 }
0x1959   :  { %v16872_v0 = vpop.permute.xlu0 %6541 }
0x195a   :  { %12875 = vmatmul.mubr.msk.f32.gmra.mxu1 %vm94_vm0, %v16729_v58 }
0x195b   :  { %12877 = vmatprep.mubr.msk.f32.mxu1 %vm94_vm0, %v16723_v13  ;;  %v16862_v23 = vpop.permute.xlu1 %6364 }
0x195d   :  { %v16876_v7 = vpop.permute.xlu0 %6370 }
0x195e   :  { %12878 = vmatmul.mubr.msk.f32.gmra.mxu1 %vm94_vm0, %v16719_v5 }
0x195f   :  { %v16866_v29 = vpop.permute.xlu1 %6360 }
0x1963   :  { %v16870_v33 = vpop.permute.xlu1 %6358 }
0x1967   :  { %v16874_v57 = vpop.permute.xlu1 %6539 }
0x1991   :  { %v12814_v34 = vpop.f32.mrf.mxu1 }
0x1992   :  { %v5806_v36 = vsel %vm654_vm2, %v12814_v34, -inf }
0x1993   :  { %5807 = vmax.xlane.f32.xlu1 %v5806_v36  ;;  %v5764_v46 = vpop.f32.mrf.mxu1 }
0x1994   :  { %v5803_v51 = vsel %vm654_vm2, %v5764_v46, -inf }
0x1995   :  { %5804 = vmax.xlane.f32.xlu0 %v5803_v51  ;;  %v12817_v42 = vpop.f32.mrf.mxu1 }
0x1996   :  { %v5812_v25 = vsel %vm654_vm2, %v12817_v42, -inf }
0x1997   :  { %v5774_v2 = vpop.f32.mrf.mxu1 }
0x1998   :  { %v5809_v40 = vsel %vm654_vm2, %v5774_v2, -inf }
0x1999   :  { %5813 = vmax.xlane.f32.xlu0 %v5812_v25  ;;  %v12820_v38 = vpop.f32.mrf.mxu1 }
0x199a   :  { %v5818_v1 = vsel %vm654_vm2, %v12820_v38, -inf }
0x199b   :  { %v5784_v32 = vpop.f32.mrf.mxu1 }
0x199c   :  { %v5815_v16 = vsel %vm654_vm2, %v5784_v32, -inf }
0x199d   :  { %5810 = vmax.xlane.f32.xlu0 %v5809_v40  ;;  %5816 = vmax.xlane.f32.xlu1 %v5815_v16  ;;  %v12823_v45 = vpop.f32.mrf.mxu1 }
0x199e   :  { %v5824_v21 = vsel %vm654_vm2, %v12823_v45, -inf }
0x199f   :  { %v5794_v48 = vpop.f32.mrf.mxu1 }
0x19a0   :  { %v5821_v28 = vsel %vm654_vm2, %v5794_v48, -inf }
0x19a1   :  { %5819 = vmax.xlane.f32.xlu0 %v5818_v1  ;;  %5822 = vmax.xlane.f32.xlu1 %v5821_v28 }
0x19a5   :  { %5825 = vmax.xlane.f32.xlu0 %v5824_v21 }
0x1a1c   :  { %v5808_v37 = vpop.xlane.xlu1 %5807 }
0x1a1d   :  { %v5828_v62 = vsub.f32 %v12814_v34, %v5808_v37 }
0x1a1e   :  { %v5805_v6 = vpop.xlane.xlu0 %5804 }
0x1a1f   :  { %v5837_v22 = vmul.f32 1.442695, %v5828_v62  ;;  %v5827_v9 = vsub.f32 %v5764_v46, %v5805_v6 }
0x1a21   :  { %13717 = vpow2.f32 %v5837_v22  ;;  %v5835_v4 = vmul.f32 1.442695, %v5827_v9 }
0x1a22   :  { %v5814_v36 = vpop.xlane.xlu0 %5813 }
0x1a23   :  { %13719 = vpow2.f32 %v5835_v4  ;;  %v5830_v51 = vsub.f32 %v12817_v42, %v5814_v36 }
0x1a25   :  { %v5841_v25 = vmul.f32 1.442695, %v5830_v51 }
0x1a26   :  { %v5811_v40 = vpop.xlane.xlu0 %5810  ;;  %v5817_v16 = vpop.xlane.xlu1 %5816 }
0x1a27   :  { %13721 = vpow2.f32 %v5841_v25  ;;  %v5829_v1 = vsub.f32 %v5774_v2, %v5811_v40  ;;  %v5831_v28 = vsub.f32 %v5784_v32, %v5817_v16 }
0x1a29   :  { %v5839_v21 = vmul.f32 1.442695, %v5829_v1  ;;  %v5843_v15 = vmul.f32 1.442695, %v5831_v28 }
0x1a2a   :  { %v5820_v50 = vpop.xlane.xlu0 %5819  ;;  %v5823_v61 = vpop.xlane.xlu1 %5822 }
0x1a2b   :  { %13723 = vpow2.f32 %v5839_v21  ;;  %v5832_v34 = vsub.f32 %v12820_v38, %v5820_v50  ;;  %v5833_v37 = vsub.f32 %v5794_v48, %v5823_v61  ;;  %v16886_v61 = vpop.f32.mrf.mxu1 }
0x1a2c   :  { %13725 = vpow2.f32 %v5843_v15 }
0x1a2d   :  { %v5845_v46 = vmul.f32 1.442695, %v5832_v34  ;;  %v5847_v62 = vmul.f32 1.442695, %v5833_v37 }
0x1a2e   :  { %v16878_v6 = vpop.eup %13717  ;;  %v5826_v22 = vpop.xlane.xlu0 %5825 }
0x1a2f   :  { %13727 = vpow2.f32 %v5845_v46  ;;  %v5834_v42 = vsub.f32 %v12823_v45, %v5826_v22  ;;  %v5854_v9 = vsel %vm654_vm2, %v16878_v6, 0.0  ;;  %v16892_v45 = vpop.f32.mrf.mxu1 }
0x1a30   :  { %v16882_v2 = vpop.eup %13719  ;;  %5855 = vadd.xlane.f32.xlu0 %v5854_v9  ;;  %13729 = vpow2.f32 %v5847_v62  ;;  %v6240_v62 = vsel %vm654_vm2, %v16886_v61, -inf  ;;  %v6237_v22 = vsel %vm654_vm2, %v16892_v45, -inf }
0x1a31   :  { %v5849_v32 = vmul.f32 1.442695, %v5834_v42  ;;  %v5851_v50 = vsel %vm654_vm2, %v16882_v2, 0.0  ;;  %v16900_v51 = vpop.f32.mrf.mxu1 }
0x1a32   :  { %5852 = vadd.xlane.f32.xlu1 %v5851_v50  ;;  %v6246_v9 = vsel %vm654_vm2, %v16900_v51, -inf }
0x1a33   :  { %13731 = vpow2.f32 %v5849_v32  ;;  %v16910_v28 = vpop.f32.mrf.mxu1 }
0x1a34   :  { %v16888_v15 = vpop.eup %13721  ;;  %v6243_v32 = vsel %vm654_vm2, %v16910_v28, -inf }
0x1a35   :  { %v5860_v38 = vsel %vm654_vm2, %v16888_v15, 0.0  ;;  %v16918_v46 = vpop.f32.mrf.mxu1 }
0x1a36   :  { %5861 = vadd.xlane.f32.xlu0 %v5860_v38  ;;  %v6252_v38 = vsel %vm654_vm2, %v16918_v46, -inf }
0x1a37   :  { %v16924_v42 = vpop.f32.mrf.mxu1 }
0x1a38   :  { %v16894_v48 = vpop.eup %13723 }
0x1a39   :  { %v5857_v4 = vsel %vm654_vm2, %v16894_v48, 0.0  ;;  %v16898_v36 = vpop.eup %13725  ;;  %v16930_v50 = vpop.f32.mrf.mxu1 }
0x1a3a   :  { %5858 = vadd.xlane.f32.xlu1 %v5857_v4  ;;  %v5863_v16 = vsel %vm654_vm2, %v16898_v36, 0.0  ;;  %v6249_v4 = vsel %vm654_vm2, %v16924_v42, -inf }
0x1a3c   :  { %v16902_v25 = vpop.eup %13727 }
0x1a3d   :  { %v5866_v40 = vsel %vm654_vm2, %v16902_v25, 0.0  ;;  %v16908_v1 = vpop.eup %13729 }
0x1a3e   :  { %5867 = vadd.xlane.f32.xlu0 %v5866_v40  ;;  %5864 = vadd.xlane.f32.xlu1 %v5863_v16  ;;  %v5869_v37 = vsel %vm654_vm2, %v16908_v1, 0.0  ;;  %v16936_v40 = vpop.f32.mrf.mxu1  ;;  %v6258_v16 = vsel %vm654_vm2, %v16930_v50, -inf }
0x1a40   :  { %v16912_v21 = vpop.eup %13731 }
0x1a41   :  { %v5872_v34 = vsel %vm654_vm2, %v16912_v21, 0.0 }
0x1a42   :  { %5873 = vadd.xlane.f32.xlu0 %v5872_v34  ;;  %5870 = vadd.xlane.f32.xlu1 %v5869_v37  ;;  %v6255_v34 = vsel %vm654_vm2, %v16936_v40, -inf }
0x1a46   :  { %6241 = vmax.xlane.f32.xlu0 %v6240_v62  ;;  %6238 = vmax.xlane.f32.xlu1 %v6237_v22 }
0x1a4a   :  { %6247 = vmax.xlane.f32.xlu0 %v6246_v9  ;;  %6244 = vmax.xlane.f32.xlu1 %v6243_v32 }
0x1a4e   :  { %6253 = vmax.xlane.f32.xlu0 %v6252_v38  ;;  %6250 = vmax.xlane.f32.xlu1 %v6249_v4 }
0x1a52   :  { %6259 = vmax.xlane.f32.xlu0 %v6258_v16  ;;  %6256 = vmax.xlane.f32.xlu1 %v6255_v34 }
0x1a63   :  { %6535 = vrot.lane.b32.xlu1 %v16693_v18, %s14083_s29 }
0x1a68   :  { %6537 = vrot.lane.b32.xlu0 %v16683_v56, %s14083_s29 }
0x1ab9   :  { %v5856_v37 = vpop.xlane.xlu0 %5855 }
0x1aba   :  { %13733 = vrcp.f32 %v5856_v37 }
0x1abb   :  { %v5853_v62 = vpop.xlane.xlu1 %5852 }
0x1abc   :  { %13735 = vrcp.f32 %v5853_v62 }
0x1abf   :  { %v5862_v22 = vpop.xlane.xlu0 %5861 }
0x1ac0   :  { %13737 = vrcp.f32 %v5862_v22 }
0x1ac3   :  { %v5859_v9 = vpop.xlane.xlu1 %5858 }
0x1ac4   :  { %13739 = vrcp.f32 %v5859_v9 }
0x1ac7   :  { %v13734_v32 = vpop.eup %13733  ;;  %v5868_v38 = vpop.xlane.xlu0 %5867 }
0x1ac8   :  { %v5865_v4 = vpop.xlane.xlu1 %5864  ;;  %v5884_v43 = vmul.f32 %v13734_v32, %v5856_v37  ;;  %13741 = vrcp.f32 %v5868_v38 }
0x1ac9   :  { %v13736_v16 = vpop.eup %13735  ;;  %13743 = vrcp.f32 %v5865_v4 }
0x1aca   :  { %v5892_v34 = vsub.f32 2.0, %v5884_v43  ;;  %v5883_v3 = vmul.f32 %v13736_v16, %v5853_v62 }
0x1acb   :  { %v5874_v27 = vpop.xlane.xlu0 %5873 }
0x1acc   :  { %v5871_v44 = vpop.xlane.xlu1 %5870  ;;  %v5900_v17 = vmul.f32 %v13734_v32, %v5892_v34  ;;  %v5891_v26 = vsub.f32 2.0, %v5883_v3  ;;  %13745 = vrcp.f32 %v5874_v27 }
0x1acd   :  { %v13738_v59 = vpop.eup %13737  ;;  %13747 = vrcp.f32 %v5871_v44 }
0x1ace   :  { %v5908_v52 = vmul.f32 %v16878_v6, %v5900_v17  ;;  %v5899_v41 = vmul.f32 %v13736_v16, %v5891_v26  ;;  %v5886_v55 = vmul.f32 %v13738_v59, %v5862_v22 }
0x1acf   :  { %v6242_v63 = vpop.xlane.xlu0 %6241 }
0x1ad0   :  { %v6239_v49 = vpop.xlane.xlu1 %6238  ;;  %5916 = vst.msk [vmem:[#allocation4 + $0x8] sm:$0xff] %vm654_vm2, %v5908_v52  ;;  %v5894_v37 = vsub.f32 2.0, %v5886_v55  ;;  %v6262_v30 = vsub.f32 %v16886_v61, %v6242_v63  ;;  %v5907_v62 = vmul.f32 %v16882_v2, %v5899_v41 }
0x1ad1   :  { %v6261_v43 = vsub.f32 %v16892_v45, %v6239_v49  ;;  %v13740_v32 = vpop.eup %13739 }
0x1ad2   :  { %v5902_v3 = vmul.f32 %v13738_v59, %v5894_v37  ;;  %v5885_v34 = vmul.f32 %v13740_v32, %v5859_v9  ;;  %v6271_v39 = vmul.f32 1.442695, %v6262_v30  ;;  %5915 = vst.msk [vmem:[#allocation4] sm:$0xff] %vm654_vm2, %v5907_v62  ;;  %12840 = vmatprep.mubr.msk.f32.mxu0 %vm654_vm2, %v5907_v62 }
0x1ad3   :  { %v6269_v24 = vmul.f32 1.442695, %v6261_v43  ;;  %12841 = vmatmul.mubr.msk.f32.vlgmr.msra.gmra.mxu0 %vm654_vm2, %v5908_v52 }
0x1ad4   :  { %v5910_v26 = vmul.f32 %v16888_v15, %v5902_v3  ;;  %v5893_v55 = vsub.f32 2.0, %v5885_v34  ;;  %13749 = vpow2.f32 %v6271_v39  ;;  %12881 = vmatpush3.msra.mxu0 %v16839_v8 }
0x1ad5   :  { %v13742_v49 = vpop.eup %13741  ;;  %13751 = vpow2.f32 %v6269_v24  ;;  %12882 = vmatprep.subr.mxu0 %v16876_v7 }
0x1ad6   :  { %v13744_v63 = vpop.eup %13743  ;;  %5918 = vst.msk [vmem:[#allocation4 + $0x18] sm:$0xff] %vm654_vm2, %v5910_v26  ;;  %v5901_v30 = vmul.f32 %v13740_v32, %v5893_v55  ;;  %v5888_v41 = vmul.f32 %v13742_v49, %v5868_v38  ;;  %12883 = vmatpush3.msra.mxu0 %v16876_v7 }
0x1ad7   :  { %v5887_v59 = vmul.f32 %v13744_v63, %v5865_v4  ;;  %12884 = vmatprep.subr.mxu0 %v16860_v20 }
0x1ad8   :  { %v5896_v52 = vsub.f32 2.0, %v5888_v41  ;;  %12885 = vmatpush3.msra.mxu0 %v16860_v20  ;;  %v5909_v24 = vmul.f32 %v16894_v48, %v5901_v30 }
0x1ad9   :  { %v13746_v17 = vpop.eup %13745  ;;  %v5895_v39 = vsub.f32 2.0, %v5887_v59  ;;  %12886 = vmatprep.subr.mxu0 %v16864_v12 }
0x1ada   :  { %v13748_v8 = vpop.eup %13747  ;;  %v5904_v6 = vmul.f32 %v13742_v49, %v5896_v52  ;;  %v5890_v2 = vmul.f32 %v13746_v17, %v5874_v27  ;;  %12887 = vmatpush3.msra.mxu0 %v16864_v12  ;;  %5917 = vst.msk [vmem:[#allocation4 + $0x10] sm:$0xff] %vm654_vm2, %v5909_v24  ;;  %12843 = vmatprep.mubr.msk.f32.mxu0 %vm654_vm2, %v5909_v24 }
0x1adb   :  { %v5903_v61 = vmul.f32 %v13744_v63, %v5895_v39  ;;  %v5889_v15 = vmul.f32 %v13748_v8, %v5871_v44  ;;  %12888 = vmatprep.subr.mxu0 %v16862_v23  ;;  %12844 = vmatmul.mubr.msk.f32.gmra.mxu0 %vm654_vm2, %v5910_v26 }
0x1adc   :  { %v5912_v20 = vmul.f32 %v16902_v25, %v5904_v6  ;;  %v5898_v7 = vsub.f32 2.0, %v5890_v2  ;;  %12889 = vmatpush3.msra.mxu0 %v16862_v23 }
0x1add   :  { %v5897_v45 = vsub.f32 2.0, %v5889_v15  ;;  %v5911_v27 = vmul.f32 %v16898_v36, %v5903_v61  ;;  %12890 = vmatprep.subr.mxu0 %v16868_v14 }
0x1ade   :  { %5920 = vst.msk [vmem:[#allocation4 + $0x28] sm:$0xff] %vm654_vm2, %v5912_v20  ;;  %v5906_v12 = vmul.f32 %v13746_v17, %v5898_v7  ;;  %12891 = vmatpush3.msra.mxu0 %v16868_v14 }
0x1adf   :  { %v5905_v44 = vmul.f32 %v13748_v8, %v5897_v45  ;;  %5919 = vst.msk [vmem:[#allocation4 + $0x20] sm:$0xff] %vm654_vm2, %v5911_v27  ;;  %12846 = vmatprep.mubr.msk.f32.mxu0 %vm654_vm2, %v5911_v27  ;;  %12892 = vmatprep.subr.mxu0 %v16866_v29 }
0x1ae0   :  { %v5914_v48 = vmul.f32 %v16912_v21, %v5906_v12  ;;  %12847 = vmatmul.mubr.msk.f32.gmra.mxu0 %vm654_vm2, %v5912_v20  ;;  %v6245_v21 = vpop.xlane.xlu1 %6244 }
0x1ae1   :  { %v16979_v23 = vpop.eup %13749  ;;  %12893 = vmatpush3.msra.mxu0 %v16866_v29  ;;  %v5913_v36 = vmul.f32 %v16908_v1, %v5905_v44  ;;  %v6248_v1 = vpop.xlane.xlu0 %6247  ;;  %v6263_v38 = vsub.f32 %v16910_v28, %v6245_v21 }
0x1ae2   :  { %v16983_v25 = vpop.eup %13751  ;;  %5922 = vst.msk [vmem:[#allocation4 + $0x38] sm:$0xff] %vm654_vm2, %v5914_v48  ;;  %12894 = vmatprep.subr.mxu0 %v16870_v33  ;;  %v6288_v14 = vsel %vm654_vm2, %v16979_v23, 0.0  ;;  %v6264_v22 = vsub.f32 %v16900_v51, %v6248_v1 }
0x1ae3   :  { %12895 = vmatpush3.msra.mxu0 %v16870_v33  ;;  %5921 = vst.msk [vmem:[#allocation4 + $0x30] sm:$0xff] %vm654_vm2, %v5913_v36  ;;  %12849 = vmatprep.mubr.msk.f32.mxu0 %vm654_vm2, %v5913_v36  ;;  %v6285_v29 = vsel %vm654_vm2, %v16983_v25, 0.0  ;;  %v6273_v37 = vmul.f32 1.442695, %v6263_v38 }
0x1ae4   :  { %12908 = vmatprep.subr.msk.mxu0 %vm94_vm0, %v16872_v0  ;;  %6289 = vadd.xlane.f32.xlu0 %v6288_v14  ;;  %v6251_v9 = vpop.xlane.xlu1 %6250  ;;  %v6275_v4 = vmul.f32 1.442695, %v6264_v22 }
0x1ae5   :  { %12850 = vmatmul.mubr.msk.f32.gmra.mxu0 %vm654_vm2, %v5914_v48  ;;  %6286 = vadd.xlane.f32.xlu1 %v6285_v29  ;;  %v6254_v33 = vpop.xlane.xlu0 %6253  ;;  %v6265_v43 = vsub.f32 %v16924_v42, %v6251_v9 }
0x1ae6   :  { %v6266_v16 = vsub.f32 %v16918_v46, %v6254_v33  ;;  %13753 = vpow2.f32 %v6275_v4 }
0x1ae7   :  { %13755 = vpow2.f32 %v6273_v37  ;;  %v6277_v26 = vmul.f32 1.442695, %v6265_v43 }
0x1ae8   :  { %v6257_v32 = vpop.xlane.xlu1 %6256  ;;  %v6279_v3 = vmul.f32 1.442695, %v6266_v16 }
0x1ae9   :  { %v6260_v62 = vpop.xlane.xlu0 %6259  ;;  %v6267_v55 = vsub.f32 %v16936_v40, %v6257_v32 }
0x1aea   :  { %v6268_v34 = vsub.f32 %v16930_v50, %v6260_v62  ;;  %13757 = vpow2.f32 %v6279_v3 }
0x1aeb   :  { %13759 = vpow2.f32 %v6277_v26  ;;  %v6281_v28 = vmul.f32 1.442695, %v6267_v55 }
0x1aec   :  { %v6283_v51 = vmul.f32 1.442695, %v6268_v34  ;;  %v6536_v8 = vpop.permute.xlu1 %6535 }
0x1aed   :  { %v6538_v24 = vpop.permute.xlu0 %6537 }
0x1aee   :  { %13761 = vpow2.f32 %v6283_v51 }
0x1aef   :  { %13763 = vpow2.f32 %v6281_v28 }
0x1af3   :  { %v17007_v46 = vpop.eup %13753 }
0x1af4   :  { %v17009_v49 = vpop.eup %13755  ;;  %v6294_v42 = vsel %vm654_vm2, %v17007_v46, 0.0 }
0x1af5   :  { %v6291_v50 = vsel %vm654_vm2, %v17009_v49, 0.0 }
0x1af6   :  { %6531 = vrot.lane.b32.xlu1 %v16703_v19, %s14083_s29 }
0x1af7   :  { %v17013_v63 = vpop.eup %13757 }
0x1af8   :  { %v17017_v40 = vpop.eup %13759  ;;  %v6300_v30 = vsel %vm654_vm2, %v17013_v63, 0.0 }
0x1af9   :  { %v6297_v59 = vsel %vm654_vm2, %v17017_v40, 0.0 }
0x1afa   :  { %6533 = vrot.lane.b32.xlu0 %v16688_v54, %s14083_s29 }
0x1afb   :  { %v17021_v41 = vpop.eup %13761 }
0x1afc   :  { %v17025_v52 = vpop.eup %13763  ;;  %v6306_v17 = vsel %vm654_vm2, %v17021_v41, 0.0 }
0x1afd   :  { %v6303_v39 = vsel %vm654_vm2, %v17025_v52, 0.0 }
0x1b19   :  { %6295 = vadd.xlane.f32.xlu0 %v6294_v42 }
0x1b1a   :  { %6292 = vadd.xlane.f32.xlu1 %v6291_v50 }
0x1b1d   :  { %6301 = vadd.xlane.f32.xlu0 %v6300_v30 }
0x1b1e   :  { %6298 = vadd.xlane.f32.xlu1 %v6297_v59 }
0x1b21   :  { %6307 = vadd.xlane.f32.xlu0 %v6306_v17 }
0x1b22   :  { %6304 = vadd.xlane.f32.xlu1 %v6303_v39 }
0x1b33   :  { %6527 = vrot.lane.b32.xlu1 %v16670_v31, %s14083_s29 }
0x1b37   :  { %6513 = vrot.lane.b32.xlu1 %v16698_v60, %s14084_s0  ;;  %6529 = vrot.lane.b32.xlu0 %v16698_v60, %s14083_s29 }
0x1b3b   :  { %6517 = vrot.lane.b32.xlu1 %v16688_v54, %s14084_s0  ;;  %6511 = vrot.lane.b32.xlu0 %v16670_v31, %s14084_s0 }
0x1b3f   :  { %6521 = vrot.lane.b32.xlu1 %v16683_v56, %s14084_s0  ;;  %6515 = vrot.lane.b32.xlu0 %v16703_v19, %s14084_s0 }
0x1b43   :  { %6525 = vrot.lane.b32.xlu1 %v16675_v10, %s14084_s0  ;;  %6519 = vrot.lane.b32.xlu0 %v16693_v18, %s14084_s0 }
0x1b47   :  { %6815 = vrot.lane.b32.xlu1 %v16675_v10, %s14085_s20  ;;  %6523 = vrot.lane.b32.xlu0 %v16678_v47, %s14084_s0 }
0x1b4b   :  { %6811 = vrot.lane.b32.xlu1 %v16683_v56, %s14085_s20  ;;  %6813 = vrot.lane.b32.xlu0 %v16678_v47, %s14085_s20 }
0x1b4f   :  { %6809 = vrot.lane.b32.xlu1 %v16693_v18, %s14085_s20  ;;  %6807 = vrot.lane.b32.xlu0 %v16688_v54, %s14085_s20 }
0x1b53   :  { %6805 = vrot.lane.b32.xlu1 %v16703_v19, %s14085_s20  ;;  %6803 = vrot.lane.b32.xlu0 %v16698_v60, %s14085_s20 }
0x1b57   :  { %6801 = vrot.lane.b32.xlu1 %v16670_v31, %s14085_s20 }
0x1b5b   :  { %6984 = vrot.lane.b32.xlu1 %v16719_v5, %s14083_s29 }
0x1b5f   :  { %6982 = vrot.lane.b32.xlu1 %v16723_v13, %s14083_s29 }
0x1b6d   :  { %v6290_v6 = vpop.xlane.xlu0 %6289 }
0x1b6e   :  { %13765 = vrcp.f32 %v6290_v6  ;;  %v6287_v2 = vpop.xlane.xlu1 %6286 }
0x1b6f   :  { %13767 = vrcp.f32 %v6287_v2 }
0x1b7b   :  { %v13766_v61 = vpop.eup %13765 }
0x1b7c   :  { %v13768_v15 = vpop.eup %13767  ;;  %v6318_v20 = vmul.f32 %v13766_v61, %v6290_v6 }
0x1b7d   :  { %v6317_v7 = vmul.f32 %v13768_v15, %v6287_v2 }
0x1b7e   :  { %v6326_v45 = vsub.f32 2.0, %v6318_v20 }
0x1b7f   :  { %v6325_v27 = vsub.f32 2.0, %v6317_v7 }
0x1b80   :  { %v6334_v12 = vmul.f32 %v13766_v61, %v6326_v45 }
0x1b81   :  { %v6333_v44 = vmul.f32 %v13768_v15, %v6325_v27 }
0x1b82   :  { %v6342_v48 = vmul.f32 %v16979_v23, %v6334_v12  ;;  %v6534_v23 = vpop.permute.xlu0 %6533 }
0x1b83   :  { %v6341_v36 = vmul.f32 %v16983_v25, %v6333_v44  ;;  %v6532_v25 = vpop.permute.xlu1 %6531 }
0x1b84   :  { %6351 = vst.msk [vmem:[#allocation4 + $0x108] sm:$0xff] %vm654_vm2, %v6342_v48 }
0x1b85   :  { %6350 = vst.msk [vmem:[#allocation4 + $0x100] sm:$0xff] %vm654_vm2, %v6341_v36  ;;  %12896 = vmatprep.mubr.msk.f32.mxu0 %vm654_vm2, %v6341_v36 }
0x1b86   :  { %12897 = vmatmul.mubr.msk.f32.vlgmr.msra.gmra.mxu0 %vm654_vm2, %v6342_v48 }
0x1b87   :  { %12909 = vmatpush3.xpose.msk.msra.mxu0 %vm94_vm0, %v16872_v0 }
0x1b88   :  { %12910 = vmatprep.subr.msk.mxu0 %vm94_vm0, %v16874_v57 }
0x1b8b   :  { %12911 = vmatpush3.xpose.msk.msra.mxu0 %vm94_vm0, %v16874_v57 }
0x1b8c   :  { %12912 = vmatprep.subr.msk.mxu0 %vm94_vm0, %v6538_v24 }
0x1b8f   :  { %12913 = vmatpush3.xpose.msk.msra.mxu0 %vm94_vm0, %v6538_v24 }
0x1b90   :  { %12914 = vmatprep.subr.msk.mxu0 %vm94_vm0, %v6536_v8 }
0x1b93   :  { %12915 = vmatpush3.xpose.msk.msra.mxu0 %vm94_vm0, %v6536_v8 }
0x1b94   :  { %12916 = vmatprep.subr.msk.mxu0 %vm94_vm0, %v6534_v23 }
0x1b97   :  { %12917 = vmatpush3.xpose.msk.msra.mxu0 %vm94_vm0, %v6534_v23 }
0x1b98   :  { %12918 = vmatprep.subr.msk.mxu0 %vm94_vm0, %v6532_v25 }
0x1b9b   :  { %12919 = vmatpush3.xpose.msk.msra.mxu0 %vm94_vm0, %v6532_v25 }
0x1ba2   :  { %v6296_v0 = vpop.xlane.xlu0 %6295 }
0x1ba3   :  { %13769 = vrcp.f32 %v6296_v0  ;;  %v6293_v57 = vpop.xlane.xlu1 %6292 }
0x1ba4   :  { %13771 = vrcp.f32 %v6293_v57 }
0x1ba6   :  { %v6302_v14 = vpop.xlane.xlu0 %6301 }
0x1ba7   :  { %13773 = vrcp.f32 %v6302_v14  ;;  %v6299_v29 = vpop.xlane.xlu1 %6298 }
0x1ba8   :  { %13775 = vrcp.f32 %v6299_v29 }
0x1baa   :  { %v6308_v1 = vpop.xlane.xlu0 %6307 }
0x1bab   :  { %13777 = vrcp.f32 %v6308_v1  ;;  %v6305_v21 = vpop.xlane.xlu1 %6304 }
0x1bac   :  { %13779 = vrcp.f32 %v6305_v21 }
0x1bae   :  { %v6530_v33 = vpop.permute.xlu0 %6529 }
0x1baf   :  { %v6528_v22 = vpop.permute.xlu1 %6527  ;;  %12920 = vmatprep.subr.msk.mxu0 %vm94_vm0, %v6530_v33 }
0x1bb0   :  { %v13770_v9 = vpop.eup %13769  ;;  %12921 = vmatpush3.xpose.msk.msra.mxu0 %vm94_vm0, %v6530_v33 }
0x1bb1   :  { %v13772_v38 = vpop.eup %13771  ;;  %v6320_v4 = vmul.f32 %v13770_v9, %v6296_v0  ;;  %12922 = vmatprep.subr.msk.mxu0 %vm94_vm0, %v6528_v22 }
0x1bb2   :  { %v6319_v16 = vmul.f32 %v13772_v38, %v6293_v57  ;;  %v6512_v37 = vpop.permute.xlu0 %6511 }
0x1bb3   :  { %v6328_v43 = vsub.f32 2.0, %v6320_v4  ;;  %v6514_v62 = vpop.permute.xlu1 %6513 }
0x1bb4   :  { %v13774_v32 = vpop.eup %13773  ;;  %v6327_v3 = vsub.f32 2.0, %v6319_v16  ;;  %12923 = vmatpush3.xpose.msk.msra.mxu0 %vm94_vm0, %v6528_v22 }
0x1bb5   :  { %v13776_v34 = vpop.eup %13775  ;;  %v6336_v26 = vmul.f32 %v13770_v9, %v6328_v43  ;;  %v6322_v55 = vmul.f32 %v13774_v32, %v6302_v14 }
0x1bb6   :  { %v6335_v51 = vmul.f32 %v13772_v38, %v6327_v3  ;;  %v6321_v28 = vmul.f32 %v13776_v34, %v6299_v29  ;;  %v6516_v42 = vpop.permute.xlu0 %6515 }
0x1bb7   :  { %v6344_v50 = vmul.f32 %v17007_v46, %v6336_v26  ;;  %v6330_v30 = vsub.f32 2.0, %v6322_v55  ;;  %v6518_v59 = vpop.permute.xlu1 %6517 }
0x1bb8   :  { %v13778_v17 = vpop.eup %13777  ;;  %v6329_v39 = vsub.f32 2.0, %v6321_v28  ;;  %v6343_v24 = vmul.f32 %v17009_v49, %v6335_v51 }
0x1bb9   :  { %v13780_v8 = vpop.eup %13779  ;;  %6353 = vst.msk [vmem:[#allocation4 + $0x118] sm:$0xff] %vm654_vm2, %v6344_v50  ;;  %v6338_v6 = vmul.f32 %v13774_v32, %v6330_v30  ;;  %v6324_v2 = vmul.f32 %v13778_v17, %v6308_v1 }
0x1bba   :  { %v6337_v61 = vmul.f32 %v13776_v34, %v6329_v39  ;;  %v6323_v15 = vmul.f32 %v13780_v8, %v6305_v21  ;;  %6352 = vst.msk [vmem:[#allocation4 + $0x110] sm:$0xff] %vm654_vm2, %v6343_v24  ;;  %12899 = vmatprep.mubr.msk.f32.mxu0 %vm654_vm2, %v6343_v24  ;;  %v6520_v20 = vpop.permute.xlu0 %6519  ;;  %v17125_v21 = vpop.f32.mrf.mxu0 }
0x1bbb   :  { %v6346_v46 = vmul.f32 %v17013_v63, %v6338_v6  ;;  %v6332_v7 = vsub.f32 2.0, %v6324_v2  ;;  %12900 = vmatmul.mubr.msk.f32.gmra.mxu0 %vm654_vm2, %v6344_v50  ;;  %v6522_v45 = vpop.permute.xlu1 %6521  ;;  %19149 = vst [vmem:[#allocation14_spill] sm:$0xff] %v17125_v21 }
0x1bbc   :  { %v6331_v27 = vsub.f32 2.0, %v6323_v15  ;;  %v6345_v49 = vmul.f32 %v17017_v40, %v6337_v61  ;;  %v17127_v33 = vpop.f32.mrf.mxu0 }
0x1bbd   :  { %6355 = vst.msk [vmem:[#allocation4 + $0x128] sm:$0xff] %vm654_vm2, %v6346_v46  ;;  %v6340_v12 = vmul.f32 %v13778_v17, %v6332_v7  ;;  %19150 = vst [vmem:[#allocation13_spill] sm:$0xff] %v17127_v33 }
0x1bbe   :  { %v6339_v44 = vmul.f32 %v13780_v8, %v6331_v27  ;;  %6354 = vst.msk [vmem:[#allocation4 + $0x120] sm:$0xff] %vm654_vm2, %v6345_v49  ;;  %12902 = vmatprep.mubr.msk.f32.mxu0 %vm654_vm2, %v6345_v49  ;;  %v6524_v36 = vpop.permute.xlu0 %6523  ;;  %v17129_v22 = vpop.f32.mrf.mxu0 }
0x1bbf   :  { %v6348_v48 = vmul.f32 %v17021_v41, %v6340_v12  ;;  %12903 = vmatmul.mubr.msk.f32.gmra.mxu0 %vm654_vm2, %v6346_v46  ;;  %v6526_v63 = vpop.permute.xlu1 %6525  ;;  %19151 = vst [vmem:[#allocation15_spill] sm:$0xff] %v17129_v22 }
0x1bc0   :  { %v6347_v23 = vmul.f32 %v17025_v52, %v6339_v44  ;;  %v17131_v9 = vpop.f32.mrf.mxu0 }
0x1bc1   :  { %6357 = vst.msk [vmem:[#allocation4 + $0x138] sm:$0xff] %vm654_vm2, %v6348_v48  ;;  %19152 = vst [vmem:[#allocation34_spill] sm:$0xff] %v17131_v9 }
0x1bc2   :  { %6356 = vst.msk [vmem:[#allocation4 + $0x130] sm:$0xff] %vm654_vm2, %v6347_v23  ;;  %12905 = vmatprep.mubr.msk.f32.mxu0 %vm654_vm2, %v6347_v23  ;;  %v6814_v25 = vpop.permute.xlu0 %6813  ;;  %v17133_v38 = vpop.f32.mrf.mxu0 }
0x1bc3   :  { %12906 = vmatmul.mubr.msk.f32.gmra.mxu0 %vm654_vm2, %v6348_v48  ;;  %v6816_v40 = vpop.permute.xlu1 %6815  ;;  %19153 = vst [vmem:[#allocation33_spill] sm:$0xff] %v17133_v38 }
0x1bc4   :  { %12924 = vmatprep.mubr.msk.f32.mxu0 %vm94_vm0, %v6512_v37  ;;  %12936 = vmatprep.subr.mxu1 %v6816_v40  ;;  %v17135_v4 = vpop.f32.mrf.mxu0 }
0x1bc5   :  { %12937 = vmatpush3.msra.mxu1 %v6816_v40  ;;  %19154 = vst [vmem:[#allocation36_spill] sm:$0xff] %v17135_v4 }
0x1bc6   :  { %12938 = vmatprep.subr.mxu1 %v6814_v25  ;;  %v6808_v52 = vpop.permute.xlu0 %6807  ;;  %v17137_v16 = vpop.f32.mrf.mxu0 }
0x1bc7   :  { %12925 = vmatmul.mubr.msk.f32.vlgmr.msra.gmra.mxu0 %vm94_vm0, %v6514_v62  ;;  %12939 = vmatpush3.msra.mxu1 %v6814_v25  ;;  %v6812_v41 = vpop.permute.xlu1 %6811  ;;  %19155 = vst [vmem:[#allocation35_spill] sm:$0xff] %v17137_v16 }
0x1bc8   :  { %12927 = vmatprep.mubr.msk.f32.mxu0 %vm94_vm0, %v6516_v42  ;;  %12940 = vmatprep.subr.mxu1 %v6812_v41  ;;  %v17139_v37 = vpop.f32.mrf.mxu0 }
0x1bc9   :  { %12941 = vmatpush3.msra.mxu1 %v6812_v41  ;;  %19156 = vst [vmem:[#allocation38_spill] sm:$0xff] %v17139_v37 }
0x1bca   :  { %v6804_v14 = vpop.permute.xlu0 %6803 }
0x1bcb   :  { %12928 = vmatmul.mubr.msk.f32.gmra.mxu0 %vm94_vm0, %v6518_v59  ;;  %v6810_v0 = vpop.permute.xlu1 %6809 }
0x1bcc   :  { %12930 = vmatprep.mubr.msk.f32.mxu0 %vm94_vm0, %v6520_v20  ;;  %12942 = vmatprep.subr.mxu1 %v6810_v0 }
0x1bcd   :  { %12943 = vmatpush3.msra.mxu1 %v6810_v0 }
0x1bce   :  { %12944 = vmatprep.subr.mxu1 %v6808_v52 }
0x1bcf   :  { %12931 = vmatmul.mubr.msk.f32.gmra.mxu0 %vm94_vm0, %v6522_v45  ;;  %12945 = vmatpush3.msra.mxu1 %v6808_v52  ;;  %v6806_v57 = vpop.permute.xlu1 %6805 }
0x1bd0   :  { %12933 = vmatprep.mubr.msk.f32.mxu0 %vm94_vm0, %v6524_v36  ;;  %12946 = vmatprep.subr.mxu1 %v6806_v57 }
0x1bd1   :  { %12947 = vmatpush3.msra.mxu1 %v6806_v57 }
0x1bd2   :  { %12948 = vmatprep.subr.mxu1 %v6804_v14 }
0x1bd3   :  { %12934 = vmatmul.mubr.msk.f32.gmra.mxu0 %vm94_vm0, %v6526_v63  ;;  %12949 = vmatpush3.msra.mxu1 %v6804_v14  ;;  %v6802_v29 = vpop.permute.xlu1 %6801 }
0x1bd4   :  { %12950 = vmatprep.subr.mxu1 %v6802_v29 }
0x1bd5   :  { %12951 = vmatpush3.msra.mxu1 %v6802_v29 }
0x1bd7   :  { %v17121_v1 = vpop.permute.xlu1 %6984 }
0x1bd8   :  { %12964 = vmatprep.subr.msk.mxu1 %vm94_vm0, %v17121_v1 }
0x1bdb   :  { %v17169_v45 = vpop.permute.xlu1 %6982 }
0x1c46   :  { %v17141_v43 = vpop.f32.mrf.mxu0 }
0x1c47   :  { %19157 = vst [vmem:[#allocation37_spill] sm:$0xff] %v17141_v43 }
0x1c48   :  { %v17143_v62 = vpop.f32.mrf.mxu0 }
0x1c49   :  { %19158 = vst [vmem:[#allocation40_spill] sm:$0xff] %v17143_v62 }
0x1c7b   :  { %v17145_v32 = vpop.f32.mrf.mxu0 }
0x1c7c   :  { %19159 = vst [vmem:[#allocation39_spill] sm:$0xff] %v17145_v32 }
0x1c7d   :  { %v17147_v3 = vpop.f32.mrf.mxu0 }
0x1c7e   :  { %19160 = vst [vmem:[#allocation16_spill] sm:$0xff] %v17147_v3 }
0x1c7f   :  { %v17149_v34 = vpop.f32.mrf.mxu0 }
0x1c80   :  { %19161 = vst [vmem:[#allocation17_spill] sm:$0xff] %v17149_v34 }
0x1c81   :  { %v17151_v26 = vpop.f32.mrf.mxu0 }
0x1c82   :  { %19162 = vst [vmem:[#allocation18_spill] sm:$0xff] %v17151_v26 }
0x1c83   :  { %v17153_v55 = vpop.f32.mrf.mxu0 }
0x1c84   :  { %19163 = vst [vmem:[#allocation19_spill] sm:$0xff] %v17153_v55 }
0x1c85   :  { %v17155_v51 = vpop.f32.mrf.mxu0 }
0x1c86   :  { %19164 = vst [vmem:[#allocation20_spill] sm:$0xff] %v17155_v51 }
0x1c87   :  { %v12926_v28 = vpop.f32.mrf.mxu0 }
0x1c88   :  { %v6683_v42 = vsel %vm654_vm2, %v12926_v28, -inf }
0x1c89   :  { %6684 = vmax.xlane.f32.xlu1 %v6683_v42  ;;  %v6641_v50 = vpop.f32.mrf.mxu0 }
0x1c8a   :  { %v6680_v30 = vsel %vm654_vm2, %v6641_v50, -inf }
0x1c8b   :  { %6681 = vmax.xlane.f32.xlu0 %v6680_v30  ;;  %v12929_v59 = vpop.f32.mrf.mxu0 }
0x1c8c   :  { %v6689_v39 = vsel %vm654_vm2, %v12929_v59, -inf }
0x1c8d   :  { %v6651_v17 = vpop.f32.mrf.mxu0 }
0x1c8e   :  { %v6686_v6 = vsel %vm654_vm2, %v6651_v17, -inf }
0x1c8f   :  { %6690 = vmax.xlane.f32.xlu0 %v6689_v39  ;;  %v12932_v24 = vpop.f32.mrf.mxu0 }
0x1c90   :  { %v6695_v20 = vsel %vm654_vm2, %v12932_v24, -inf }
0x1c91   :  { %v6661_v8 = vpop.f32.mrf.mxu0 }
0x1c92   :  { %v6692_v2 = vsel %vm654_vm2, %v6661_v8, -inf }
0x1c93   :  { %6687 = vmax.xlane.f32.xlu0 %v6686_v6  ;;  %6693 = vmax.xlane.f32.xlu1 %v6692_v2  ;;  %v12935_v61 = vpop.f32.mrf.mxu0 }
0x1c94   :  { %v6701_v7 = vsel %vm654_vm2, %v12935_v61, -inf }
0x1c95   :  { %v6671_v15 = vpop.f32.mrf.mxu0 }
0x1c96   :  { %v6698_v46 = vsel %vm654_vm2, %v6671_v15, -inf }
0x1c97   :  { %6696 = vmax.xlane.f32.xlu0 %v6695_v20  ;;  %6699 = vmax.xlane.f32.xlu1 %v6698_v46 }
0x1c9b   :  { %6702 = vmax.xlane.f32.xlu0 %v6701_v7 }
0x1ca8   :  { %6978 = vrot.lane.b32.xlu1 %v16735_v11, %s14083_s29 }
0x1cb1   :  { %6980 = vrot.lane.b32.xlu0 %v16729_v58, %s14083_s29 }
0x1d12   :  { %v6685_v27 = vpop.xlane.xlu1 %6684 }
0x1d13   :  { %v6705_v49 = vsub.f32 %v12926_v28, %v6685_v27 }
0x1d14   :  { %v6682_v12 = vpop.xlane.xlu0 %6681 }
0x1d15   :  { %v6714_v44 = vmul.f32 1.442695, %v6705_v49  ;;  %v6704_v48 = vsub.f32 %v6641_v50, %v6682_v12 }
0x1d17   :  { %13781 = vpow2.f32 %v6714_v44  ;;  %v6712_v36 = vmul.f32 1.442695, %v6704_v48 }
0x1d18   :  { %v6691_v41 = vpop.xlane.xlu0 %6690 }
0x1d19   :  { %13783 = vpow2.f32 %v6712_v36  ;;  %v6707_v57 = vsub.f32 %v12929_v59, %v6691_v41  ;;  %v19165_v41 = vld [vmem:[#allocation11_spill] sm:$0xff] }
0x1d1b   :  { %v6718_v42 = vmul.f32 1.442695, %v6707_v57 }
0x1d1c   :  { %v6688_v52 = vpop.xlane.xlu0 %6687  ;;  %v6694_v0 = vpop.xlane.xlu1 %6693 }
0x1d1d   :  { %v6708_v14 = vsub.f32 %v6661_v8, %v6694_v0  ;;  %v6706_v50 = vsub.f32 %v6651_v17, %v6688_v52  ;;  %13785 = vpow2.f32 %v6718_v42  ;;  %v19166_v52 = vld [vmem:[#allocation12_spill] sm:$0xff] }
0x1d1f   :  { %v6720_v30 = vmul.f32 1.442695, %v6708_v14  ;;  %v6716_v6 = vmul.f32 1.442695, %v6706_v50 }
0x1d20   :  { %v6697_v29 = vpop.xlane.xlu0 %6696  ;;  %v6700_v28 = vpop.xlane.xlu1 %6699 }
0x1d21   :  { %v6710_v39 = vsub.f32 %v6671_v15, %v6700_v28  ;;  %v6709_v2 = vsub.f32 %v12932_v24, %v6697_v29  ;;  %13787 = vpow2.f32 %v6720_v30 }
0x1d22   :  { %13789 = vpow2.f32 %v6716_v6 }
0x1d23   :  { %v6724_v46 = vmul.f32 1.442695, %v6710_v39  ;;  %v6722_v7 = vmul.f32 1.442695, %v6709_v2 }
0x1d24   :  { %v17171_v63 = vpop.eup %13781  ;;  %v6703_v20 = vpop.xlane.xlu0 %6702 }
0x1d25   :  { %v6731_v23 = vsel %vm654_vm2, %v17171_v63, 0.0  ;;  %v6711_v27 = vsub.f32 %v12935_v61, %v6703_v20  ;;  %13791 = vpow2.f32 %v6724_v46  ;;  %v6979_v57 = vpop.permute.xlu1 %6978 }
0x1d26   :  { %v17175_v40 = vpop.eup %13783  ;;  %6732 = vadd.xlane.f32.xlu0 %v6731_v23  ;;  %13793 = vpow2.f32 %v6722_v7 }
0x1d27   :  { %v6728_v25 = vsel %vm654_vm2, %v17175_v40, 0.0  ;;  %v6726_v49 = vmul.f32 1.442695, %v6711_v27 }
0x1d28   :  { %6729 = vadd.xlane.f32.xlu1 %v6728_v25  ;;  %v6981_v0 = vpop.permute.xlu0 %6980 }
0x1d29   :  { %13795 = vpow2.f32 %v6726_v49 }
0x1d2a   :  { %v17183_v59 = vpop.eup %13785 }
0x1d2b   :  { %v6737_v17 = vsel %vm654_vm2, %v17183_v59, 0.0 }
0x1d2e   :  { %v17185_v8 = vpop.eup %13787 }
0x1d2f   :  { %v17189_v15 = vpop.eup %13789  ;;  %v6740_v24 = vsel %vm654_vm2, %v17185_v8, 0.0 }
0x1d30   :  { %v6734_v61 = vsel %vm654_vm2, %v17189_v15, 0.0 }
0x1d32   :  { %v17193_v12 = vpop.eup %13791 }
0x1d33   :  { %v17197_v44 = vpop.eup %13793  ;;  %v6746_v48 = vsel %vm654_vm2, %v17193_v12, 0.0 }
0x1d34   :  { %v6743_v36 = vsel %vm654_vm2, %v17197_v44, 0.0 }
0x1d36   :  { %v17203_v23 = vpop.eup %13795 }
0x1d37   :  { %v6749_v25 = vsel %vm654_vm2, %v17203_v23, 0.0 }
0x1d39   :  { %6974 = vrot.lane.b32.xlu1 %v16747_v53, %s14083_s29 }
0x1d3c   :  { %6976 = vrot.lane.b32.xlu0 %v16741_v35, %s14083_s29 }
0x1d5b   :  { %6738 = vadd.xlane.f32.xlu0 %v6737_v17 }
0x1d5d   :  { %6741 = vadd.xlane.f32.xlu1 %v6740_v24 }
0x1d5f   :  { %6735 = vadd.xlane.f32.xlu0 %v6734_v61 }
0x1d61   :  { %6747 = vadd.xlane.f32.xlu1 %v6746_v48 }
0x1d63   :  { %6744 = vadd.xlane.f32.xlu0 %v6743_v36 }
0x1d67   :  { %6750 = vadd.xlane.f32.xlu0 %v6749_v25 }
0x1d72   :  { %6970 = vrot.lane.b32.xlu1 %v19165_v41, %s14083_s29 }
0x1d76   :  { %6956 = vrot.lane.b32.xlu1 %v19166_v52, %s14084_s0 }
0x1d7a   :  { %6960 = vrot.lane.b32.xlu1 %v16741_v35, %s14084_s0 }
0x1d7d   :  { %6972 = vrot.lane.b32.xlu0 %v19166_v52, %s14083_s29  ;;  %s19174_s29 = smov 104  }
0x1d7e   :  { %6964 = vrot.lane.b32.xlu1 %v16729_v58, %s14084_s0 }
0x1d81   :  { %6954 = vrot.lane.b32.xlu0 %v19165_v41, %s14084_s0 }
0x1d82   :  { %6968 = vrot.lane.b32.xlu1 %v16719_v5, %s14084_s0 }
0x1d85   :  { %6958 = vrot.lane.b32.xlu0 %v16747_v53, %s14084_s0 }
0x1d86   :  { %7258 = vrot.lane.b32.xlu1 %v16719_v5, %s14085_s20 }
0x1d89   :  { %6962 = vrot.lane.b32.xlu0 %v16735_v11, %s14084_s0 }
0x1d8a   :  { %7254 = vrot.lane.b32.xlu1 %v16729_v58, %s14085_s20 }
0x1d8d   :  { %6966 = vrot.lane.b32.xlu0 %v16723_v13, %s14084_s0  ;;  %s19175_s0 = smov 40  }
0x1d8e   :  { %7252 = vrot.lane.b32.xlu1 %v16735_v11, %s14085_s20 }
0x1d91   :  { %7256 = vrot.lane.b32.xlu0 %v16723_v13, %s14085_s20 }
0x1d92   :  { %7248 = vrot.lane.b32.xlu1 %v16747_v53, %s14085_s20 }
0x1d95   :  { %7250 = vrot.lane.b32.xlu0 %v16741_v35, %s14085_s20 }
0x1d96   :  { %7244 = vrot.lane.b32.xlu1 %v19165_v41, %s14085_s20 }
0x1d99   :  { %7246 = vrot.lane.b32.xlu0 %v19166_v52, %s14085_s20  ;;  %s19177_s20 = smov 8  }
0x1d9a   :  { %7427 = vrot.lane.b32.xlu1 %v16675_v10, %s14086_s21 }
0x1d9e   :  { %7425 = vrot.lane.b32.xlu1 %v16678_v47, %s14086_s21 }
0x1daf   :  { %v6733_v14 = vpop.xlane.xlu0 %6732 }
0x1db0   :  { %13797 = vrcp.f32 %v6733_v14 }
0x1db1   :  { %v6730_v29 = vpop.xlane.xlu1 %6729 }
0x1db2   :  { %13799 = vrcp.f32 %v6730_v29 }
0x1dbd   :  { %v13798_v28 = vpop.eup %13797 }
0x1dbe   :  { %v6761_v42 = vmul.f32 %v13798_v28, %v6733_v14 }
0x1dbf   :  { %v13800_v50 = vpop.eup %13799 }
0x1dc0   :  { %v6769_v30 = vsub.f32 2.0, %v6761_v42  ;;  %v6760_v39 = vmul.f32 %v13800_v50, %v6730_v29 }
0x1dc2   :  { %v6777_v6 = vmul.f32 %v13798_v28, %v6769_v30  ;;  %v6768_v2 = vsub.f32 2.0, %v6760_v39 }
0x1dc4   :  { %v6785_v20 = vmul.f32 %v17171_v63, %v6777_v6  ;;  %v6776_v46 = vmul.f32 %v13800_v50, %v6768_v2  ;;  %v6977_v63 = vpop.permute.xlu0 %6976 }
0x1dc6   :  { %6794 = vst.msk [vmem:[#allocation4 + $0x48] sm:$0xff] %vm654_vm2, %v6785_v20  ;;  %v6784_v7 = vmul.f32 %v17175_v40, %v6776_v46  ;;  %v6975_v40 = vpop.permute.xlu1 %6974 }
0x1dc8   :  { %6793 = vst.msk [vmem:[#allocation4 + $0x40] sm:$0xff] %vm654_vm2, %v6784_v7  ;;  %12952 = vmatprep.mubr.msk.f32.mxu1 %vm654_vm2, %v6784_v7 }
0x1dc9   :  { %12953 = vmatmul.mubr.msk.f32.vlgmr.msra.gmra.mxu1 %vm654_vm2, %v6785_v20 }
0x1dca   :  { %12965 = vmatpush3.xpose.msk.msra.mxu1 %vm94_vm0, %v17121_v1 }
0x1dcb   :  { %12966 = vmatprep.subr.msk.mxu1 %vm94_vm0, %v17169_v45 }
0x1dce   :  { %12967 = vmatpush3.xpose.msk.msra.mxu1 %vm94_vm0, %v17169_v45 }
0x1dcf   :  { %12968 = vmatprep.subr.msk.mxu1 %vm94_vm0, %v6981_v0 }
0x1dd2   :  { %12969 = vmatpush3.xpose.msk.msra.mxu1 %vm94_vm0, %v6981_v0 }
0x1dd3   :  { %12970 = vmatprep.subr.msk.mxu1 %vm94_vm0, %v6979_v57 }
0x1dd6   :  { %12971 = vmatpush3.xpose.msk.msra.mxu1 %vm94_vm0, %v6979_v57 }
0x1dd7   :  { %12972 = vmatprep.subr.msk.mxu1 %vm94_vm0, %v6977_v63 }
0x1dda   :  { %12973 = vmatpush3.xpose.msk.msra.mxu1 %vm94_vm0, %v6977_v63 }
0x1ddb   :  { %12974 = vmatprep.subr.msk.mxu1 %vm94_vm0, %v6975_v40 }
0x1dde   :  { %12975 = vmatpush3.xpose.msk.msra.mxu1 %vm94_vm0, %v6975_v40 }
0x1de4   :  { %v6739_v1 = vpop.xlane.xlu0 %6738 }
0x1de5   :  { %13801 = vrcp.f32 %v6739_v1 }
0x1de6   :  { %v6742_v45 = vpop.xlane.xlu1 %6741 }
0x1de7   :  { %13803 = vrcp.f32 %v6742_v45 }
0x1de8   :  { %v6736_v27 = vpop.xlane.xlu0 %6735 }
0x1de9   :  { %13805 = vrcp.f32 %v6736_v27 }
0x1dea   :  { %v6748_v49 = vpop.xlane.xlu1 %6747 }
0x1deb   :  { %13807 = vrcp.f32 %v6748_v49 }
0x1dec   :  { %v6745_v17 = vpop.xlane.xlu0 %6744 }
0x1ded   :  { %13809 = vrcp.f32 %v6745_v17 }
0x1dee   :  { %v6971_v24 = vpop.permute.xlu1 %6970 }
0x1df0   :  { %v6751_v61 = vpop.xlane.xlu0 %6750 }
0x1df1   :  { %13811 = vrcp.f32 %v6751_v61 }
0x1df2   :  { %v13802_v48 = vpop.eup %13801  ;;  %v17267_v36 = vpop.permute.xlu1 %6956 }
0x1df3   :  { %v6763_v25 = vmul.f32 %v13802_v48, %v6739_v1 }
0x1df4   :  { %v13804_v0 = vpop.eup %13803  ;;  %v6973_v57 = vpop.permute.xlu0 %6972 }
0x1df5   :  { %v6771_v14 = vsub.f32 2.0, %v6763_v25  ;;  %v6764_v29 = vmul.f32 %v13804_v0, %v6742_v45  ;;  %12976 = vmatprep.subr.msk.mxu1 %vm94_vm0, %v6973_v57 }
0x1df6   :  { %v13806_v28 = vpop.eup %13805  ;;  %12977 = vmatpush3.xpose.msk.msra.mxu1 %vm94_vm0, %v6973_v57  ;;  %v17271_v42 = vpop.permute.xlu1 %6960 }
0x1df7   :  { %v6779_v50 = vmul.f32 %v13802_v48, %v6771_v14  ;;  %v6772_v30 = vsub.f32 2.0, %v6764_v29  ;;  %v6762_v39 = vmul.f32 %v13806_v28, %v6736_v27  ;;  %12978 = vmatprep.subr.msk.mxu1 %vm94_vm0, %v6971_v24 }
0x1df8   :  { %v13808_v6 = vpop.eup %13807  ;;  %v6955_v2 = vpop.permute.xlu0 %6954 }
0x1df9   :  { %v6787_v20 = vmul.f32 %v17183_v59, %v6779_v50  ;;  %v6780_v46 = vmul.f32 %v13804_v0, %v6772_v30  ;;  %v6770_v7 = vsub.f32 2.0, %v6762_v39  ;;  %v6766_v63 = vmul.f32 %v13808_v6, %v6748_v49 }
0x1dfa   :  { %v13810_v40 = vpop.eup %13809  ;;  %12979 = vmatpush3.xpose.msk.msra.mxu1 %vm94_vm0, %v6971_v24  ;;  %v6965_v1 = vpop.permute.xlu1 %6964 }
0x1dfb   :  { %6796 = vst.msk [vmem:[#allocation4 + $0x58] sm:$0xff] %vm654_vm2, %v6787_v20  ;;  %v6778_v45 = vmul.f32 %v13806_v28, %v6770_v7  ;;  %v6774_v25 = vsub.f32 2.0, %v6766_v63  ;;  %v6765_v48 = vmul.f32 %v13810_v40, %v6745_v17  ;;  %v6788_v27 = vmul.f32 %v17185_v8, %v6780_v46 }
0x1dfc   :  { %v6959_v57 = vpop.permute.xlu0 %6958 }
0x1dfd   :  { %v6782_v14 = vmul.f32 %v13808_v6, %v6774_v25  ;;  %v6773_v29 = vsub.f32 2.0, %v6765_v48  ;;  %v6786_v55 = vmul.f32 %v17189_v15, %v6778_v45  ;;  %6797 = vst.msk [vmem:[#allocation4 + $0x60] sm:$0xff] %vm654_vm2, %v6788_v27 }
0x1dfe   :  { %v13812_v59 = vpop.eup %13811  ;;  %v6969_v49 = vpop.permute.xlu1 %6968 }
0x1dff   :  { %v6781_v0 = vmul.f32 %v13810_v40, %v6773_v29  ;;  %v6767_v50 = vmul.f32 %v13812_v59, %v6751_v61  ;;  %6795 = vst.msk [vmem:[#allocation4 + $0x50] sm:$0xff] %vm654_vm2, %v6786_v55  ;;  %12955 = vmatprep.mubr.msk.f32.mxu1 %vm654_vm2, %v6786_v55  ;;  %v6790_v24 = vmul.f32 %v17193_v12, %v6782_v14 }
0x1e00   :  { %v6963_v17 = vpop.permute.xlu0 %6962  ;;  %12956 = vmatmul.mubr.msk.f32.gmra.mxu1 %vm654_vm2, %v6787_v20 }
0x1e01   :  { %v6789_v8 = vmul.f32 %v17197_v44, %v6781_v0  ;;  %v6775_v28 = vsub.f32 2.0, %v6767_v50  ;;  %12958 = vmatprep.mubr.msk.f32.mxu1 %vm654_vm2, %v6788_v27  ;;  %6799 = vst.msk [vmem:[#allocation4 + $0x70] sm:$0xff] %vm654_vm2, %v6790_v24 }
0x1e02   :  { %v7259_v15 = vpop.permute.xlu1 %7258 }
0x1e03   :  { %6798 = vst.msk [vmem:[#allocation4 + $0x68] sm:$0xff] %vm654_vm2, %v6789_v8  ;;  %v6783_v61 = vmul.f32 %v13812_v59, %v6775_v28  ;;  %12992 = vmatprep.subr.mxu0 %v7259_v15 }
0x1e04   :  { %v6967_v30 = vpop.permute.xlu0 %6966  ;;  %12959 = vmatmul.mubr.msk.f32.gmra.mxu1 %vm654_vm2, %v6789_v8  ;;  %12993 = vmatpush3.msra.mxu0 %v7259_v15 }
0x1e05   :  { %v6791_v55 = vmul.f32 %v17203_v23, %v6783_v61  ;;  %12961 = vmatprep.mubr.msk.f32.mxu1 %vm654_vm2, %v6790_v24 }
0x1e06   :  { %v7255_v12 = vpop.permute.xlu1 %7254 }
0x1e07   :  { %6800 = vst.msk [vmem:[#allocation4 + $0x78] sm:$0xff] %vm654_vm2, %v6791_v55 }
0x1e08   :  { %v7257_v44 = vpop.permute.xlu0 %7256  ;;  %12962 = vmatmul.mubr.msk.f32.gmra.mxu1 %vm654_vm2, %v6791_v55 }
0x1e09   :  { %12980 = vmatprep.mubr.msk.f32.mxu1 %vm94_vm0, %v6955_v2  ;;  %12994 = vmatprep.subr.mxu0 %v7257_v44 }
0x1e0a   :  { %12995 = vmatpush3.msra.mxu0 %v7257_v44  ;;  %v7253_v39 = vpop.permute.xlu1 %7252 }
0x1e0b   :  { %12996 = vmatprep.subr.mxu0 %v7255_v12 }
0x1e0c   :  { %v7251_v6 = vpop.permute.xlu0 %7250  ;;  %12981 = vmatmul.mubr.msk.f32.vlgmr.msra.gmra.mxu1 %vm94_vm0, %v17267_v36  ;;  %12997 = vmatpush3.msra.mxu0 %v7255_v12 }
0x1e0d   :  { %12983 = vmatprep.mubr.msk.f32.mxu1 %vm94_vm0, %v6959_v57  ;;  %12998 = vmatprep.subr.mxu0 %v7253_v39 }
0x1e0e   :  { %12999 = vmatpush3.msra.mxu0 %v7253_v39  ;;  %v7249_v23 = vpop.permute.xlu1 %7248 }
0x1e0f   :  { %13000 = vmatprep.subr.mxu0 %v7251_v6 }
0x1e10   :  { %12984 = vmatmul.mubr.msk.f32.gmra.mxu1 %vm94_vm0, %v17271_v42  ;;  %13001 = vmatpush3.msra.mxu0 %v7251_v6  ;;  %v7247_v2 = vpop.permute.xlu0 %7246 }
0x1e11   :  { %12986 = vmatprep.mubr.msk.f32.mxu1 %vm94_vm0, %v6963_v17  ;;  %13002 = vmatprep.subr.mxu0 %v7249_v23 }
0x1e12   :  { %13003 = vmatpush3.msra.mxu0 %v7249_v23  ;;  %v7245_v20 = vpop.permute.xlu1 %7244 }
0x1e13   :  { %13004 = vmatprep.subr.mxu0 %v7247_v2 }
0x1e14   :  { %12987 = vmatmul.mubr.msk.f32.gmra.mxu1 %vm94_vm0, %v6965_v1  ;;  %13005 = vmatpush3.msra.mxu0 %v7247_v2 }
0x1e15   :  { %12989 = vmatprep.mubr.msk.f32.mxu1 %vm94_vm0, %v6967_v30  ;;  %13006 = vmatprep.subr.mxu0 %v7245_v20 }
0x1e16   :  { %13007 = vmatpush3.msra.mxu0 %v7245_v20  ;;  %v17302_v36 = vpop.permute.xlu1 %7427 }
0x1e17   :  { %13020 = vmatprep.subr.msk.mxu0 %vm94_vm0, %v17302_v36 }
0x1e18   :  { %12990 = vmatmul.mubr.msk.f32.gmra.mxu1 %vm94_vm0, %v6969_v49 }
0x1e1a   :  { %v17335_v55 = vpop.permute.xlu1 %7425 }
0x1e89   :  { %v17307_v42 = vpop.f32.mrf.mxu1 }
0x1e8b   :  { %v17309_v46 = vpop.f32.mrf.mxu1 }
0x1ec0   :  { %v17311_v7 = vpop.f32.mrf.mxu1 }
0x1ec2   :  { %v17313_v63 = vpop.f32.mrf.mxu1 }
0x1ec4   :  { %v17315_v40 = vpop.f32.mrf.mxu1 }
0x1ec6   :  { %v17317_v1 = vpop.f32.mrf.mxu1 }
0x1ec8   :  { %v17319_v45 = vpop.f32.mrf.mxu1 }
0x1eca   :  { %v17321_v25 = vpop.f32.mrf.mxu1 }
0x1ecc   :  { %v12982_v48 = vpop.f32.mrf.mxu1 }
0x1ecd   :  { %v7126_v27 = vsel %vm654_vm2, %v12982_v48, -inf }
0x1ece   :  { %7127 = vmax.xlane.f32.xlu1 %v7126_v27  ;;  %v7084_v57 = vpop.f32.mrf.mxu1 }
0x1ecf   :  { %v7123_v14 = vsel %vm654_vm2, %v7084_v57, -inf }
0x1ed0   :  { %7124 = vmax.xlane.f32.xlu0 %v7123_v14  ;;  %v12985_v29 = vpop.f32.mrf.mxu1 }
0x1ed1   :  { %v7132_v49 = vsel %vm654_vm2, %v12985_v29, -inf }
0x1ed2   :  { %v7094_v59 = vpop.f32.mrf.mxu1 }
0x1ed3   :  { %v7129_v24 = vsel %vm654_vm2, %v7094_v59, -inf }
0x1ed4   :  { %7133 = vmax.xlane.f32.xlu0 %v7132_v49  ;;  %v12988_v0 = vpop.f32.mrf.mxu1 }
0x1ed5   :  { %v7138_v15 = vsel %vm654_vm2, %v12988_v0, -inf }
0x1ed6   :  { %v7104_v50 = vpop.f32.mrf.mxu1 }
0x1ed7   :  { %v7135_v17 = vsel %vm654_vm2, %v7104_v50, -inf }
0x1ed8   :  { %7130 = vmax.xlane.f32.xlu0 %v7129_v24  ;;  %7136 = vmax.xlane.f32.xlu1 %v7135_v17  ;;  %v12991_v8 = vpop.f32.mrf.mxu1 }
0x1ed9   :  { %v7144_v30 = vsel %vm654_vm2, %v12991_v8, -inf }
0x1eda   :  { %v7114_v28 = vpop.f32.mrf.mxu1 }
0x1edb   :  { %v7141_v61 = vsel %vm654_vm2, %v7114_v28, -inf }
0x1edc   :  { %7139 = vmax.xlane.f32.xlu0 %v7138_v15  ;;  %7142 = vmax.xlane.f32.xlu1 %v7141_v61 }
0x1ee0   :  { %7145 = vmax.xlane.f32.xlu0 %v7144_v30 }
0x1eed   :  { %7421 = vrot.lane.b32.xlu1 %v16693_v18, %s14086_s21 }
0x1ef6   :  { %7423 = vrot.lane.b32.xlu0 %v16683_v56, %s14086_s21 }
0x1f57   :  { %v7128_v12 = vpop.xlane.xlu1 %7127 }
0x1f58   :  { %v7148_v44 = vsub.f32 %v12982_v48, %v7128_v12 }
0x1f59   :  { %v7125_v39 = vpop.xlane.xlu0 %7124 }
0x1f5a   :  { %v7157_v6 = vmul.f32 1.442695, %v7148_v44  ;;  %v7147_v23 = vsub.f32 %v7084_v57, %v7125_v39 }
0x1f5c   :  { %13813 = vpow2.f32 %v7157_v6  ;;  %v7155_v2 = vmul.f32 1.442695, %v7147_v23 }
0x1f5d   :  { %v7134_v24 = vpop.xlane.xlu0 %7133 }
0x1f5e   :  { %13815 = vpow2.f32 %v7155_v2  ;;  %v7150_v17 = vsub.f32 %v12985_v29, %v7134_v24 }
0x1f60   :  { %v7161_v12 = vmul.f32 1.442695, %v7150_v17 }
0x1f61   :  { %v7131_v48 = vpop.xlane.xlu0 %7130  ;;  %v7137_v57 = vpop.xlane.xlu1 %7136 }
0x1f62   :  { %v7151_v15 = vsub.f32 %v7104_v50, %v7137_v57  ;;  %v7149_v44 = vsub.f32 %v7094_v59, %v7131_v48  ;;  %13817 = vpow2.f32 %v7161_v12 }
0x1f64   :  { %v7163_v39 = vmul.f32 1.442695, %v7151_v15  ;;  %v7159_v23 = vmul.f32 1.442695, %v7149_v44 }
0x1f65   :  { %v7140_v61 = vpop.xlane.xlu0 %7139  ;;  %v7143_v30 = vpop.xlane.xlu1 %7142 }
0x1f66   :  { %v7153_v6 = vsub.f32 %v7114_v28, %v7143_v30  ;;  %v7152_v2 = vsub.f32 %v12988_v0, %v7140_v61  ;;  %13819 = vpow2.f32 %v7163_v39 }
0x1f67   :  { %13821 = vpow2.f32 %v7159_v23 }
0x1f68   :  { %v7165_v51 = vmul.f32 1.442695, %v7152_v2 }
0x1f69   :  { %v17337_v20 = vpop.eup %13813  ;;  %v7422_v15 = vpop.permute.xlu1 %7421 }
0x1f6a   :  { %v7174_v27 = vsel %vm654_vm2, %v17337_v20, 0.0 }
0x1f6b   :  { %v17341_v14 = vpop.eup %13815  ;;  %7175 = vadd.xlane.f32.xlu0 %v7174_v27  ;;  %v7146_v27 = vpop.xlane.xlu0 %7145 }
0x1f6c   :  { %v7171_v49 = vsel %vm654_vm2, %v17341_v14, 0.0  ;;  %v7154_v34 = vsub.f32 %v12991_v8, %v7146_v27 }
0x1f6d   :  { %7172 = vadd.xlane.f32.xlu1 %v7171_v49  ;;  %v7167_v49 = vmul.f32 1.442695, %v7153_v6 }
0x1f6e   :  { %v7169_v26 = vmul.f32 1.442695, %v7154_v34 }
0x1f6f   :  { %13823 = vpow2.f32 %v7167_v49  ;;  %v17349_v29 = vpop.eup %13817  ;;  %v7424_v17 = vpop.permute.xlu0 %7423 }
0x1f70   :  { %13825 = vpow2.f32 %v7165_v51  ;;  %v7180_v59 = vsel %vm654_vm2, %v17349_v29, 0.0 }
0x1f71   :  { %13827 = vpow2.f32 %v7169_v26 }
0x1f73   :  { %v17351_v50 = vpop.eup %13819 }
0x1f74   :  { %v17355_v28 = vpop.eup %13821  ;;  %v7183_v0 = vsel %vm654_vm2, %v17351_v50, 0.0 }
0x1f75   :  { %v7177_v34 = vsel %vm654_vm2, %v17355_v28, 0.0 }
0x1f7c   :  { %v17359_v24 = vpop.eup %13823 }
0x1f7d   :  { %v17363_v26 = vpop.eup %13825  ;;  %v7189_v51 = vsel %vm654_vm2, %v17359_v24, 0.0 }
0x1f7e   :  { %7417 = vrot.lane.b32.xlu1 %v16703_v19, %s14086_s21  ;;  %v7186_v8 = vsel %vm654_vm2, %v17363_v26, 0.0  ;;  %v17369_v48 = vpop.eup %13827 }
0x1f7f   :  { %v7192_v57 = vsel %vm654_vm2, %v17369_v48, 0.0 }
0x1f81   :  { %7419 = vrot.lane.b32.xlu0 %v16688_v54, %s14086_s21 }
0x1fa0   :  { %7181 = vadd.xlane.f32.xlu0 %v7180_v59 }
0x1fa2   :  { %7184 = vadd.xlane.f32.xlu1 %v7183_v0 }
0x1fa4   :  { %7178 = vadd.xlane.f32.xlu0 %v7177_v34 }
0x1fa6   :  { %7190 = vadd.xlane.f32.xlu1 %v7189_v51 }
0x1fa8   :  { %7187 = vadd.xlane.f32.xlu0 %v7186_v8 }
0x1fac   :  { %7193 = vadd.xlane.f32.xlu0 %v7192_v57 }
0x1fb7   :  { %7413 = vrot.lane.b32.xlu1 %v16670_v31, %s14086_s21 }
0x1fbb   :  { %7399 = vrot.lane.b32.xlu1 %v16698_v60, %s19167_s4 }
0x1fbf   :  { %7403 = vrot.lane.b32.xlu1 %v16688_v54, %s19167_s4 }
0x1fc2   :  { %7415 = vrot.lane.b32.xlu0 %v16698_v60, %s14086_s21 }
0x1fc3   :  { %7407 = vrot.lane.b32.xlu1 %v16683_v56, %s19167_s4 }
0x1fc6   :  { %7397 = vrot.lane.b32.xlu0 %v16670_v31, %s19167_s4 }
0x1fc7   :  { %7411 = vrot.lane.b32.xlu1 %v16675_v10, %s19167_s4 }
0x1fca   :  { %7401 = vrot.lane.b32.xlu0 %v16703_v19, %s19167_s4 }
0x1fcb   :  { %7701 = vrot.lane.b32.xlu1 %v16675_v10, %s19168_s27 }
0x1fce   :  { %7405 = vrot.lane.b32.xlu0 %v16693_v18, %s19167_s4 }
0x1fcf   :  { %7697 = vrot.lane.b32.xlu1 %v16683_v56, %s19168_s27 }
0x1fd2   :  { %7409 = vrot.lane.b32.xlu0 %v16678_v47, %s19167_s4 }
0x1fd3   :  { %7695 = vrot.lane.b32.xlu1 %v16693_v18, %s19168_s27 }
0x1fd6   :  { %7699 = vrot.lane.b32.xlu0 %v16678_v47, %s19168_s27 }
0x1fd7   :  { %7691 = vrot.lane.b32.xlu1 %v16703_v19, %s19168_s27 }
0x1fda   :  { %7693 = vrot.lane.b32.xlu0 %v16688_v54, %s19168_s27 }
0x1fdb   :  { %7687 = vrot.lane.b32.xlu1 %v16670_v31, %s19168_s27 }
0x1fde   :  { %7689 = vrot.lane.b32.xlu0 %v16698_v60, %s19168_s27 }
0x1fdf   :  { %7870 = vrot.lane.b32.xlu1 %v16719_v5, %s14086_s21 }
0x1fe3   :  { %7868 = vrot.lane.b32.xlu1 %v16723_v13, %s14086_s21 }
0x1ff4   :  { %v7176_v61 = vpop.xlane.xlu0 %7175 }
0x1ff5   :  { %13829 = vrcp.f32 %v7176_v61 }
0x1ff6   :  { %v7173_v30 = vpop.xlane.xlu1 %7172 }
0x1ff7   :  { %13831 = vrcp.f32 %v7173_v30 }
0x2002   :  { %v13830_v12 = vpop.eup %13829 }
0x2003   :  { %v7204_v44 = vmul.f32 %v13830_v12, %v7176_v61 }
0x2004   :  { %v13832_v39 = vpop.eup %13831 }
0x2005   :  { %v7212_v6 = vsub.f32 2.0, %v7204_v44  ;;  %v7203_v23 = vmul.f32 %v13832_v39, %v7173_v30 }
0x2007   :  { %v7220_v2 = vmul.f32 %v13830_v12, %v7212_v6  ;;  %v7211_v27 = vsub.f32 2.0, %v7203_v23 }
0x2009   :  { %v7228_v49 = vmul.f32 %v17337_v20, %v7220_v2  ;;  %v7219_v59 = vmul.f32 %v13832_v39, %v7211_v27  ;;  %v7420_v20 = vpop.permute.xlu0 %7419 }
0x200b   :  { %7237 = vst.msk [vmem:[#allocation4 + $0x148] sm:$0xff] %vm654_vm2, %v7228_v49  ;;  %v7227_v0 = vmul.f32 %v17341_v14, %v7219_v59  ;;  %v7418_v14 = vpop.permute.xlu1 %7417 }
0x200d   :  { %7236 = vst.msk [vmem:[#allocation4 + $0x140] sm:$0xff] %vm654_vm2, %v7227_v0  ;;  %13008 = vmatprep.mubr.msk.f32.mxu0 %vm654_vm2, %v7227_v0 }
0x200e   :  { %13009 = vmatmul.mubr.msk.f32.vlgmr.msra.gmra.mxu0 %vm654_vm2, %v7228_v49 }
0x200f   :  { %13021 = vmatpush3.xpose.msk.msra.mxu0 %vm94_vm0, %v17302_v36 }
0x2010   :  { %13022 = vmatprep.subr.msk.mxu0 %vm94_vm0, %v17335_v55 }
0x2013   :  { %13023 = vmatpush3.xpose.msk.msra.mxu0 %vm94_vm0, %v17335_v55 }
0x2014   :  { %13024 = vmatprep.subr.msk.mxu0 %vm94_vm0, %v7424_v17 }
0x2017   :  { %13025 = vmatpush3.xpose.msk.msra.mxu0 %vm94_vm0, %v7424_v17 }
0x2018   :  { %13026 = vmatprep.subr.msk.mxu0 %vm94_vm0, %v7422_v15 }
0x201b   :  { %13027 = vmatpush3.xpose.msk.msra.mxu0 %vm94_vm0, %v7422_v15 }
0x201c   :  { %13028 = vmatprep.subr.msk.mxu0 %vm94_vm0, %v7420_v20 }
0x201f   :  { %13029 = vmatpush3.xpose.msk.msra.mxu0 %vm94_vm0, %v7420_v20 }
0x2020   :  { %13030 = vmatprep.subr.msk.mxu0 %vm94_vm0, %v7418_v14 }
0x2023   :  { %13031 = vmatpush3.xpose.msk.msra.mxu0 %vm94_vm0, %v7418_v14 }
0x2029   :  { %v7182_v36 = vpop.xlane.xlu0 %7181 }
0x202a   :  { %13833 = vrcp.f32 %v7182_v36 }
0x202b   :  { %v7185_v55 = vpop.xlane.xlu1 %7184 }
0x202c   :  { %13835 = vrcp.f32 %v7185_v55 }
0x202d   :  { %v7179_v34 = vpop.xlane.xlu0 %7178 }
0x202e   :  { %13837 = vrcp.f32 %v7179_v34 }
0x202f   :  { %v7191_v51 = vpop.xlane.xlu1 %7190 }
0x2030   :  { %13839 = vrcp.f32 %v7191_v51 }
0x2031   :  { %v7188_v8 = vpop.xlane.xlu0 %7187 }
0x2032   :  { %13841 = vrcp.f32 %v7188_v8 }
0x2033   :  { %v7414_v57 = vpop.permute.xlu1 %7413 }
0x2035   :  { %v7194_v17 = vpop.xlane.xlu0 %7193 }
0x2036   :  { %13843 = vrcp.f32 %v7194_v17 }
0x2037   :  { %v13834_v15 = vpop.eup %13833  ;;  %v17433_v61 = vpop.permute.xlu1 %7399 }
0x2038   :  { %v7206_v30 = vmul.f32 %v13834_v15, %v7182_v36 }
0x2039   :  { %v13836_v12 = vpop.eup %13835  ;;  %v7416_v44 = vpop.permute.xlu0 %7415 }
0x203a   :  { %v7214_v39 = vsub.f32 2.0, %v7206_v30  ;;  %v7207_v6 = vmul.f32 %v13836_v12, %v7185_v55  ;;  %13032 = vmatprep.subr.msk.mxu0 %vm94_vm0, %v7416_v44 }
0x203b   :  { %v13838_v23 = vpop.eup %13837  ;;  %13033 = vmatpush3.xpose.msk.msra.mxu0 %vm94_vm0, %v7416_v44  ;;  %v17437_v2 = vpop.permute.xlu1 %7403 }
0x203c   :  { %v7222_v27 = vmul.f32 %v13834_v15, %v7214_v39  ;;  %v7215_v49 = vsub.f32 2.0, %v7207_v6  ;;  %v7205_v59 = vmul.f32 %v13838_v23, %v7179_v34  ;;  %13034 = vmatprep.subr.msk.mxu0 %vm94_vm0, %v7414_v57 }
0x203d   :  { %v13840_v0 = vpop.eup %13839  ;;  %v7398_v20 = vpop.permute.xlu0 %7397 }
0x203e   :  { %v7230_v14 = vmul.f32 %v17349_v29, %v7222_v27  ;;  %v7223_v36 = vmul.f32 %v13836_v12, %v7215_v49  ;;  %v7213_v32 = vsub.f32 2.0, %v7205_v59  ;;  %v7209_v30 = vmul.f32 %v13840_v0, %v7191_v51 }
0x203f   :  { %v13842_v55 = vpop.eup %13841  ;;  %13035 = vmatpush3.xpose.msk.msra.mxu0 %vm94_vm0, %v7414_v57  ;;  %v7408_v3 = vpop.permute.xlu1 %7407 }
0x2040   :  { %7239 = vst.msk [vmem:[#allocation4 + $0x158] sm:$0xff] %vm654_vm2, %v7230_v14  ;;  %v7221_v44 = vmul.f32 %v13838_v23, %v7213_v32  ;;  %v7217_v43 = vsub.f32 2.0, %v7209_v30  ;;  %v7208_v15 = vmul.f32 %v13842_v55, %v7188_v8  ;;  %v7231_v34 = vmul.f32 %v17351_v50, %v7223_v36 }
0x2041   :  { %v7402_v39 = vpop.permute.xlu0 %7401 }
0x2042   :  { %v7225_v6 = vmul.f32 %v13840_v0, %v7217_v43  ;;  %v7216_v62 = vsub.f32 2.0, %v7208_v15  ;;  %v7229_v16 = vmul.f32 %v17355_v28, %v7221_v44  ;;  %7240 = vst.msk [vmem:[#allocation4 + $0x160] sm:$0xff] %vm654_vm2, %v7231_v34 }
0x2043   :  { %v13844_v29 = vpop.eup %13843  ;;  %v7412_v51 = vpop.permute.xlu1 %7411 }
0x2044   :  { %v7224_v12 = vmul.f32 %v13842_v55, %v7216_v62  ;;  %v7210_v27 = vmul.f32 %v13844_v29, %v7194_v17  ;;  %7238 = vst.msk [vmem:[#allocation4 + $0x150] sm:$0xff] %vm654_vm2, %v7229_v16  ;;  %13011 = vmatprep.mubr.msk.f32.mxu0 %vm654_vm2, %v7229_v16  ;;  %v7233_v32 = vmul.f32 %v17359_v24, %v7225_v6 }
0x2045   :  { %v7406_v8 = vpop.permute.xlu0 %7405  ;;  %13012 = vmatmul.mubr.msk.f32.gmra.mxu0 %vm654_vm2, %v7230_v14 }
0x2046   :  { %v7232_v43 = vmul.f32 %v17363_v26, %v7224_v12  ;;  %v7218_v50 = vsub.f32 2.0, %v7210_v27  ;;  %13014 = vmatprep.mubr.msk.f32.mxu0 %vm654_vm2, %v7231_v34  ;;  %7242 = vst.msk [vmem:[#allocation4 + $0x170] sm:$0xff] %vm654_vm2, %v7233_v32 }
0x2047   :  { %v7702_v28 = vpop.permute.xlu1 %7701 }
0x2048   :  { %7241 = vst.msk [vmem:[#allocation4 + $0x168] sm:$0xff] %vm654_vm2, %v7232_v43  ;;  %v7226_v62 = vmul.f32 %v13844_v29, %v7218_v50  ;;  %13048 = vmatprep.subr.mxu1 %v7702_v28 }
0x2049   :  { %v7410_v57 = vpop.permute.xlu0 %7409  ;;  %13015 = vmatmul.mubr.msk.f32.gmra.mxu0 %vm654_vm2, %v7232_v43  ;;  %13049 = vmatpush3.msra.mxu1 %v7702_v28 }
0x204a   :  { %v7234_v16 = vmul.f32 %v17369_v48, %v7226_v62  ;;  %13017 = vmatprep.mubr.msk.f32.mxu0 %vm654_vm2, %v7233_v32 }
0x204b   :  { %v7698_v24 = vpop.permute.xlu1 %7697 }
0x204c   :  { %7243 = vst.msk [vmem:[#allocation4 + $0x178] sm:$0xff] %vm654_vm2, %v7234_v16 }
0x204d   :  { %v7700_v26 = vpop.permute.xlu0 %7699  ;;  %13018 = vmatmul.mubr.msk.f32.gmra.mxu0 %vm654_vm2, %v7234_v16 }
0x204e   :  { %13036 = vmatprep.mubr.msk.f32.mxu0 %vm94_vm0, %v7398_v20  ;;  %13050 = vmatprep.subr.mxu1 %v7700_v26 }
0x204f   :  { %13051 = vmatpush3.msra.mxu1 %v7700_v26  ;;  %v7696_v17 = vpop.permute.xlu1 %7695 }
0x2050   :  { %13052 = vmatprep.subr.mxu1 %v7698_v24 }
0x2051   :  { %v7694_v23 = vpop.permute.xlu0 %7693  ;;  %13037 = vmatmul.mubr.msk.f32.vlgmr.msra.gmra.mxu0 %vm94_vm0, %v17433_v61  ;;  %13053 = vmatpush3.msra.mxu1 %v7698_v24 }
0x2052   :  { %13039 = vmatprep.mubr.msk.f32.mxu0 %vm94_vm0, %v7402_v39  ;;  %13054 = vmatprep.subr.mxu1 %v7696_v17 }
0x2053   :  { %13055 = vmatpush3.msra.mxu1 %v7696_v17  ;;  %v7692_v48 = vpop.permute.xlu1 %7691 }
0x2054   :  { %13056 = vmatprep.subr.mxu1 %v7694_v23 }
0x2055   :  { %13040 = vmatmul.mubr.msk.f32.gmra.mxu0 %vm94_vm0, %v17437_v2  ;;  %13057 = vmatpush3.msra.mxu1 %v7694_v23  ;;  %v7690_v49 = vpop.permute.xlu0 %7689 }
0x2056   :  { %13042 = vmatprep.mubr.msk.f32.mxu0 %vm94_vm0, %v7406_v8  ;;  %13058 = vmatprep.subr.mxu1 %v7692_v48 }
0x2057   :  { %13059 = vmatpush3.msra.mxu1 %v7692_v48  ;;  %v7688_v59 = vpop.permute.xlu1 %7687 }
0x2058   :  { %13060 = vmatprep.subr.mxu1 %v7690_v49 }
0x2059   :  { %13043 = vmatmul.mubr.msk.f32.gmra.mxu0 %vm94_vm0, %v7408_v3  ;;  %13061 = vmatpush3.msra.mxu1 %v7690_v49 }
0x205a   :  { %13045 = vmatprep.mubr.msk.f32.mxu0 %vm94_vm0, %v7410_v57  ;;  %13062 = vmatprep.subr.mxu1 %v7688_v59 }
0x205b   :  { %13063 = vmatpush3.msra.mxu1 %v7688_v59  ;;  %v17468_v61 = vpop.permute.xlu1 %7870 }
0x205c   :  { %13076 = vmatprep.subr.msk.mxu1 %vm94_vm0, %v17468_v61 }
0x205d   :  { %13046 = vmatmul.mubr.msk.f32.gmra.mxu0 %vm94_vm0, %v7412_v51 }
0x205f   :  { %v17501_v16 = vpop.permute.xlu1 %7868 }
0x20ce   :  { %v17473_v2 = vpop.f32.mrf.mxu0 }
0x20d0   :  { %v17475_v0 = vpop.f32.mrf.mxu0 }
0x2105   :  { %v17477_v20 = vpop.f32.mrf.mxu0 }
0x2107   :  { %v17479_v14 = vpop.f32.mrf.mxu0 }
0x2108   :  { %19169 = vst [vmem:[#allocation21_spill] sm:$0xff] %v17479_v14 }
0x2109   :  { %v17481_v3 = vpop.f32.mrf.mxu0 }
0x210b   :  { %v17483_v36 = vpop.f32.mrf.mxu0 }
0x210c   :  { %19170 = vst [vmem:[#allocation22_spill] sm:$0xff] %v17483_v36 }
0x210d   :  { %v17485_v30 = vpop.f32.mrf.mxu0 }
0x210e   :  { %19171 = vst [vmem:[#allocation23_spill] sm:$0xff] %v17485_v30 }
0x210f   :  { %v17487_v55 = vpop.f32.mrf.mxu0 }
0x2110   :  { %19172 = vst [vmem:[#allocation11_spill] sm:$0xff] %v17487_v55 }
0x2111   :  { %v13038_v44 = vpop.f32.mrf.mxu0 }
0x2112   :  { %v7569_v15 = vsel %vm654_vm2, %v13038_v44, -inf }
0x2113   :  { %7570 = vmax.xlane.f32.xlu1 %v7569_v15  ;;  %v7527_v34 = vpop.f32.mrf.mxu0 }
0x2114   :  { %v7566_v39 = vsel %vm654_vm2, %v7527_v34, -inf }
0x2115   :  { %7567 = vmax.xlane.f32.xlu0 %v7566_v39  ;;  %v13041_v6 = vpop.f32.mrf.mxu0 }
0x2116   :  { %v7575_v51 = vsel %vm654_vm2, %v13041_v6, -inf }
0x2117   :  { %v7537_v29 = vpop.f32.mrf.mxu0 }
0x2118   :  { %v7572_v32 = vsel %vm654_vm2, %v7537_v29, -inf }
0x2119   :  { %7576 = vmax.xlane.f32.xlu0 %v7575_v51  ;;  %v13044_v12 = vpop.f32.mrf.mxu0 }
0x211a   :  { %v7581_v28 = vsel %vm654_vm2, %v13044_v12, -inf }
0x211b   :  { %v7547_v27 = vpop.f32.mrf.mxu0 }
0x211c   :  { %v7578_v8 = vsel %vm654_vm2, %v7547_v27, -inf }
0x211d   :  { %7573 = vmax.xlane.f32.xlu0 %v7572_v32  ;;  %7579 = vmax.xlane.f32.xlu1 %v7578_v8  ;;  %v13047_v43 = vpop.f32.mrf.mxu0 }
0x211e   :  { %v7587_v57 = vsel %vm654_vm2, %v13047_v43, -inf }
0x211f   :  { %v7557_v50 = vpop.f32.mrf.mxu0 }
0x2120   :  { %v7584_v62 = vsel %vm654_vm2, %v7557_v50, -inf }
0x2121   :  { %7582 = vmax.xlane.f32.xlu0 %v7581_v28  ;;  %7585 = vmax.xlane.f32.xlu1 %v7584_v62 }
0x2125   :  { %7588 = vmax.xlane.f32.xlu0 %v7587_v57 }
0x2132   :  { %7864 = vrot.lane.b32.xlu1 %v16735_v11, %s14086_s21 }
0x213b   :  { %7866 = vrot.lane.b32.xlu0 %v16729_v58, %s14086_s21 }
0x219c   :  { %v7571_v24 = vpop.xlane.xlu1 %7570 }
0x219d   :  { %v7591_v26 = vsub.f32 %v13038_v44, %v7571_v24 }
0x219e   :  { %v7568_v17 = vpop.xlane.xlu0 %7567 }
0x219f   :  { %v7600_v23 = vmul.f32 1.442695, %v7591_v26  ;;  %v7590_v48 = vsub.f32 %v7527_v34, %v7568_v17 }
0x21a1   :  { %13845 = vpow2.f32 %v7600_v23  ;;  %v7598_v49 = vmul.f32 1.442695, %v7590_v48 }
0x21a2   :  { %v7577_v32 = vpop.xlane.xlu0 %7576 }
0x21a3   :  { %13847 = vpow2.f32 %v7598_v49  ;;  %v7593_v8 = vsub.f32 %v13041_v6, %v7577_v32 }
0x21a5   :  { %v7604_v24 = vmul.f32 1.442695, %v7593_v8 }
0x21a6   :  { %v7574_v44 = vpop.xlane.xlu0 %7573  ;;  %v7580_v34 = vpop.xlane.xlu1 %7579 }
0x21a7   :  { %v7594_v28 = vsub.f32 %v7547_v27, %v7580_v34  ;;  %v7592_v26 = vsub.f32 %v7537_v29, %v7574_v44  ;;  %13849 = vpow2.f32 %v7604_v24 }
0x21a9   :  { %v7606_v17 = vmul.f32 1.442695, %v7594_v28  ;;  %v7602_v48 = vmul.f32 1.442695, %v7592_v26 }
0x21aa   :  { %v7583_v62 = vpop.xlane.xlu0 %7582  ;;  %v7586_v57 = vpop.xlane.xlu1 %7585 }
0x21ab   :  { %v7596_v23 = vsub.f32 %v7557_v50, %v7586_v57  ;;  %v7595_v49 = vsub.f32 %v13044_v12, %v7583_v62  ;;  %13851 = vpow2.f32 %v7606_v17 }
0x21ac   :  { %13853 = vpow2.f32 %v7602_v48 }
0x21ad   :  { %v7608_v37 = vmul.f32 1.442695, %v7595_v49 }
0x21ae   :  { %v17503_v59 = vpop.eup %13845  ;;  %v7865_v28 = vpop.permute.xlu1 %7864 }
0x21af   :  { %v7617_v15 = vsel %vm654_vm2, %v17503_v59, 0.0 }
0x21b0   :  { %v17507_v39 = vpop.eup %13847  ;;  %7618 = vadd.xlane.f32.xlu0 %v7617_v15  ;;  %v7589_v15 = vpop.xlane.xlu0 %7588 }
0x21b1   :  { %v7614_v51 = vsel %vm654_vm2, %v17507_v39, 0.0  ;;  %v7597_v38 = vsub.f32 %v13047_v43, %v7589_v15 }
0x21b2   :  { %7615 = vadd.xlane.f32.xlu1 %v7614_v51  ;;  %v7610_v51 = vmul.f32 1.442695, %v7596_v23 }
0x21b3   :  { %v7612_v4 = vmul.f32 1.442695, %v7597_v38 }
0x21b4   :  { %13855 = vpow2.f32 %v7610_v51  ;;  %v17515_v6 = vpop.eup %13849  ;;  %v7867_v8 = vpop.permute.xlu0 %7866 }
0x21b5   :  { %13857 = vpow2.f32 %v7608_v37  ;;  %v7623_v29 = vsel %vm654_vm2, %v17515_v6, 0.0 }
0x21b6   :  { %13859 = vpow2.f32 %v7612_v4 }
0x21b8   :  { %v17517_v27 = vpop.eup %13851 }
0x21b9   :  { %v17521_v50 = vpop.eup %13853  ;;  %v7626_v12 = vsel %vm654_vm2, %v17517_v27, 0.0 }
0x21ba   :  { %v7620_v38 = vsel %vm654_vm2, %v17521_v50, 0.0 }
0x21c1   :  { %v17525_v32 = vpop.eup %13855 }
0x21c2   :  { %v17529_v4 = vpop.eup %13857  ;;  %v7632_v37 = vsel %vm654_vm2, %v17525_v32, 0.0 }
0x21c3   :  { %7860 = vrot.lane.b32.xlu1 %v16747_v53, %s14086_s21  ;;  %v7629_v43 = vsel %vm654_vm2, %v17529_v4, 0.0  ;;  %v17535_v44 = vpop.eup %13859 }
0x21c4   :  { %v7635_v34 = vsel %vm654_vm2, %v17535_v44, 0.0 }
0x21c6   :  { %7862 = vrot.lane.b32.xlu0 %v16741_v35, %s14086_s21 }
0x21e5   :  { %7624 = vadd.xlane.f32.xlu0 %v7623_v29 }
0x21e7   :  { %7627 = vadd.xlane.f32.xlu1 %v7626_v12 }
0x21e9   :  { %7621 = vadd.xlane.f32.xlu0 %v7620_v38 }
0x21eb   :  { %7633 = vadd.xlane.f32.xlu1 %v7632_v37 }
0x21ed   :  { %7630 = vadd.xlane.f32.xlu0 %v7629_v43 }
0x21f1   :  { %7636 = vadd.xlane.f32.xlu0 %v7635_v34 }
0x21fc   :  { %7856 = vrot.lane.b32.xlu1 %v19165_v41, %s14086_s21 }
0x2200   :  { %7842 = vrot.lane.b32.xlu1 %v19166_v52, %s19167_s4 }
0x2204   :  { %7846 = vrot.lane.b32.xlu1 %v16741_v35, %s19167_s4 }
0x2207   :  { %7858 = vrot.lane.b32.xlu0 %v19166_v52, %s14086_s21  ;;  %s19178_s21 = smov 16  }
0x2208   :  { %7850 = vrot.lane.b32.xlu1 %v16729_v58, %s19167_s4 }
0x220b   :  { %7840 = vrot.lane.b32.xlu0 %v19165_v41, %s19167_s4 }
0x220c   :  { %7854 = vrot.lane.b32.xlu1 %v16719_v5, %s19167_s4 }
0x220f   :  { %7844 = vrot.lane.b32.xlu0 %v16747_v53, %s19167_s4 }
0x2210   :  { %8144 = vrot.lane.b32.xlu1 %v16719_v5, %s19168_s27 }
0x2213   :  { %7848 = vrot.lane.b32.xlu0 %v16735_v11, %s19167_s4 }
0x2214   :  { %8140 = vrot.lane.b32.xlu1 %v16729_v58, %s19168_s27 }
0x2217   :  { %7852 = vrot.lane.b32.xlu0 %v16723_v13, %s19167_s4 }
0x2218   :  { %8138 = vrot.lane.b32.xlu1 %v16735_v11, %s19168_s27 }
0x221b   :  { %8142 = vrot.lane.b32.xlu0 %v16723_v13, %s19168_s27 }
0x221c   :  { %8134 = vrot.lane.b32.xlu1 %v16747_v53, %s19168_s27 }
0x221f   :  { %8136 = vrot.lane.b32.xlu0 %v16741_v35, %s19168_s27 }
0x2220   :  { %8130 = vrot.lane.b32.xlu1 %v19165_v41, %s19168_s27 }
0x2223   :  { %8132 = vrot.lane.b32.xlu0 %v19166_v52, %s19168_s27 }
0x2224   :  { %8313 = vrot.lane.b32.xlu1 %v16675_v10, %s19173_s28 }
0x2228   :  { %8311 = vrot.lane.b32.xlu1 %v16678_v47, %s19173_s28 }
0x2239   :  { %v7619_v62 = vpop.xlane.xlu0 %7618 }
0x223a   :  { %13861 = vrcp.f32 %v7619_v62 }
0x223b   :  { %v7616_v57 = vpop.xlane.xlu1 %7615 }
0x223c   :  { %13863 = vrcp.f32 %v7616_v57 }
0x2247   :  { %v13862_v24 = vpop.eup %13861 }
0x2248   :  { %v7647_v26 = vmul.f32 %v13862_v24, %v7619_v62 }
0x2249   :  { %v13864_v17 = vpop.eup %13863 }
0x224a   :  { %v7655_v23 = vsub.f32 2.0, %v7647_v26  ;;  %v7646_v48 = vmul.f32 %v13864_v17, %v7616_v57 }
0x224c   :  { %v7663_v49 = vmul.f32 %v13862_v24, %v7655_v23  ;;  %v7654_v15 = vsub.f32 2.0, %v7646_v48 }
0x224e   :  { %v7671_v51 = vmul.f32 %v17503_v59, %v7663_v49  ;;  %v7662_v29 = vmul.f32 %v13864_v17, %v7654_v15  ;;  %v7863_v59 = vpop.permute.xlu0 %7862 }
0x2250   :  { %7680 = vst.msk [vmem:[#allocation4 + $0x88] sm:$0xff] %vm654_vm2, %v7671_v51  ;;  %v7670_v12 = vmul.f32 %v17507_v39, %v7662_v29  ;;  %v7861_v39 = vpop.permute.xlu1 %7860 }
0x2252   :  { %7679 = vst.msk [vmem:[#allocation4 + $0x80] sm:$0xff] %vm654_vm2, %v7670_v12  ;;  %13064 = vmatprep.mubr.msk.f32.mxu1 %vm654_vm2, %v7670_v12 }
0x2253   :  { %13065 = vmatmul.mubr.msk.f32.vlgmr.msra.gmra.mxu1 %vm654_vm2, %v7671_v51 }
0x2254   :  { %13077 = vmatpush3.xpose.msk.msra.mxu1 %vm94_vm0, %v17468_v61 }
0x2255   :  { %13078 = vmatprep.subr.msk.mxu1 %vm94_vm0, %v17501_v16 }
0x2258   :  { %13079 = vmatpush3.xpose.msk.msra.mxu1 %vm94_vm0, %v17501_v16 }
0x2259   :  { %13080 = vmatprep.subr.msk.mxu1 %vm94_vm0, %v7867_v8 }
0x225c   :  { %13081 = vmatpush3.xpose.msk.msra.mxu1 %vm94_vm0, %v7867_v8 }
0x225d   :  { %13082 = vmatprep.subr.msk.mxu1 %vm94_vm0, %v7865_v28 }
0x2260   :  { %13083 = vmatpush3.xpose.msk.msra.mxu1 %vm94_vm0, %v7865_v28 }
0x2261   :  { %13084 = vmatprep.subr.msk.mxu1 %vm94_vm0, %v7863_v59 }
0x2264   :  { %13085 = vmatpush3.xpose.msk.msra.mxu1 %vm94_vm0, %v7863_v59 }
0x2265   :  { %13086 = vmatprep.subr.msk.mxu1 %vm94_vm0, %v7861_v39 }
0x2268   :  { %13087 = vmatpush3.xpose.msk.msra.mxu1 %vm94_vm0, %v7861_v39 }
0x226e   :  { %v7625_v61 = vpop.xlane.xlu0 %7624 }
0x226f   :  { %13865 = vrcp.f32 %v7625_v61 }
0x2270   :  { %v7628_v16 = vpop.xlane.xlu1 %7627 }
0x2271   :  { %13867 = vrcp.f32 %v7628_v16 }
0x2272   :  { %v7622_v38 = vpop.xlane.xlu0 %7621 }
0x2273   :  { %13869 = vrcp.f32 %v7622_v38 }
0x2274   :  { %v7634_v37 = vpop.xlane.xlu1 %7633 }
0x2275   :  { %13871 = vrcp.f32 %v7634_v37 }
0x2276   :  { %v7631_v43 = vpop.xlane.xlu0 %7630 }
0x2277   :  { %13873 = vrcp.f32 %v7631_v43 }
0x2278   :  { %v7857_v34 = vpop.permute.xlu1 %7856 }
0x227a   :  { %v7637_v8 = vpop.xlane.xlu0 %7636 }
0x227b   :  { %13875 = vrcp.f32 %v7637_v8 }
0x227c   :  { %v13866_v28 = vpop.eup %13865  ;;  %v17599_v62 = vpop.permute.xlu1 %7842 }
0x227d   :  { %v7649_v57 = vmul.f32 %v13866_v28, %v7625_v61 }
0x227e   :  { %v13868_v24 = vpop.eup %13867  ;;  %v7859_v26 = vpop.permute.xlu0 %7858 }
0x227f   :  { %v7657_v17 = vsub.f32 2.0, %v7649_v57  ;;  %v7650_v23 = vmul.f32 %v13868_v24, %v7628_v16  ;;  %13088 = vmatprep.subr.msk.mxu1 %vm94_vm0, %v7859_v26 }
0x2280   :  { %v13870_v48 = vpop.eup %13869  ;;  %13089 = vmatpush3.xpose.msk.msra.mxu1 %vm94_vm0, %v7859_v26  ;;  %v17603_v49 = vpop.permute.xlu1 %7846 }
0x2281   :  { %v7665_v15 = vmul.f32 %v13866_v28, %v7657_v17  ;;  %v7658_v51 = vsub.f32 2.0, %v7650_v23  ;;  %v7648_v29 = vmul.f32 %v13870_v48, %v7622_v38  ;;  %13090 = vmatprep.subr.msk.mxu1 %vm94_vm0, %v7857_v34 }
0x2282   :  { %v13872_v12 = vpop.eup %13871  ;;  %v7841_v59 = vpop.permute.xlu0 %7840 }
0x2283   :  { %v7673_v39 = vmul.f32 %v17515_v6, %v7665_v15  ;;  %v7666_v61 = vmul.f32 %v13868_v24, %v7658_v51  ;;  %v7656_v22 = vsub.f32 2.0, %v7648_v29  ;;  %v7652_v57 = vmul.f32 %v13872_v12, %v7634_v37 }
0x2284   :  { %v13874_v16 = vpop.eup %13873  ;;  %13091 = vmatpush3.xpose.msk.msra.mxu1 %vm94_vm0, %v7857_v34  ;;  %v7851_v9 = vpop.permute.xlu1 %7850 }
0x2285   :  { %7682 = vst.msk [vmem:[#allocation4 + $0x98] sm:$0xff] %vm654_vm2, %v7673_v39  ;;  %v7664_v26 = vmul.f32 %v13870_v48, %v7656_v22  ;;  %v7660_v21 = vsub.f32 2.0, %v7652_v57  ;;  %v7651_v28 = vmul.f32 %v13874_v16, %v7631_v43  ;;  %v7674_v38 = vmul.f32 %v17517_v27, %v7666_v61 }
0x2286   :  { %v7845_v17 = vpop.permute.xlu0 %7844 }
0x2287   :  { %v7668_v23 = vmul.f32 %v13872_v12, %v7660_v21  ;;  %v7659_v33 = vsub.f32 2.0, %v7651_v28  ;;  %v7672_v55 = vmul.f32 %v17521_v50, %v7664_v26  ;;  %7683 = vst.msk [vmem:[#allocation4 + $0xa0] sm:$0xff] %vm654_vm2, %v7674_v38 }
0x2288   :  { %v13876_v6 = vpop.eup %13875  ;;  %v7855_v37 = vpop.permute.xlu1 %7854 }
0x2289   :  { %v7667_v24 = vmul.f32 %v13874_v16, %v7659_v33  ;;  %v7653_v15 = vmul.f32 %v13876_v6, %v7637_v8  ;;  %7681 = vst.msk [vmem:[#allocation4 + $0x90] sm:$0xff] %vm654_vm2, %v7672_v55  ;;  %13067 = vmatprep.mubr.msk.f32.mxu1 %vm654_vm2, %v7672_v55  ;;  %v7676_v22 = vmul.f32 %v17525_v32, %v7668_v23 }
0x228a   :  { %v7849_v43 = vpop.permute.xlu0 %7848  ;;  %13068 = vmatmul.mubr.msk.f32.gmra.mxu1 %vm654_vm2, %v7673_v39 }
0x228b   :  { %v7675_v21 = vmul.f32 %v17529_v4, %v7667_v24  ;;  %v7661_v27 = vsub.f32 2.0, %v7653_v15  ;;  %13070 = vmatprep.mubr.msk.f32.mxu1 %vm654_vm2, %v7674_v38  ;;  %7685 = vst.msk [vmem:[#allocation4 + $0xb0] sm:$0xff] %vm654_vm2, %v7676_v22 }
0x228c   :  { %v8145_v50 = vpop.permute.xlu1 %8144 }
0x228d   :  { %7684 = vst.msk [vmem:[#allocation4 + $0xa8] sm:$0xff] %vm654_vm2, %v7675_v21  ;;  %v7669_v33 = vmul.f32 %v13876_v6, %v7661_v27  ;;  %13104 = vmatprep.subr.mxu0 %v8145_v50 }
0x228e   :  { %v7853_v34 = vpop.permute.xlu0 %7852  ;;  %13071 = vmatmul.mubr.msk.f32.gmra.mxu1 %vm654_vm2, %v7675_v21  ;;  %13105 = vmatpush3.msra.mxu0 %v8145_v50 }
0x228f   :  { %v7677_v55 = vmul.f32 %v17535_v44, %v7669_v33  ;;  %13073 = vmatprep.mubr.msk.f32.mxu1 %vm654_vm2, %v7676_v22 }
0x2290   :  { %v8141_v32 = vpop.permute.xlu1 %8140 }
0x2291   :  { %7686 = vst.msk [vmem:[#allocation4 + $0xb8] sm:$0xff] %vm654_vm2, %v7677_v55 }
0x2292   :  { %v8143_v4 = vpop.permute.xlu0 %8142  ;;  %13074 = vmatmul.mubr.msk.f32.gmra.mxu1 %vm654_vm2, %v7677_v55 }
0x2293   :  { %13092 = vmatprep.mubr.msk.f32.mxu1 %vm94_vm0, %v7841_v59  ;;  %13106 = vmatprep.subr.mxu0 %v8143_v4 }
0x2294   :  { %13107 = vmatpush3.msra.mxu0 %v8143_v4  ;;  %v8139_v8 = vpop.permute.xlu1 %8138 }
0x2295   :  { %13108 = vmatprep.subr.mxu0 %v8141_v32 }
0x2296   :  { %v8137_v48 = vpop.permute.xlu0 %8136  ;;  %13093 = vmatmul.mubr.msk.f32.vlgmr.msra.gmra.mxu1 %vm94_vm0, %v17599_v62  ;;  %13109 = vmatpush3.msra.mxu0 %v8141_v32 }
0x2297   :  { %13095 = vmatprep.mubr.msk.f32.mxu1 %vm94_vm0, %v7845_v17  ;;  %13110 = vmatprep.subr.mxu0 %v8139_v8 }
0x2298   :  { %13111 = vmatpush3.msra.mxu0 %v8139_v8  ;;  %v8135_v44 = vpop.permute.xlu1 %8134 }
0x2299   :  { %13112 = vmatprep.subr.mxu0 %v8137_v48 }
0x229a   :  { %13096 = vmatmul.mubr.msk.f32.gmra.mxu1 %vm94_vm0, %v17603_v49  ;;  %13113 = vmatpush3.msra.mxu0 %v8137_v48  ;;  %v8133_v51 = vpop.permute.xlu0 %8132 }
0x229b   :  { %13098 = vmatprep.mubr.msk.f32.mxu1 %vm94_vm0, %v7849_v43  ;;  %13114 = vmatprep.subr.mxu0 %v8135_v44 }
0x229c   :  { %13115 = vmatpush3.msra.mxu0 %v8135_v44  ;;  %v8131_v29 = vpop.permute.xlu1 %8130 }
0x229d   :  { %13116 = vmatprep.subr.mxu0 %v8133_v51 }
0x229e   :  { %13099 = vmatmul.mubr.msk.f32.gmra.mxu1 %vm94_vm0, %v7851_v9  ;;  %13117 = vmatpush3.msra.mxu0 %v8133_v51 }
0x229f   :  { %13101 = vmatprep.mubr.msk.f32.mxu1 %vm94_vm0, %v7853_v34  ;;  %13118 = vmatprep.subr.mxu0 %v8131_v29 }
0x22a0   :  { %13119 = vmatpush3.msra.mxu0 %v8131_v29  ;;  %v17634_v62 = vpop.permute.xlu1 %8313 }
0x22a1   :  { %13132 = vmatprep.subr.msk.mxu0 %vm94_vm0, %v17634_v62 }
0x22a2   :  { %13102 = vmatmul.mubr.msk.f32.gmra.mxu1 %vm94_vm0, %v7855_v37 }
0x22a4   :  { %v17667_v55 = vpop.permute.xlu1 %8311 }
0x2313   :  { %v17639_v49 = vpop.f32.mrf.mxu1 }
0x2315   :  { %v17641_v12 = vpop.f32.mrf.mxu1 }
0x234a   :  { %v17643_v59 = vpop.f32.mrf.mxu1 }
0x234c   :  { %v17645_v39 = vpop.f32.mrf.mxu1 }
0x234e   :  { %v17647_v9 = vpop.f32.mrf.mxu1 }
0x2350   :  { %v17649_v61 = vpop.f32.mrf.mxu1 }
0x2352   :  { %v17651_v57 = vpop.f32.mrf.mxu1 }
0x2354   :  { %v17653_v16 = vpop.f32.mrf.mxu1 }
0x2356   :  { %v13094_v26 = vpop.f32.mrf.mxu1 }
0x2357   :  { %v8012_v28 = vsel %vm654_vm2, %v13094_v26, -inf }
0x2358   :  { %8013 = vmax.xlane.f32.xlu1 %v8012_v28  ;;  %v7970_v38 = vpop.f32.mrf.mxu1 }
0x2359   :  { %v8009_v17 = vsel %vm654_vm2, %v7970_v38, -inf }
0x235a   :  { %8010 = vmax.xlane.f32.xlu0 %v8009_v17  ;;  %v13097_v23 = vpop.f32.mrf.mxu1 }
0x235b   :  { %v8018_v37 = vsel %vm654_vm2, %v13097_v23, -inf }
0x235c   :  { %v7980_v6 = vpop.f32.mrf.mxu1 }
0x235d   :  { %v8015_v22 = vsel %vm654_vm2, %v7980_v6, -inf }
0x235e   :  { %8019 = vmax.xlane.f32.xlu0 %v8018_v37  ;;  %v13100_v24 = vpop.f32.mrf.mxu1 }
0x235f   :  { %v8024_v50 = vsel %vm654_vm2, %v13100_v24, -inf }
0x2360   :  { %v7990_v15 = vpop.f32.mrf.mxu1 }
0x2361   :  { %v8021_v43 = vsel %vm654_vm2, %v7990_v15, -inf }
0x2362   :  { %8016 = vmax.xlane.f32.xlu0 %v8015_v22  ;;  %8022 = vmax.xlane.f32.xlu1 %v8021_v43  ;;  %v13103_v21 = vpop.f32.mrf.mxu1 }
0x2363   :  { %v8030_v34 = vsel %vm654_vm2, %v13103_v21, -inf }
0x2364   :  { %v8000_v27 = vpop.f32.mrf.mxu1 }
0x2365   :  { %v8027_v33 = vsel %vm654_vm2, %v8000_v27, -inf }
0x2366   :  { %8025 = vmax.xlane.f32.xlu0 %v8024_v50  ;;  %8028 = vmax.xlane.f32.xlu1 %v8027_v33 }
0x236a   :  { %8031 = vmax.xlane.f32.xlu0 %v8030_v34 }
0x2377   :  { %8307 = vrot.lane.b32.xlu1 %v16693_v18, %s19173_s28 }
0x2380   :  { %8309 = vrot.lane.b32.xlu0 %v16683_v56, %s19173_s28 }
0x23e1   :  { %v8014_v32 = vpop.xlane.xlu1 %8013 }
0x23e2   :  { %v8034_v4 = vsub.f32 %v13094_v26, %v8014_v32 }
0x23e3   :  { %v8011_v8 = vpop.xlane.xlu0 %8010 }
0x23e4   :  { %v8043_v48 = vmul.f32 1.442695, %v8034_v4  ;;  %v8033_v44 = vsub.f32 %v7970_v38, %v8011_v8 }
0x23e6   :  { %13877 = vpow2.f32 %v8043_v48  ;;  %v8041_v51 = vmul.f32 1.442695, %v8033_v44 }
0x23e7   :  { %v8020_v22 = vpop.xlane.xlu0 %8019 }
0x23e8   :  { %13879 = vpow2.f32 %v8041_v51  ;;  %v8036_v43 = vsub.f32 %v13097_v23, %v8020_v22 }
0x23ea   :  { %v8047_v32 = vmul.f32 1.442695, %v8036_v43 }
0x23eb   :  { %v8017_v26 = vpop.xlane.xlu0 %8016  ;;  %v8023_v38 = vpop.xlane.xlu1 %8022 }
0x23ec   :  { %v8037_v50 = vsub.f32 %v7990_v15, %v8023_v38  ;;  %v8035_v4 = vsub.f32 %v7980_v6, %v8017_v26  ;;  %13881 = vpow2.f32 %v8047_v32 }
0x23ee   :  { %v8049_v8 = vmul.f32 1.442695, %v8037_v50  ;;  %v8045_v44 = vmul.f32 1.442695, %v8035_v4 }
0x23ef   :  { %v8026_v33 = vpop.xlane.xlu0 %8025  ;;  %v8029_v34 = vpop.xlane.xlu1 %8028 }
0x23f0   :  { %v8039_v48 = vsub.f32 %v8000_v27, %v8029_v34  ;;  %v8038_v51 = vsub.f32 %v13100_v24, %v8026_v33  ;;  %13883 = vpow2.f32 %v8049_v8 }
0x23f1   :  { %13885 = vpow2.f32 %v8045_v44 }
0x23f2   :  { %v8051_v36 = vmul.f32 1.442695, %v8038_v51 }
0x23f3   :  { %v17669_v29 = vpop.eup %13877 }
0x23f4   :  { %v8060_v28 = vsel %vm654_vm2, %v17669_v29, 0.0 }
0x23f5   :  { %v17673_v17 = vpop.eup %13879  ;;  %8061 = vadd.xlane.f32.xlu0 %v8060_v28  ;;  %v8032_v28 = vpop.xlane.xlu0 %8031 }
0x23f6   :  { %v8057_v37 = vsel %vm654_vm2, %v17673_v17, 0.0  ;;  %v8040_v30 = vsub.f32 %v13103_v21, %v8032_v28 }
0x23f7   :  { %8058 = vadd.xlane.f32.xlu1 %v8057_v37  ;;  %v8053_v37 = vmul.f32 1.442695, %v8039_v48 }
0x23f8   :  { %v8055_v14 = vmul.f32 1.442695, %v8040_v30 }
0x23f9   :  { %13887 = vpow2.f32 %v8053_v37  ;;  %v17681_v23 = vpop.eup %13881 }
0x23fa   :  { %13889 = vpow2.f32 %v8051_v36  ;;  %v8066_v6 = vsel %vm654_vm2, %v17681_v23, 0.0 }
0x23fb   :  { %13891 = vpow2.f32 %v8055_v14 }
0x23fd   :  { %v17683_v15 = vpop.eup %13883 }
0x23fe   :  { %v17687_v27 = vpop.eup %13885  ;;  %v8069_v24 = vsel %vm654_vm2, %v17683_v15, 0.0 }
0x23ff   :  { %v8063_v36 = vsel %vm654_vm2, %v17687_v27, 0.0 }
0x2406   :  { %v17691_v22 = vpop.eup %13887 }
0x2407   :  { %v17695_v14 = vpop.eup %13889  ;;  %v8075_v30 = vsel %vm654_vm2, %v17691_v22, 0.0 }
0x2408   :  { %8303 = vrot.lane.b32.xlu1 %v16703_v19, %s19173_s28  ;;  %v8072_v21 = vsel %vm654_vm2, %v17695_v14, 0.0  ;;  %v17701_v26 = vpop.eup %13891 }
0x2409   :  { %v8078_v38 = vsel %vm654_vm2, %v17701_v26, 0.0 }
0x240b   :  { %8305 = vrot.lane.b32.xlu0 %v16688_v54, %s19173_s28 }
0x242a   :  { %8067 = vadd.xlane.f32.xlu0 %v8066_v6 }
0x242c   :  { %8070 = vadd.xlane.f32.xlu1 %v8069_v24 }
0x242e   :  { %8064 = vadd.xlane.f32.xlu0 %v8063_v36 }
0x2430   :  { %8076 = vadd.xlane.f32.xlu1 %v8075_v30 }
0x2432   :  { %8073 = vadd.xlane.f32.xlu0 %v8072_v21 }
0x2436   :  { %8079 = vadd.xlane.f32.xlu0 %v8078_v38 }
0x2441   :  { %8299 = vrot.lane.b32.xlu1 %v16670_v31, %s19173_s28 }
0x2445   :  { %8285 = vrot.lane.b32.xlu1 %v16698_v60, %s19174_s29 }
0x2449   :  { %8289 = vrot.lane.b32.xlu1 %v16688_v54, %s19174_s29 }
0x244c   :  { %8301 = vrot.lane.b32.xlu0 %v16698_v60, %s19173_s28 }
0x244d   :  { %8293 = vrot.lane.b32.xlu1 %v16683_v56, %s19174_s29 }
0x2450   :  { %8283 = vrot.lane.b32.xlu0 %v16670_v31, %s19174_s29 }
0x2451   :  { %8297 = vrot.lane.b32.xlu1 %v16675_v10, %s19174_s29 }
0x2454   :  { %8287 = vrot.lane.b32.xlu0 %v16703_v19, %s19174_s29 }
0x2455   :  { %8587 = vrot.lane.b32.xlu1 %v16675_v10, %s19175_s0  ;;  %v8310_v10 = vpop.permute.xlu0 %8309 }
0x2458   :  { %8291 = vrot.lane.b32.xlu0 %v16693_v18, %s19174_s29 }
0x2459   :  { %8583 = vrot.lane.b32.xlu1 %v16683_v56, %s19175_s0 }
0x245c   :  { %8295 = vrot.lane.b32.xlu0 %v16678_v47, %s19174_s29 }
0x245d   :  { %8581 = vrot.lane.b32.xlu1 %v16693_v18, %s19175_s0 }
0x2460   :  { %8585 = vrot.lane.b32.xlu0 %v16678_v47, %s19175_s0  ;;  %v8308_v47 = vpop.permute.xlu1 %8307 }
0x2461   :  { %8577 = vrot.lane.b32.xlu1 %v16703_v19, %s19175_s0 }
0x2464   :  { %8579 = vrot.lane.b32.xlu0 %v16688_v54, %s19175_s0 }
0x2465   :  { %8573 = vrot.lane.b32.xlu1 %v16670_v31, %s19175_s0 }
0x2468   :  { %8575 = vrot.lane.b32.xlu0 %v16698_v60, %s19175_s0 }
0x2469   :  { %8756 = vrot.lane.b32.xlu1 %v16719_v5, %s19173_s28 }
0x246d   :  { %8754 = vrot.lane.b32.xlu1 %v16723_v13, %s19173_s28 }
0x247e   :  { %v8062_v56 = vpop.xlane.xlu0 %8061 }
0x247f   :  { %13893 = vrcp.f32 %v8062_v56 }
0x2480   :  { %v8059_v18 = vpop.xlane.xlu1 %8058 }
0x2481   :  { %13895 = vrcp.f32 %v8059_v18 }
0x248c   :  { %v13894_v19 = vpop.eup %13893 }
0x248d   :  { %v8090_v54 = vmul.f32 %v13894_v19, %v8062_v56 }
0x248e   :  { %v13896_v43 = vpop.eup %13895 }
0x248f   :  { %v8098_v50 = vsub.f32 2.0, %v8090_v54  ;;  %v8089_v31 = vmul.f32 %v13896_v43, %v8059_v18 }
0x2491   :  { %v8106_v33 = vmul.f32 %v13894_v19, %v8098_v50  ;;  %v8097_v34 = vsub.f32 2.0, %v8089_v31 }
0x2493   :  { %v8114_v60 = vmul.f32 %v17669_v29, %v8106_v33  ;;  %v8105_v32 = vmul.f32 %v13896_v43, %v8097_v34  ;;  %v8306_v29 = vpop.permute.xlu0 %8305 }
0x2495   :  { %8123 = vst.msk [vmem:[#allocation4 + $0x188] sm:$0xff] %vm654_vm2, %v8114_v60  ;;  %v8113_v4 = vmul.f32 %v17673_v17, %v8105_v32  ;;  %v8304_v17 = vpop.permute.xlu1 %8303 }
0x2497   :  { %8122 = vst.msk [vmem:[#allocation4 + $0x180] sm:$0xff] %vm654_vm2, %v8113_v4  ;;  %13120 = vmatprep.mubr.msk.f32.mxu0 %vm654_vm2, %v8113_v4 }
0x2498   :  { %13121 = vmatmul.mubr.msk.f32.vlgmr.msra.gmra.mxu0 %vm654_vm2, %v8114_v60 }
0x2499   :  { %13133 = vmatpush3.xpose.msk.msra.mxu0 %vm94_vm0, %v17634_v62 }
0x249a   :  { %13134 = vmatprep.subr.msk.mxu0 %vm94_vm0, %v17667_v55 }
0x249d   :  { %13135 = vmatpush3.xpose.msk.msra.mxu0 %vm94_vm0, %v17667_v55 }
0x249e   :  { %13136 = vmatprep.subr.msk.mxu0 %vm94_vm0, %v8310_v10 }
0x24a1   :  { %13137 = vmatpush3.xpose.msk.msra.mxu0 %vm94_vm0, %v8310_v10 }
0x24a2   :  { %13138 = vmatprep.subr.msk.mxu0 %vm94_vm0, %v8308_v47 }
0x24a5   :  { %13139 = vmatpush3.xpose.msk.msra.mxu0 %vm94_vm0, %v8308_v47 }
0x24a6   :  { %13140 = vmatprep.subr.msk.mxu0 %vm94_vm0, %v8306_v29 }
0x24a9   :  { %13141 = vmatpush3.xpose.msk.msra.mxu0 %vm94_vm0, %v8306_v29 }
0x24aa   :  { %13142 = vmatprep.subr.msk.mxu0 %vm94_vm0, %v8304_v17 }
0x24ad   :  { %13143 = vmatpush3.xpose.msk.msra.mxu0 %vm94_vm0, %v8304_v17 }
0x24b3   :  { %v8068_v62 = vpop.xlane.xlu0 %8067 }
0x24b4   :  { %13897 = vrcp.f32 %v8068_v62 }
0x24b5   :  { %v8071_v55 = vpop.xlane.xlu1 %8070 }
0x24b6   :  { %13899 = vrcp.f32 %v8071_v55 }
0x24b7   :  { %v8065_v8 = vpop.xlane.xlu0 %8064 }
0x24b8   :  { %13901 = vrcp.f32 %v8065_v8 }
0x24b9   :  { %v8077_v48 = vpop.xlane.xlu1 %8076 }
0x24ba   :  { %13903 = vrcp.f32 %v8077_v48 }
0x24bb   :  { %v8074_v44 = vpop.xlane.xlu0 %8073 }
0x24bc   :  { %13905 = vrcp.f32 %v8074_v44 }
0x24bd   :  { %v8300_v51 = vpop.permute.xlu1 %8299 }
0x24bf   :  { %v8080_v28 = vpop.xlane.xlu0 %8079 }
0x24c0   :  { %13907 = vrcp.f32 %v8080_v28 }
0x24c1   :  { %v13898_v37 = vpop.eup %13897  ;;  %v17765_v6 = vpop.permute.xlu1 %8285 }
0x24c2   :  { %v8092_v24 = vmul.f32 %v13898_v37, %v8068_v62 }
0x24c3   :  { %v13900_v36 = vpop.eup %13899  ;;  %v8302_v30 = vpop.permute.xlu0 %8301 }
0x24c4   :  { %v8100_v21 = vsub.f32 2.0, %v8092_v24  ;;  %v8093_v38 = vmul.f32 %v13900_v36, %v8071_v55  ;;  %13144 = vmatprep.subr.msk.mxu0 %vm94_vm0, %v8302_v30 }
0x24c5   :  { %v13902_v10 = vpop.eup %13901  ;;  %13145 = vmatpush3.xpose.msk.msra.mxu0 %vm94_vm0, %v8302_v30  ;;  %v17769_v47 = vpop.permute.xlu1 %8289 }
0x24c6   :  { %v8108_v56 = vmul.f32 %v13898_v37, %v8100_v21  ;;  %v8101_v18 = vsub.f32 2.0, %v8093_v38  ;;  %v8091_v19 = vmul.f32 %v13902_v10, %v8065_v8  ;;  %13146 = vmatprep.subr.msk.mxu0 %vm94_vm0, %v8300_v51 }
0x24c7   :  { %v13904_v54 = vpop.eup %13903  ;;  %v8284_v43 = vpop.permute.xlu0 %8283 }
0x24c8   :  { %v8116_v50 = vmul.f32 %v17681_v23, %v8108_v56  ;;  %v8109_v31 = vmul.f32 %v13900_v36, %v8101_v18  ;;  %v8099_v33 = vsub.f32 2.0, %v8091_v19  ;;  %v8095_v34 = vmul.f32 %v13904_v54, %v8077_v48 }
0x24c9   :  { %v13906_v60 = vpop.eup %13905  ;;  %13147 = vmatpush3.xpose.msk.msra.mxu0 %vm94_vm0, %v8300_v51  ;;  %v8294_v32 = vpop.permute.xlu1 %8293 }
0x24ca   :  { %8125 = vst.msk [vmem:[#allocation4 + $0x198] sm:$0xff] %vm654_vm2, %v8116_v50  ;;  %v8107_v4 = vmul.f32 %v13902_v10, %v8099_v33  ;;  %v8103_v29 = vsub.f32 2.0, %v8095_v34  ;;  %v8094_v17 = vmul.f32 %v13906_v60, %v8074_v44  ;;  %v8117_v62 = vmul.f32 %v17683_v15, %v8109_v31 }
0x24cb   :  { %v8288_v55 = vpop.permute.xlu0 %8287 }
0x24cc   :  { %v8111_v8 = vmul.f32 %v13904_v54, %v8103_v29  ;;  %v8102_v37 = vsub.f32 2.0, %v8094_v17  ;;  %v8115_v24 = vmul.f32 %v17687_v27, %v8107_v4  ;;  %8126 = vst.msk [vmem:[#allocation4 + $0x1a0] sm:$0xff] %vm654_vm2, %v8117_v62 }
0x24cd   :  { %v13908_v23 = vpop.eup %13907  ;;  %v8298_v48 = vpop.permute.xlu1 %8297 }
0x24ce   :  { %v8110_v36 = vmul.f32 %v13906_v60, %v8102_v37  ;;  %v8096_v30 = vmul.f32 %v13908_v23, %v8080_v28  ;;  %8124 = vst.msk [vmem:[#allocation4 + $0x190] sm:$0xff] %vm654_vm2, %v8115_v24  ;;  %13123 = vmatprep.mubr.msk.f32.mxu0 %vm654_vm2, %v8115_v24  ;;  %v8119_v51 = vmul.f32 %v17691_v22, %v8111_v8 }
0x24cf   :  { %v8292_v44 = vpop.permute.xlu0 %8291  ;;  %13124 = vmatmul.mubr.msk.f32.gmra.mxu0 %vm654_vm2, %v8116_v50 }
0x24d0   :  { %v8118_v15 = vmul.f32 %v17695_v14, %v8110_v36  ;;  %v8104_v21 = vsub.f32 2.0, %v8096_v30  ;;  %13126 = vmatprep.mubr.msk.f32.mxu0 %vm654_vm2, %v8117_v62  ;;  %8128 = vst.msk [vmem:[#allocation4 + $0x1b0] sm:$0xff] %vm654_vm2, %v8119_v51 }
0x24d1   :  { %v8588_v27 = vpop.permute.xlu1 %8587 }
0x24d2   :  { %8127 = vst.msk [vmem:[#allocation4 + $0x1a8] sm:$0xff] %vm654_vm2, %v8118_v15  ;;  %v8112_v28 = vmul.f32 %v13908_v23, %v8104_v21  ;;  %13160 = vmatprep.subr.mxu1 %v8588_v27 }
0x24d3   :  { %v8296_v38 = vpop.permute.xlu0 %8295  ;;  %13127 = vmatmul.mubr.msk.f32.gmra.mxu0 %vm654_vm2, %v8118_v15  ;;  %13161 = vmatpush3.msra.mxu1 %v8588_v27 }
0x24d4   :  { %v8120_v22 = vmul.f32 %v17701_v26, %v8112_v28  ;;  %13129 = vmatprep.mubr.msk.f32.mxu0 %vm654_vm2, %v8119_v51 }
0x24d5   :  { %v8584_v10 = vpop.permute.xlu1 %8583 }
0x24d6   :  { %8129 = vst.msk [vmem:[#allocation4 + $0x1b8] sm:$0xff] %vm654_vm2, %v8120_v22 }
0x24d7   :  { %v8586_v14 = vpop.permute.xlu0 %8585  ;;  %13130 = vmatmul.mubr.msk.f32.gmra.mxu0 %vm654_vm2, %v8120_v22 }
0x24d8   :  { %13148 = vmatprep.mubr.msk.f32.mxu0 %vm94_vm0, %v8284_v43  ;;  %13162 = vmatprep.subr.mxu1 %v8586_v14 }
0x24d9   :  { %13163 = vmatpush3.msra.mxu1 %v8586_v14  ;;  %v8582_v56 = vpop.permute.xlu1 %8581 }
0x24da   :  { %13164 = vmatprep.subr.mxu1 %v8584_v10 }
0x24db   :  { %v8580_v18 = vpop.permute.xlu0 %8579  ;;  %13149 = vmatmul.mubr.msk.f32.vlgmr.msra.gmra.mxu0 %vm94_vm0, %v17765_v6  ;;  %13165 = vmatpush3.msra.mxu1 %v8584_v10 }
0x24dc   :  { %13151 = vmatprep.mubr.msk.f32.mxu0 %vm94_vm0, %v8288_v55  ;;  %13166 = vmatprep.subr.mxu1 %v8582_v56 }
0x24dd   :  { %13167 = vmatpush3.msra.mxu1 %v8582_v56  ;;  %v8578_v26 = vpop.permute.xlu1 %8577 }
0x24de   :  { %13168 = vmatprep.subr.mxu1 %v8580_v18 }
0x24df   :  { %13152 = vmatmul.mubr.msk.f32.gmra.mxu0 %vm94_vm0, %v17769_v47  ;;  %13169 = vmatpush3.msra.mxu1 %v8580_v18  ;;  %v8576_v19 = vpop.permute.xlu0 %8575 }
0x24e0   :  { %13154 = vmatprep.mubr.msk.f32.mxu0 %vm94_vm0, %v8292_v44  ;;  %13170 = vmatprep.subr.mxu1 %v8578_v26 }
0x24e1   :  { %13171 = vmatpush3.msra.mxu1 %v8578_v26  ;;  %v8574_v54 = vpop.permute.xlu1 %8573 }
0x24e2   :  { %13172 = vmatprep.subr.mxu1 %v8576_v19 }
0x24e3   :  { %13155 = vmatmul.mubr.msk.f32.gmra.mxu0 %vm94_vm0, %v8294_v32  ;;  %13173 = vmatpush3.msra.mxu1 %v8576_v19 }
0x24e4   :  { %13157 = vmatprep.mubr.msk.f32.mxu0 %vm94_vm0, %v8296_v38  ;;  %13174 = vmatprep.subr.mxu1 %v8574_v54 }
0x24e5   :  { %13175 = vmatpush3.msra.mxu1 %v8574_v54  ;;  %v17800_v6 = vpop.permute.xlu1 %8756 }
0x24e6   :  { %13188 = vmatprep.subr.msk.mxu1 %vm94_vm0, %v17800_v6 }
0x24e7   :  { %13158 = vmatmul.mubr.msk.f32.gmra.mxu0 %vm94_vm0, %v8298_v48 }
0x24e9   :  { %v17833_v27 = vpop.permute.xlu1 %8754 }
0x2558   :  { %v17805_v47 = vpop.f32.mrf.mxu0 }
0x255a   :  { %v17807_v43 = vpop.f32.mrf.mxu0 }
0x258f   :  { %v17809_v50 = vpop.f32.mrf.mxu0 }
0x2591   :  { %v17811_v31 = vpop.f32.mrf.mxu0 }
0x2593   :  { %v17813_v33 = vpop.f32.mrf.mxu0 }
0x2595   :  { %v17815_v34 = vpop.f32.mrf.mxu0 }
0x2597   :  { %v17817_v60 = vpop.f32.mrf.mxu0 }
0x2599   :  { %v17819_v32 = vpop.f32.mrf.mxu0 }
0x259a   :  { %19176 = vst [vmem:[#allocation12_spill] sm:$0xff] %v17819_v32 }
0x259b   :  { %v13150_v4 = vpop.f32.mrf.mxu0 }
0x259c   :  { %v8455_v29 = vsel %vm654_vm2, %v13150_v4, -inf }
0x259d   :  { %8456 = vmax.xlane.f32.xlu1 %v8455_v29  ;;  %v8413_v17 = vpop.f32.mrf.mxu0 }
0x259e   :  { %v8452_v62 = vsel %vm654_vm2, %v8413_v17, -inf }
0x259f   :  { %8453 = vmax.xlane.f32.xlu0 %v8452_v62  ;;  %v13153_v55 = vpop.f32.mrf.mxu0 }
0x25a0   :  { %v8461_v37 = vsel %vm654_vm2, %v13153_v55, -inf }
0x25a1   :  { %v8423_v8 = vpop.f32.mrf.mxu0 }
0x25a2   :  { %v8458_v48 = vsel %vm654_vm2, %v8423_v8, -inf }
0x25a3   :  { %8462 = vmax.xlane.f32.xlu0 %v8461_v37  ;;  %v13156_v24 = vpop.f32.mrf.mxu0 }
0x25a4   :  { %v8467_v44 = vsel %vm654_vm2, %v13156_v24, -inf }
0x25a5   :  { %v8433_v23 = vpop.f32.mrf.mxu0 }
0x25a6   :  { %v8464_v36 = vsel %vm654_vm2, %v8433_v23, -inf }
0x25a7   :  { %8459 = vmax.xlane.f32.xlu0 %v8458_v48  ;;  %8465 = vmax.xlane.f32.xlu1 %v8464_v36  ;;  %v13159_v30 = vpop.f32.mrf.mxu0 }
0x25a8   :  { %v8473_v21 = vsel %vm654_vm2, %v13159_v30, -inf }
0x25a9   :  { %v8443_v51 = vpop.f32.mrf.mxu0 }
0x25aa   :  { %v8470_v15 = vsel %vm654_vm2, %v8443_v51, -inf }
0x25ab   :  { %8468 = vmax.xlane.f32.xlu0 %v8467_v44  ;;  %8471 = vmax.xlane.f32.xlu1 %v8470_v15 }
0x25af   :  { %8474 = vmax.xlane.f32.xlu0 %v8473_v21 }
0x25bc   :  { %8750 = vrot.lane.b32.xlu1 %v16735_v11, %s19173_s28 }
0x25c5   :  { %8752 = vrot.lane.b32.xlu0 %v16729_v58, %s19173_s28 }
0x2626   :  { %v8457_v28 = vpop.xlane.xlu1 %8456 }
0x2627   :  { %v8477_v38 = vsub.f32 %v13150_v4, %v8457_v28 }
0x2628   :  { %v8454_v22 = vpop.xlane.xlu0 %8453 }
0x2629   :  { %v8486_v10 = vmul.f32 1.442695, %v8477_v38  ;;  %v8476_v14 = vsub.f32 %v8413_v17, %v8454_v22 }
0x262b   :  { %13909 = vpow2.f32 %v8486_v10  ;;  %v8484_v56 = vmul.f32 1.442695, %v8476_v14 }
0x262c   :  { %v8463_v29 = vpop.xlane.xlu0 %8462 }
0x262d   :  { %13911 = vpow2.f32 %v8484_v56  ;;  %v8479_v62 = vsub.f32 %v13153_v55, %v8463_v29 }
0x262f   :  { %v8490_v44 = vmul.f32 1.442695, %v8479_v62 }
0x2630   :  { %v8460_v4 = vpop.xlane.xlu0 %8459  ;;  %v8466_v17 = vpop.xlane.xlu1 %8465 }
0x2631   :  { %v8480_v37 = vsub.f32 %v8433_v23, %v8466_v17  ;;  %v8478_v15 = vsub.f32 %v8423_v8, %v8460_v4  ;;  %13913 = vpow2.f32 %v8490_v44 }
0x2633   :  { %v8492_v21 = vmul.f32 1.442695, %v8480_v37  ;;  %v8488_v38 = vmul.f32 1.442695, %v8478_v15 }
0x2634   :  { %v8469_v48 = vpop.xlane.xlu0 %8468  ;;  %v8472_v36 = vpop.xlane.xlu1 %8471 }
0x2635   :  { %v8482_v28 = vsub.f32 %v8443_v51, %v8472_v36  ;;  %v8481_v22 = vsub.f32 %v13156_v24, %v8469_v48  ;;  %13915 = vpow2.f32 %v8492_v21 }
0x2636   :  { %13917 = vpow2.f32 %v8488_v38 }
0x2637   :  { %v8496_v14 = vmul.f32 1.442695, %v8482_v28  ;;  %v8494_v56 = vmul.f32 1.442695, %v8481_v22 }
0x2638   :  { %v17835_v18 = vpop.eup %13909  ;;  %v8475_v10 = vpop.xlane.xlu0 %8474 }
0x2639   :  { %v8503_v26 = vsel %vm654_vm2, %v17835_v18, 0.0  ;;  %13919 = vpow2.f32 %v8496_v14  ;;  %v8751_v44 = vpop.permute.xlu1 %8750 }
0x263a   :  { %v17839_v19 = vpop.eup %13911  ;;  %8504 = vadd.xlane.f32.xlu0 %v8503_v26  ;;  %v8483_v26 = vsub.f32 %v13159_v30, %v8475_v10  ;;  %13921 = vpow2.f32 %v8494_v56 }
0x263b   :  { %v8500_v54 = vsel %vm654_vm2, %v17839_v19, 0.0 }
0x263c   :  { %8501 = vadd.xlane.f32.xlu1 %v8500_v54  ;;  %v8498_v54 = vmul.f32 1.442695, %v8483_v26  ;;  %v8753_v36 = vpop.permute.xlu0 %8752 }
0x263e   :  { %13923 = vpow2.f32 %v8498_v54  ;;  %v17847_v55 = vpop.eup %13913 }
0x263f   :  { %v8509_v8 = vsel %vm654_vm2, %v17847_v55, 0.0 }
0x2642   :  { %v17849_v23 = vpop.eup %13915 }
0x2643   :  { %v17853_v51 = vpop.eup %13917  ;;  %v8512_v24 = vsel %vm654_vm2, %v17849_v23, 0.0 }
0x2644   :  { %v8506_v30 = vsel %vm654_vm2, %v17853_v51, 0.0 }
0x2646   :  { %v17857_v29 = vpop.eup %13919 }
0x2647   :  { %v17861_v4 = vpop.eup %13921  ;;  %v8518_v17 = vsel %vm654_vm2, %v17857_v29, 0.0 }
0x2648   :  { %v8515_v62 = vsel %vm654_vm2, %v17861_v4, 0.0 }
0x264b   :  { %v17867_v37 = vpop.eup %13923 }
0x264c   :  { %v8521_v48 = vsel %vm654_vm2, %v17867_v37, 0.0 }
0x264d   :  { %8746 = vrot.lane.b32.xlu1 %v16747_v53, %s19173_s28 }
0x2650   :  { %8748 = vrot.lane.b32.xlu0 %v16741_v35, %s19173_s28 }
0x266f   :  { %8510 = vadd.xlane.f32.xlu0 %v8509_v8 }
0x2671   :  { %8513 = vadd.xlane.f32.xlu1 %v8512_v24 }
0x2673   :  { %8507 = vadd.xlane.f32.xlu0 %v8506_v30 }
0x2675   :  { %8519 = vadd.xlane.f32.xlu1 %v8518_v17 }
0x2677   :  { %8516 = vadd.xlane.f32.xlu0 %v8515_v62 }
0x267b   :  { %8522 = vadd.xlane.f32.xlu0 %v8521_v48 }
0x2686   :  { %8742 = vrot.lane.b32.xlu1 %v19165_v41, %s19173_s28 }
0x268a   :  { %8728 = vrot.lane.b32.xlu1 %v19166_v52, %s19174_s29 }
0x268e   :  { %8732 = vrot.lane.b32.xlu1 %v16741_v35, %s19174_s29 }
0x2691   :  { %8744 = vrot.lane.b32.xlu0 %v19166_v52, %s19173_s28 }
0x2692   :  { %8736 = vrot.lane.b32.xlu1 %v16729_v58, %s19174_s29 }
0x2695   :  { %8726 = vrot.lane.b32.xlu0 %v19165_v41, %s19174_s29 }
0x2696   :  { %8740 = vrot.lane.b32.xlu1 %v16719_v5, %s19174_s29 }
0x2699   :  { %8730 = vrot.lane.b32.xlu0 %v16747_v53, %s19174_s29 }
0x269d   :  { %8734 = vrot.lane.b32.xlu0 %v16735_v11, %s19174_s29 }
0x26a1   :  { %8738 = vrot.lane.b32.xlu0 %v16723_v13, %s19174_s29 }
0x26c3   :  { %v8505_v15 = vpop.xlane.xlu0 %8504 }
0x26c4   :  { %13925 = vrcp.f32 %v8505_v15 }
0x26c5   :  { %v8502_v21 = vpop.xlane.xlu1 %8501 }
0x26c6   :  { %13927 = vrcp.f32 %v8502_v21 }
0x26d1   :  { %v13926_v28 = vpop.eup %13925 }
0x26d2   :  { %v8533_v38 = vmul.f32 %v13926_v28, %v8505_v15 }
0x26d3   :  { %v13928_v22 = vpop.eup %13927 }
0x26d4   :  { %v8541_v10 = vsub.f32 2.0, %v8533_v38  ;;  %v8532_v14 = vmul.f32 %v13928_v22, %v8502_v21 }
0x26d6   :  { %v8549_v56 = vmul.f32 %v13926_v28, %v8541_v10  ;;  %v8540_v26 = vsub.f32 2.0, %v8532_v14 }
0x26d8   :  { %v8557_v54 = vmul.f32 %v17835_v18, %v8549_v56  ;;  %v8548_v8 = vmul.f32 %v13928_v22, %v8540_v26  ;;  %v8749_v18 = vpop.permute.xlu0 %8748 }
0x26da   :  { %8566 = vst.msk [vmem:[#allocation4 + $0xc8] sm:$0xff] %vm654_vm2, %v8557_v54  ;;  %v8556_v24 = vmul.f32 %v17839_v19, %v8548_v8  ;;  %v8747_v19 = vpop.permute.xlu1 %8746 }
0x26dc   :  { %8565 = vst.msk [vmem:[#allocation4 + $0xc0] sm:$0xff] %vm654_vm2, %v8556_v24  ;;  %13176 = vmatprep.mubr.msk.f32.mxu1 %vm654_vm2, %v8556_v24 }
0x26dd   :  { %13177 = vmatmul.mubr.msk.f32.vlgmr.msra.gmra.mxu1 %vm654_vm2, %v8557_v54 }
0x26de   :  { %13189 = vmatpush3.xpose.msk.msra.mxu1 %vm94_vm0, %v17800_v6 }
0x26df   :  { %13190 = vmatprep.subr.msk.mxu1 %vm94_vm0, %v17833_v27 }
0x26e2   :  { %13191 = vmatpush3.xpose.msk.msra.mxu1 %vm94_vm0, %v17833_v27 }
0x26e3   :  { %13192 = vmatprep.subr.msk.mxu1 %vm94_vm0, %v8753_v36 }
0x26e6   :  { %13193 = vmatpush3.xpose.msk.msra.mxu1 %vm94_vm0, %v8753_v36 }
0x26e7   :  { %13194 = vmatprep.subr.msk.mxu1 %vm94_vm0, %v8751_v44 }
0x26ea   :  { %13195 = vmatpush3.xpose.msk.msra.mxu1 %vm94_vm0, %v8751_v44 }
0x26eb   :  { %13196 = vmatprep.subr.msk.mxu1 %vm94_vm0, %v8749_v18 }
0x26ee   :  { %13197 = vmatpush3.xpose.msk.msra.mxu1 %vm94_vm0, %v8749_v18 }
0x26ef   :  { %13198 = vmatprep.subr.msk.mxu1 %vm94_vm0, %v8747_v19 }
0x26f2   :  { %13199 = vmatpush3.xpose.msk.msra.mxu1 %vm94_vm0, %v8747_v19 }
0x26f8   :  { %v8511_v6 = vpop.xlane.xlu0 %8510 }
0x26f9   :  { %13929 = vrcp.f32 %v8511_v6 }
0x26fa   :  { %v8514_v27 = vpop.xlane.xlu1 %8513 }
0x26fb   :  { %13931 = vrcp.f32 %v8514_v27 }
0x26fc   :  { %v8508_v30 = vpop.xlane.xlu0 %8507 }
0x26fd   :  { %13933 = vrcp.f32 %v8508_v30 }
0x26fe   :  { %v8520_v17 = vpop.xlane.xlu1 %8519 }
0x26ff   :  { %13935 = vrcp.f32 %v8520_v17 }
0x2700   :  { %v8517_v62 = vpop.xlane.xlu0 %8516 }
0x2701   :  { %13937 = vrcp.f32 %v8517_v62 }
0x2702   :  { %v8743_v10 = vpop.permute.xlu1 %8742 }
0x2704   :  { %v8523_v48 = vpop.xlane.xlu0 %8522 }
0x2705   :  { %13939 = vrcp.f32 %v8523_v48 }
0x2706   :  { %v13930_v36 = vpop.eup %13929 }
0x2707   :  { %v8535_v44 = vmul.f32 %v13930_v36, %v8511_v6 }
0x2708   :  { %v13932_v15 = vpop.eup %13931  ;;  %v8745_v21 = vpop.permute.xlu0 %8744 }
0x2709   :  { %v8543_v28 = vsub.f32 2.0, %v8535_v44  ;;  %v8536_v38 = vmul.f32 %v13932_v15, %v8514_v27  ;;  %13200 = vmatprep.subr.msk.mxu1 %vm94_vm0, %v8745_v21 }
0x270a   :  { %v13934_v22 = vpop.eup %13933  ;;  %13201 = vmatpush3.xpose.msk.msra.mxu1 %vm94_vm0, %v8745_v21 }
0x270b   :  { %v8551_v14 = vmul.f32 %v13930_v36, %v8543_v28  ;;  %v8544_v56 = vsub.f32 2.0, %v8536_v38  ;;  %v8534_v26 = vmul.f32 %v13934_v22, %v8508_v30  ;;  %13202 = vmatprep.subr.msk.mxu1 %vm94_vm0, %v8743_v10 }
0x270c   :  { %v13936_v54 = vpop.eup %13935 }
0x270d   :  { %v8559_v8 = vmul.f32 %v17847_v55, %v8551_v14  ;;  %v8552_v24 = vmul.f32 %v13932_v15, %v8544_v56  ;;  %v8542_v18 = vsub.f32 2.0, %v8534_v26  ;;  %v8538_v19 = vmul.f32 %v13936_v54, %v8520_v17 }
0x270e   :  { %v13938_v6 = vpop.eup %13937  ;;  %13203 = vmatpush3.xpose.msk.msra.mxu1 %vm94_vm0, %v8743_v10 }
0x270f   :  { %8568 = vst.msk [vmem:[#allocation4 + $0xd8] sm:$0xff] %vm654_vm2, %v8559_v8  ;;  %v8550_v27 = vmul.f32 %v13934_v22, %v8542_v18  ;;  %v8546_v44 = vsub.f32 2.0, %v8538_v19  ;;  %v8537_v32 = vmul.f32 %v13938_v6, %v8517_v62  ;;  %v8560_v36 = vmul.f32 %v17849_v23, %v8552_v24  ;;  %v8729_v22 = vpop.permute.xlu1 %8728 }
0x2711   :  { %v8554_v21 = vmul.f32 %v13936_v54, %v8546_v44  ;;  %v8545_v30 = vsub.f32 2.0, %v8537_v32  ;;  %v8558_v28 = vmul.f32 %v17853_v51, %v8550_v27  ;;  %8569 = vst.msk [vmem:[#allocation4 + $0xe0] sm:$0xff] %vm654_vm2, %v8560_v36  ;;  %v8727_v32 = vpop.permute.xlu0 %8726 }
0x2712   :  { %v13940_v55 = vpop.eup %13939 }
0x2713   :  { %v8553_v15 = vmul.f32 %v13938_v6, %v8545_v30  ;;  %v8539_v38 = vmul.f32 %v13940_v55, %v8523_v48  ;;  %8567 = vst.msk [vmem:[#allocation4 + $0xd0] sm:$0xff] %vm654_vm2, %v8558_v28  ;;  %13179 = vmatprep.mubr.msk.f32.mxu1 %vm654_vm2, %v8558_v28  ;;  %v8562_v17 = vmul.f32 %v17857_v29, %v8554_v21 }
0x2714   :  { %13180 = vmatmul.mubr.msk.f32.gmra.mxu1 %vm654_vm2, %v8559_v8 }
0x2715   :  { %v8561_v62 = vmul.f32 %v17861_v4, %v8553_v15  ;;  %v8547_v23 = vsub.f32 2.0, %v8539_v38  ;;  %13182 = vmatprep.mubr.msk.f32.mxu1 %vm654_vm2, %v8560_v36  ;;  %8571 = vst.msk [vmem:[#allocation4 + $0xf0] sm:$0xff] %vm654_vm2, %v8562_v17  ;;  %v8731_v29 = vpop.permute.xlu0 %8730  ;;  %v8733_v4 = vpop.permute.xlu1 %8732 }
0x2717   :  { %8570 = vst.msk [vmem:[#allocation4 + $0xe8] sm:$0xff] %vm654_vm2, %v8561_v62  ;;  %v8555_v51 = vmul.f32 %v13940_v55, %v8547_v23 }
0x2718   :  { %13183 = vmatmul.mubr.msk.f32.gmra.mxu1 %vm654_vm2, %v8561_v62 }
0x2719   :  { %v8563_v48 = vmul.f32 %v17867_v37, %v8555_v51  ;;  %13185 = vmatprep.mubr.msk.f32.mxu1 %vm654_vm2, %v8562_v17  ;;  %v8735_v10 = vpop.permute.xlu0 %8734  ;;  %v8737_v14 = vpop.permute.xlu1 %8736 }
0x271b   :  { %8572 = vst.msk [vmem:[#allocation4 + $0xf8] sm:$0xff] %vm654_vm2, %v8563_v48 }
0x271c   :  { %13186 = vmatmul.mubr.msk.f32.gmra.mxu1 %vm654_vm2, %v8563_v48 }
0x271d   :  { %13204 = vmatprep.mubr.msk.f32.mxu1 %vm94_vm0, %v8727_v32  ;;  %v8739_v37 = vpop.permute.xlu0 %8738  ;;  %v8741_v56 = vpop.permute.xlu1 %8740 }
0x2720   :  { %13205 = vmatmul.mubr.msk.f32.vlgmr.msra.gmra.mxu1 %vm94_vm0, %v8729_v22 }
0x2721   :  { %13207 = vmatprep.mubr.msk.f32.mxu1 %vm94_vm0, %v8731_v29 }
0x2724   :  { %13208 = vmatmul.mubr.msk.f32.gmra.mxu1 %vm94_vm0, %v8733_v4 }
0x2725   :  { %13210 = vmatprep.mubr.msk.f32.mxu1 %vm94_vm0, %v8735_v10 }
0x2728   :  { %13211 = vmatmul.mubr.msk.f32.gmra.mxu1 %vm94_vm0, %v8737_v14 }
0x2729   :  { %13213 = vmatprep.mubr.msk.f32.mxu1 %vm94_vm0, %v8739_v37 }
0x272c   :  { %13214 = vmatmul.mubr.msk.f32.gmra.mxu1 %vm94_vm0, %v8741_v56 }
0x279d   :  { %v17941_v26 = vpop.f32.mrf.mxu1 }
0x279f   :  { %v17943_v54 = vpop.f32.mrf.mxu1 }
0x27d4   :  { %v17945_v8 = vpop.f32.mrf.mxu1 }
0x27d6   :  { %v17947_v24 = vpop.f32.mrf.mxu1 }
0x27d8   :  { %v17949_v18 = vpop.f32.mrf.mxu1 }
0x27da   :  { %v17951_v19 = vpop.f32.mrf.mxu1 }
0x27dc   :  { %v17953_v6 = vpop.f32.mrf.mxu1 }
0x27de   :  { %v17955_v27 = vpop.f32.mrf.mxu1 }
0x27e0   :  { %v13206_v44 = vpop.f32.mrf.mxu1 }
0x27e1   :  { %v8898_v36 = vsel %vm654_vm2, %v13206_v44, -inf }
0x27e2   :  { %8899 = vmax.xlane.f32.xlu1 %v8898_v36  ;;  %v8856_v21 = vpop.f32.mrf.mxu1 }
0x27e3   :  { %v8895_v30 = vsel %vm654_vm2, %v8856_v21, -inf }
0x27e4   :  { %8896 = vmax.xlane.f32.xlu0 %v8895_v30  ;;  %v13209_v28 = vpop.f32.mrf.mxu1 }
0x27e5   :  { %v8904_v62 = vsel %vm654_vm2, %v13209_v28, -inf }
0x27e6   :  { %v8866_v55 = vpop.f32.mrf.mxu1 }
0x27e7   :  { %v8901_v15 = vsel %vm654_vm2, %v8866_v55, -inf }
0x27e8   :  { %8902 = vmax.xlane.f32.xlu0 %v8901_v15  ;;  %v13212_v38 = vpop.f32.mrf.mxu1 }
0x27e9   :  { %v8910_v48 = vsel %vm654_vm2, %v13212_v38, -inf }
0x27ea   :  { %v8876_v17 = vpop.f32.mrf.mxu1 }
0x27eb   :  { %v8907_v23 = vsel %vm654_vm2, %v8876_v17, -inf }
0x27ec   :  { %8905 = vmax.xlane.f32.xlu0 %v8904_v62  ;;  %8908 = vmax.xlane.f32.xlu1 %v8907_v23  ;;  %v13215_v32 = vpop.f32.mrf.mxu1 }
0x27ed   :  { %v8916_v29 = vsel %vm654_vm2, %v13215_v32, -inf }
0x27ee   :  { %v8886_v51 = vpop.f32.mrf.mxu1 }
0x27ef   :  { %v8913_v22 = vsel %vm654_vm2, %v8886_v51, -inf }
0x27f0   :  { %8911 = vmax.xlane.f32.xlu0 %v8910_v48  ;;  %8914 = vmax.xlane.f32.xlu1 %v8913_v22 }
0x27f4   :  { %8917 = vmax.xlane.f32.xlu0 %v8916_v29 }
0x2801   :  { %9030 = vrot.lane.b32.xlu1 %v16719_v5, %s19175_s0 }
0x2805   :  { %9026 = vrot.lane.b32.xlu1 %v16729_v58, %s19175_s0 }
0x2809   :  { %9024 = vrot.lane.b32.xlu1 %v16735_v11, %s19175_s0 }
0x280a   :  { %9028 = vrot.lane.b32.xlu0 %v16723_v13, %s19175_s0 }
0x280d   :  { %9020 = vrot.lane.b32.xlu1 %v16747_v53, %s19175_s0 }
0x280e   :  { %9022 = vrot.lane.b32.xlu0 %v16741_v35, %s19175_s0 }
0x286b   :  { %v8900_v4 = vpop.xlane.xlu1 %8899 }
0x286c   :  { %v8920_v10 = vsub.f32 %v13206_v44, %v8900_v4 }
0x286d   :  { %v8897_v14 = vpop.xlane.xlu0 %8896 }
0x286e   :  { %v8929_v37 = vmul.f32 1.442695, %v8920_v10  ;;  %v8919_v5 = vsub.f32 %v8856_v21, %v8897_v14 }
0x2870   :  { %13941 = vpow2.f32 %v8929_v37  ;;  %v8927_v56 = vmul.f32 1.442695, %v8919_v5 }
0x2871   :  { %v8903_v58 = vpop.xlane.xlu0 %8902 }
0x2872   :  { %13943 = vpow2.f32 %v8927_v56  ;;  %v8921_v36 = vsub.f32 %v8866_v55, %v8903_v58 }
0x2874   :  { %v8931_v11 = vmul.f32 1.442695, %v8921_v36 }
0x2875   :  { %v8906_v30 = vpop.xlane.xlu0 %8905  ;;  %v8909_v15 = vpop.xlane.xlu1 %8908 }
0x2876   :  { %13945 = vpow2.f32 %v8931_v11  ;;  %v8922_v13 = vsub.f32 %v13209_v28, %v8906_v30  ;;  %v8923_v62 = vsub.f32 %v8876_v17, %v8909_v15 }
0x2878   :  { %v8933_v53 = vmul.f32 1.442695, %v8922_v13  ;;  %v8935_v23 = vmul.f32 1.442695, %v8923_v62 }
0x2879   :  { %v8912_v48 = vpop.xlane.xlu0 %8911  ;;  %v8915_v35 = vpop.xlane.xlu1 %8914 }
0x287a   :  { %13947 = vpow2.f32 %v8933_v53  ;;  %v8924_v44 = vsub.f32 %v13212_v38, %v8912_v48  ;;  %v8925_v22 = vsub.f32 %v8886_v51, %v8915_v35 }
0x287b   :  { %13949 = vpow2.f32 %v8935_v23 }
0x287c   :  { %v8937_v21 = vmul.f32 1.442695, %v8924_v44  ;;  %v8939_v29 = vmul.f32 1.442695, %v8925_v22 }
0x287d   :  { %v17977_v4 = vpop.eup %13941  ;;  %v8918_v10 = vpop.xlane.xlu0 %8917 }
0x287e   :  { %v9031_v55 = vpop.permute.xlu1 %9030  ;;  %13951 = vpow2.f32 %v8937_v21  ;;  %v8926_v14 = vsub.f32 %v13215_v32, %v8918_v10  ;;  %v8946_v28 = vsel %vm654_vm2, %v17977_v4, 0.0 }
0x287f   :  { %13216 = vmatprep.subr.mxu0 %v9031_v55  ;;  %v17981_v17 = vpop.eup %13943  ;;  %13953 = vpow2.f32 %v8939_v29  ;;  %8947 = vadd.xlane.f32.xlu0 %v8946_v28 }
0x2880   :  { %13217 = vmatpush3.msra.mxu0 %v9031_v55  ;;  %v8941_v38 = vmul.f32 1.442695, %v8926_v14  ;;  %v8943_v51 = vsel %vm654_vm2, %v17981_v17, 0.0  ;;  %v11343_v14 = vld [vmem:[%s18975_s5 + $0x28] sm:$0xff] }
0x2881   :  { %v9029_v37 = vpop.permute.xlu0 %9028  ;;  %8944 = vadd.xlane.f32.xlu1 %v8943_v51 }
0x2882   :  { %v9027_v5 = vpop.permute.xlu1 %9026  ;;  %13955 = vpow2.f32 %v8941_v38  ;;  %13218 = vmatprep.subr.mxu0 %v9029_v37 }
0x2883   :  { %v17985_v56 = vpop.eup %13945  ;;  %13219 = vmatpush3.msra.mxu0 %v9029_v37 }
0x2884   :  { %13220 = vmatprep.subr.mxu0 %v9027_v5  ;;  %v8949_v32 = vsel %vm654_vm2, %v17985_v56, 0.0 }
0x2885   :  { %8950 = vadd.xlane.f32.xlu1 %v8949_v32  ;;  %13221 = vmatpush3.msra.mxu0 %v9027_v5  ;;  %v9023_v11 = vpop.permute.xlu0 %9022 }
0x2886   :  { %v9025_v58 = vpop.permute.xlu1 %9024 }
0x2887   :  { %13222 = vmatprep.subr.mxu0 %v9025_v58  ;;  %v17989_v36 = vpop.eup %13947 }
0x2888   :  { %13223 = vmatpush3.msra.mxu0 %v9025_v58  ;;  %v17991_v30 = vpop.eup %13949  ;;  %v8952_v15 = vsel %vm654_vm2, %v17989_v36, 0.0 }
0x2889   :  { %13224 = vmatprep.subr.mxu0 %v9023_v11  ;;  %8953 = vadd.xlane.f32.xlu0 %v8952_v15  ;;  %v8955_v13 = vsel %vm654_vm2, %v17991_v30, 0.0 }
0x288a   :  { %13225 = vmatpush3.msra.mxu0 %v9023_v11  ;;  %v9021_v62 = vpop.permute.xlu1 %9020  ;;  %8956 = vadd.xlane.f32.xlu1 %v8955_v13 }
0x288b   :  { %13226 = vmatprep.subr.mxu0 %v9021_v62  ;;  %v17997_v53 = vpop.eup %13951 }
0x288c   :  { %13227 = vmatpush3.msra.mxu0 %v9021_v62  ;;  %v17999_v23 = vpop.eup %13953  ;;  %v8958_v48 = vsel %vm654_vm2, %v17997_v53, 0.0 }
0x288d   :  { %8959 = vadd.xlane.f32.xlu0 %v8958_v48  ;;  %v8961_v35 = vsel %vm654_vm2, %v17999_v23, 0.0 }
0x288e   :  { %8962 = vadd.xlane.f32.xlu1 %v8961_v35 }
0x288f   :  { %v18005_v44 = vpop.eup %13955 }
0x2890   :  { %v8964_v22 = vsel %vm654_vm2, %v18005_v44, 0.0 }
0x2891   :  { %8965 = vadd.xlane.f32.xlu0 %v8964_v22 }
0x289f   :  { %9016 = vrot.lane.b32.xlu1 %v19165_v41, %s19175_s0  ;;  %v19180_v41 = vld [vmem:[#allocation21_spill] sm:$0xff] }
0x28a3   :  { %9187 = vrot.lane.b32.xlu1 %v17307_v42, %s19177_s20  ;;  %v19182_v42 = vld [vmem:[#allocation22_spill] sm:$0xff] }
0x28a7   :  { %9251 = vrot.lane.b32.xlu1 %v17639_v49, %s19178_s21  ;;  %9018 = vrot.lane.b32.xlu0 %v19166_v52, %s19175_s0  ;;  %v19181_v52 = vld [vmem:[#allocation23_spill] sm:$0xff] }
0x28ab   :  { %9315 = vrot.lane.b32.xlu1 %v17941_v26, %s19179_s25  ;;  %9185 = vrot.lane.b32.xlu0 %v17309_v46, %s19177_s20  ;;  %v19183_v46 = vld [vmem:[#allocation11_spill] sm:$0xff] }
0x28af   :  { %9191 = vrot.lane.b32.xlu1 %v17311_v7, %s19177_s20  ;;  %9249 = vrot.lane.b32.xlu0 %v17641_v12, %s19178_s21  ;;  %v19184_v7 = vld [vmem:[#allocation12_spill] sm:$0xff] }
0x28b3   :  { %9255 = vrot.lane.b32.xlu1 %v17643_v59, %s19178_s21  ;;  %9313 = vrot.lane.b32.xlu0 %v17943_v54, %s19179_s25  ;;  %v11345_v54 = vld [vmem:[%s18975_s5 + $0x38] sm:$0xff] }
0x28b7   :  { %9319 = vrot.lane.b32.xlu1 %v17945_v8, %s19179_s25  ;;  %9189 = vrot.lane.b32.xlu0 %v17313_v63, %s19177_s20 }
0x28bb   :  { %9195 = vrot.lane.b32.xlu1 %v17315_v40, %s19177_s20  ;;  %9253 = vrot.lane.b32.xlu0 %v17645_v39, %s19178_s21 }
0x28bf   :  { %9259 = vrot.lane.b32.xlu1 %v17647_v9, %s19178_s21  ;;  %9317 = vrot.lane.b32.xlu0 %v17947_v24, %s19179_s25 }
0x28c3   :  { %9323 = vrot.lane.b32.xlu1 %v17949_v18, %s19179_s25  ;;  %9193 = vrot.lane.b32.xlu0 %v17317_v1, %s19177_s20 }
0x28c7   :  { %9199 = vrot.lane.b32.xlu1 %v17319_v45, %s19177_s20  ;;  %9257 = vrot.lane.b32.xlu0 %v17649_v61, %s19178_s21 }
0x28cb   :  { %9263 = vrot.lane.b32.xlu1 %v17651_v57, %s19178_s21  ;;  %9321 = vrot.lane.b32.xlu0 %v17951_v19, %s19179_s25 }
0x28cf   :  { %9327 = vrot.lane.b32.xlu1 %v17953_v6, %s19179_s25  ;;  %9197 = vrot.lane.b32.xlu0 %v17321_v25, %s19177_s20 }
0x28d3   :  { %9203 = vrot.lane.b32.xlu1 %v17473_v2, %s19177_s20  ;;  %9261 = vrot.lane.b32.xlu0 %v17653_v16, %s19178_s21 }
0x28d7   :  { %9267 = vrot.lane.b32.xlu1 %v17805_v47, %s19178_s21  ;;  %9325 = vrot.lane.b32.xlu0 %v17955_v27, %s19179_s25  ;;  %v11344_v27 = vld [vmem:[%s18975_s5 + $0x30] sm:$0xff] }
0x28db   :  { %9207 = vrot.lane.b32.xlu1 %v17477_v20, %s19177_s20  ;;  %9201 = vrot.lane.b32.xlu0 %v17475_v0, %s19177_s20 }
0x28df   :  { %9271 = vrot.lane.b32.xlu1 %v17809_v50, %s19178_s21  ;;  %9265 = vrot.lane.b32.xlu0 %v17807_v43, %s19178_s21 }
0x28e3   :  { %9211 = vrot.lane.b32.xlu1 %v17481_v3, %s19177_s20  ;;  %9205 = vrot.lane.b32.xlu0 %v19180_v41, %s19177_s20 }
0x28e7   :  { %9275 = vrot.lane.b32.xlu1 %v17813_v33, %s19178_s21  ;;  %9269 = vrot.lane.b32.xlu0 %v17811_v31, %s19178_s21 }
0x28eb   :  { %9215 = vrot.lane.b32.xlu1 %v19181_v52, %s19177_s20  ;;  %9209 = vrot.lane.b32.xlu0 %v19182_v42, %s19177_s20 }
0x28ef   :  { %9279 = vrot.lane.b32.xlu1 %v17817_v60, %s19178_s21  ;;  %9273 = vrot.lane.b32.xlu0 %v17815_v34, %s19178_s21 }
0x28f3   :  { %9213 = vrot.lane.b32.xlu0 %v19183_v46, %s19177_s20 }
0x28f7   :  { %9277 = vrot.lane.b32.xlu0 %v19184_v7, %s19178_s21 }
0x2908   :  { %v8948_v63 = vpop.xlane.xlu0 %8947 }
0x2909   :  { %13957 = vrcp.f32 %v8948_v63 }
0x290a   :  { %v8945_v40 = vpop.xlane.xlu1 %8944 }
0x290b   :  { %13959 = vrcp.f32 %v8945_v40 }
0x290e   :  { %v8951_v1 = vpop.xlane.xlu1 %8950 }
0x290f   :  { %13961 = vrcp.f32 %v8951_v1 }
0x2912   :  { %v8954_v45 = vpop.xlane.xlu0 %8953 }
0x2913   :  { %13963 = vrcp.f32 %v8954_v45  ;;  %v8957_v25 = vpop.xlane.xlu1 %8956 }
0x2914   :  { %13965 = vrcp.f32 %v8957_v25 }
0x2916   :  { %v13958_v2 = vpop.eup %13957  ;;  %v8960_v0 = vpop.xlane.xlu0 %8959 }
0x2917   :  { %v8976_v20 = vmul.f32 %v13958_v2, %v8948_v63  ;;  %13967 = vrcp.f32 %v8960_v0  ;;  %v8963_v3 = vpop.xlane.xlu1 %8962 }
0x2918   :  { %v13960_v49 = vpop.eup %13959  ;;  %13969 = vrcp.f32 %v8963_v3 }
0x2919   :  { %v8984_v12 = vsub.f32 2.0, %v8976_v20  ;;  %v8975_v59 = vmul.f32 %v13960_v49, %v8945_v40  ;;  %v19185_v40 = vld [vmem:[#allocation13_spill] sm:$0xff] }
0x291a   :  { %v8966_v39 = vpop.xlane.xlu0 %8965 }
0x291b   :  { %v8992_v9 = vmul.f32 %v13958_v2, %v8984_v12  ;;  %v8983_v61 = vsub.f32 2.0, %v8975_v59  ;;  %13971 = vrcp.f32 %v8966_v39  ;;  %v9017_v57 = vpop.permute.xlu1 %9016  ;;  %v19188_v59 = vld [vmem:[#allocation15_spill] sm:$0xff] }
0x291c   :  { %v13962_v16 = vpop.eup %13961 }
0x291d   :  { %v9000_v47 = vmul.f32 %v17977_v4, %v8992_v9  ;;  %v8991_v43 = vmul.f32 %v13960_v49, %v8983_v61  ;;  %v8977_v50 = vmul.f32 %v13962_v16, %v8951_v1  ;;  %v19187_v49 = vld [vmem:[#allocation34_spill] sm:$0xff] }
0x291e   :  { %v9019_v31 = vpop.permute.xlu0 %9018 }
0x291f   :  { %9009 = vst.msk [vmem:[#allocation4 + $0x1c8] sm:$0xff] %vm654_vm2, %v9000_v47  ;;  %v8985_v33 = vsub.f32 2.0, %v8977_v50  ;;  %v18095_v34 = vpop.permute.xlu1 %9187  ;;  %13228 = vmatprep.subr.mxu0 %v9019_v31  ;;  %v8999_v60 = vmul.f32 %v17981_v17, %v8991_v43 }
0x2920   :  { %v13964_v26 = vpop.eup %13963  ;;  %13229 = vmatpush3.msra.mxu0 %v9019_v31 }
0x2921   :  { %v13966_v8 = vpop.eup %13965  ;;  %v8993_v24 = vmul.f32 %v13962_v16, %v8985_v33  ;;  %v8978_v18 = vmul.f32 %v13964_v26, %v8954_v45  ;;  %13230 = vmatprep.subr.mxu0 %v9017_v57  ;;  %9008 = vst.msk [vmem:[#allocation4 + $0x1c0] sm:$0xff] %vm654_vm2, %v8999_v60  ;;  %13232 = vmatprep.mubr.msk.f32.mxu0 %vm654_vm2, %v8999_v60  ;;  %v19189_v60 = vld [vmem:[#allocation36_spill] sm:$0xff] }
0x2922   :  { %v8979_v19 = vmul.f32 %v13966_v8, %v8957_v25  ;;  %v9186_v6 = vpop.permute.xlu0 %9185  ;;  %13231 = vmatpush3.msra.mxu0 %v9017_v57  ;;  %v19186_v25 = vld [vmem:[#allocation14_spill] sm:$0xff] }
0x2923   :  { %v8986_v21 = vsub.f32 2.0, %v8978_v18  ;;  %v9252_v29 = vpop.permute.xlu1 %9251  ;;  %13233 = vmatmul.mubr.msk.f32.vlgmr.msra.gmra.mxu0 %vm654_vm2, %v9000_v47  ;;  %v9001_v4 = vmul.f32 %v17985_v56, %v8993_v24  ;;  %13244 = vmatprep.subr.mxu0 %v11345_v54  ;;  %v11342_v56 = vld [vmem:[%s18975_s5 + $0x20] sm:$0xff]  ;;  %v9361_v1 = vsel %vm94_vm0, %v19185_v40, %v9186_v6  ;;  %v9362_v2 = vsel %vm94_vm0, %v19186_v25, %v18095_v34 }
0x2924   :  { %v13968_v10 = vpop.eup %13967  ;;  %v8987_v55 = vsub.f32 2.0, %v8979_v19  ;;  %13245 = vmatpush3.msra.mxu0 %v11345_v54  ;;  %v19190_v54 = vld [vmem:[#allocation33_spill] sm:$0xff]  ;;  %v19193_v40 = vld [vmem:[#allocation24_spill] sm:$0xff] }
0x2925   :  { %v13970_v28 = vpop.eup %13969  ;;  %v8994_v17 = vmul.f32 %v13964_v26, %v8986_v21  ;;  %v8980_v38 = vmul.f32 %v13968_v10, %v8960_v0  ;;  %9010 = vst.msk [vmem:[#allocation4 + $0x1d0] sm:$0xff] %vm654_vm2, %v9001_v4  ;;  %13235 = vmatprep.mubr.msk.f32.mxu0 %vm654_vm2, %v9001_v4  ;;  %13246 = vmatprep.subr.mxu0 %v11344_v27 }
0x2926   :  { %v8995_v51 = vmul.f32 %v13966_v8, %v8987_v55  ;;  %v8981_v37 = vmul.f32 %v13970_v28, %v8963_v3  ;;  %v9250_v5 = vpop.permute.xlu0 %9249  ;;  %13247 = vmatpush3.msra.mxu0 %v11344_v27  ;;  %v19191_v55 = vld [vmem:[#allocation38_spill] sm:$0xff] }
0x2927   :  { %v9002_v32 = vmul.f32 %v17989_v36, %v8994_v17  ;;  %v8988_v58 = vsub.f32 2.0, %v8980_v38  ;;  %v9316_v11 = vpop.permute.xlu1 %9315  ;;  %13248 = vmatprep.subr.mxu0 %v11343_v14  ;;  %v9377_v45 = vsel %vm4229_vm3, %v9361_v1, %v9250_v5  ;;  %v19192_v17 = vld [vmem:[#allocation35_spill] sm:$0xff] }
0x2928   :  { %v13972_v15 = vpop.eup %13971  ;;  %v8989_v13 = vsub.f32 2.0, %v8981_v37  ;;  %v9003_v62 = vmul.f32 %v17991_v30, %v8995_v51  ;;  %13249 = vmatpush3.msra.mxu0 %v11343_v14 }
0x2929   :  { %9011 = vst.msk [vmem:[#allocation4 + $0x1d8] sm:$0xff] %vm654_vm2, %v9002_v32  ;;  %v8996_v48 = vmul.f32 %v13968_v10, %v8988_v58  ;;  %v8982_v35 = vmul.f32 %v13972_v15, %v8966_v39  ;;  %13236 = vmatmul.mubr.msk.f32.gmra.mxu0 %vm654_vm2, %v9002_v32  ;;  %13250 = vmatprep.subr.mxu0 %v11342_v56 }
0x292a   :  { %v8997_v22 = vmul.f32 %v13970_v28, %v8989_v13  ;;  %v9314_v41 = vpop.permute.xlu0 %9313  ;;  %9012 = vst.msk [vmem:[#allocation4 + $0x1e0] sm:$0xff] %vm654_vm2, %v9003_v62  ;;  %13238 = vmatprep.mubr.msk.f32.mxu0 %vm654_vm2, %v9003_v62  ;;  %13251 = vmatpush3.msra.mxu0 %v11342_v56 }
0x292b   :  { %v9004_v36 = vmul.f32 %v17997_v53, %v8996_v48  ;;  %v8990_v52 = vsub.f32 2.0, %v8982_v35  ;;  %v9192_v42 = vpop.permute.xlu1 %9191 }
0x292c   :  { %v9005_v30 = vmul.f32 %v17999_v23, %v8997_v22  ;;  %v9393_v23 = vsel %vm4246_vm4, %v9377_v45, %v9314_v41  ;;  %v9364_v39 = vsel %vm94_vm0, %v19188_v59, %v9192_v42  ;;  %v19196_v59 = vld [vmem:[#allocation44_spill] sm:$0xff] }
0x292d   :  { %9013 = vst.msk [vmem:[#allocation4 + $0x1e8] sm:$0xff] %vm654_vm2, %v9004_v36  ;;  %v8998_v46 = vmul.f32 %v13972_v15, %v8990_v52  ;;  %13239 = vmatmul.mubr.msk.f32.gmra.mxu0 %vm654_vm2, %v9004_v36 }
0x292e   :  { %v9190_v7 = vpop.permute.xlu0 %9189  ;;  %9014 = vst.msk [vmem:[#allocation4 + $0x1f0] sm:$0xff] %vm654_vm2, %v9005_v30  ;;  %13241 = vmatprep.mubr.msk.f32.mxu0 %vm654_vm2, %v9005_v30  ;;  %v18183_v30 = vld [vmem:[%s18976_s6 + $0x1] ss:$0 sm:$0xff] }
0x292f   :  { %v9006_v63 = vmul.f32 %v18005_v44, %v8998_v46  ;;  %v9256_v53 = vpop.permute.xlu1 %9255  ;;  %v9378_v44 = vsel %vm4229_vm3, %v9362_v2, %v9252_v29  ;;  %v9363_v12 = vsel %vm94_vm0, %v19187_v49, %v9190_v7 }
0x2930   :  { %v9394_v3 = vsel %vm4246_vm4, %v9378_v44, %v9316_v11  ;;  %v9380_v57 = vsel %vm4229_vm3, %v9364_v39, %v9256_v53 }
0x2931   :  { %9015 = vst.msk [vmem:[#allocation4 + $0x1f8] sm:$0xff] %vm654_vm2, %v9006_v63  ;;  %13242 = vmatmul.mubr.msk.f32.gmra.mxu0 %vm654_vm2, %v9006_v63 }
0x2932   :  { %v9254_v0 = vpop.permute.xlu0 %9253  ;;  %13252 = vmatprep.mubr.msk.f32.mxu0 %vm299_vm1, %v9393_v23  ;;  %v19194_v23 = vld [vmem:[#allocation42_spill] sm:$0xff] }
0x2933   :  { %v9320_v20 = vpop.permute.xlu1 %9319  ;;  %v9379_v9 = vsel %vm4229_vm3, %v9363_v12, %v9254_v0 }
0x2934   :  { %v9396_v43 = vsel %vm4246_vm4, %v9380_v57, %v9320_v20  ;;  %v19195_v20 = vld [vmem:[#allocation41_spill] sm:$0xff]  ;;  %v19197_v57 = vld [vmem:[#allocation43_spill] sm:$0xff] }
0x2935   :  { %13253 = vmatmul.mubr.msk.f32.vlgmr.msra.gmra.mxu0 %vm299_vm1, %v9394_v3 }
0x2936   :  { %v9318_v61 = vpop.permute.xlu0 %9317 }
0x2937   :  { %v9395_v16 = vsel %vm4246_vm4, %v9379_v9, %v9318_v61  ;;  %v9196_v47 = vpop.permute.xlu1 %9195 }
0x2938   :  { %13255 = vmatprep.mubr.msk.f32.mxu0 %vm299_vm1, %v9395_v16  ;;  %v9366_v8 = vsel %vm94_vm0, %v19190_v54, %v9196_v47 }
0x2939   :  { %13256 = vmatmul.mubr.msk.f32.gmra.mxu0 %vm299_vm1, %v9396_v43 }
0x293a   :  { %v9194_v50 = vpop.permute.xlu0 %9193 }
0x293b   :  { %v9260_v31 = vpop.permute.xlu1 %9259  ;;  %v9365_v26 = vsel %vm94_vm0, %v19189_v60, %v9194_v50  ;;  %v19198_v50 = vld [vmem:[#allocation25_spill] sm:$0xff] }
0x293c   :  { %v9382_v19 = vsel %vm4229_vm3, %v9366_v8, %v9260_v31 }
0x293e   :  { %v9258_v33 = vpop.permute.xlu0 %9257 }
0x293f   :  { %v9324_v34 = vpop.permute.xlu1 %9323  ;;  %v9381_v24 = vsel %vm4229_vm3, %v9365_v26, %v9258_v33 }
0x2940   :  { %v9398_v21 = vsel %vm4246_vm4, %v9382_v19, %v9324_v34  ;;  %v19199_v34 = vld [vmem:[#allocation26_spill] sm:$0xff] }
0x2942   :  { %v9322_v18 = vpop.permute.xlu0 %9321 }
0x2943   :  { %v9397_v6 = vsel %vm4246_vm4, %v9381_v24, %v9322_v18  ;;  %v9200_v27 = vpop.permute.xlu1 %9199  ;;  %v19200_v24 = vld [vmem:[#allocation28_spill] sm:$0xff] }
0x2944   :  { %13258 = vmatprep.mubr.msk.f32.mxu0 %vm299_vm1, %v9397_v6  ;;  %v9368_v38 = vsel %vm94_vm0, %v19192_v17, %v9200_v27 }
0x2945   :  { %13259 = vmatmul.mubr.msk.f32.gmra.mxu0 %vm299_vm1, %v9398_v21 }
0x2946   :  { %v9198_v29 = vpop.permute.xlu0 %9197 }
0x2947   :  { %v9264_v4 = vpop.permute.xlu1 %9263  ;;  %v9367_v14 = vsel %vm94_vm0, %v19191_v55, %v9198_v29 }
0x2948   :  { %v9384_v5 = vsel %vm4229_vm3, %v9368_v38, %v9264_v4 }
0x294a   :  { %v9262_v10 = vpop.permute.xlu0 %9261 }
0x294b   :  { %v9328_v28 = vpop.permute.xlu1 %9327  ;;  %v9383_v51 = vsel %vm4229_vm3, %v9367_v14, %v9262_v10 }
0x294c   :  { %v9400_v32 = vsel %vm4246_vm4, %v9384_v5, %v9328_v28 }
0x294e   :  { %v9326_v37 = vpop.permute.xlu0 %9325 }
0x294f   :  { %v9399_v56 = vsel %vm4246_vm4, %v9383_v51, %v9326_v37  ;;  %v9204_v27 = vpop.permute.xlu1 %9203 }
0x2950   :  { %13261 = vmatprep.mubr.msk.f32.mxu0 %vm299_vm1, %v9399_v56 }
0x2951   :  { %13262 = vmatmul.mubr.msk.f32.gmra.mxu0 %vm299_vm1, %v9400_v32 }
0x2952   :  { %v9202_v21 = vpop.permute.xlu0 %9201 }
0x2953   :  { %v9268_v29 = vpop.permute.xlu1 %9267 }
0x2956   :  { %v9266_v4 = vpop.permute.xlu0 %9265 }
0x2957   :  { %v9208_v10 = vpop.permute.xlu1 %9207 }
0x295a   :  { %v9206_v55 = vpop.permute.xlu0 %9205 }
0x295b   :  { %v9272_v14 = vpop.permute.xlu1 %9271 }
0x295e   :  { %v9270_v28 = vpop.permute.xlu0 %9269 }
0x295f   :  { %v9212_v17 = vpop.permute.xlu1 %9211 }
0x2962   :  { %v9210_v38 = vpop.permute.xlu0 %9209 }
0x2963   :  { %v9276_v51 = vpop.permute.xlu1 %9275 }
0x2966   :  { %v9274_v37 = vpop.permute.xlu0 %9273 }
0x2967   :  { %v9216_v5 = vpop.permute.xlu1 %9215 }
0x296a   :  { %v9214_v56 = vpop.permute.xlu0 %9213 }
0x296b   :  { %v9280_v32 = vpop.permute.xlu1 %9279 }
0x29e3   :  { %v13234_v58 = vpop.f32.mrf.mxu0 }
0x29e4   :  { %9331 = vrot.lane.b32.xlu1 %v13234_v58, %s19179_s25  ;;  %v9278_v58 = vpop.permute.xlu0 %9277 }
0x29e5   :  { %v9130_v11 = vpop.f32.mrf.mxu0 }
0x29e6   :  { %9329 = vrot.lane.b32.xlu0 %v9130_v11, %s19179_s25  ;;  %v19201_v11 = vld [vmem:[#allocation40_spill] sm:$0xff] }
0x29e9   :  { %v13237_v15 = vpop.f32.mrf.mxu0 }
0x29ea   :  { %9335 = vrot.lane.b32.xlu1 %v13237_v15, %s19179_s25  ;;  %v9369_v15 = vsel %vm94_vm0, %v19201_v11, %v9202_v21 }
0x29eb   :  { %v9140_v13 = vpop.f32.mrf.mxu0 }
0x29ec   :  { %9333 = vrot.lane.b32.xlu0 %v9140_v13, %s19179_s25 }
0x29ed   :  { %v13240_v62 = vpop.f32.mrf.mxu0 }
0x29ee   :  { %9339 = vrot.lane.b32.xlu1 %v13240_v62, %s19179_s25  ;;  %v19202_v62 = vld [vmem:[#allocation37_spill] sm:$0xff] }
0x29ef   :  { %v9150_v48 = vpop.f32.mrf.mxu0 }
0x29f0   :  { %9337 = vrot.lane.b32.xlu0 %v9150_v48, %s19179_s25  ;;  %v9370_v48 = vsel %vm94_vm0, %v19202_v62, %v9204_v27 }
0x29f1   :  { %v13243_v35 = vpop.f32.mrf.mxu0 }
0x29f2   :  { %9343 = vrot.lane.b32.xlu1 %v13243_v35, %s19179_s25  ;;  %v9385_v35 = vsel %vm4229_vm3, %v9369_v15, %v9266_v4 }
0x29f3   :  { %v9160_v22 = vpop.f32.mrf.mxu0 }
0x29f4   :  { %9341 = vrot.lane.b32.xlu0 %v9160_v22, %s19179_s25 }
0x29f5   :  { %v13254_v41 = vpop.f32.mrf.mxu0 }
0x29f6   :  { %v9542_v63 = vadd.f32 %v13254_v41, %v18183_v30  ;;  %v9386_v41 = vsel %vm4229_vm3, %v9370_v48, %v9268_v29 }
0x29f7   :  { %v9536_v36 = vpop.f32.mrf.mxu0 }
0x29f8   :  { %v9537_v46 = vadd.f32 %v18183_v30, %v9536_v36  ;;  %v18192_v25 = vadd.f32 %v9542_v63, %v19194_v23  ;;  %v19204_v63 = vld [vmem:[#allocation39_spill] sm:$0xff] }
0x29f9   :  { %v13257_v52 = vpop.f32.mrf.mxu0 }
0x29fa   :  { %v18188_v1 = vadd.f32 %v9537_v46, %v19193_v40  ;;  %v9552_v44 = vadd.f32 %v13257_v52, %v18183_v30  ;;  %v9638_v61 = vsel %vm299_vm1, %v18192_v25, 0.0  ;;  %v19203_v46 = vld [vmem:[#allocation16_spill] sm:$0xff]  ;;  %v9372_v40 = vsel %vm94_vm0, %v19204_v63, %v9208_v10 }
0x29fb   :  { %v9546_v42 = vpop.f32.mrf.mxu0  ;;  %v9388_v23 = vsel %vm4229_vm3, %v9372_v40, %v9272_v14  ;;  %v19209_v14 = vld [vmem:[#allocation30_spill] sm:$0xff]  ;;  %v19213_v63 = vld [vmem:[#allocation8_spill] sm:$0xff] }
0x29fc   :  { %v9547_v53 = vadd.f32 %v18183_v30, %v9546_v42  ;;  %v9635_v49 = vsel %vm299_vm1, %v18188_v1, 0.0  ;;  %v18208_v16 = vadd.f32 %v9552_v44, %v19197_v57 }
0x29fe   :  { %v18197_v3 = vadd.f32 %v9547_v53, %v19195_v20  ;;  %v9644_v54 = vsel %vm299_vm1, %v18208_v16, 0.0  ;;  %v19205_v20 = vld [vmem:[#allocation18_spill] sm:$0xff] }
0x2a00   :  { %v9641_v43 = vsel %vm299_vm1, %v18197_v3, 0.0 }
0x2a05   :  { %v13260_v7 = vpop.f32.mrf.mxu0 }
0x2a06   :  { %v9562_v47 = vadd.f32 %v13260_v7, %v18183_v30  ;;  %v9371_v7 = vsel %vm94_vm0, %v19203_v46, %v9206_v55 }
0x2a07   :  { %v9556_v45 = vpop.f32.mrf.mxu0  ;;  %v9387_v53 = vsel %vm4229_vm3, %v9371_v7, %v9270_v28 }
0x2a08   :  { %v9557_v2 = vadd.f32 %v18183_v30, %v9556_v45  ;;  %v18219_v60 = vadd.f32 %v9562_v47, %v19199_v34 }
0x2a0a   :  { %v18202_v39 = vadd.f32 %v9557_v2, %v19196_v59  ;;  %v9650_v19 = vsel %vm299_vm1, %v18219_v60, 0.0 }
0x2a0c   :  { %v9647_v33 = vsel %vm299_vm1, %v18202_v39, 0.0 }
0x2a11   :  { %v13263_v0 = vpop.f32.mrf.mxu0 }
0x2a12   :  { %v9572_v26 = vadd.f32 %v13263_v0, %v18183_v30 }
0x2a13   :  { %9636 = vadd.xlane.f32.xlu0 %v9635_v49  ;;  %v9566_v12 = vpop.f32.mrf.mxu0  ;;  %v9373_v49 = vsel %vm94_vm0, %v19205_v20, %v9210_v38  ;;  %v19210_v38 = vld [vmem:[#allocation27_spill] sm:$0xff] }
0x2a14   :  { %v9567_v9 = vadd.f32 %v18183_v30, %v9566_v12  ;;  %v18227_v18 = vadd.f32 %v9572_v26, %v19200_v24  ;;  %v19206_v12 = vld [vmem:[#allocation17_spill] sm:$0xff]  ;;  %v19208_v26 = vld [vmem:[#allocation19_spill] sm:$0xff] }
0x2a15   :  { %v9374_v59 = vsel %vm94_vm0, %v19206_v12, %v9212_v17  ;;  %v19214_v20 = vld [vmem:[#allocation31_spill] sm:$0xff] }
0x2a16   :  { %9639 = vadd.xlane.f32.xlu1 %v9638_v61  ;;  %v18214_v31 = vadd.f32 %v9567_v9, %v19198_v50  ;;  %v9656_v6 = vsel %vm299_vm1, %v18227_v18, 0.0  ;;  %v9389_v9 = vsel %vm4229_vm3, %v9373_v49, %v9274_v37  ;;  %v9390_v57 = vsel %vm4229_vm3, %v9374_v59, %v9276_v51  ;;  %v19207_v50 = vld [vmem:[#allocation20_spill] sm:$0xff] }
0x2a17   :  { %9642 = vadd.xlane.f32.xlu0 %v9641_v43 }
0x2a18   :  { %v9653_v8 = vsel %vm299_vm1, %v18214_v31, 0.0 }
0x2a1a   :  { %9648 = vadd.xlane.f32.xlu1 %v9647_v33  ;;  %v9375_v33 = vsel %vm94_vm0, %v19207_v50, %v9214_v56 }
0x2a1b   :  { %9645 = vadd.xlane.f32.xlu0 %v9644_v54  ;;  %v9376_v54 = vsel %vm94_vm0, %v19208_v26, %v9216_v5 }
0x2a1e   :  { %9654 = vadd.xlane.f32.xlu1 %v9653_v8  ;;  %v9391_v8 = vsel %vm4229_vm3, %v9375_v33, %v9278_v58 }
0x2a1f   :  { %9651 = vadd.xlane.f32.xlu0 %v9650_v19  ;;  %v9392_v19 = vsel %vm4229_vm3, %v9376_v54, %v9280_v32  ;;  %v19216_v54 = vld [vmem:[#allocation9_spill] sm:$0xff] }
0x2a23   :  { %9657 = vadd.xlane.f32.xlu0 %v9656_v6 }
0x2a56   :  { %v9332_v13 = vpop.permute.xlu1 %9331 }
0x2a57   :  { %v9402_v52 = vsel %vm4246_vm4, %v9386_v41, %v9332_v13  ;;  %v19211_v13 = vld [vmem:[#allocation32_spill] sm:$0xff]  ;;  %v19212_v41 = vld [vmem:[#allocation29_spill] sm:$0xff] }
0x2a58   :  { %v9330_v22 = vpop.permute.xlu0 %9329 }
0x2a59   :  { %v9401_v36 = vsel %vm4246_vm4, %v9385_v35, %v9330_v22 }
0x2a5a   :  { %13264 = vmatprep.mubr.msk.f32.mxu0 %vm299_vm1, %v9401_v36 }
0x2a5b   :  { %13265 = vmatmul.mubr.msk.f32.gmra.mxu0 %vm299_vm1, %v9402_v52 }
0x2a5c   :  { %v9336_v42 = vpop.permute.xlu1 %9335 }
0x2a5d   :  { %v9404_v0 = vsel %vm4246_vm4, %v9388_v23, %v9336_v42 }
0x2a5e   :  { %v9334_v45 = vpop.permute.xlu0 %9333 }
0x2a5f   :  { %v9403_v2 = vsel %vm4246_vm4, %v9387_v53, %v9334_v45 }
0x2a60   :  { %13267 = vmatprep.mubr.msk.f32.mxu0 %vm299_vm1, %v9403_v2  ;;  %v9340_v44 = vpop.permute.xlu1 %9339 }
0x2a61   :  { %13268 = vmatmul.mubr.msk.f32.gmra.mxu0 %vm299_vm1, %v9404_v0  ;;  %v9406_v43 = vsel %vm4246_vm4, %v9390_v57, %v9340_v44 }
0x2a62   :  { %v9338_v61 = vpop.permute.xlu0 %9337 }
0x2a63   :  { %v9405_v47 = vsel %vm4246_vm4, %v9389_v9, %v9338_v61 }
0x2a64   :  { %13270 = vmatprep.mubr.msk.f32.mxu0 %vm299_vm1, %v9405_v47  ;;  %v9344_v34 = vpop.permute.xlu1 %9343  ;;  %v19215_v47 = vld [vmem:[#allocation10_spill] sm:$0xff] }
0x2a65   :  { %13271 = vmatmul.mubr.msk.f32.gmra.mxu0 %vm299_vm1, %v9406_v43  ;;  %v9408_v27 = vsel %vm4246_vm4, %v9392_v19, %v9344_v34 }
0x2a66   :  { %v9342_v24 = vpop.permute.xlu0 %9341 }
0x2a67   :  { %v9407_v6 = vsel %vm4246_vm4, %v9391_v8, %v9342_v24 }
0x2a68   :  { %13273 = vmatprep.mubr.msk.f32.mxu0 %vm299_vm1, %v9407_v6 }
0x2a69   :  { %13274 = vmatmul.mubr.msk.f32.gmra.mxu0 %vm299_vm1, %v9408_v27 }
0x2a9c   :  { %v9637_v21 = vpop.xlane.xlu0 %9636 }
0x2a9d   :  { %v9683_v46 = vmul.f32 0.03125, %v9637_v21 }
0x2a9f   :  { %v9640_v56 = vpop.xlane.xlu1 %9639  ;;  %v18312_v9 = vsub.f32 %v18188_v1, %v9683_v46 }
0x2aa0   :  { %v9643_v10 = vpop.xlane.xlu0 %9642  ;;  %v9684_v35 = vmul.f32 0.03125, %v9640_v56 }
0x2aa2   :  { %v18303_v23 = vsub.f32 %v18192_v25, %v9684_v35  ;;  %v9685_v25 = vmul.f32 0.03125, %v9643_v10  ;;  %v11370_v35 = vld [vmem:[%s18979_s9 + $0x30] sm:$0xff] }
0x2aa3   :  { %v9649_v61 = vpop.xlane.xlu1 %9648 }
0x2aa4   :  { %v9646_v11 = vpop.xlane.xlu0 %9645  ;;  %v9716_v34 = vmul.f32 %v18303_v23, %v18303_v23  ;;  %v9687_v6 = vmul.f32 0.03125, %v9649_v61 }
0x2aa5   :  { %v9686_v44 = vmul.f32 0.03125, %v9646_v11 }
0x2aa6   :  { %v9734_v10 = vsel %vm299_vm1, %v9716_v34, 0.0 }
0x2aa7   :  { %v18323_v26 = vsub.f32 %v18208_v16, %v9686_v44  ;;  %v9715_v16 = vmul.f32 %v18312_v9, %v18312_v9  ;;  %v9655_v21 = vpop.xlane.xlu1 %9654 }
0x2aa8   :  { %v9652_v2 = vpop.xlane.xlu0 %9651 }
0x2aa9   :  { %v9688_v1 = vmul.f32 0.03125, %v9652_v2 }
0x2aac   :  { %v9658_v19 = vpop.xlane.xlu0 %9657 }
0x2b1b   :  { %v13266_v29 = vpop.f32.mrf.mxu0 }
0x2b1c   :  { %v9582_v4 = vadd.f32 %v13266_v29, %v18183_v30  ;;  %v18338_v29 = vsub.f32 %v18219_v60, %v9688_v1 }
0x2b1d   :  { %v9576_v55 = vpop.f32.mrf.mxu0 }
0x2b1e   :  { %v18275_v28 = vadd.f32 %v9582_v4, %v19209_v14  ;;  %v9577_v17 = vadd.f32 %v18183_v30, %v9576_v55  ;;  %v9690_v4 = vmul.f32 0.03125, %v9658_v19  ;;  %v9718_v55 = vmul.f32 %v18323_v26, %v18323_v26 }
0x2b1f   :  { %v9689_v14 = vmul.f32 0.03125, %v9655_v21 }
0x2b20   :  { %v18279_v51 = vadd.f32 %v9577_v17, %v19210_v38  ;;  %v9662_v37 = vsel %vm299_vm1, %v18275_v28, 0.0  ;;  %v9731_v17 = vsel %vm299_vm1, %v9715_v16, 0.0  ;;  %v18350_v60 = vsub.f32 %v18227_v18, %v9690_v4 }
0x2b21   :  { %9663 = vadd.xlane.f32.xlu0 %v9662_v37  ;;  %v13269_v5 = vpop.f32.mrf.mxu0  ;;  %v9740_v37 = vsel %vm299_vm1, %v9718_v55, 0.0  ;;  %v18356_v56 = vsub.f32 %v18214_v31, %v9689_v14 }
0x2b22   :  { %v9592_v32 = vadd.f32 %v13269_v5, %v18183_v30  ;;  %v9659_v58 = vsel %vm299_vm1, %v18279_v51, 0.0  ;;  %v9720_v5 = vmul.f32 %v18338_v29, %v18338_v29  ;;  %v9722_v18 = vmul.f32 %v18350_v60, %v18350_v60 }
0x2b23   :  { %9660 = vadd.xlane.f32.xlu1 %v9659_v58  ;;  %v9586_v15 = vpop.f32.mrf.mxu0 }
0x2b24   :  { %v18287_v62 = vadd.f32 %v9592_v32, %v19211_v13  ;;  %v9587_v48 = vadd.f32 %v18183_v30, %v9586_v15  ;;  %v9746_v58 = vsel %vm299_vm1, %v9720_v5, 0.0  ;;  %v9721_v15 = vmul.f32 %v18356_v56, %v18356_v56 }
0x2b25   :  { %v13272_v22 = vpop.f32.mrf.mxu0  ;;  %v9752_v31 = vsel %vm299_vm1, %v9722_v18, 0.0 }
0x2b26   :  { %v18291_v36 = vadd.f32 %v9587_v48, %v19212_v41  ;;  %v9602_v52 = vadd.f32 %v13272_v22, %v18183_v30  ;;  %v9668_v42 = vsel %vm299_vm1, %v18287_v62, 0.0  ;;  %v9749_v13 = vsel %vm299_vm1, %v9721_v15, 0.0  ;;  %v11371_v48 = vld [vmem:[%s18979_s9 + $0x38] sm:$0xff]  ;;  %v11369_v22 = vld [vmem:[%s18979_s9 + $0x28] sm:$0xff]  ;;  %v11368_v41 = vld [vmem:[%s18979_s9 + $0x20] sm:$0xff] }
0x2b27   :  { %9669 = vadd.xlane.f32.xlu0 %v9668_v42  ;;  %v9596_v7 = vpop.f32.mrf.mxu0  ;;  %13276 = vmatprep.subr.mxu1 %v11371_v48 }
0x2b28   :  { %v18297_v40 = vadd.f32 %v9602_v52, %v19213_v63  ;;  %v9597_v53 = vadd.f32 %v18183_v30, %v9596_v7  ;;  %v9665_v45 = vsel %vm299_vm1, %v18291_v36, 0.0  ;;  %13277 = vmatpush3.msra.mxu1 %v11371_v48 }
0x2b29   :  { %9666 = vadd.xlane.f32.xlu1 %v9665_v45  ;;  %v13275_v0 = vpop.f32.mrf.mxu0  ;;  %13278 = vmatprep.subr.mxu1 %v11370_v35 }
0x2b2a   :  { %v18306_v49 = vadd.f32 %v9597_v53, %v19214_v20  ;;  %v9612_v12 = vadd.f32 %v13275_v0, %v18183_v30  ;;  %v9674_v59 = vsel %vm299_vm1, %v18297_v40, 0.0  ;;  %13279 = vmatpush3.msra.mxu1 %v11370_v35 }
0x2b2b   :  { %9675 = vadd.xlane.f32.xlu0 %v9674_v59  ;;  %v9606_v57 = vpop.f32.mrf.mxu0  ;;  %13280 = vmatprep.subr.mxu1 %v11369_v22 }
0x2b2c   :  { %v18315_v43 = vadd.f32 %v9612_v12, %v19215_v47  ;;  %v9607_v50 = vadd.f32 %v18183_v30, %v9606_v57  ;;  %v9671_v33 = vsel %vm299_vm1, %v18306_v49, 0.0  ;;  %v18331_v30 = vsub.f32 %v18197_v3, %v9685_v25  ;;  %13281 = vmatpush3.msra.mxu1 %v11369_v22 }
0x2b2d   :  { %9672 = vadd.xlane.f32.xlu1 %v9671_v33  ;;  %v18344_v3 = vsub.f32 %v18202_v39, %v9687_v6  ;;  %13282 = vmatprep.subr.mxu1 %v11368_v41 }
0x2b2e   :  { %v18326_v8 = vadd.f32 %v9607_v50, %v19216_v54  ;;  %v9680_v24 = vsel %vm299_vm1, %v18315_v43, 0.0  ;;  %v9717_v38 = vmul.f32 %v18331_v30, %v18331_v30  ;;  %13283 = vmatpush3.msra.mxu1 %v11368_v41 }
0x2b2f   :  { %9681 = vadd.xlane.f32.xlu0 %v9680_v24  ;;  %v9719_v32 = vmul.f32 %v18344_v3, %v18344_v3 }
0x2b30   :  { %v9677_v27 = vsel %vm299_vm1, %v18326_v8, 0.0  ;;  %v9737_v39 = vsel %vm299_vm1, %v9717_v38, 0.0 }
0x2b31   :  { %9678 = vadd.xlane.f32.xlu1 %v9677_v27  ;;  %v9743_v11 = vsel %vm299_vm1, %v9719_v32, 0.0 }
0x2b33   :  { %9735 = vadd.xlane.f32.xlu0 %v9734_v10 }
0x2b35   :  { %9732 = vadd.xlane.f32.xlu1 %v9731_v17 }
0x2b37   :  { %9741 = vadd.xlane.f32.xlu0 %v9740_v37 }
0x2b39   :  { %9738 = vadd.xlane.f32.xlu1 %v9737_v39 }
0x2b3b   :  { %9747 = vadd.xlane.f32.xlu0 %v9746_v58 }
0x2b3d   :  { %9744 = vadd.xlane.f32.xlu1 %v9743_v11 }
0x2b3f   :  { %9753 = vadd.xlane.f32.xlu0 %v9752_v31 }
0x2b41   :  { %9750 = vadd.xlane.f32.xlu1 %v9749_v13 }
0x2baa   :  { %v9664_v52 = vpop.xlane.xlu0 %9663 }
0x2bab   :  { %v9692_v42 = vmul.f32 0.03125, %v9664_v52 }
0x2bac   :  { %v9661_v46 = vpop.xlane.xlu1 %9660 }
0x2bad   :  { %v18382_v7 = vsub.f32 %v18275_v28, %v9692_v42  ;;  %v9691_v63 = vmul.f32 0.03125, %v9661_v46 }
0x2baf   :  { %v18385_v53 = vsub.f32 %v18279_v51, %v9691_v63  ;;  %v9724_v45 = vmul.f32 %v18382_v7, %v18382_v7 }
0x2bb0   :  { %v9670_v2 = vpop.xlane.xlu0 %9669 }
0x2bb1   :  { %v9694_v0 = vmul.f32 0.03125, %v9670_v2  ;;  %v9758_v44 = vsel %vm299_vm1, %v9724_v45, 0.0  ;;  %v9723_v20 = vmul.f32 %v18385_v53, %v18385_v53 }
0x2bb2   :  { %9759 = vadd.xlane.f32.xlu0 %v9758_v44  ;;  %v9667_v12 = vpop.xlane.xlu1 %9666 }
0x2bb3   :  { %v18393_v59 = vsub.f32 %v18287_v62, %v9694_v0  ;;  %v9693_v28 = vmul.f32 0.03125, %v9667_v12  ;;  %v9755_v61 = vsel %vm299_vm1, %v9723_v20, 0.0  ;;  %v18432_v12 = vld [vmem:[%s18977_s7 + $0x1] ss:$0 sm:$0xff]  ;;  %s14095_s7 = smov [#allocation2]  }
0x2bb4   :  { %v9676_v51 = vpop.xlane.xlu0 %9675  ;;  %9756 = vadd.xlane.f32.xlu1 %v9755_v61 }
0x2bb5   :  { %v18397_v57 = vsub.f32 %v18291_v36, %v9693_v28  ;;  %v9696_v25 = vmul.f32 0.03125, %v9676_v51  ;;  %v9726_v47 = vmul.f32 %v18393_v59, %v18393_v59 }
0x2bb6   :  { %v9673_v50 = vpop.xlane.xlu1 %9672 }
0x2bb7   :  { %v18402_v33 = vsub.f32 %v18297_v40, %v9696_v25  ;;  %v9695_v34 = vmul.f32 0.03125, %v9673_v50  ;;  %v9764_v62 = vsel %vm299_vm1, %v9726_v47, 0.0  ;;  %v9725_v1 = vmul.f32 %v18397_v57, %v18397_v57  ;;  %v18440_v50 = vld [vmem:[%s18978_s8 + $0x1] ss:$0 sm:$0xff]  ;;  %s10819_s8 = sshll.u32 %s14095_s7, 4  ;;  %s10820_s8 = int_to_ptr.vmem [resolvable:$true] %s10819_s8 }
0x2bb8   :  { %v9682_v54 = vpop.xlane.xlu0 %9681  ;;  %9765 = vadd.xlane.f32.xlu0 %v9764_v62  ;;  %s14037_s2 = scalar_lea.vmem %s10820_s8, 8192  ;;  %p14042_p1 = scmp.lt.s32.totalorder %s10820_s8, %s10820_s8 }
0x2bb9   :  { %v18408_v24 = vsub.f32 %v18306_v49, %v9695_v34  ;;  %v9698_v36 = vmul.f32 0.03125, %v9682_v54  ;;  %v9761_v19 = vsel %vm299_vm1, %v9725_v1, 0.0  ;;  %v9728_v6 = vmul.f32 %v18402_v33, %v18402_v33  ;;  %p14038_p0 = scmp.ne.s32.totalorder %s10820_s8, %s14037_s2  ;;  %p14043_p2 = scmp.lt.s32.totalorder %s14037_s2, %s14037_s2 }
0x2bba   :  { %9762 = vadd.xlane.f32.xlu1 %v9761_v19  ;;  %v9679_v40 = vpop.xlane.xlu1 %9678 }
0x2bbb   :  { %v18414_v27 = vsub.f32 %v18315_v43, %v9698_v36  ;;  %v9697_v16 = vmul.f32 0.03125, %v9679_v40  ;;  %v9770_v21 = vsel %vm299_vm1, %v9728_v6, 0.0  ;;  %v9727_v4 = vmul.f32 %v18408_v24, %v18408_v24  ;;  %p14044_p3 = por %p14043_p2, %p14042_p1 }
0x2bbc   :  { %9771 = vadd.xlane.f32.xlu0 %v9770_v21  ;;  %v9736_v49 = vpop.xlane.xlu0 %9735 }
0x2bbd   :  { %v18420_v10 = vsub.f32 %v18326_v8, %v9697_v16  ;;  %v9780_v55 = vmul.f32 0.03125, %v9736_v49  ;;  %v9767_v14 = vsel %vm299_vm1, %v9727_v4, 0.0  ;;  %v9730_v17 = vmul.f32 %v18414_v27, %v18414_v27  ;;  %p14045_p4 = pnand %p14044_p3, %p14038_p0 }
0x2bbe   :  { %9768 = vadd.xlane.f32.xlu1 %v9767_v14  ;;  %v9733_v43 = vpop.xlane.xlu1 %9732 }
0x2bbf   :  { %v9796_v38 = vadd.f32 1e-09, %v9780_v55  ;;  %v9779_v37 = vmul.f32 0.03125, %v9733_v43  ;;  %v9776_v5 = vsel %vm299_vm1, %v9730_v17, 0.0  ;;  %v9729_v39 = vmul.f32 %v18420_v10, %v18420_v10 }
0x2bc0   :  { %9777 = vadd.xlane.f32.xlu0 %v9776_v5  ;;  %v9742_v32 = vpop.xlane.xlu0 %9741 }
0x2bc1   :  { %13973 = vrsqrt.f32 %v9796_v38  ;;  %v9795_v8 = vadd.f32 1e-09, %v9779_v37  ;;  %v9782_v58 = vmul.f32 0.03125, %v9742_v32  ;;  %v9773_v18 = vsel %vm299_vm1, %v9729_v39, 0.0  ;;  %v11396_v39 = vld [vmem:[%s18981_s11 + $0x70] sm:$0xff]  ;;  %v11395_v32 = vld [vmem:[%s18981_s11 + $0x68] sm:$0xff] }
0x2bc2   :  { %9774 = vadd.xlane.f32.xlu1 %v9773_v18  ;;  %v9739_v11 = vpop.xlane.xlu1 %9738  ;;  %v11392_v18 = vld [vmem:[%s18981_s11 + $0x50] sm:$0xff] }
0x2bc3   :  { %13975 = vrsqrt.f32 %v9795_v8  ;;  %v9798_v15 = vadd.f32 1e-09, %v9782_v58  ;;  %v9781_v31 = vmul.f32 0.03125, %v9739_v11  ;;  %v11394_v8 = vld [vmem:[%s18981_s11 + $0x60] sm:$0xff]  ;;  %v11393_v58 = vld [vmem:[%s18981_s11 + $0x58] sm:$0xff]  ;;  %v11391_v11 = vld [vmem:[%s18981_s11 + $0x48] sm:$0xff] }
0x2bc4   :  { %v9748_v13 = vpop.xlane.xlu0 %9747 }
0x2bc5   :  { %13977 = vrsqrt.f32 %v9798_v15  ;;  %v9797_v48 = vadd.f32 1e-09, %v9781_v31  ;;  %v9784_v35 = vmul.f32 0.03125, %v9748_v13  ;;  %v11390_v15 = vld [vmem:[%s18981_s11 + $0x40] sm:$0xff] }
0x2bc6   :  { %v9745_v22 = vpop.xlane.xlu1 %9744 }
0x2bc7   :  { %13979 = vrsqrt.f32 %v9797_v48  ;;  %v9800_v41 = vadd.f32 1e-09, %v9784_v35  ;;  %v9783_v52 = vmul.f32 0.03125, %v9745_v22 }
0x2bc8   :  { %v9754_v42 = vpop.xlane.xlu0 %9753 }
0x2bc9   :  { %13981 = vrsqrt.f32 %v9800_v41  ;;  %v9799_v46 = vadd.f32 1e-09, %v9783_v52  ;;  %v9786_v63 = vmul.f32 0.03125, %v9754_v42 }
0x2bca   :  { %v9751_v45 = vpop.xlane.xlu1 %9750 }
0x2bcb   :  { %13983 = vrsqrt.f32 %v9799_v46  ;;  %v9802_v2 = vadd.f32 1e-09, %v9786_v63  ;;  %v9785_v0 = vmul.f32 0.03125, %v9751_v45 }
0x2bcd   :  { %13985 = vrsqrt.f32 %v9802_v2  ;;  %v9801_v44 = vadd.f32 1e-09, %v9785_v0 }
0x2bce   :  { %v13974_v20 = vpop.eup %13973 }
0x2bcf   :  { %v9828_v28 = vmul.f32 %v13974_v20, %v18303_v23  ;;  %13987 = vrsqrt.f32 %v9801_v44 }
0x2bd0   :  { %v13976_v61 = vpop.eup %13975 }
0x2bd1   :  { %v9827_v51 = vmul.f32 %v13976_v61, %v18312_v9  ;;  %v9850_v47 = vmul.f32 %v18432_v12, %v9828_v28 }
0x2bd2   :  { %v13978_v25 = vpop.eup %13977 }
0x2bd3   :  { %v9830_v34 = vmul.f32 %v13978_v25, %v18323_v26  ;;  %v9849_v62 = vmul.f32 %v18432_v12, %v9827_v51  ;;  %v18449_v9 = vadd.f32 %v18440_v50, %v9850_v47 }
0x2bd4   :  { %v13980_v1 = vpop.eup %13979 }
0x2bd5   :  { %v18445_v54 = vadd.f32 %v18440_v50, %v9849_v62  ;;  %v9829_v23 = vmul.f32 %v13980_v1, %v18331_v30  ;;  %v9852_v19 = vmul.f32 %v18432_v12, %v9830_v34 }
0x2bd6   :  { %v13982_v36 = vpop.eup %13981 }
0x2bd7   :  { %v9832_v6 = vmul.f32 %v13982_v36, %v18338_v29  ;;  %13284 = vmatprep.mubr.msk.f32.mxu1 %vm299_vm1, %v18445_v54  ;;  %v9851_v26 = vmul.f32 %v18432_v12, %v9829_v23  ;;  %v18463_v4 = vadd.f32 %v18440_v50, %v9852_v19 }
0x2bd8   :  { %v13984_v40 = vpop.eup %13983  ;;  %13285 = vmatmul.mubr.msk.f32.vlgmr.msra.gmra.mxu1 %vm299_vm1, %v18449_v9 }
0x2bd9   :  { %v18459_v16 = vadd.f32 %v18440_v50, %v9851_v26  ;;  %v9831_v30 = vmul.f32 %v13984_v40, %v18344_v3  ;;  %v9854_v29 = vmul.f32 %v18432_v12, %v9832_v6 }
0x2bda   :  { %v13986_v21 = vpop.eup %13985 }
0x2bdb   :  { %v9834_v49 = vmul.f32 %v13986_v21, %v18350_v60  ;;  %13287 = vmatprep.mubr.msk.f32.mxu1 %vm299_vm1, %v18459_v16  ;;  %v9853_v55 = vmul.f32 %v18432_v12, %v9831_v30  ;;  %v18477_v43 = vadd.f32 %v18440_v50, %v9854_v29 }
0x2bdc   :  { %v13988_v14 = vpop.eup %13987  ;;  %13288 = vmatmul.mubr.msk.f32.gmra.mxu1 %vm299_vm1, %v18463_v4 }
0x2bdd   :  { %v18473_v17 = vadd.f32 %v18440_v50, %v9853_v55  ;;  %v9833_v3 = vmul.f32 %v13988_v14, %v18356_v56  ;;  %v9856_v38 = vmul.f32 %v18432_v12, %v9834_v49  ;;  %v11397_v56 = vld [vmem:[%s18981_s11 + $0x78] sm:$0xff] }
0x2bde   :  { %13308 = vmatprep.subr.mxu0 %v11397_v56 }
0x2bdf   :  { %13290 = vmatprep.mubr.msk.f32.mxu1 %vm299_vm1, %v18473_v17  ;;  %v9855_v60 = vmul.f32 %v18432_v12, %v9833_v3  ;;  %v18489_v5 = vadd.f32 %v18440_v50, %v9856_v38  ;;  %13309 = vmatpush3.msra.mxu0 %v11397_v56 }
0x2be0   :  { %13291 = vmatmul.mubr.msk.f32.gmra.mxu1 %vm299_vm1, %v18477_v43  ;;  %13310 = vmatprep.subr.mxu0 %v11396_v39 }
0x2be1   :  { %v18486_v37 = vadd.f32 %v18440_v50, %v9855_v60  ;;  %13311 = vmatpush3.msra.mxu0 %v11396_v39 }
0x2be2   :  { %13312 = vmatprep.subr.mxu0 %v11395_v32 }
0x2be3   :  { %13293 = vmatprep.mubr.msk.f32.mxu1 %vm299_vm1, %v18486_v37  ;;  %13313 = vmatpush3.msra.mxu0 %v11395_v32 }
0x2be4   :  { %13294 = vmatmul.mubr.msk.f32.gmra.mxu1 %vm299_vm1, %v18489_v5  ;;  %13314 = vmatprep.subr.mxu0 %v11394_v8 }
0x2be5   :  { %13315 = vmatpush3.msra.mxu0 %v11394_v8 }
0x2be6   :  { %13316 = vmatprep.subr.mxu0 %v11393_v58 }
0x2be7   :  { %13317 = vmatpush3.msra.mxu0 %v11393_v58 }
0x2be8   :  { %13318 = vmatprep.subr.mxu0 %v11392_v18 }
0x2be9   :  { %13319 = vmatpush3.msra.mxu0 %v11392_v18 }
0x2bea   :  { %13320 = vmatprep.subr.mxu0 %v11391_v11 }
0x2beb   :  { %13321 = vmatpush3.msra.mxu0 %v11391_v11 }
0x2bec   :  { %13322 = vmatprep.subr.mxu0 %v11390_v15 }
0x2bed   :  { %13323 = vmatpush3.msra.mxu0 %v11390_v15 }
0x2c3b   :  { %v9760_v31 = vpop.xlane.xlu0 %9759 }
0x2c3c   :  { %v9788_v13 = vmul.f32 0.03125, %v9760_v31 }
0x2c3d   :  { %v9757_v48 = vpop.xlane.xlu1 %9756 }
0x2c3e   :  { %v9804_v35 = vadd.f32 1e-09, %v9788_v13  ;;  %v9787_v22 = vmul.f32 0.03125, %v9757_v48 }
0x2c40   :  { %13989 = vrsqrt.f32 %v9804_v35  ;;  %v9803_v41 = vadd.f32 1e-09, %v9787_v22 }
0x2c41   :  { %v9766_v52 = vpop.xlane.xlu0 %9765 }
0x2c42   :  { %13991 = vrsqrt.f32 %v9803_v41  ;;  %v9790_v42 = vmul.f32 0.03125, %v9766_v52 }
0x2c43   :  { %v9763_v46 = vpop.xlane.xlu1 %9762 }
0x2c44   :  { %v9806_v63 = vadd.f32 1e-09, %v9790_v42  ;;  %v9789_v45 = vmul.f32 0.03125, %v9763_v46 }
0x2c45   :  { %v9772_v2 = vpop.xlane.xlu0 %9771 }
0x2c46   :  { %13993 = vrsqrt.f32 %v9806_v63  ;;  %v9805_v0 = vadd.f32 1e-09, %v9789_v45  ;;  %v9792_v44 = vmul.f32 0.03125, %v9772_v2 }
0x2c47   :  { %v9769_v20 = vpop.xlane.xlu1 %9768 }
0x2c48   :  { %13995 = vrsqrt.f32 %v9805_v0  ;;  %v9808_v28 = vadd.f32 1e-09, %v9792_v44  ;;  %v9791_v61 = vmul.f32 0.03125, %v9769_v20 }
0x2c49   :  { %v9778_v51 = vpop.xlane.xlu0 %9777 }
0x2c4a   :  { %13997 = vrsqrt.f32 %v9808_v28  ;;  %v9807_v25 = vadd.f32 1e-09, %v9791_v61  ;;  %v9794_v47 = vmul.f32 0.03125, %v9778_v51 }
0x2c4b   :  { %v9775_v34 = vpop.xlane.xlu1 %9774 }
0x2c4c   :  { %13999 = vrsqrt.f32 %v9807_v25  ;;  %v9810_v62 = vadd.f32 1e-09, %v9794_v47  ;;  %v9793_v1 = vmul.f32 0.03125, %v9775_v34 }
0x2c4d   :  { %v13990_v23 = vpop.eup %13989 }
0x2c4e   :  { %v9836_v36 = vmul.f32 %v13990_v23, %v18382_v7  ;;  %14001 = vrsqrt.f32 %v9810_v62  ;;  %v9809_v19 = vadd.f32 1e-09, %v9793_v1 }
0x2c4f   :  { %v13992_v6 = vpop.eup %13991 }
0x2c50   :  { %14003 = vrsqrt.f32 %v9809_v19  ;;  %v9835_v26 = vmul.f32 %v13992_v6, %v18385_v53  ;;  %v9858_v40 = vmul.f32 %v18432_v12, %v9836_v36 }
0x2c52   :  { %v9857_v30 = vmul.f32 %v18432_v12, %v9835_v26  ;;  %v18528_v14 = vadd.f32 %v18440_v50, %v9858_v40 }
0x2c53   :  { %v13994_v21 = vpop.eup %13993 }
0x2c54   :  { %v9838_v29 = vmul.f32 %v13994_v21, %v18393_v59  ;;  %v18525_v49 = vadd.f32 %v18440_v50, %v9857_v30 }
0x2c55   :  { %v13996_v55 = vpop.eup %13995 }
0x2c56   :  { %13296 = vmatprep.mubr.msk.f32.mxu1 %vm299_vm1, %v18525_v49  ;;  %v9837_v7 = vmul.f32 %v13996_v55, %v18397_v57  ;;  %v9860_v3 = vmul.f32 %v18432_v12, %v9838_v29 }
0x2c57   :  { %v13998_v53 = vpop.eup %13997  ;;  %13297 = vmatmul.mubr.msk.f32.gmra.mxu1 %vm299_vm1, %v18528_v14 }
0x2c58   :  { %v9840_v59 = vmul.f32 %v13998_v53, %v18402_v33  ;;  %v9859_v38 = vmul.f32 %v18432_v12, %v9837_v7  ;;  %v18543_v8 = vadd.f32 %v18440_v50, %v9860_v3 }
0x2c59   :  { %v14000_v60 = vpop.eup %13999 }
0x2c5a   :  { %v18539_v56 = vadd.f32 %v18440_v50, %v9859_v38  ;;  %v9839_v39 = vmul.f32 %v14000_v60, %v18408_v24  ;;  %v9862_v57 = vmul.f32 %v18432_v12, %v9840_v59 }
0x2c5b   :  { %v14002_v32 = vpop.eup %14001 }
0x2c5c   :  { %v9842_v58 = vmul.f32 %v14002_v32, %v18414_v27  ;;  %13299 = vmatprep.mubr.msk.f32.mxu1 %vm299_vm1, %v18539_v56  ;;  %v9861_v33 = vmul.f32 %v18432_v12, %v9839_v39  ;;  %v18557_v15 = vadd.f32 %v18440_v50, %v9862_v57 }
0x2c5d   :  { %v14004_v18 = vpop.eup %14003  ;;  %13300 = vmatmul.mubr.msk.f32.gmra.mxu1 %vm299_vm1, %v18543_v8 }
0x2c5e   :  { %v18553_v11 = vadd.f32 %v18440_v50, %v9861_v33  ;;  %v9841_v24 = vmul.f32 %v14004_v18, %v18420_v10  ;;  %v9864_v31 = vmul.f32 %v18432_v12, %v9842_v58  ;;  %v11373_v10 = vld [vmem:[%s18980_s10 + $0x1] ss:$0 sm:$0xff] }
0x2c60   :  { %13302 = vmatprep.mubr.msk.f32.mxu1 %vm299_vm1, %v18553_v11  ;;  %v9863_v27 = vmul.f32 %v18432_v12, %v9841_v24  ;;  %v18569_v48 = vadd.f32 %v18440_v50, %v9864_v31 }
0x2c61   :  { %13303 = vmatmul.mubr.msk.f32.gmra.mxu1 %vm299_vm1, %v18557_v15 }
0x2c62   :  { %v18566_v13 = vadd.f32 %v18440_v50, %v9863_v27 }
0x2c64   :  { %13305 = vmatprep.mubr.msk.f32.mxu1 %vm299_vm1, %v18566_v13 }
0x2c65   :  { %13306 = vmatmul.mubr.msk.f32.gmra.mxu1 %vm299_vm1, %v18569_v48 }
0x2c98   :  { %v13286_v12 = vpop.f32.mrf.mxu1 }
0x2c99   :  { %v10020_v35 = vadd.f32 %v13286_v12, %v11373_v10 }
0x2c9a   :  { %v10014_v22 = vpop.f32.mrf.mxu1 }
0x2c9b   :  { %v10015_v41 = vadd.f32 %v11373_v10, %v10014_v22  ;;  %v10094_v46 = vmax.f32 %v10020_v35, 0.0  ;;  %v18597_v35 = vld [vmem:[%s18982_s12 + $0x1] ss:$0 sm:$0xff] }
0x2c9c   :  { %v13289_v52 = vpop.f32.mrf.mxu1 }
0x2c9d   :  { %v10093_v42 = vmax.f32 %v10015_v41, 0.0  ;;  %v10030_v63 = vadd.f32 %v13289_v52, %v11373_v10 }
0x2c9e   :  { %v10024_v50 = vpop.f32.mrf.mxu1 }
0x2c9f   :  { %v10025_v45 = vadd.f32 %v11373_v10, %v10024_v50  ;;  %13324 = vmatprep.mubr.msk.f32.mxu0 %vm654_vm2, %v10093_v42  ;;  %v10096_v44 = vmax.f32 %v10030_v63, 0.0 }
0x2ca0   :  { %v13292_v2 = vpop.f32.mrf.mxu1  ;;  %13325 = vmatmul.mubr.msk.f32.vlgmr.msra.gmra.mxu0 %vm654_vm2, %v10094_v46 }
0x2ca1   :  { %v10095_v0 = vmax.f32 %v10025_v45, 0.0  ;;  %v10040_v20 = vadd.f32 %v13292_v2, %v11373_v10 }
0x2ca2   :  { %v10034_v28 = vpop.f32.mrf.mxu1 }
0x2ca3   :  { %v10035_v61 = vadd.f32 %v11373_v10, %v10034_v28  ;;  %13327 = vmatprep.mubr.msk.f32.mxu0 %vm654_vm2, %v10095_v0  ;;  %v10098_v47 = vmax.f32 %v10040_v20, 0.0 }
0x2ca4   :  { %v13295_v51 = vpop.f32.mrf.mxu1  ;;  %13328 = vmatmul.mubr.msk.f32.gmra.mxu0 %vm654_vm2, %v10096_v44 }
0x2ca5   :  { %v10097_v25 = vmax.f32 %v10035_v61, 0.0  ;;  %v10050_v34 = vadd.f32 %v13295_v51, %v11373_v10 }
0x2ca6   :  { %v10044_v62 = vpop.f32.mrf.mxu1 }
0x2ca7   :  { %v10045_v1 = vadd.f32 %v11373_v10, %v10044_v62  ;;  %13330 = vmatprep.mubr.msk.f32.mxu0 %vm654_vm2, %v10097_v25  ;;  %v10100_v36 = vmax.f32 %v10050_v34, 0.0 }
0x2ca8   :  { %13331 = vmatmul.mubr.msk.f32.gmra.mxu0 %vm654_vm2, %v10098_v47 }
0x2ca9   :  { %v10099_v23 = vmax.f32 %v10045_v1, 0.0 }
0x2cab   :  { %13333 = vmatprep.mubr.msk.f32.mxu0 %vm654_vm2, %v10099_v23 }
0x2cac   :  { %13334 = vmatmul.mubr.msk.f32.gmra.mxu0 %vm654_vm2, %v10100_v36 }
0x2d17   :  { %v13298_v19 = vpop.f32.mrf.mxu1 }
0x2d18   :  { %v10060_v6 = vadd.f32 %v13298_v19, %v11373_v10 }
0x2d19   :  { %v10054_v26 = vpop.f32.mrf.mxu1 }
0x2d1a   :  { %v10055_v40 = vadd.f32 %v11373_v10, %v10054_v26  ;;  %v10102_v21 = vmax.f32 %v10060_v6, 0.0 }
0x2d1c   :  { %v10101_v30 = vmax.f32 %v10055_v40, 0.0 }
0x2d1d   :  { %v13301_v29 = vpop.f32.mrf.mxu1 }
0x2d1e   :  { %13336 = vmatprep.mubr.msk.f32.mxu0 %vm654_vm2, %v10101_v30  ;;  %v10070_v55 = vadd.f32 %v13301_v29, %v11373_v10 }
0x2d1f   :  { %v10064_v7 = vpop.f32.mrf.mxu1  ;;  %13337 = vmatmul.mubr.msk.f32.gmra.mxu0 %vm654_vm2, %v10102_v21 }
0x2d20   :  { %v10065_v53 = vadd.f32 %v11373_v10, %v10064_v7  ;;  %v10104_v38 = vmax.f32 %v10070_v55, 0.0 }
0x2d21   :  { %v13304_v3 = vpop.f32.mrf.mxu1 }
0x2d22   :  { %v10103_v59 = vmax.f32 %v10065_v53, 0.0  ;;  %v10080_v60 = vadd.f32 %v13304_v3, %v11373_v10 }
0x2d23   :  { %v10074_v39 = vpop.f32.mrf.mxu1 }
0x2d24   :  { %v10075_v32 = vadd.f32 %v11373_v10, %v10074_v39  ;;  %13339 = vmatprep.mubr.msk.f32.mxu0 %vm654_vm2, %v10103_v59  ;;  %v10106_v33 = vmax.f32 %v10080_v60, 0.0 }
0x2d25   :  { %v13307_v57 = vpop.f32.mrf.mxu1  ;;  %13340 = vmatmul.mubr.msk.f32.gmra.mxu0 %vm654_vm2, %v10104_v38 }
0x2d26   :  { %v10105_v58 = vmax.f32 %v10075_v32, 0.0  ;;  %v10090_v18 = vadd.f32 %v13307_v57, %v11373_v10 }
0x2d27   :  { %v10084_v24 = vpop.f32.mrf.mxu1 }
0x2d28   :  { %v10085_v31 = vadd.f32 %v11373_v10, %v10084_v24  ;;  %13342 = vmatprep.mubr.msk.f32.mxu0 %vm654_vm2, %v10105_v58  ;;  %v10108_v12 = vmax.f32 %v10090_v18, 0.0 }
0x2d29   :  { %13343 = vmatmul.mubr.msk.f32.gmra.mxu0 %vm654_vm2, %v10106_v33 }
0x2d2a   :  { %v10107_v27 = vmax.f32 %v10085_v31, 0.0 }
0x2d2c   :  { %13345 = vmatprep.mubr.msk.f32.mxu0 %vm654_vm2, %v10107_v27 }
0x2d2d   :  { %13346 = vmatmul.mubr.msk.f32.gmra.mxu0 %vm654_vm2, %v10108_v12 }
0x2d60   :  { %v13326_v22 = vpop.f32.mrf.mxu0 }
0x2d61   :  { %v10246_v41 = vadd.f32 %v13326_v22, %v18597_v35 }
0x2d62   :  { %v10240_v52 = vpop.f32.mrf.mxu0 }
0x2d63   :  { %v18601_v10 = vadd.f32 %v10246_v41, %v18449_v9  ;;  %v10241_v42 = vadd.f32 %v18597_v35, %v10240_v52 }
0x2d64   :  { %v13329_v46 = vpop.f32.mrf.mxu0 }
0x2d65   :  { %v18605_v63 = vadd.f32 %v10241_v42, %v18445_v54  ;;  %v10256_v50 = vadd.f32 %v13329_v46, %v18597_v35  ;;  %v10342_v45 = vsel %vm299_vm1, %v18601_v10, 0.0 }
0x2d66   :  { %10343 = vadd.xlane.f32.xlu0 %v10342_v45  ;;  %v10250_v2 = vpop.f32.mrf.mxu0 }
0x2d67   :  { %v18611_v0 = vadd.f32 %v10256_v50, %v18463_v4  ;;  %v10251_v44 = vadd.f32 %v18597_v35, %v10250_v2  ;;  %v10339_v9 = vsel %vm299_vm1, %v18605_v63, 0.0 }
0x2d68   :  { %10340 = vadd.xlane.f32.xlu1 %v10339_v9  ;;  %v13332_v20 = vpop.f32.mrf.mxu0 }
0x2d69   :  { %v18617_v54 = vadd.f32 %v10251_v44, %v18459_v16  ;;  %v10266_v28 = vadd.f32 %v13332_v20, %v18597_v35  ;;  %v10348_v61 = vsel %vm299_vm1, %v18611_v0, 0.0 }
0x2d6a   :  { %10349 = vadd.xlane.f32.xlu0 %v10348_v61  ;;  %v10260_v51 = vpop.f32.mrf.mxu0 }
0x2d6b   :  { %v18623_v4 = vadd.f32 %v10266_v28, %v18477_v43  ;;  %v10261_v25 = vadd.f32 %v18597_v35, %v10260_v51  ;;  %v10345_v47 = vsel %vm299_vm1, %v18617_v54, 0.0 }
0x2d6c   :  { %10346 = vadd.xlane.f32.xlu1 %v10345_v47  ;;  %v13335_v34 = vpop.f32.mrf.mxu0 }
0x2d6d   :  { %v18629_v16 = vadd.f32 %v10261_v25, %v18473_v17  ;;  %v10276_v62 = vadd.f32 %v13335_v34, %v18597_v35  ;;  %v10354_v1 = vsel %vm299_vm1, %v18623_v4, 0.0 }
0x2d6e   :  { %10355 = vadd.xlane.f32.xlu0 %v10354_v1  ;;  %v10270_v23 = vpop.f32.mrf.mxu0 }
0x2d6f   :  { %v18635_v43 = vadd.f32 %v10276_v62, %v18489_v5  ;;  %v10271_v36 = vadd.f32 %v18597_v35, %v10270_v23  ;;  %v10351_v19 = vsel %vm299_vm1, %v18629_v16, 0.0 }
0x2d70   :  { %10352 = vadd.xlane.f32.xlu1 %v10351_v19 }
0x2d71   :  { %v18641_v6 = vadd.f32 %v10271_v36, %v18486_v37  ;;  %v10360_v17 = vsel %vm299_vm1, %v18635_v43, 0.0 }
0x2d72   :  { %10361 = vadd.xlane.f32.xlu0 %v10360_v17 }
0x2d73   :  { %v10357_v26 = vsel %vm299_vm1, %v18641_v6, 0.0 }
0x2d74   :  { %10358 = vadd.xlane.f32.xlu1 %v10357_v26 }
0x2ddf   :  { %v13338_v40 = vpop.f32.mrf.mxu0 }
0x2de0   :  { %v10286_v5 = vadd.f32 %v13338_v40, %v18597_v35 }
0x2de1   :  { %v10280_v30 = vpop.f32.mrf.mxu0 }
0x2de2   :  { %v18649_v21 = vadd.f32 %v10286_v5, %v18528_v14  ;;  %v10281_v29 = vadd.f32 %v18597_v35, %v10280_v30 }
0x2de4   :  { %v18653_v37 = vadd.f32 %v10281_v29, %v18525_v49  ;;  %v10366_v55 = vsel %vm299_vm1, %v18649_v21, 0.0 }
0x2de5   :  { %10367 = vadd.xlane.f32.xlu0 %v10366_v55  ;;  %v13341_v7 = vpop.f32.mrf.mxu0 }
0x2de6   :  { %v10296_v53 = vadd.f32 %v13341_v7, %v18597_v35  ;;  %v10363_v3 = vsel %vm299_vm1, %v18653_v37, 0.0 }
0x2de7   :  { %10364 = vadd.xlane.f32.xlu1 %v10363_v3  ;;  %v10290_v59 = vpop.f32.mrf.mxu0 }
0x2de8   :  { %v18661_v14 = vadd.f32 %v10296_v53, %v18543_v8  ;;  %v10291_v38 = vadd.f32 %v18597_v35, %v10290_v59 }
0x2de9   :  { %v13344_v60 = vpop.f32.mrf.mxu0 }
0x2dea   :  { %v18665_v49 = vadd.f32 %v10291_v38, %v18539_v56  ;;  %v10306_v39 = vadd.f32 %v13344_v60, %v18597_v35  ;;  %v10372_v32 = vsel %vm299_vm1, %v18661_v14, 0.0  ;;  %v10593_v38 = vld [vmem:[%s18985_s15 + $0x10] sm:$0xff]  ;;  %v10592_v60 = vld [vmem:[%s18985_s15 + $0x8] sm:$0xff] }
0x2deb   :  { %10373 = vadd.xlane.f32.xlu0 %v10372_v32  ;;  %v10300_v57 = vpop.f32.mrf.mxu0 }
0x2dec   :  { %v18671_v58 = vadd.f32 %v10306_v39, %v18557_v15  ;;  %v10301_v33 = vadd.f32 %v18597_v35, %v10300_v57  ;;  %v10369_v8 = vsel %vm299_vm1, %v18665_v49, 0.0  ;;  %v10591_v39 = vld [vmem:[%s18985_s15] sm:$0xff] }
0x2ded   :  { %10370 = vadd.xlane.f32.xlu1 %v10369_v8  ;;  %v13347_v18 = vpop.f32.mrf.mxu0 }
0x2dee   :  { %v18677_v56 = vadd.f32 %v10301_v33, %v18553_v11  ;;  %v10316_v24 = vadd.f32 %v13347_v18, %v18597_v35  ;;  %v10378_v31 = vsel %vm299_vm1, %v18671_v58, 0.0 }
0x2def   :  { %v10344_v27 = vpop.xlane.xlu0 %10343  ;;  %10379 = vadd.xlane.f32.xlu0 %v10378_v31  ;;  %v10310_v12 = vpop.f32.mrf.mxu0 }
0x2df0   :  { %v18683_v15 = vadd.f32 %v10316_v24, %v18569_v48  ;;  %v10388_v22 = vmul.f32 0.03125, %v10344_v27  ;;  %v10311_v41 = vadd.f32 %v18597_v35, %v10310_v12  ;;  %v10375_v52 = vsel %vm299_vm1, %v18677_v56, 0.0 }
0x2df1   :  { %10376 = vadd.xlane.f32.xlu1 %v10375_v52  ;;  %v10341_v11 = vpop.xlane.xlu1 %10340 }
0x2df2   :  { %v18689_v42 = vsub.f32 %v18601_v10, %v10388_v22  ;;  %v18692_v46 = vadd.f32 %v10311_v41, %v18566_v13  ;;  %v10387_v50 = vmul.f32 0.03125, %v10341_v11  ;;  %v10384_v45 = vsel %vm299_vm1, %v18683_v15, 0.0 }
0x2df3   :  { %v10350_v48 = vpop.xlane.xlu0 %10349  ;;  %10385 = vadd.xlane.f32.xlu0 %v10384_v45 }
0x2df4   :  { %v18697_v2 = vsub.f32 %v18605_v63, %v10387_v50  ;;  %v10390_v35 = vmul.f32 0.03125, %v10350_v48  ;;  %v10381_v44 = vsel %vm299_vm1, %v18692_v46, 0.0  ;;  %v10420_v10 = vmul.f32 %v18689_v42, %v18689_v42 }
0x2df5   :  { %10382 = vadd.xlane.f32.xlu1 %v10381_v44  ;;  %v10347_v9 = vpop.xlane.xlu1 %10346 }
0x2df6   :  { %v18704_v13 = vsub.f32 %v18611_v0, %v10390_v35  ;;  %v10389_v20 = vmul.f32 0.03125, %v10347_v9  ;;  %v10438_v28 = vsel %vm299_vm1, %v10420_v10, 0.0  ;;  %v10419_v61 = vmul.f32 %v18697_v2, %v18697_v2 }
0x2df7   :  { %v10356_v63 = vpop.xlane.xlu0 %10355  ;;  %10439 = vadd.xlane.f32.xlu0 %v10438_v28 }
0x2df8   :  { %v18710_v51 = vsub.f32 %v18617_v54, %v10389_v20  ;;  %v10392_v25 = vmul.f32 0.03125, %v10356_v63  ;;  %v10435_v47 = vsel %vm299_vm1, %v10419_v61, 0.0  ;;  %v10422_v34 = vmul.f32 %v18704_v13, %v18704_v13 }
0x2df9   :  { %10436 = vadd.xlane.f32.xlu1 %v10435_v47  ;;  %v10353_v0 = vpop.xlane.xlu1 %10352 }
0x2dfa   :  { %v18716_v62 = vsub.f32 %v18623_v4, %v10392_v25  ;;  %v10391_v1 = vmul.f32 0.03125, %v10353_v0  ;;  %v10444_v23 = vsel %vm299_vm1, %v10422_v34, 0.0  ;;  %v10421_v36 = vmul.f32 %v18710_v51, %v18710_v51 }
0x2dfb   :  { %v10362_v19 = vpop.xlane.xlu0 %10361  ;;  %10445 = vadd.xlane.f32.xlu0 %v10444_v23 }
0x2dfc   :  { %v18722_v54 = vsub.f32 %v18629_v16, %v10391_v1  ;;  %v10394_v17 = vmul.f32 0.03125, %v10362_v19  ;;  %v10441_v26 = vsel %vm299_vm1, %v10421_v36, 0.0  ;;  %v10424_v40 = vmul.f32 %v18716_v62, %v18716_v62 }
0x2dfd   :  { %10442 = vadd.xlane.f32.xlu1 %v10441_v26  ;;  %v10359_v4 = vpop.xlane.xlu1 %10358 }
0x2dfe   :  { %v18728_v5 = vsub.f32 %v18635_v43, %v10394_v17  ;;  %v10393_v30 = vmul.f32 0.03125, %v10359_v4  ;;  %v10450_v29 = vsel %vm299_vm1, %v10424_v40, 0.0  ;;  %v10423_v55 = vmul.f32 %v18722_v54, %v18722_v54 }
0x2dff   :  { %10451 = vadd.xlane.f32.xlu0 %v10450_v29 }
0x2e00   :  { %v18734_v16 = vsub.f32 %v18641_v6, %v10393_v30  ;;  %v10447_v7 = vsel %vm299_vm1, %v10423_v55, 0.0  ;;  %v10426_v53 = vmul.f32 %v18728_v5, %v18728_v5  ;;  %v10594_v6 = vld [vmem:[%s18985_s15 + $0x18] sm:$0xff] }
0x2e01   :  { %10448 = vadd.xlane.f32.xlu1 %v10447_v7  ;;  %13348 = vmatprep.subr.mxu1 %v10594_v6 }
0x2e02   :  { %v10456_v3 = vsel %vm299_vm1, %v10426_v53, 0.0  ;;  %v10425_v43 = vmul.f32 %v18734_v16, %v18734_v16  ;;  %13349 = vmatpush3.msra.mxu1 %v10594_v6 }
0x2e03   :  { %10457 = vadd.xlane.f32.xlu0 %v10456_v3  ;;  %13350 = vmatprep.subr.mxu1 %v10593_v38 }
0x2e04   :  { %v10453_v59 = vsel %vm299_vm1, %v10425_v43, 0.0  ;;  %13351 = vmatpush3.msra.mxu1 %v10593_v38 }
0x2e05   :  { %10454 = vadd.xlane.f32.xlu1 %v10453_v59  ;;  %13352 = vmatprep.subr.mxu1 %v10592_v60 }
0x2e06   :  { %13353 = vmatpush3.msra.mxu1 %v10592_v60 }
0x2e07   :  { %13354 = vmatprep.subr.mxu1 %v10591_v39 }
0x2e08   :  { %13355 = vmatpush3.msra.mxu1 %v10591_v39 }
0x2e6e   :  { %v10368_v32 = vpop.xlane.xlu0 %10367 }
0x2e6f   :  { %v10396_v57 = vmul.f32 0.03125, %v10368_v32 }
0x2e70   :  { %v10365_v33 = vpop.xlane.xlu1 %10364 }
0x2e71   :  { %v18756_v8 = vsub.f32 %v18649_v21, %v10396_v57  ;;  %v10395_v18 = vmul.f32 0.03125, %v10365_v33 }
0x2e73   :  { %v18759_v24 = vsub.f32 %v18653_v37, %v10395_v18  ;;  %v10428_v31 = vmul.f32 %v18756_v8, %v18756_v8 }
0x2e74   :  { %v10374_v27 = vpop.xlane.xlu0 %10373 }
0x2e75   :  { %v10398_v12 = vmul.f32 0.03125, %v10374_v27  ;;  %v10462_v22 = vsel %vm299_vm1, %v10428_v31, 0.0  ;;  %v10427_v41 = vmul.f32 %v18759_v24, %v18759_v24 }
0x2e76   :  { %10463 = vadd.xlane.f32.xlu0 %v10462_v22  ;;  %v10371_v52 = vpop.xlane.xlu1 %10370 }
0x2e77   :  { %v18767_v11 = vsub.f32 %v18661_v14, %v10398_v12  ;;  %v10397_v21 = vmul.f32 0.03125, %v10371_v52  ;;  %v10459_v50 = vsel %vm299_vm1, %v10427_v41, 0.0  ;;  %v18806_v52 = vld [vmem:[%s18983_s13 + $0x1] ss:$0 sm:$0xff] }
0x2e78   :  { %v10380_v37 = vpop.xlane.xlu0 %10379  ;;  %10460 = vadd.xlane.f32.xlu1 %v10459_v50 }
0x2e79   :  { %v18771_v45 = vsub.f32 %v18665_v49, %v10397_v21  ;;  %v10400_v48 = vmul.f32 0.03125, %v10380_v37  ;;  %v10430_v35 = vmul.f32 %v18767_v11, %v18767_v11 }
0x2e7a   :  { %v10377_v44 = vpop.xlane.xlu1 %10376 }
0x2e7b   :  { %v18776_v10 = vsub.f32 %v18671_v58, %v10400_v48  ;;  %v10399_v9 = vmul.f32 0.03125, %v10377_v44  ;;  %v10468_v14 = vsel %vm299_vm1, %v10430_v35, 0.0  ;;  %v10429_v20 = vmul.f32 %v18771_v45, %v18771_v45  ;;  %v18814_v44 = vld [vmem:[%s18984_s14 + $0x1] ss:$0 sm:$0xff] }
0x2e7c   :  { %10469 = vadd.xlane.f32.xlu0 %v10468_v14  ;;  %v10386_v28 = vpop.xlane.xlu0 %10385 }
0x2e7d   :  { %v18782_v61 = vsub.f32 %v18677_v56, %v10399_v9  ;;  %v10402_v49 = vmul.f32 0.03125, %v10386_v28  ;;  %v10465_v63 = vsel %vm299_vm1, %v10429_v20, 0.0  ;;  %v10432_v25 = vmul.f32 %v18776_v10, %v18776_v10 }
0x2e7e   :  { %10466 = vadd.xlane.f32.xlu1 %v10465_v63  ;;  %v10383_v58 = vpop.xlane.xlu1 %10382 }
0x2e7f   :  { %v18788_v47 = vsub.f32 %v18683_v15, %v10402_v49  ;;  %v10401_v34 = vmul.f32 0.03125, %v10383_v58  ;;  %v10474_v0 = vsel %vm299_vm1, %v10432_v25, 0.0  ;;  %v10431_v1 = vmul.f32 %v18782_v61, %v18782_v61 }
0x2e80   :  { %10475 = vadd.xlane.f32.xlu0 %v10474_v0  ;;  %v10440_v56 = vpop.xlane.xlu0 %10439 }
0x2e81   :  { %v18794_v23 = vsub.f32 %v18692_v46, %v10401_v34  ;;  %v10484_v36 = vmul.f32 0.03125, %v10440_v56  ;;  %v10471_v19 = vsel %vm299_vm1, %v10431_v1, 0.0  ;;  %v10434_v17 = vmul.f32 %v18788_v47, %v18788_v47 }
0x2e82   :  { %10472 = vadd.xlane.f32.xlu1 %v10471_v19  ;;  %v10437_v15 = vpop.xlane.xlu1 %10436 }
0x2e83   :  { %v10500_v26 = vadd.f32 1e-09, %v10484_v36  ;;  %v10483_v40 = vmul.f32 0.03125, %v10437_v15  ;;  %v10480_v4 = vsel %vm299_vm1, %v10434_v17, 0.0  ;;  %v10433_v30 = vmul.f32 %v18794_v23, %v18794_v23 }
0x2e84   :  { %10481 = vadd.xlane.f32.xlu0 %v10480_v4  ;;  %v10446_v29 = vpop.xlane.xlu0 %10445 }
0x2e85   :  { %14005 = vrsqrt.f32 %v10500_v26  ;;  %v10499_v46 = vadd.f32 1e-09, %v10483_v40  ;;  %v10486_v55 = vmul.f32 0.03125, %v10446_v29  ;;  %v10477_v7 = vsel %vm299_vm1, %v10433_v30, 0.0 }
0x2e86   :  { %10478 = vadd.xlane.f32.xlu1 %v10477_v7  ;;  %v10443_v53 = vpop.xlane.xlu1 %10442 }
0x2e87   :  { %14007 = vrsqrt.f32 %v10499_v46  ;;  %v10502_v3 = vadd.f32 1e-09, %v10486_v55  ;;  %v10485_v43 = vmul.f32 0.03125, %v10443_v53 }
0x2e88   :  { %v10452_v59 = vpop.xlane.xlu0 %10451 }
0x2e89   :  { %14009 = vrsqrt.f32 %v10502_v3  ;;  %v10501_v6 = vadd.f32 1e-09, %v10485_v43  ;;  %v10488_v38 = vmul.f32 0.03125, %v10452_v59 }
0x2e8a   :  { %v10449_v60 = vpop.xlane.xlu1 %10448 }
0x2e8b   :  { %14011 = vrsqrt.f32 %v10501_v6  ;;  %v10504_v39 = vadd.f32 1e-09, %v10488_v38  ;;  %v10487_v32 = vmul.f32 0.03125, %v10449_v60 }
0x2e8c   :  { %v10458_v57 = vpop.xlane.xlu0 %10457 }
0x2e8d   :  { %14013 = vrsqrt.f32 %v10504_v39  ;;  %v10503_v33 = vadd.f32 1e-09, %v10487_v32  ;;  %v10490_v18 = vmul.f32 0.03125, %v10458_v57 }
0x2e8e   :  { %v10455_v31 = vpop.xlane.xlu1 %10454 }
0x2e8f   :  { %14015 = vrsqrt.f32 %v10503_v33  ;;  %v10506_v27 = vadd.f32 1e-09, %v10490_v18  ;;  %v10489_v12 = vmul.f32 0.03125, %v10455_v31 }
0x2e91   :  { %14017 = vrsqrt.f32 %v10506_v27  ;;  %v10505_v22 = vadd.f32 1e-09, %v10489_v12 }
0x2e92   :  { %v14006_v41 = vpop.eup %14005 }
0x2e93   :  { %v10532_v21 = vmul.f32 %v14006_v41, %v18689_v42  ;;  %14019 = vrsqrt.f32 %v10505_v22 }
0x2e94   :  { %v14008_v50 = vpop.eup %14007 }
0x2e95   :  { %v10531_v37 = vmul.f32 %v14008_v50, %v18697_v2  ;;  %v10554_v35 = vmul.f32 %v18806_v52, %v10532_v21 }
0x2e96   :  { %v14010_v48 = vpop.eup %14009 }
0x2e97   :  { %v10534_v9 = vmul.f32 %v14010_v48, %v18704_v13  ;;  %v10553_v14 = vmul.f32 %v18806_v52, %v10531_v37  ;;  %v10576_v2 = vadd.f32 %v18814_v44, %v10554_v35 }
0x2e98   :  { %v14012_v20 = vpop.eup %14011 }
0x2e99   :  { %v10575_v28 = vadd.f32 %v18814_v44, %v10553_v14  ;;  %v10533_v42 = vmul.f32 %v14012_v20, %v18710_v51  ;;  %v10556_v63 = vmul.f32 %v18806_v52, %v10534_v9 }
0x2e9a   :  { %v14014_v49 = vpop.eup %14013 }
0x2e9b   :  { %v10536_v25 = vmul.f32 %v14014_v49, %v18716_v62  ;;  %13356 = vmatprep.mubr.msk.f32.mxu1 %vm299_vm1, %v10575_v28  ;;  %v10555_v58 = vmul.f32 %v18806_v52, %v10533_v42  ;;  %v10578_v51 = vadd.f32 %v18814_v44, %v10556_v63 }
0x2e9c   :  { %v14016_v34 = vpop.eup %14015  ;;  %13357 = vmatmul.mubr.msk.f32.vlgmr.msra.gmra.mxu1 %vm299_vm1, %v10576_v2 }
0x2e9d   :  { %v10577_v13 = vadd.f32 %v18814_v44, %v10555_v58  ;;  %v10535_v0 = vmul.f32 %v14016_v34, %v18722_v54  ;;  %v10558_v56 = vmul.f32 %v18806_v52, %v10536_v25 }
0x2e9e   :  { %v14018_v1 = vpop.eup %14017 }
0x2e9f   :  { %v10538_v36 = vmul.f32 %v14018_v1, %v18728_v5  ;;  %13359 = vmatprep.mubr.msk.f32.mxu1 %vm299_vm1, %v10577_v13  ;;  %v10557_v62 = vmul.f32 %v18806_v52, %v10535_v0  ;;  %v10580_v54 = vadd.f32 %v18814_v44, %v10558_v56 }
0x2ea0   :  { %v14020_v19 = vpop.eup %14019  ;;  %13360 = vmatmul.mubr.msk.f32.gmra.mxu1 %vm299_vm1, %v10578_v51 }
0x2ea1   :  { %v10579_v17 = vadd.f32 %v18814_v44, %v10557_v62  ;;  %v10537_v15 = vmul.f32 %v14020_v19, %v18734_v16  ;;  %v10560_v26 = vmul.f32 %v18806_v52, %v10538_v36 }
0x2ea3   :  { %13362 = vmatprep.mubr.msk.f32.mxu1 %vm299_vm1, %v10579_v17  ;;  %v10559_v40 = vmul.f32 %v18806_v52, %v10537_v15  ;;  %v10582_v4 = vadd.f32 %v18814_v44, %v10560_v26 }
0x2ea4   :  { %13363 = vmatmul.mubr.msk.f32.gmra.mxu1 %vm299_vm1, %v10580_v54 }
0x2ea5   :  { %v10581_v5 = vadd.f32 %v18814_v44, %v10559_v40 }
0x2ea7   :  { %13365 = vmatprep.mubr.msk.f32.mxu1 %vm299_vm1, %v10581_v5 }
0x2ea8   :  { %13366 = vmatmul.mubr.msk.f32.gmra.mxu1 %vm299_vm1, %v10582_v4 }
0x2eff   :  { %v10464_v30 = vpop.xlane.xlu0 %10463 }
0x2f00   :  { %v10492_v16 = vmul.f32 0.03125, %v10464_v30 }
0x2f01   :  { %v10461_v29 = vpop.xlane.xlu1 %10460 }
0x2f02   :  { %v10508_v46 = vadd.f32 1e-09, %v10492_v16  ;;  %v10491_v55 = vmul.f32 0.03125, %v10461_v29 }
0x2f04   :  { %14021 = vrsqrt.f32 %v10508_v46  ;;  %v10507_v7 = vadd.f32 1e-09, %v10491_v55 }
0x2f05   :  { %v10470_v53 = vpop.xlane.xlu0 %10469 }
0x2f06   :  { %14023 = vrsqrt.f32 %v10507_v7  ;;  %v10494_v3 = vmul.f32 0.03125, %v10470_v53 }
0x2f07   :  { %v10467_v43 = vpop.xlane.xlu1 %10466 }
0x2f08   :  { %v10510_v59 = vadd.f32 1e-09, %v10494_v3  ;;  %v10493_v6 = vmul.f32 0.03125, %v10467_v43 }
0x2f09   :  { %v10476_v38 = vpop.xlane.xlu0 %10475 }
0x2f0a   :  { %14025 = vrsqrt.f32 %v10510_v59  ;;  %v10509_v60 = vadd.f32 1e-09, %v10493_v6  ;;  %v10496_v39 = vmul.f32 0.03125, %v10476_v38 }
0x2f0b   :  { %v10473_v32 = vpop.xlane.xlu1 %10472 }
0x2f0c   :  { %14027 = vrsqrt.f32 %v10509_v60  ;;  %v10512_v57 = vadd.f32 1e-09, %v10496_v39  ;;  %v10495_v33 = vmul.f32 0.03125, %v10473_v32 }
0x2f0d   :  { %v10482_v18 = vpop.xlane.xlu0 %10481 }
0x2f0e   :  { %14029 = vrsqrt.f32 %v10512_v57  ;;  %v10511_v31 = vadd.f32 1e-09, %v10495_v33  ;;  %v10498_v27 = vmul.f32 0.03125, %v10482_v18 }
0x2f0f   :  { %v10479_v12 = vpop.xlane.xlu1 %10478 }
0x2f10   :  { %14031 = vrsqrt.f32 %v10511_v31  ;;  %v10514_v22 = vadd.f32 1e-09, %v10498_v27  ;;  %v10497_v41 = vmul.f32 0.03125, %v10479_v12 }
0x2f11   :  { %v14022_v21 = vpop.eup %14021 }
0x2f12   :  { %v10540_v50 = vmul.f32 %v14022_v21, %v18756_v8  ;;  %14033 = vrsqrt.f32 %v10514_v22  ;;  %v10513_v37 = vadd.f32 1e-09, %v10497_v41 }
0x2f13   :  { %v14024_v48 = vpop.eup %14023 }
0x2f14   :  { %14035 = vrsqrt.f32 %v10513_v37  ;;  %v10539_v35 = vmul.f32 %v14024_v48, %v18759_v24  ;;  %v10562_v9 = vmul.f32 %v18806_v52, %v10540_v50 }
0x2f16   :  { %v10561_v14 = vmul.f32 %v18806_v52, %v10539_v35  ;;  %v10584_v2 = vadd.f32 %v18814_v44, %v10562_v9 }
0x2f17   :  { %v14026_v20 = vpop.eup %14025 }
0x2f18   :  { %v10542_v28 = vmul.f32 %v14026_v20, %v18767_v11  ;;  %v10583_v42 = vadd.f32 %v18814_v44, %v10561_v14 }
0x2f19   :  { %v14028_v49 = vpop.eup %14027 }
0x2f1a   :  { %13368 = vmatprep.mubr.msk.f32.mxu1 %vm299_vm1, %v10583_v42  ;;  %v10541_v8 = vmul.f32 %v14028_v49, %v18771_v45  ;;  %v10564_v24 = vmul.f32 %v18806_v52, %v10542_v28 }
0x2f1b   :  { %v14030_v63 = vpop.eup %14029  ;;  %13369 = vmatmul.mubr.msk.f32.gmra.mxu1 %vm299_vm1, %v10584_v2 }
0x2f1c   :  { %v10544_v25 = vmul.f32 %v14030_v63, %v18776_v10  ;;  %v10563_v58 = vmul.f32 %v18806_v52, %v10541_v8  ;;  %v10586_v1 = vadd.f32 %v18814_v44, %v10564_v24 }
0x2f1d   :  { %v14032_v34 = vpop.eup %14031 }
0x2f1e   :  { %v10585_v11 = vadd.f32 %v18814_v44, %v10563_v58  ;;  %v10543_v13 = vmul.f32 %v14032_v34, %v18782_v61  ;;  %v10566_v51 = vmul.f32 %v18806_v52, %v10544_v25 }
0x2f1f   :  { %v14034_v0 = vpop.eup %14033 }
0x2f20   :  { %v10546_v45 = vmul.f32 %v14034_v0, %v18788_v47  ;;  %13371 = vmatprep.mubr.msk.f32.mxu1 %vm299_vm1, %v10585_v11  ;;  %v10565_v56 = vmul.f32 %v18806_v52, %v10543_v13  ;;  %v10588_v61 = vadd.f32 %v18814_v44, %v10566_v51 }
0x2f21   :  { %v14036_v36 = vpop.eup %14035  ;;  %13372 = vmatmul.mubr.msk.f32.gmra.mxu1 %vm299_vm1, %v10586_v1 }
0x2f22   :  { %v10587_v10 = vadd.f32 %v18814_v44, %v10565_v56  ;;  %v10545_v62 = vmul.f32 %v14036_v36, %v18794_v23  ;;  %v10568_v19 = vmul.f32 %v18806_v52, %v10546_v45  ;;  %v18880_v23 = vld [vmem:[%s18986_s16] ss:$0 sm:$0xff] }
0x2f24   :  { %13374 = vmatprep.mubr.msk.f32.mxu1 %vm299_vm1, %v10587_v10  ;;  %v10567_v17 = vmul.f32 %v18806_v52, %v10545_v62  ;;  %v10590_v15 = vadd.f32 %v18814_v44, %v10568_v19 }
0x2f25   :  { %13375 = vmatmul.mubr.msk.f32.gmra.mxu1 %vm299_vm1, %v10588_v61 }
0x2f26   :  { %v10589_v47 = vadd.f32 %v18814_v44, %v10567_v17 }
0x2f28   :  { %13377 = vmatprep.mubr.msk.f32.mxu1 %vm299_vm1, %v10589_v47 }
0x2f29   :  { %13378 = vmatmul.mubr.msk.f32.gmra.mxu1 %vm299_vm1, %v10590_v15 }
0x2f5c   :  { %v13358_v54 = vpop.f32.mrf.mxu1 }
0x2f5d   :  { %v10722_v26 = vadd.f32 %v13358_v54, %v18880_v23 }
0x2f5e   :  { %v10716_v52 = vpop.f32.mrf.mxu1 }
0x2f5f   :  { %10797 = vst.msk [vmem:[%s18987_s17 + $0x8] sm:$0xff] %vm10795_vm5, %v10722_v26  ;;  %v10717_v44 = vadd.f32 %v18880_v23, %v10716_v52 }
0x2f60   :  { %v13361_v40 = vpop.f32.mrf.mxu1 }
0x2f61   :  { %10796 = vst.msk [vmem:[%s18987_s17] sm:$0xff] %vm10795_vm5, %v10717_v44  ;;  %v10732_v5 = vadd.f32 %v13361_v40, %v18880_v23 }
0x2f62   :  { %v10726_v4 = vpop.f32.mrf.mxu1 }
0x2f63   :  { %10799 = vst.msk [vmem:[%s18987_s17 + $0x18] sm:$0xff] %vm10795_vm5, %v10732_v5  ;;  %v10727_v30 = vadd.f32 %v18880_v23, %v10726_v4 }
0x2f64   :  { %v13364_v16 = vpop.f32.mrf.mxu1 }
0x2f65   :  { %10798 = vst.msk [vmem:[%s18987_s17 + $0x10] sm:$0xff] %vm10795_vm5, %v10727_v30  ;;  %v10742_v29 = vadd.f32 %v13364_v16, %v18880_v23 }
0x2f66   :  { %v10736_v46 = vpop.f32.mrf.mxu1 }
0x2f67   :  { %10801 = vst.msk [vmem:[%s18987_s17 + $0x28] sm:$0xff] %vm10795_vm5, %v10742_v29  ;;  %v10737_v55 = vadd.f32 %v18880_v23, %v10736_v46 }
0x2f68   :  { %v13367_v7 = vpop.f32.mrf.mxu1 }
0x2f69   :  { %10800 = vst.msk [vmem:[%s18987_s17 + $0x20] sm:$0xff] %vm10795_vm5, %v10737_v55  ;;  %v10752_v53 = vadd.f32 %v13367_v7, %v18880_v23 }
0x2f6a   :  { %v10746_v3 = vpop.f32.mrf.mxu1 }
0x2f6b   :  { %10803 = vst.msk [vmem:[%s18987_s17 + $0x38] sm:$0xff] %vm10795_vm5, %v10752_v53  ;;  %v10747_v43 = vadd.f32 %v18880_v23, %v10746_v3 }
0x2f6d   :  { %10802 = vst.msk [vmem:[%s18987_s17 + $0x30] sm:$0xff] %vm10795_vm5, %v10747_v43 }
0x2f6e   :  { %14048 = shalt.err (!%p14045_p4)
}
0x2f6f   :  { %s14097_s15 = smov 128   ;;  %s14057_s4 = scalar_lea.vmem %s10832_s23, 8192 }
0x2f70   :  { %10825 = dma.vmem_to_hbm [thread:$0]  %s10820_s8, 8192, %s18988_s18, [#allocation3], %s14097_s15, %s14097_s15, %s19177_s20  }
0x2f71   :  { %p14058_p5 = scmp.ne.s32.totalorder %s10832_s23, %s14057_s4  ;;  %p14062_p6 = scmp.lt.s32.totalorder %s10832_s23, %s10832_s23 }
0x2f72   :  { %p14063_p7 = scmp.lt.s32.totalorder %s14057_s4, %s14057_s4 }
0x2f74   :  { %p14064_p8 = por %p14063_p7, %p14062_p6 }
0x2f76   :  { %p14065_p9 = pnand %p14064_p8, %p14058_p5 }
0x2f78   :  { %14068 = shalt.err (!%p14065_p9)
}
0x2f79   :  { %10837 = dma.vmem_to_hbm [thread:$0]  %s10832_s23, 8192, %s18989_s19, [#allocation5], %s14097_s15, %s14097_s15, %s19177_s20  }
0x2fdb   :  { %v13370_v59 = vpop.f32.mrf.mxu1 }
0x2fdc   :  { %v10762_v6 = vadd.f32 %v13370_v59, %v18880_v23 }
0x2fdd   :  { %v10756_v38 = vpop.f32.mrf.mxu1 }
0x2fde   :  { %10805 = vst.msk [vmem:[%s18987_s17 + $0x48] sm:$0xff] %vm10795_vm5, %v10762_v6  ;;  %v10757_v60 = vadd.f32 %v18880_v23, %v10756_v38 }
0x2fe0   :  { %10804 = vst.msk [vmem:[%s18987_s17 + $0x40] sm:$0xff] %vm10795_vm5, %v10757_v60 }
0x2fe1   :  { %v13373_v39 = vpop.f32.mrf.mxu1 }
0x2fe2   :  { %v10772_v32 = vadd.f32 %v13373_v39, %v18880_v23 }
0x2fe3   :  { %v10766_v57 = vpop.f32.mrf.mxu1 }
0x2fe4   :  { %10807 = vst.msk [vmem:[%s18987_s17 + $0x58] sm:$0xff] %vm10795_vm5, %v10772_v32  ;;  %v10767_v33 = vadd.f32 %v18880_v23, %v10766_v57 }
0x2fe5   :  { %v13376_v18 = vpop.f32.mrf.mxu1 }
0x2fe6   :  { %10806 = vst.msk [vmem:[%s18987_s17 + $0x50] sm:$0xff] %vm10795_vm5, %v10767_v33  ;;  %v10782_v31 = vadd.f32 %v13376_v18, %v18880_v23 }
0x2fe7   :  { %v10776_v27 = vpop.f32.mrf.mxu1 }
0x2fe8   :  { %10809 = vst.msk [vmem:[%s18987_s17 + $0x68] sm:$0xff] %vm10795_vm5, %v10782_v31  ;;  %v10777_v12 = vadd.f32 %v18880_v23, %v10776_v27 }
0x2fe9   :  { %v13379_v22 = vpop.f32.mrf.mxu1 }
0x2fea   :  { %10808 = vst.msk [vmem:[%s18987_s17 + $0x60] sm:$0xff] %vm10795_vm5, %v10777_v12  ;;  %v10792_v41 = vadd.f32 %v13379_v22, %v18880_v23 }
0x2feb   :  { %v10786_v21 = vpop.f32.mrf.mxu1 }
0x2fec   :  { %10811 = vst.msk [vmem:[%s18987_s17 + $0x78] sm:$0xff] %vm10795_vm5, %v10792_v41  ;;  %v10787_v50 = vadd.f32 %v18880_v23, %v10786_v21 }
0x2fee   :  { %10810 = vst.msk [vmem:[%s18987_s17 + $0x70] sm:$0xff] %vm10795_vm5, %v10787_v50 }
0x2fef   :  { %14077 = dma.done.wait [#allocation3], 8192  }
0x2ff0   :  { %14078 = vsyncadd [#allocation3], 4294959104 }
0x2ff1   :  { %14079 = dma.done.wait [#allocation5], 8192  }
0x2ff2   :  { %14080 = vsyncadd [#allocation5], 4294959104 }
0x2ff3   :  { %10846 = vsyncpa [#allocation3], 1 }
0x2ff4   :  { %10847 = vsyncpa [#allocation5], 1 }

</bundles_post_ra>
